<compile_context>
chip_gen: v6e
topology: v6e:2x2x1
jax: 0.10.0
libtpu: 0.0.40
codegen_flags: <defaults>
</compile_context>

<pallas_src>
import jax
import jax.numpy as jnp
from jax import lax
from jax.experimental import pallas as pl
from jax.experimental.pallas import tpu as pltpu


# ----------------------------- Pallas kernel --------------------------------
def _make_double_conv_kernel(H, W):
    """Builds the fused (conv3x3+BN+ReLU) x2 kernel for an HxW image tile."""

    def kernel(x_ref, w1_ref, ss1_ref, w2_ref, ss2_ref, o_ref, mid_ref):
        # x_ref:   (1, H+2, W+2, Cin)   bf16, zero-padded input image
        # w1_ref:  (3, 3, Cin, Cmid)    bf16
        # ss1_ref: (2, Cmid)            f32  [scale; shift] (BN1 + bias folded)
        # w2_ref:  (3, 3, Cmid, Cout)   bf16
        # ss2_ref: (2, Cout)            f32  [scale; shift] (BN2 + bias folded)
        # o_ref:   (1, H*W, Cout)       f32  output image (flattened spatial)
        # mid_ref: (H+2, W+2, Cmid)     bf16 VMEM scratch (conv1 act + halo)
        cin = x_ref.shape[-1]
        cmid = w1_ref.shape[-1]
        cout = w2_ref.shape[-1]

        # ---- conv1: 9 shifted (H*W, Cin) x (Cin, Cmid) MXU matmuls ----------
        acc1 = None
        for dy in range(3):
            for dx in range(3):
                xs = x_ref[0, dy:dy + H, dx:dx + W, :].reshape(H * W, cin)
                t = jnp.dot(xs, w1_ref[dy, dx],
                            preferred_element_type=jnp.float32)
                acc1 = t if acc1 is None else acc1 + t
        y1 = jnp.maximum(acc1 * ss1_ref[0:1, :] + ss1_ref[1:2, :], 0.0)

        # ---- stash conv1 activation (with zero halo) in VMEM scratch --------
        mid_ref[...] = jnp.zeros_like(mid_ref)
        mid_ref[1:H + 1, 1:W + 1, :] = (
            y1.reshape(H, W, cmid).astype(mid_ref.dtype))

        # ---- conv2: 9 shifted (H*W, Cmid) x (Cmid, Cout) MXU matmuls --------
        acc2 = None
        for dy in range(3):
            for dx in range(3):
                ys = mid_ref[dy:dy + H, dx:dx + W, :].reshape(H * W, cmid)
                t = jnp.dot(ys, w2_ref[dy, dx],
                            preferred_element_type=jnp.float32)
                acc2 = t if acc2 is None else acc2 + t
        y2 = jnp.maximum(acc2 * ss2_ref[0:1, :] + ss2_ref[1:2, :], 0.0)

        o_ref[0] = y2.astype(o_ref.dtype)

    return kernel


# ------------------------------ JAX wrapper ----------------------------------
def _fold_bn(conv_b, gamma, beta, mean, var, eps):
    """Fold conv bias + inference BatchNorm into per-channel scale/shift."""
    inv_std = lax.rsqrt(var + eps)
    scale = gamma * inv_std
    shift = beta + (conv_b - mean) * scale
    return jnp.stack([scale, shift], axis=0).astype(jnp.float32)   # (2, C)


def conv_block_forward(x_nchw, params, eps=1e-5):
    """Equivalent of conv_block.forward (eval mode). NCHW in / NCHW out."""
    x = jnp.transpose(x_nchw, (0, 2, 3, 1))                # NCHW -> NHWC
    n, h, w, cin = x.shape
    cmid = params["w1"].shape[-1]
    cout = params["w2"].shape[-1]

    # Pad once for the first conv's halo (cheap: +2 rows/cols, not 9x im2col),
    # cast GEMM operands to bf16 (halves HBM/DMA bytes, native MXU dtype).
    xp = jnp.pad(x, ((0, 0), (1, 1), (1, 1), (0, 0))).astype(jnp.bfloat16)
    w1 = params["w1"].astype(jnp.bfloat16)                 # (3,3,Cin,Cmid)
    w2 = params["w2"].astype(jnp.bfloat16)                 # (3,3,Cmid,Cout)
    ss1 = _fold_bn(params["b1"], params["g1"], params["be1"],
                   params["m1"], params["v1"], eps)        # (2, Cmid) f32
    ss2 = _fold_bn(params["b2"], params["g2"], params["be2"],
                   params["m2"], params["v2"], eps)        # (2, Cout) f32

    kernel = _make_double_conv_kernel(h, w)

    out2d = pl.pallas_call(
        kernel,
        out_shape=jax.ShapeDtypeStruct((n, h * w, cout), jnp.float32),
        grid_spec=pltpu.PrefetchScalarGridSpec(
            num_scalar_prefetch=0,
            grid=(n,),                                     # one image per step
            in_specs=[
                pl.BlockSpec((1, h + 2, w + 2, cin), lambda i: (i, 0, 0, 0)),
                pl.BlockSpec((3, 3, cin, cmid), lambda i: (0, 0, 0, 0)),
                pl.BlockSpec((2, cmid), lambda i: (0, 0)),
                pl.BlockSpec((3, 3, cmid, cout), lambda i: (0, 0, 0, 0)),
                pl.BlockSpec((2, cout), lambda i: (0, 0)),
            ],
            out_specs=pl.BlockSpec((1, h * w, cout), lambda i: (i, 0, 0)),
            scratch_shapes=[
                pltpu.VMEM((h + 2, w + 2, cmid), jnp.bfloat16),
            ],
        ),
        compiler_params=pltpu.CompilerParams(
            dimension_semantics=("parallel",),             # shard batch on v7x
            vmem_limit_bytes=32 * 1024 * 1024),
    )(xp, w1, ss1, w2, ss2)

    out = out2d.reshape(n, h, w, cout)
    return jnp.transpose(out, (0, 3, 1, 2))                # NHWC -> NCHW


# --------------------------- pure-JAX reference ------------------------------
def _ref_conv_bn_relu(x_nhwc, w_hwio, b, gamma, beta, mean, var, eps=1e-5):
    y = lax.conv_general_dilated(
        x_nhwc, w_hwio, window_strides=(1, 1), padding="SAME",
        dimension_numbers=("NHWC", "HWIO", "NHWC")) + b
    y = (y - mean) * gamma * lax.rsqrt(var + eps) + beta
    return jnp.maximum(y, 0.0)


def conv_block_ref(x_nchw, p):
    x = jnp.transpose(x_nchw, (0, 2, 3, 1))
    x = _ref_conv_bn_relu(x, p["w1"], p["b1"], p["g1"], p["be1"], p["m1"], p["v1"])
    x = _ref_conv_bn_relu(x, p["w2"], p["b2"], p["g2"], p["be2"], p["m2"], p["v2"])
    return jnp.transpose(x, (0, 3, 1, 2))


# --------------------------------- main --------------------------------------
def _init_params(key, in_c, out_c):
    ks = jax.random.split(key, 12)
    f32 = jnp.float32
    return {
        # conv1: (3,3,in_c,out_c) HWIO ; BatchNorm2d(out_c) inference stats
        "w1": 0.1 * jax.random.normal(ks[0], (3, 3, in_c, out_c), f32),
        "b1": 0.1 * jax.random.normal(ks[1], (out_c,), f32),
        "g1": jax.random.uniform(ks[2], (out_c,), f32, 0.5, 1.5),
        "be1": 0.1 * jax.random.normal(ks[3], (out_c,), f32),
        "m1": 0.1 * jax.random.normal(ks[4], (out_c,), f32),
        "v1": jax.random.uniform(ks[5], (out_c,), f32, 0.5, 1.5),
        # conv2: (3,3,out_c,out_c)
        "w2": 0.1 * jax.random.normal(ks[6], (3, 3, out_c, out_c), f32),
        "b2": 0.1 * jax.random.normal(ks[7], (out_c,), f32),
        "g2": jax.random.uniform(ks[8], (out_c,), f32, 0.5, 1.5),
        "be2": 0.1 * jax.random.normal(ks[9], (out_c,), f32),
        "m2": 0.1 * jax.random.normal(ks[10], (out_c,), f32),
        "v2": jax.random.uniform(ks[11], (out_c,), f32, 0.5, 1.5),
    }


if __name__ == "__main__":
    N, IN_C, OUT_C, H, W = 2, 4, 8, 16, 16

    key = jax.random.PRNGKey(0)
    kx, kp = jax.random.split(key)
    x = jax.random.normal(kx, (N, IN_C, H, W), jnp.float32)   # NCHW like PyTorch
    params = _init_params(kp, IN_C, OUT_C)

    out = jax.jit(conv_block_forward)(x, params)
    out = jax.block_until_ready(out)

    ref = jax.block_until_ready(conv_block_ref(x, params))
    assert out.shape == (N, OUT_C, H, W), out.shape
    # bf16 GEMM operands (f32 accumulation) -> relaxed tolerance vs f32 reference.
    assert jnp.allclose(out, ref, rtol=5e-2, atol=5e-2), float(
        jnp.max(jnp.abs(out - ref)))

    print("KERNEL_OK")
</pallas_src>

<mosaic_0001>
module attributes {stable_mosaic.version = 11 : i64} {
  func.func @kernel(%arg0: i32, %arg1: memref<1x18x18x4xbf16, #tpu.memory_space<vmem>>, %arg2: memref<3x3x4x8xbf16, #tpu.memory_space<vmem>>, %arg3: memref<2x8xf32, #tpu.memory_space<vmem>>, %arg4: memref<3x3x8x8xbf16, #tpu.memory_space<vmem>>, %arg5: memref<2x8xf32, #tpu.memory_space<vmem>>, %arg6: memref<1x256x8xf32, #tpu.memory_space<vmem>>, %arg7: memref<18x18x8xbf16, #tpu.memory_space<vmem>>) attributes {dimension_semantics = [#tpu.dimension_semantics<parallel>], iteration_bounds = array<i64: 2>, scalar_prefetch = 0 : i64, scratch_operands = 1 : i64, tpu.core_type = #tpu.core_type<tc>, window_params = [{transform_indices = @transform_0, window_bounds = array<i64: 1, 18, 18, 4>}, {pipeline_mode = #tpu.pipeline_mode<synchronous>, transform_indices = @transform_1, window_bounds = array<i64: 3, 3, 4, 8>}, {pipeline_mode = #tpu.pipeline_mode<synchronous>, transform_indices = @transform_2, window_bounds = array<i64: 2, 8>}, {pipeline_mode = #tpu.pipeline_mode<synchronous>, transform_indices = @transform_3, window_bounds = array<i64: 3, 3, 8, 8>}, {pipeline_mode = #tpu.pipeline_mode<synchronous>, transform_indices = @transform_4, window_bounds = array<i64: 2, 8>}, {transform_indices = @transform_5, window_bounds = array<i64: 1, 256, 8>}]} {
    %c0 = arith.constant 0 : index
    %c0_0 = arith.constant 0 : index
    %c0_1 = arith.constant 0 : index
    %c0_2 = arith.constant 0 : index
    %0 = vector.load %arg1[%c0, %c0_0, %c0_1, %c0_2] : memref<1x18x18x4xbf16, #tpu.memory_space<vmem>>, vector<1x16x16x4xbf16>
    %1 = vector.shape_cast %0 : vector<1x16x16x4xbf16> to vector<16x16x4xbf16>
    %2 = vector.shape_cast %1 : vector<16x16x4xbf16> to vector<256x4xbf16>
    %c0_3 = arith.constant 0 : index
    %c0_4 = arith.constant 0 : index
    %c0_5 = arith.constant 0 : index
    %c0_6 = arith.constant 0 : index
    %3 = vector.load %arg2[%c0_3, %c0_4, %c0_5, %c0_6] : memref<3x3x4x8xbf16, #tpu.memory_space<vmem>>, vector<1x1x4x8xbf16>
    %4 = vector.shape_cast %3 : vector<1x1x4x8xbf16> to vector<4x8xbf16>
    %cst = arith.constant dense<0.000000e+00> : vector<256x8xf32>
    %5 = tpu.matmul %2, %4, %cst {dimension_numbers = #tpu.dot_dimension_numbers<[1], [0], [0], [1], [0, 0, 1, 1], [], []>} : vector<256x4xbf16>, vector<4x8xbf16>, vector<256x8xf32> -> vector<256x8xf32>
    %c0_7 = arith.constant 0 : index
    %c0_8 = arith.constant 0 : index
    %c1 = arith.constant 1 : index
    %c0_9 = arith.constant 0 : index
    %6 = vector.load %arg1[%c0_7, %c0_8, %c1, %c0_9] : memref<1x18x18x4xbf16, #tpu.memory_space<vmem>>, vector<1x16x16x4xbf16>
    %7 = vector.shape_cast %6 : vector<1x16x16x4xbf16> to vector<16x16x4xbf16>
    %8 = vector.shape_cast %7 : vector<16x16x4xbf16> to vector<256x4xbf16>
    %c0_10 = arith.constant 0 : index
    %c1_11 = arith.constant 1 : index
    %c0_12 = arith.constant 0 : index
    %c0_13 = arith.constant 0 : index
    %9 = vector.load %arg2[%c0_10, %c1_11, %c0_12, %c0_13] : memref<3x3x4x8xbf16, #tpu.memory_space<vmem>>, vector<1x1x4x8xbf16>
    %10 = vector.shape_cast %9 : vector<1x1x4x8xbf16> to vector<4x8xbf16>
    %cst_14 = arith.constant dense<0.000000e+00> : vector<256x8xf32>
    %11 = tpu.matmul %8, %10, %cst_14 {dimension_numbers = #tpu.dot_dimension_numbers<[1], [0], [0], [1], [0, 0, 1, 1], [], []>} : vector<256x4xbf16>, vector<4x8xbf16>, vector<256x8xf32> -> vector<256x8xf32>
    %12 = arith.addf %5, %11 : vector<256x8xf32>
    %c0_15 = arith.constant 0 : index
    %c0_16 = arith.constant 0 : index
    %c2 = arith.constant 2 : index
    %c0_17 = arith.constant 0 : index
    %13 = vector.load %arg1[%c0_15, %c0_16, %c2, %c0_17] : memref<1x18x18x4xbf16, #tpu.memory_space<vmem>>, vector<1x16x16x4xbf16>
    %14 = vector.shape_cast %13 : vector<1x16x16x4xbf16> to vector<16x16x4xbf16>
    %15 = vector.shape_cast %14 : vector<16x16x4xbf16> to vector<256x4xbf16>
    %c0_18 = arith.constant 0 : index
    %c2_19 = arith.constant 2 : index
    %c0_20 = arith.constant 0 : index
    %c0_21 = arith.constant 0 : index
    %16 = vector.load %arg2[%c0_18, %c2_19, %c0_20, %c0_21] : memref<3x3x4x8xbf16, #tpu.memory_space<vmem>>, vector<1x1x4x8xbf16>
    %17 = vector.shape_cast %16 : vector<1x1x4x8xbf16> to vector<4x8xbf16>
    %cst_22 = arith.constant dense<0.000000e+00> : vector<256x8xf32>
    %18 = tpu.matmul %15, %17, %cst_22 {dimension_numbers = #tpu.dot_dimension_numbers<[1], [0], [0], [1], [0, 0, 1, 1], [], []>} : vector<256x4xbf16>, vector<4x8xbf16>, vector<256x8xf32> -> vector<256x8xf32>
    %19 = arith.addf %12, %18 : vector<256x8xf32>
    %c0_23 = arith.constant 0 : index
    %c1_24 = arith.constant 1 : index
    %c0_25 = arith.constant 0 : index
    %c0_26 = arith.constant 0 : index
    %20 = vector.load %arg1[%c0_23, %c1_24, %c0_25, %c0_26] : memref<1x18x18x4xbf16, #tpu.memory_space<vmem>>, vector<1x16x16x4xbf16>
    %21 = vector.shape_cast %20 : vector<1x16x16x4xbf16> to vector<16x16x4xbf16>
    %22 = vector.shape_cast %21 : vector<16x16x4xbf16> to vector<256x4xbf16>
    %c1_27 = arith.constant 1 : index
    %c0_28 = arith.constant 0 : index
    %c0_29 = arith.constant 0 : index
    %c0_30 = arith.constant 0 : index
    %23 = vector.load %arg2[%c1_27, %c0_28, %c0_29, %c0_30] : memref<3x3x4x8xbf16, #tpu.memory_space<vmem>>, vector<1x1x4x8xbf16>
    %24 = vector.shape_cast %23 : vector<1x1x4x8xbf16> to vector<4x8xbf16>
    %cst_31 = arith.constant dense<0.000000e+00> : vector<256x8xf32>
    %25 = tpu.matmul %22, %24, %cst_31 {dimension_numbers = #tpu.dot_dimension_numbers<[1], [0], [0], [1], [0, 0, 1, 1], [], []>} : vector<256x4xbf16>, vector<4x8xbf16>, vector<256x8xf32> -> vector<256x8xf32>
    %26 = arith.addf %19, %25 : vector<256x8xf32>
    %c0_32 = arith.constant 0 : index
    %c1_33 = arith.constant 1 : index
    %c1_34 = arith.constant 1 : index
    %c0_35 = arith.constant 0 : index
    %27 = vector.load %arg1[%c0_32, %c1_33, %c1_34, %c0_35] : memref<1x18x18x4xbf16, #tpu.memory_space<vmem>>, vector<1x16x16x4xbf16>
    %28 = vector.shape_cast %27 : vector<1x16x16x4xbf16> to vector<16x16x4xbf16>
    %29 = vector.shape_cast %28 : vector<16x16x4xbf16> to vector<256x4xbf16>
    %c1_36 = arith.constant 1 : index
    %c1_37 = arith.constant 1 : index
    %c0_38 = arith.constant 0 : index
    %c0_39 = arith.constant 0 : index
    %30 = vector.load %arg2[%c1_36, %c1_37, %c0_38, %c0_39] : memref<3x3x4x8xbf16, #tpu.memory_space<vmem>>, vector<1x1x4x8xbf16>
    %31 = vector.shape_cast %30 : vector<1x1x4x8xbf16> to vector<4x8xbf16>
    %cst_40 = arith.constant dense<0.000000e+00> : vector<256x8xf32>
    %32 = tpu.matmul %29, %31, %cst_40 {dimension_numbers = #tpu.dot_dimension_numbers<[1], [0], [0], [1], [0, 0, 1, 1], [], []>} : vector<256x4xbf16>, vector<4x8xbf16>, vector<256x8xf32> -> vector<256x8xf32>
    %33 = arith.addf %26, %32 : vector<256x8xf32>
    %c0_41 = arith.constant 0 : index
    %c1_42 = arith.constant 1 : index
    %c2_43 = arith.constant 2 : index
    %c0_44 = arith.constant 0 : index
    %34 = vector.load %arg1[%c0_41, %c1_42, %c2_43, %c0_44] : memref<1x18x18x4xbf16, #tpu.memory_space<vmem>>, vector<1x16x16x4xbf16>
    %35 = vector.shape_cast %34 : vector<1x16x16x4xbf16> to vector<16x16x4xbf16>
    %36 = vector.shape_cast %35 : vector<16x16x4xbf16> to vector<256x4xbf16>
    %c1_45 = arith.constant 1 : index
    %c2_46 = arith.constant 2 : index
    %c0_47 = arith.constant 0 : index
    %c0_48 = arith.constant 0 : index
    %37 = vector.load %arg2[%c1_45, %c2_46, %c0_47, %c0_48] : memref<3x3x4x8xbf16, #tpu.memory_space<vmem>>, vector<1x1x4x8xbf16>
    %38 = vector.shape_cast %37 : vector<1x1x4x8xbf16> to vector<4x8xbf16>
    %cst_49 = arith.constant dense<0.000000e+00> : vector<256x8xf32>
    %39 = tpu.matmul %36, %38, %cst_49 {dimension_numbers = #tpu.dot_dimension_numbers<[1], [0], [0], [1], [0, 0, 1, 1], [], []>} : vector<256x4xbf16>, vector<4x8xbf16>, vector<256x8xf32> -> vector<256x8xf32>
    %40 = arith.addf %33, %39 : vector<256x8xf32>
    %c0_50 = arith.constant 0 : index
    %c2_51 = arith.constant 2 : index
    %c0_52 = arith.constant 0 : index
    %c0_53 = arith.constant 0 : index
    %41 = vector.load %arg1[%c0_50, %c2_51, %c0_52, %c0_53] : memref<1x18x18x4xbf16, #tpu.memory_space<vmem>>, vector<1x16x16x4xbf16>
    %42 = vector.shape_cast %41 : vector<1x16x16x4xbf16> to vector<16x16x4xbf16>
    %43 = vector.shape_cast %42 : vector<16x16x4xbf16> to vector<256x4xbf16>
    %c2_54 = arith.constant 2 : index
    %c0_55 = arith.constant 0 : index
    %c0_56 = arith.constant 0 : index
    %c0_57 = arith.constant 0 : index
    %44 = vector.load %arg2[%c2_54, %c0_55, %c0_56, %c0_57] : memref<3x3x4x8xbf16, #tpu.memory_space<vmem>>, vector<1x1x4x8xbf16>
    %45 = vector.shape_cast %44 : vector<1x1x4x8xbf16> to vector<4x8xbf16>
    %cst_58 = arith.constant dense<0.000000e+00> : vector<256x8xf32>
    %46 = tpu.matmul %43, %45, %cst_58 {dimension_numbers = #tpu.dot_dimension_numbers<[1], [0], [0], [1], [0, 0, 1, 1], [], []>} : vector<256x4xbf16>, vector<4x8xbf16>, vector<256x8xf32> -> vector<256x8xf32>
    %47 = arith.addf %40, %46 : vector<256x8xf32>
    %c0_59 = arith.constant 0 : index
    %c2_60 = arith.constant 2 : index
    %c1_61 = arith.constant 1 : index
    %c0_62 = arith.constant 0 : index
    %48 = vector.load %arg1[%c0_59, %c2_60, %c1_61, %c0_62] : memref<1x18x18x4xbf16, #tpu.memory_space<vmem>>, vector<1x16x16x4xbf16>
    %49 = vector.shape_cast %48 : vector<1x16x16x4xbf16> to vector<16x16x4xbf16>
    %50 = vector.shape_cast %49 : vector<16x16x4xbf16> to vector<256x4xbf16>
    %c2_63 = arith.constant 2 : index
    %c1_64 = arith.constant 1 : index
    %c0_65 = arith.constant 0 : index
    %c0_66 = arith.constant 0 : index
    %51 = vector.load %arg2[%c2_63, %c1_64, %c0_65, %c0_66] : memref<3x3x4x8xbf16, #tpu.memory_space<vmem>>, vector<1x1x4x8xbf16>
    %52 = vector.shape_cast %51 : vector<1x1x4x8xbf16> to vector<4x8xbf16>
    %cst_67 = arith.constant dense<0.000000e+00> : vector<256x8xf32>
    %53 = tpu.matmul %50, %52, %cst_67 {dimension_numbers = #tpu.dot_dimension_numbers<[1], [0], [0], [1], [0, 0, 1, 1], [], []>} : vector<256x4xbf16>, vector<4x8xbf16>, vector<256x8xf32> -> vector<256x8xf32>
    %54 = arith.addf %47, %53 : vector<256x8xf32>
    %c0_68 = arith.constant 0 : index
    %c2_69 = arith.constant 2 : index
    %c2_70 = arith.constant 2 : index
    %c0_71 = arith.constant 0 : index
    %55 = vector.load %arg1[%c0_68, %c2_69, %c2_70, %c0_71] : memref<1x18x18x4xbf16, #tpu.memory_space<vmem>>, vector<1x16x16x4xbf16>
    %56 = vector.shape_cast %55 : vector<1x16x16x4xbf16> to vector<16x16x4xbf16>
    %57 = vector.shape_cast %56 : vector<16x16x4xbf16> to vector<256x4xbf16>
    %c2_72 = arith.constant 2 : index
    %c2_73 = arith.constant 2 : index
    %c0_74 = arith.constant 0 : index
    %c0_75 = arith.constant 0 : index
    %58 = vector.load %arg2[%c2_72, %c2_73, %c0_74, %c0_75] : memref<3x3x4x8xbf16, #tpu.memory_space<vmem>>, vector<1x1x4x8xbf16>
    %59 = vector.shape_cast %58 : vector<1x1x4x8xbf16> to vector<4x8xbf16>
    %cst_76 = arith.constant dense<0.000000e+00> : vector<256x8xf32>
    %60 = tpu.matmul %57, %59, %cst_76 {dimension_numbers = #tpu.dot_dimension_numbers<[1], [0], [0], [1], [0, 0, 1, 1], [], []>} : vector<256x4xbf16>, vector<4x8xbf16>, vector<256x8xf32> -> vector<256x8xf32>
    %61 = arith.addf %54, %60 : vector<256x8xf32>
    %c0_77 = arith.constant 0 : index
    %c0_78 = arith.constant 0 : index
    %62 = vector.load %arg3[%c0_77, %c0_78] : memref<2x8xf32, #tpu.memory_space<vmem>>, vector<1x8xf32>
    %63 = vector.broadcast %62 : vector<1x8xf32> to vector<256x8xf32>
    %64 = arith.mulf %61, %63 : vector<256x8xf32>
    %c1_79 = arith.constant 1 : index
    %c0_80 = arith.constant 0 : index
    %65 = vector.load %arg3[%c1_79, %c0_80] : memref<2x8xf32, #tpu.memory_space<vmem>>, vector<1x8xf32>
    %66 = vector.broadcast %65 : vector<1x8xf32> to vector<256x8xf32>
    %67 = arith.addf %64, %66 : vector<256x8xf32>
    %cst_81 = arith.constant 0.000000e+00 : f32
    %68 = vector.broadcast %cst_81 : f32 to vector<256x8xf32>
    %69 = arith.maximumf %67, %68 : vector<256x8xf32>
    %cst_82 = arith.constant 0.000000e+00 : bf16
    %70 = vector.broadcast %cst_82 : bf16 to vector<18x18x8xbf16>
    %c0_83 = arith.constant 0 : index
    %c0_84 = arith.constant 0 : index
    %c0_85 = arith.constant 0 : index
    %71 = vector.load %arg7[%c0_83, %c0_84, %c0_85] : memref<18x18x8xbf16, #tpu.memory_space<vmem>>, vector<18x18x8xbf16>
    tpu.vector_store %arg7[%c0_83, %c0_84, %c0_85], %70 {strides = array<i32>} : memref<18x18x8xbf16, #tpu.memory_space<vmem>>, vector<18x18x8xbf16>,
    %72 = vector.shape_cast %69 : vector<256x8xf32> to vector<16x16x8xf32>
    %73 = arith.truncf %72 : vector<16x16x8xf32> to vector<16x16x8xbf16>
    %c1_86 = arith.constant 1 : index
    %c1_87 = arith.constant 1 : index
    %c0_88 = arith.constant 0 : index
    %74 = vector.load %arg7[%c1_86, %c1_87, %c0_88] : memref<18x18x8xbf16, #tpu.memory_space<vmem>>, vector<16x16x8xbf16>
    tpu.vector_store %arg7[%c1_86, %c1_87, %c0_88], %73 {strides = array<i32>} : memref<18x18x8xbf16, #tpu.memory_space<vmem>>, vector<16x16x8xbf16>,
    %c0_89 = arith.constant 0 : index
    %c0_90 = arith.constant 0 : index
    %c0_91 = arith.constant 0 : index
    %75 = vector.load %arg7[%c0_89, %c0_90, %c0_91] : memref<18x18x8xbf16, #tpu.memory_space<vmem>>, vector<16x16x8xbf16>
    %76 = vector.shape_cast %75 : vector<16x16x8xbf16> to vector<256x8xbf16>
    %c0_92 = arith.constant 0 : index
    %c0_93 = arith.constant 0 : index
    %c0_94 = arith.constant 0 : index
    %c0_95 = arith.constant 0 : index
    %77 = vector.load %arg4[%c0_92, %c0_93, %c0_94, %c0_95] : memref<3x3x8x8xbf16, #tpu.memory_space<vmem>>, vector<1x1x8x8xbf16>
    %78 = vector.shape_cast %77 : vector<1x1x8x8xbf16> to vector<8x8xbf16>
    %cst_96 = arith.constant dense<0.000000e+00> : vector<256x8xf32>
    %79 = tpu.matmul %76, %78, %cst_96 {dimension_numbers = #tpu.dot_dimension_numbers<[1], [0], [0], [1], [0, 0, 1, 1], [], []>} : vector<256x8xbf16>, vector<8x8xbf16>, vector<256x8xf32> -> vector<256x8xf32>
    %c0_97 = arith.constant 0 : index
    %c1_98 = arith.constant 1 : index
    %c0_99 = arith.constant 0 : index
    %80 = vector.load %arg7[%c0_97, %c1_98, %c0_99] : memref<18x18x8xbf16, #tpu.memory_space<vmem>>, vector<16x16x8xbf16>
    %81 = vector.shape_cast %80 : vector<16x16x8xbf16> to vector<256x8xbf16>
    %c0_100 = arith.constant 0 : index
    %c1_101 = arith.constant 1 : index
    %c0_102 = arith.constant 0 : index
    %c0_103 = arith.constant 0 : index
    %82 = vector.load %arg4[%c0_100, %c1_101, %c0_102, %c0_103] : memref<3x3x8x8xbf16, #tpu.memory_space<vmem>>, vector<1x1x8x8xbf16>
    %83 = vector.shape_cast %82 : vector<1x1x8x8xbf16> to vector<8x8xbf16>
    %cst_104 = arith.constant dense<0.000000e+00> : vector<256x8xf32>
    %84 = tpu.matmul %81, %83, %cst_104 {dimension_numbers = #tpu.dot_dimension_numbers<[1], [0], [0], [1], [0, 0, 1, 1], [], []>} : vector<256x8xbf16>, vector<8x8xbf16>, vector<256x8xf32> -> vector<256x8xf32>
    %85 = arith.addf %79, %84 : vector<256x8xf32>
    %c0_105 = arith.constant 0 : index
    %c2_106 = arith.constant 2 : index
    %c0_107 = arith.constant 0 : index
    %86 = vector.load %arg7[%c0_105, %c2_106, %c0_107] : memref<18x18x8xbf16, #tpu.memory_space<vmem>>, vector<16x16x8xbf16>
    %87 = vector.shape_cast %86 : vector<16x16x8xbf16> to vector<256x8xbf16>
    %c0_108 = arith.constant 0 : index
    %c2_109 = arith.constant 2 : index
    %c0_110 = arith.constant 0 : index
    %c0_111 = arith.constant 0 : index
    %88 = vector.load %arg4[%c0_108, %c2_109, %c0_110, %c0_111] : memref<3x3x8x8xbf16, #tpu.memory_space<vmem>>, vector<1x1x8x8xbf16>
    %89 = vector.shape_cast %88 : vector<1x1x8x8xbf16> to vector<8x8xbf16>
    %cst_112 = arith.constant dense<0.000000e+00> : vector<256x8xf32>
    %90 = tpu.matmul %87, %89, %cst_112 {dimension_numbers = #tpu.dot_dimension_numbers<[1], [0], [0], [1], [0, 0, 1, 1], [], []>} : vector<256x8xbf16>, vector<8x8xbf16>, vector<256x8xf32> -> vector<256x8xf32>
    %91 = arith.addf %85, %90 : vector<256x8xf32>
    %c1_113 = arith.constant 1 : index
    %c0_114 = arith.constant 0 : index
    %c0_115 = arith.constant 0 : index
    %92 = vector.load %arg7[%c1_113, %c0_114, %c0_115] : memref<18x18x8xbf16, #tpu.memory_space<vmem>>, vector<16x16x8xbf16>
    %93 = vector.shape_cast %92 : vector<16x16x8xbf16> to vector<256x8xbf16>
    %c1_116 = arith.constant 1 : index
    %c0_117 = arith.constant 0 : index
    %c0_118 = arith.constant 0 : index
    %c0_119 = arith.constant 0 : index
    %94 = vector.load %arg4[%c1_116, %c0_117, %c0_118, %c0_119] : memref<3x3x8x8xbf16, #tpu.memory_space<vmem>>, vector<1x1x8x8xbf16>
    %95 = vector.shape_cast %94 : vector<1x1x8x8xbf16> to vector<8x8xbf16>
    %cst_120 = arith.constant dense<0.000000e+00> : vector<256x8xf32>
    %96 = tpu.matmul %93, %95, %cst_120 {dimension_numbers = #tpu.dot_dimension_numbers<[1], [0], [0], [1], [0, 0, 1, 1], [], []>} : vector<256x8xbf16>, vector<8x8xbf16>, vector<256x8xf32> -> vector<256x8xf32>
    %97 = arith.addf %91, %96 : vector<256x8xf32>
    %c1_121 = arith.constant 1 : index
    %c1_122 = arith.constant 1 : index
    %c0_123 = arith.constant 0 : index
    %98 = vector.load %arg7[%c1_121, %c1_122, %c0_123] : memref<18x18x8xbf16, #tpu.memory_space<vmem>>, vector<16x16x8xbf16>
    %99 = vector.shape_cast %98 : vector<16x16x8xbf16> to vector<256x8xbf16>
    %c1_124 = arith.constant 1 : index
    %c1_125 = arith.constant 1 : index
    %c0_126 = arith.constant 0 : index
    %c0_127 = arith.constant 0 : index
    %100 = vector.load %arg4[%c1_124, %c1_125, %c0_126, %c0_127] : memref<3x3x8x8xbf16, #tpu.memory_space<vmem>>, vector<1x1x8x8xbf16>
    %101 = vector.shape_cast %100 : vector<1x1x8x8xbf16> to vector<8x8xbf16>
    %cst_128 = arith.constant dense<0.000000e+00> : vector<256x8xf32>
    %102 = tpu.matmul %99, %101, %cst_128 {dimension_numbers = #tpu.dot_dimension_numbers<[1], [0], [0], [1], [0, 0, 1, 1], [], []>} : vector<256x8xbf16>, vector<8x8xbf16>, vector<256x8xf32> -> vector<256x8xf32>
    %103 = arith.addf %97, %102 : vector<256x8xf32>
    %c1_129 = arith.constant 1 : index
    %c2_130 = arith.constant 2 : index
    %c0_131 = arith.constant 0 : index
    %104 = vector.load %arg7[%c1_129, %c2_130, %c0_131] : memref<18x18x8xbf16, #tpu.memory_space<vmem>>, vector<16x16x8xbf16>
    %105 = vector.shape_cast %104 : vector<16x16x8xbf16> to vector<256x8xbf16>
    %c1_132 = arith.constant 1 : index
    %c2_133 = arith.constant 2 : index
    %c0_134 = arith.constant 0 : index
    %c0_135 = arith.constant 0 : index
    %106 = vector.load %arg4[%c1_132, %c2_133, %c0_134, %c0_135] : memref<3x3x8x8xbf16, #tpu.memory_space<vmem>>, vector<1x1x8x8xbf16>
    %107 = vector.shape_cast %106 : vector<1x1x8x8xbf16> to vector<8x8xbf16>
    %cst_136 = arith.constant dense<0.000000e+00> : vector<256x8xf32>
    %108 = tpu.matmul %105, %107, %cst_136 {dimension_numbers = #tpu.dot_dimension_numbers<[1], [0], [0], [1], [0, 0, 1, 1], [], []>} : vector<256x8xbf16>, vector<8x8xbf16>, vector<256x8xf32> -> vector<256x8xf32>
    %109 = arith.addf %103, %108 : vector<256x8xf32>
    %c2_137 = arith.constant 2 : index
    %c0_138 = arith.constant 0 : index
    %c0_139 = arith.constant 0 : index
    %110 = vector.load %arg7[%c2_137, %c0_138, %c0_139] : memref<18x18x8xbf16, #tpu.memory_space<vmem>>, vector<16x16x8xbf16>
    %111 = vector.shape_cast %110 : vector<16x16x8xbf16> to vector<256x8xbf16>
    %c2_140 = arith.constant 2 : index
    %c0_141 = arith.constant 0 : index
    %c0_142 = arith.constant 0 : index
    %c0_143 = arith.constant 0 : index
    %112 = vector.load %arg4[%c2_140, %c0_141, %c0_142, %c0_143] : memref<3x3x8x8xbf16, #tpu.memory_space<vmem>>, vector<1x1x8x8xbf16>
    %113 = vector.shape_cast %112 : vector<1x1x8x8xbf16> to vector<8x8xbf16>
    %cst_144 = arith.constant dense<0.000000e+00> : vector<256x8xf32>
    %114 = tpu.matmul %111, %113, %cst_144 {dimension_numbers = #tpu.dot_dimension_numbers<[1], [0], [0], [1], [0, 0, 1, 1], [], []>} : vector<256x8xbf16>, vector<8x8xbf16>, vector<256x8xf32> -> vector<256x8xf32>
    %115 = arith.addf %109, %114 : vector<256x8xf32>
    %c2_145 = arith.constant 2 : index
    %c1_146 = arith.constant 1 : index
    %c0_147 = arith.constant 0 : index
    %116 = vector.load %arg7[%c2_145, %c1_146, %c0_147] : memref<18x18x8xbf16, #tpu.memory_space<vmem>>, vector<16x16x8xbf16>
    %117 = vector.shape_cast %116 : vector<16x16x8xbf16> to vector<256x8xbf16>
    %c2_148 = arith.constant 2 : index
    %c1_149 = arith.constant 1 : index
    %c0_150 = arith.constant 0 : index
    %c0_151 = arith.constant 0 : index
    %118 = vector.load %arg4[%c2_148, %c1_149, %c0_150, %c0_151] : memref<3x3x8x8xbf16, #tpu.memory_space<vmem>>, vector<1x1x8x8xbf16>
    %119 = vector.shape_cast %118 : vector<1x1x8x8xbf16> to vector<8x8xbf16>
    %cst_152 = arith.constant dense<0.000000e+00> : vector<256x8xf32>
    %120 = tpu.matmul %117, %119, %cst_152 {dimension_numbers = #tpu.dot_dimension_numbers<[1], [0], [0], [1], [0, 0, 1, 1], [], []>} : vector<256x8xbf16>, vector<8x8xbf16>, vector<256x8xf32> -> vector<256x8xf32>
    %121 = arith.addf %115, %120 : vector<256x8xf32>
    %c2_153 = arith.constant 2 : index
    %c2_154 = arith.constant 2 : index
    %c0_155 = arith.constant 0 : index
    %122 = vector.load %arg7[%c2_153, %c2_154, %c0_155] : memref<18x18x8xbf16, #tpu.memory_space<vmem>>, vector<16x16x8xbf16>
    %123 = vector.shape_cast %122 : vector<16x16x8xbf16> to vector<256x8xbf16>
    %c2_156 = arith.constant 2 : index
    %c2_157 = arith.constant 2 : index
    %c0_158 = arith.constant 0 : index
    %c0_159 = arith.constant 0 : index
    %124 = vector.load %arg4[%c2_156, %c2_157, %c0_158, %c0_159] : memref<3x3x8x8xbf16, #tpu.memory_space<vmem>>, vector<1x1x8x8xbf16>
    %125 = vector.shape_cast %124 : vector<1x1x8x8xbf16> to vector<8x8xbf16>
    %cst_160 = arith.constant dense<0.000000e+00> : vector<256x8xf32>
    %126 = tpu.matmul %123, %125, %cst_160 {dimension_numbers = #tpu.dot_dimension_numbers<[1], [0], [0], [1], [0, 0, 1, 1], [], []>} : vector<256x8xbf16>, vector<8x8xbf16>, vector<256x8xf32> -> vector<256x8xf32>
    %127 = arith.addf %121, %126 : vector<256x8xf32>
    %c0_161 = arith.constant 0 : index
    %c0_162 = arith.constant 0 : index
    %128 = vector.load %arg5[%c0_161, %c0_162] : memref<2x8xf32, #tpu.memory_space<vmem>>, vector<1x8xf32>
    %129 = vector.broadcast %128 : vector<1x8xf32> to vector<256x8xf32>
    %130 = arith.mulf %127, %129 : vector<256x8xf32>
    %c1_163 = arith.constant 1 : index
    %c0_164 = arith.constant 0 : index
    %131 = vector.load %arg5[%c1_163, %c0_164] : memref<2x8xf32, #tpu.memory_space<vmem>>, vector<1x8xf32>
    %132 = vector.broadcast %131 : vector<1x8xf32> to vector<256x8xf32>
    %133 = arith.addf %130, %132 : vector<256x8xf32>
    %cst_165 = arith.constant 0.000000e+00 : f32
    %134 = vector.broadcast %cst_165 : f32 to vector<256x8xf32>
    %135 = arith.maximumf %133, %134 : vector<256x8xf32>
    %c0_166 = arith.constant 0 : index
    %c0_167 = arith.constant 0 : index
    %c0_168 = arith.constant 0 : index
    %136 = vector.load %arg6[%c0_166, %c0_167, %c0_168] : memref<1x256x8xf32, #tpu.memory_space<vmem>>, vector<1x256x8xf32>
    %137 = vector.shape_cast %136 : vector<1x256x8xf32> to vector<256x8xf32>
    %138 = vector.shape_cast %135 : vector<256x8xf32> to vector<1x256x8xf32>
    tpu.vector_store %arg6[%c0_166, %c0_167, %c0_168], %138 {strides = array<i32>} : memref<1x256x8xf32, #tpu.memory_space<vmem>>, vector<1x256x8xf32>,
    return
  }
  func.func @transform_0(%arg0: i32) -> (i32, i32, i32, i32) {
    %c0_i32 = arith.constant 0 : i32
    %c0_i32_0 = arith.constant 0 : i32
    %c0_i32_1 = arith.constant 0 : i32
    %c0_i32_2 = arith.constant 0 : i32
    return %arg0, %c0_i32, %c0_i32_0, %c0_i32_1 : i32, i32, i32, i32
  }
  func.func @transform_1(%arg0: i32) -> (i32, i32, i32, i32) {
    %c0_i32 = arith.constant 0 : i32
    %c0_i32_0 = arith.constant 0 : i32
    %c0_i32_1 = arith.constant 0 : i32
    %c0_i32_2 = arith.constant 0 : i32
    %c0_i32_3 = arith.constant 0 : i32
    return %c0_i32, %c0_i32_0, %c0_i32_1, %c0_i32_2 : i32, i32, i32, i32
  }
  func.func @transform_2(%arg0: i32) -> (i32, i32) {
    %c0_i32 = arith.constant 0 : i32
    %c0_i32_0 = arith.constant 0 : i32
    %c0_i32_1 = arith.constant 0 : i32
    return %c0_i32, %c0_i32_0 : i32, i32
  }
  func.func @transform_3(%arg0: i32) -> (i32, i32, i32, i32) {
    %c0_i32 = arith.constant 0 : i32
    %c0_i32_0 = arith.constant 0 : i32
    %c0_i32_1 = arith.constant 0 : i32
    %c0_i32_2 = arith.constant 0 : i32
    %c0_i32_3 = arith.constant 0 : i32
    return %c0_i32, %c0_i32_0, %c0_i32_1, %c0_i32_2 : i32, i32, i32, i32
  }
  func.func @transform_4(%arg0: i32) -> (i32, i32) {
    %c0_i32 = arith.constant 0 : i32
    %c0_i32_0 = arith.constant 0 : i32
    %c0_i32_1 = arith.constant 0 : i32
    return %c0_i32, %c0_i32_0 : i32, i32
  }
  func.func @transform_5(%arg0: i32) -> (i32, i32, i32) {
    %c0_i32 = arith.constant 0 : i32
    %c0_i32_0 = arith.constant 0 : i32
    %c0_i32_1 = arith.constant 0 : i32
    return %arg0, %c0_i32, %c0_i32_0 : i32, i32, i32
  }
}

</mosaic_0001>

<bundles_post_ra>
// kernel: conv_block_forward.1
= control target key start
LH: loop header
LB: loop body
LE: loop exit
PB: predicated region body
PF: predicated region fallthrough
CT: control target
= control target key end

     0   :  { %s12281_s18 = smov 0   ;;  %s17203_s0 = inlined_call_operand.vmem [shape: bf16[2,18,18,4], index: 0, kind: input, shape index: {}]   ;;  %s17204_s1 = inlined_call_operand.vmem [shape: bf16[3,3,4,8], index: 1, kind: input, shape index: {}]   ;;  %s17205_s2 = inlined_call_operand.vmem [shape: f32[2,8], index: 2, kind: input, shape index: {}]   ;;  %s17206_s3 = inlined_call_operand.vmem [shape: bf16[3,3,8,8], index: 3, kind: input, shape index: {}]   ;;  %s17207_s4 = inlined_call_operand.vmem [shape: f32[2,8], index: 4, kind: input, shape index: {}]   ;;  %s17208_s5 = inlined_call_operand.vmem [shape: f32[2,256,8], index: 5, kind: output, shape index: {}]  }
   0x1 LB: > { %s10229_s19 = sadd.s32 4294967295, %s12248_s18   ;;  %p10233_p0 = scmp.ge.s32.totalorder %s12248_s18, 1  ;;  %s12248_s18 = sphi %s12281_s18, %s15_s18  }
   0x2   : > { %p187_p1 = scmp.lt.s32.totalorder %s12248_s18, 3 }
   0x4   : > { %p188_p2 = pnand %p10233_p0, %p187_p1 }
   0x6   : > { %191 = sbr.rel (%p188_p2) target bundleno = 1133 (0x46d), region = 40 }
   0xb   : > { %v10237_v0 = vld [vmem:[%s17204_s1 + $0x2] sm:$0x3]  ;;  %vm761_vm0 = vcmask 1041408   ;;  %v258_v1 = vld [vmem:[%s17204_s1] sm:$0x3]  ;;  %p215_p3 = scmp.lt.s32.totalorder %s10229_s19, 1 }
   0xc   : > { %12106 = vmatprep.subr.msk.bf16.mxu0 %vm761_vm0, %v10237_v0  ;;  %v763_v2 = vsel %vm761_vm0, %v10237_v0, 0  ;;  %12107 = vmatprep.subr.msk.bf16.mxu1 %vm761_vm0, %v258_v1  ;;  %v1055_v3 = vsel %vm761_vm0, %v258_v1, 0  ;;  %v10318_v4 = vld [vmem:[%s17204_s1 + $0x4] sm:$0x3]  ;;  %v10383_v5 = vld [vmem:[%s17204_s1 + $0x6] sm:$0x3] }
   0xd   : > { %11495 = vmatpush3.bf16.msra.mxu0 %v763_v2  ;;  %11529 = vmatpush3.bf16.msra.mxu1 %v1055_v3  ;;  %s17592_s19 = smov (!%p215_p3, %s10229_s19), 1  ;;  %v12312_v6 = vld [vmem:[%s17204_s1 + $0x8] sm:$0x3]  ;;  %vm275_vm1 = vsmask.f32 3328  ;;  %vm712_vm3 = vcmask 31744  }
   0xe   : > { %12108 = vmatprep.subr.msk.bf16.mxu0 %vm761_vm0, %v10318_v4  ;;  %12109 = vmatprep.subr.msk.bf16.mxu1 %vm761_vm0, %v10383_v5  ;;  %s12124_s30 = smul.u32 216, %s17592_s19  ;;  %vm276_vm2 = vsmask.f32 7440  ;;  %v12321_v7 = vsel %vm761_vm0, %v10318_v4, 0  ;;  %v1839_v8 = vsel %vm761_vm0, %v10383_v5, 0  ;;  %v12326_v9 = vsel %vm761_vm0, %v12312_v6, 0 }
   0xf   : > { %vm12354_vm4 = vmor %vm275_vm1, %vm276_vm2  ;;  %v17235_v36 = vmov 0  ;;  %vm1266_vm5 = vcmask 1042432   ;;  %vm1267_vm6 = vcmask 1046532   ;;  %vm6016_vm8 = vcmask 1043456  }
  0x10   : > { %s12318_s8 = scalar_lea.vmem %s17203_s0, %s12124_s30  ;;  %v17236_v36 = vsel %vm12354_vm4, 4294967295, %v17235_v36  ;;  %vm12616_vm7 = vmor %vm1266_vm5, %vm1267_vm6  ;;  %vm4891_vm9 = vcmask 60416   ;;  %vm4894_vm10 = vcmask 57344   ;;  %vm5967_vm11 = vcmask 64512   ;;  %s11155_s30 = sshll.u32 %s17592_s19, 8 }
  0x11   : > { %v226_v10 = vld [vmem:[%s12318_s8] sm:$0xf]  ;;  %v12330_v11 = vld [vmem:[%s12318_s8 + $0x4] sm:$0xf]  ;;  %v12333_v12 = vld [vmem:[%s12318_s8 + $0x8] sm:$0x1]  ;;  %s16962_s7 = scalar_lea.vmem %s17208_s5, %s11155_s30 }
  0x12   : > { %v279_v13 = vshrl.u32 %v226_v10, 16  ;;  %v282_v14 = vshll.u32 %v226_v10, 16  ;;  %v288_v15 = vshll.u32 %v12330_v11, 16  ;;  %v292_v16 = vshrl.u32 %v12330_v11, 16  ;;  %v228_v17 = vld [vmem:[%s12318_s8 + $0xc] sm:$0xf] }
  0x13   : > { %v298_v18 = vshll.u32 %v12333_v12, 16  ;;  %v1274_v19 = vrot.slane %v12333_v12, 5  ;;  %v10270_v20 = vcombine.low %v226_v10, %v12330_v11  ;;  %v12342_v21 = vld [vmem:[%s12318_s8 + $0x10] sm:$0xf]  ;;  %v12345_v22 = vld [vmem:[%s12318_s8 + $0x14] sm:$0x1] }
  0x14   : > { %v281_v23 = vrot.slane %v279_v13, 4  ;;  %v284_v24 = vrot.slane %v282_v14, 5  ;;  %v290_v25 = vrot.slane %v288_v15, 5  ;;  %v294_v26 = vrot.slane %v292_v16, 4  ;;  %v230_v35 = vld [vmem:[%s12318_s8 + $0x18] sm:$0xf] }
  0x15   : > { %v300_v27 = vrot.slane %v298_v18, 5  ;;  %11530 = vmatprep.mubr.msk.bf16.mxu1 %vm712_vm3, %v10270_v20  ;;  %v303_v28 = vshrl.u32 %v228_v17, 16  ;;  %v306_v29 = vshll.u32 %v228_v17, 16  ;;  %v312_v30 = vshll.u32 %v12342_v21, 16  ;;  %17237 = vst [vmem:[#allocation3_spill] sm:$0xff] %v17236_v36 }
  0x16   : > { %v285_v31 = vor.u32 %v284_v24, %v281_v23  ;;  %v295_v32 = vor.u32 %v294_v26, %v290_v25  ;;  %v316_v33 = vshrl.u32 %v12342_v21, 16  ;;  %v322_v34 = vshll.u32 %v12345_v22, 16  ;;  %v12360_v45 = vld [vmem:[%s12318_s8 + $0x1c] sm:$0xf]  ;;  %v12365_v49 = vld [vmem:[%s12318_s8 + $0x20] sm:$0x1] }
  0x17   : > { %v305_v37 = vrot.slane %v303_v28, 4  ;;  %v308_v38 = vrot.slane %v306_v29, 5  ;;  %v314_v39 = vrot.slane %v312_v30, 5  ;;  %v1278_v40 = vrot.slane %v12342_v21, 5  ;;  %v232_v55 = vld [vmem:[%s12318_s8 + $0x24] sm:$0xf] }
  0x18   : > { %v286_v41 = vrot.slane %v285_v31, 4  ;;  %v296_v42 = vrot.slane %v295_v32, 4  ;;  %v318_v43 = vrot.slane %v316_v33, 4  ;;  %v324_v44 = vrot.slane %v322_v34, 5  ;;  %v12377_v0 = vld [vmem:[%s12318_s8 + $0x28] sm:$0xf] }
  0x19   : > { %v309_v46 = vor.u32 %v308_v38, %v305_v37  ;;  %v1281_v47 = vrot.slane %v12345_v22, 5  ;;  %v10271_v48 = vcombine.low %v228_v17, %v12342_v21  ;;  %v327_v50 = vshrl.u32 %v230_v35, 16  ;;  %v12384_v4 = vld [vmem:[%s12318_s8 + $0x2c] sm:$0x1]  ;;  %v12399_v31 = vld [vmem:[%s12318_s8 + $0x38] sm:$0x1] }
  0x1a   : > { %v291_v51 = vsel %vm12354_vm4, %v286_v41, %v290_v25  ;;  %v301_v52 = vsel %vm12354_vm4, %v296_v42, %v300_v27  ;;  %v319_v53 = vor.u32 %v318_v43, %v314_v39  ;;  %v330_v54 = vshll.u32 %v230_v35, 16  ;;  %v12394_v27 = vld [vmem:[%s12318_s8 + $0x34] sm:$0xf] }
  0x1b   : > { %v10238_v56 = vcombine.low %v291_v51, %v301_v52  ;;  %v310_v57 = vrot.slane %v309_v46, 4  ;;  %11531 = vmatmul.mubr.msk.bf16.vlgmr.msra.gmra.mxu1 %vm712_vm3, %v10271_v48  ;;  %v329_v58 = vrot.slane %v327_v50, 4  ;;  %v336_v59 = vshll.u32 %v12360_v45, 16  ;;  %v236_v48 = vld [vmem:[%s12318_s8 + $0x3c] sm:$0xf] }
  0x1c   : > { %v320_v60 = vrot.slane %v319_v53, 4  ;;  %v332_v61 = vrot.slane %v330_v54, 5  ;;  %v340_v62 = vshrl.u32 %v12360_v45, 16  ;;  %v346_v63 = vshll.u32 %v12365_v49, 16  ;;  %11597 = vmatpush3.bf16.msra.mxu1 %v1839_v8  ;;  %v234_v8 = vld [vmem:[%s12318_s8 + $0x30] sm:$0xf] }
  0x1d   : > { %11496 = vmatprep.mubr.msk.bf16.mxu0 %vm712_vm3, %v10238_v56  ;;  %v315_v1 = vsel %vm12354_vm4, %v310_v57, %v314_v39  ;;  %v338_v2 = vrot.slane %v336_v59, 5  ;;  %v10272_v3 = vcombine.low %v230_v35, %v12360_v45  ;;  %v351_v5 = vshrl.u32 %v232_v55, 16  ;;  %v12414_v54 = vld [vmem:[%s12318_s8 + $0x40] sm:$0xf] }
  0x1e   : > { %v325_v10 = vsel %vm12354_vm4, %v320_v60, %v324_v44  ;;  %v333_v13 = vor.u32 %v332_v61, %v329_v58  ;;  %v342_v14 = vrot.slane %v340_v62, 4  ;;  %v348_v15 = vrot.slane %v346_v63, 5  ;;  %v12421_v60 = vld [vmem:[%s12318_s8 + $0x44] sm:$0x1] }
  0x1f   : > { %v10239_v16 = vcombine.low %v315_v1, %v325_v10  ;;  %11534 = vmatprep.mubr.msk.bf16.mxu1 %vm712_vm3, %v10272_v3  ;;  %v353_v17 = vrot.slane %v351_v5, 4  ;;  %v354_v18 = vshll.u32 %v232_v55, 16  ;;  %v360_v20 = vshll.u32 %v12377_v0, 16  ;;  %v238_v5 = vld [vmem:[%s12318_s8 + $0x48] sm:$0xf] }
  0x20   : > { %v334_v23 = vrot.slane %v333_v13, 4  ;;  %v343_v24 = vor.u32 %v342_v14, %v338_v2  ;;  %v364_v25 = vshrl.u32 %v12377_v0, 16  ;;  %v370_v26 = vshll.u32 %v12384_v4, 16 }
  0x21   : > { %11497 = vmatmul.mubr.msk.bf16.vlgmr.msra.gmra.mxu0 %vm712_vm3, %v10239_v16  ;;  %v356_v28 = vrot.slane %v354_v18, 5  ;;  %v362_v29 = vrot.slane %v360_v20, 5  ;;  %v10273_v30 = vcombine.low %v232_v55, %v12377_v0  ;;  %v375_v32 = vshrl.u32 %v234_v8, 16  ;;  %v12431_v20 = vld [vmem:[%s12318_s8 + $0x4c] sm:$0xf] }
  0x22   : > { %11563 = vmatpush3.bf16.msra.mxu0 %v12321_v7  ;;  %v339_v33 = vsel %vm12354_vm4, %v334_v23, %v338_v2  ;;  %v344_v34 = vrot.slane %v343_v24, 4  ;;  %v366_v35 = vrot.slane %v364_v25, 4  ;;  %v372_v37 = vrot.slane %v370_v26, 5  ;;  %v12438_v26 = vld [vmem:[%s12318_s8 + $0x50] sm:$0x1] }
  0x23   : > { %v357_v38 = vor.u32 %v356_v28, %v353_v17  ;;  %11535 = vmatmul.mubr.msk.bf16.gmra.mxu1 %vm712_vm3, %v10273_v30  ;;  %v377_v39 = vrot.slane %v375_v32, 4  ;;  %v378_v41 = vshll.u32 %v234_v8, 16  ;;  %v384_v42 = vshll.u32 %v12394_v27, 16  ;;  %12110 = vmatprep.subr.msk.bf16.mxu0 %vm761_vm0, %v12312_v6 }
  0x24   : > { %v349_v7 = vsel %vm12354_vm4, %v344_v34, %v348_v15  ;;  %v367_v43 = vor.u32 %v366_v35, %v362_v29  ;;  %v388_v44 = vshrl.u32 %v12394_v27, 16  ;;  %v394_v46 = vshll.u32 %v12399_v31, 16  ;;  %v240_v34 = vld [vmem:[%s12318_s8 + $0x54] sm:$0xf] }
  0x25   : > { %v10240_v50 = vcombine.low %v339_v33, %v349_v7  ;;  %v358_v51 = vrot.slane %v357_v38, 4  ;;  %v380_v52 = vrot.slane %v378_v41, 5  ;;  %v386_v53 = vrot.slane %v384_v42, 5 }
  0x26   : > { %v368_v55 = vrot.slane %v367_v43, 4  ;;  %v390_v56 = vrot.slane %v388_v44, 4  ;;  %v396_v6 = vrot.slane %v394_v46, 5  ;;  %v10274_v57 = vcombine.low %v234_v8, %v12394_v27  ;;  %v12448_v44 = vld [vmem:[%s12318_s8 + $0x58] sm:$0xf] }
  0x27   : > { %11500 = vmatprep.mubr.msk.bf16.mxu0 %vm712_vm3, %v10240_v50  ;;  %v363_v58 = vsel %vm12354_vm4, %v358_v51, %v362_v29  ;;  %v381_v59 = vor.u32 %v380_v52, %v377_v39  ;;  %v399_v61 = vshrl.u32 %v236_v48, 16  ;;  %v402_v62 = vshll.u32 %v236_v48, 16  ;;  %v12455_v51 = vld [vmem:[%s12318_s8 + $0x5c] sm:$0x1] }
  0x28   : > { %v373_v63 = vsel %vm12354_vm4, %v368_v55, %v372_v37  ;;  %v391_v1 = vor.u32 %v390_v56, %v386_v53  ;;  %11538 = vmatprep.mubr.msk.bf16.mxu1 %vm712_vm3, %v10274_v57  ;;  %v408_v2 = vshll.u32 %v12414_v54, 16  ;;  %v412_v3 = vshrl.u32 %v12414_v54, 16  ;;  %v242_v57 = vld [vmem:[%s12318_s8 + $0x60] sm:$0xf] }
  0x29   : > { %v10241_v10 = vcombine.low %v363_v58, %v373_v63  ;;  %v382_v13 = vrot.slane %v381_v59, 4  ;;  %v401_v14 = vrot.slane %v399_v61, 4  ;;  %v404_v15 = vrot.slane %v402_v62, 5 }
  0x2a   : > { %v392_v8 = vrot.slane %v391_v1, 4  ;;  %v410_v16 = vrot.slane %v408_v2, 5  ;;  %v414_v17 = vrot.slane %v412_v3, 4  ;;  %v418_v18 = vshll.u32 %v12421_v60, 16 }
  0x2b   : > { %11501 = vmatmul.mubr.msk.bf16.gmra.mxu0 %vm712_vm3, %v10241_v10  ;;  %v387_v23 = vsel %vm12354_vm4, %v382_v13, %v386_v53  ;;  %v405_v24 = vor.u32 %v404_v15, %v401_v14  ;;  %v10275_v25 = vcombine.low %v236_v48, %v12414_v54  ;;  %v423_v28 = vshrl.u32 %v238_v5, 16  ;;  %v12470_v15 = vld [vmem:[%s12318_s8 + $0x68] sm:$0x1] }
  0x2c   : > { %v397_v29 = vsel %vm12354_vm4, %v392_v8, %v396_v6  ;;  %v415_v30 = vor.u32 %v414_v17, %v410_v16  ;;  %v420_v32 = vrot.slane %v418_v18, 5  ;;  %v426_v33 = vshll.u32 %v238_v5, 16 }
  0x2d   : > { %v10242_v35 = vcombine.low %v387_v23, %v397_v29  ;;  %v406_v37 = vrot.slane %v405_v24, 4  ;;  %11539 = vmatmul.mubr.msk.bf16.gmra.mxu1 %vm712_vm3, %v10275_v25  ;;  %v425_v38 = vrot.slane %v423_v28, 4  ;;  %v432_v39 = vshll.u32 %v12431_v20, 16  ;;  %v244_v24 = vld [vmem:[%s12318_s8 + $0x6c] sm:$0xf] }
  0x2e   : > { %v416_v41 = vrot.slane %v415_v30, 4  ;;  %v428_v42 = vrot.slane %v426_v33, 5  ;;  %v436_v7 = vshrl.u32 %v12431_v20, 16  ;;  %v442_v43 = vshll.u32 %v12438_v26, 16 }
  0x2f   : > { %11504 = vmatprep.mubr.msk.bf16.mxu0 %vm712_vm3, %v10242_v35  ;;  %v411_v46 = vsel %vm12354_vm4, %v406_v37, %v410_v16  ;;  %v434_v48 = vrot.slane %v432_v39, 5  ;;  %v10276_v50 = vcombine.low %v238_v5, %v12431_v20  ;;  %v447_v52 = vshrl.u32 %v240_v34, 16  ;;  %v12465_v5 = vld [vmem:[%s12318_s8 + $0x64] sm:$0xf] }
  0x30   : > { %v421_v53 = vsel %vm12354_vm4, %v416_v41, %v420_v32  ;;  %v429_v55 = vor.u32 %v428_v42, %v425_v38  ;;  %v438_v56 = vrot.slane %v436_v7, 4  ;;  %v444_v6 = vrot.slane %v442_v43, 5  ;;  %v12478_v32 = vld [vmem:[%s12318_s8 + $0x70] sm:$0xf]  ;;  %v12485_v7 = vld [vmem:[%s12318_s8 + $0x74] sm:$0x1] }
  0x31   : > { %v10243_v58 = vcombine.low %v411_v46, %v421_v53  ;;  %11542 = vmatprep.mubr.msk.bf16.mxu1 %vm712_vm3, %v10276_v50  ;;  %v449_v59 = vrot.slane %v447_v52, 4  ;;  %v450_v61 = vshll.u32 %v240_v34, 16  ;;  %v456_v62 = vshll.u32 %v12448_v44, 16  ;;  %v246_v52 = vld [vmem:[%s12318_s8 + $0x78] sm:$0xf] }
  0x32   : > { %v430_v63 = vrot.slane %v429_v55, 4  ;;  %v439_v1 = vor.u32 %v438_v56, %v434_v48  ;;  %v460_v2 = vshrl.u32 %v12448_v44, 16  ;;  %v466_v3 = vshll.u32 %v12455_v51, 16 }
  0x33   : > { %11505 = vmatmul.mubr.msk.bf16.gmra.mxu0 %vm712_vm3, %v10243_v58  ;;  %v452_v10 = vrot.slane %v450_v61, 5  ;;  %v458_v13 = vrot.slane %v456_v62, 5  ;;  %v10277_v14 = vcombine.low %v240_v34, %v12448_v44  ;;  %v471_v8 = vshrl.u32 %v242_v57, 16  ;;  %v12498_v62 = vld [vmem:[%s12318_s8 + $0x7c] sm:$0xf] }
  0x34   : > { %v435_v16 = vsel %vm12354_vm4, %v430_v63, %v434_v48  ;;  %v440_v17 = vrot.slane %v439_v1, 4  ;;  %v462_v18 = vrot.slane %v460_v2, 4  ;;  %v468_v23 = vrot.slane %v466_v3, 5 }
  0x35   : > { %v453_v25 = vor.u32 %v452_v10, %v449_v59  ;;  %11543 = vmatmul.mubr.msk.bf16.gmra.mxu1 %vm712_vm3, %v10277_v14  ;;  %v473_v28 = vrot.slane %v471_v8, 4  ;;  %v474_v29 = vshll.u32 %v242_v57, 16  ;;  %v480_v30 = vshll.u32 %v12465_v5, 16  ;;  %v12501_v10 = vld [vmem:[%s12318_s8 + $0x80] sm:$0x1] }
  0x36   : > { %v445_v33 = vsel %vm12354_vm4, %v440_v17, %v444_v6  ;;  %v463_v34 = vor.u32 %v462_v18, %v458_v13  ;;  %v484_v35 = vshrl.u32 %v12465_v5, 16  ;;  %v490_v37 = vshll.u32 %v12470_v15, 16  ;;  %v248_v17 = vld [vmem:[%s12318_s8 + $0x84] sm:$0xf] }
  0x37   : > { %v10244_v38 = vcombine.low %v435_v16, %v445_v33  ;;  %v454_v39 = vrot.slane %v453_v25, 4  ;;  %v476_v41 = vrot.slane %v474_v29, 5  ;;  %v482_v42 = vrot.slane %v480_v30, 5 }
  0x38   : > { %v464_v43 = vrot.slane %v463_v34, 4  ;;  %v486_v46 = vrot.slane %v484_v35, 4  ;;  %v492_v48 = vrot.slane %v490_v37, 5  ;;  %v10278_v50 = vcombine.low %v242_v57, %v12465_v5  ;;  %v12512_v35 = vld [vmem:[%s12318_s8 + $0x88] sm:$0xf] }
  0x39   : > { %11508 = vmatprep.mubr.msk.bf16.mxu0 %vm712_vm3, %v10244_v38  ;;  %v459_v53 = vsel %vm12354_vm4, %v454_v39, %v458_v13  ;;  %v477_v55 = vor.u32 %v476_v41, %v473_v28  ;;  %v495_v56 = vshrl.u32 %v244_v24, 16  ;;  %v498_v6 = vshll.u32 %v244_v24, 16 }
  0x3a   : > { %v469_v58 = vsel %vm12354_vm4, %v464_v43, %v468_v23  ;;  %v487_v59 = vor.u32 %v486_v46, %v482_v42  ;;  %11546 = vmatprep.mubr.msk.bf16.mxu1 %vm712_vm3, %v10278_v50  ;;  %v504_v61 = vshll.u32 %v12478_v32, 16  ;;  %v508_v57 = vshrl.u32 %v12478_v32, 16  ;;  %v250_v50 = vld [vmem:[%s12318_s8 + $0x90] sm:$0xf] }
  0x3b   : > { %v10245_v63 = vcombine.low %v459_v53, %v469_v58  ;;  %v478_v1 = vrot.slane %v477_v55, 4  ;;  %v497_v2 = vrot.slane %v495_v56, 4  ;;  %v500_v3 = vrot.slane %v498_v6, 5 }
  0x3c   : > { %v488_v13 = vrot.slane %v487_v59, 4  ;;  %v506_v14 = vrot.slane %v504_v61, 5  ;;  %v510_v8 = vrot.slane %v508_v57, 4  ;;  %v514_v16 = vshll.u32 %v12485_v7, 16 }
  0x3d   : > { %11509 = vmatmul.mubr.msk.bf16.gmra.mxu0 %vm712_vm3, %v10245_v63  ;;  %v483_v18 = vsel %vm12354_vm4, %v478_v1, %v482_v42  ;;  %v501_v23 = vor.u32 %v500_v3, %v497_v2  ;;  %v10279_v25 = vcombine.low %v244_v24, %v12478_v32  ;;  %v519_v28 = vshrl.u32 %v246_v52, 16  ;;  %v12517_v42 = vld [vmem:[%s12318_s8 + $0x8c] sm:$0x1] }
  0x3e   : > { %v493_v29 = vsel %vm12354_vm4, %v488_v13, %v492_v48  ;;  %v511_v30 = vor.u32 %v510_v8, %v506_v14  ;;  %v516_v33 = vrot.slane %v514_v16, 5  ;;  %v522_v34 = vshll.u32 %v246_v52, 16  ;;  %v12531_v13 = vld [vmem:[%s12318_s8 + $0x94] sm:$0xf] }
  0x3f   : > { %v10246_v37 = vcombine.low %v483_v18, %v493_v29  ;;  %v502_v38 = vrot.slane %v501_v23, 4  ;;  %11547 = vmatmul.mubr.msk.bf16.gmra.mxu1 %vm712_vm3, %v10279_v25  ;;  %v521_v39 = vrot.slane %v519_v28, 4  ;;  %v528_v41 = vshll.u32 %v12498_v62, 16  ;;  %v12536_v18 = vld [vmem:[%s12318_s8 + $0x98] sm:$0x1] }
  0x40   : > { %v512_v24 = vrot.slane %v511_v30, 4  ;;  %v524_v43 = vrot.slane %v522_v34, 5  ;;  %v532_v46 = vshrl.u32 %v12498_v62, 16  ;;  %v538_v48 = vshll.u32 %v12501_v10, 16 }
  0x41   : > { %11512 = vmatprep.mubr.msk.bf16.mxu0 %vm712_vm3, %v10246_v37  ;;  %v507_v53 = vsel %vm12354_vm4, %v502_v38, %v506_v14  ;;  %v530_v55 = vrot.slane %v528_v41, 5  ;;  %v10280_v56 = vcombine.low %v246_v52, %v12498_v62  ;;  %v543_v6 = vshrl.u32 %v248_v17, 16  ;;  %v252_v38 = vld [vmem:[%s12318_s8 + $0x9c] sm:$0xf] }
  0x42   : > { %v517_v58 = vsel %vm12354_vm4, %v512_v24, %v516_v33  ;;  %v525_v59 = vor.u32 %v524_v43, %v521_v39  ;;  %v534_v61 = vrot.slane %v532_v46, 4  ;;  %v540_v57 = vrot.slane %v538_v48, 5 }
  0x43   : > { %v10247_v63 = vcombine.low %v507_v53, %v517_v58  ;;  %11550 = vmatprep.mubr.msk.bf16.mxu1 %vm712_vm3, %v10280_v56  ;;  %v545_v1 = vrot.slane %v543_v6, 4  ;;  %v546_v2 = vshll.u32 %v248_v17, 16  ;;  %v552_v3 = vshll.u32 %v12512_v35, 16 }
  0x44   : > { %v526_v14 = vrot.slane %v525_v59, 4  ;;  %v535_v52 = vor.u32 %v534_v61, %v530_v55  ;;  %v556_v8 = vshrl.u32 %v12512_v35, 16  ;;  %v562_v16 = vshll.u32 %v12517_v42, 16  ;;  %v12553_v61 = vld [vmem:[%s12318_s8 + $0xa4] sm:$0x1] }
  0x45   : > { %11513 = vmatmul.mubr.msk.bf16.gmra.mxu0 %vm712_vm3, %v10247_v63  ;;  %v548_v23 = vrot.slane %v546_v2, 5  ;;  %v554_v25 = vrot.slane %v552_v3, 5  ;;  %v10281_v28 = vcombine.low %v248_v17, %v12512_v35  ;;  %v567_v29 = vshrl.u32 %v250_v50, 16 }
  0x46   : > { %v531_v30 = vsel %vm12354_vm4, %v526_v14, %v530_v55  ;;  %v536_v33 = vrot.slane %v535_v52, 4  ;;  %v558_v34 = vrot.slane %v556_v8, 4  ;;  %v564_v37 = vrot.slane %v562_v16, 5  ;;  %v12550_v55 = vld [vmem:[%s12318_s8 + $0xa0] sm:$0xf] }
  0x47   : > { %v549_v39 = vor.u32 %v548_v23, %v545_v1  ;;  %11551 = vmatmul.mubr.msk.bf16.gmra.mxu1 %vm712_vm3, %v10281_v28  ;;  %v569_v41 = vrot.slane %v567_v29, 4  ;;  %v570_v24 = vshll.u32 %v250_v50, 16  ;;  %v576_v43 = vshll.u32 %v12531_v13, 16 }
  0x48   : > { %v541_v17 = vsel %vm12354_vm4, %v536_v33, %v540_v57  ;;  %v559_v46 = vor.u32 %v558_v34, %v554_v25  ;;  %v580_v48 = vshrl.u32 %v12531_v13, 16  ;;  %v586_v53 = vshll.u32 %v12536_v18, 16  ;;  %v254_v57 = vld [vmem:[%s12318_s8 + $0xa8] sm:$0xf] }
  0x49   : > { %v10248_v56 = vcombine.low %v531_v30, %v541_v17  ;;  %v550_v6 = vrot.slane %v549_v39, 4  ;;  %v572_v58 = vrot.slane %v570_v24, 5  ;;  %v578_v59 = vrot.slane %v576_v43, 5  ;;  %v12566_v30 = vld [vmem:[%s12318_s8 + $0xac] sm:$0xf] }
  0x4a   : > { %v560_v63 = vrot.slane %v559_v46, 4  ;;  %v582_v1 = vrot.slane %v580_v48, 4  ;;  %v588_v2 = vrot.slane %v586_v53, 5  ;;  %v10282_v3 = vcombine.low %v250_v50, %v12531_v13  ;;  %v256_v46 = vld [vmem:[%s12318_s8 + $0xb4] sm:$0xf] }
  0x4b   : > { %11516 = vmatprep.mubr.msk.bf16.mxu0 %vm712_vm3, %v10248_v56  ;;  %v555_v14 = vsel %vm12354_vm4, %v550_v6, %v554_v25  ;;  %v573_v52 = vor.u32 %v572_v58, %v569_v41  ;;  %v591_v8 = vshrl.u32 %v252_v38, 16  ;;  %v594_v16 = vshll.u32 %v252_v38, 16  ;;  %v12569_v41 = vld [vmem:[%s12318_s8 + $0xb0] sm:$0x1] }
  0x4c   : > { %v565_v23 = vsel %vm12354_vm4, %v560_v63, %v564_v37  ;;  %v583_v28 = vor.u32 %v582_v1, %v578_v59  ;;  %11554 = vmatprep.mubr.msk.bf16.mxu1 %vm712_vm3, %v10282_v3  ;;  %v600_v29 = vshll.u32 %v12550_v55, 16  ;;  %v604_v50 = vshrl.u32 %v12550_v55, 16 }
  0x4d   : > { %v10249_v33 = vcombine.low %v555_v14, %v565_v23  ;;  %v574_v34 = vrot.slane %v573_v52, 4  ;;  %v593_v39 = vrot.slane %v591_v8, 4  ;;  %v596_v25 = vrot.slane %v594_v16, 5  ;;  %v12580_v14 = vld [vmem:[%s12318_s8 + $0xb8] sm:$0xf] }
  0x4e   : > { %v584_v37 = vrot.slane %v583_v28, 4  ;;  %v602_v24 = vrot.slane %v600_v29, 5  ;;  %v606_v43 = vrot.slane %v604_v50, 4  ;;  %v610_v17 = vshll.u32 %v12553_v61, 16  ;;  %v12585_v23 = vld [vmem:[%s12318_s8 + $0xbc] sm:$0x1] }
  0x4f   : > { %11517 = vmatmul.mubr.msk.bf16.gmra.mxu0 %vm712_vm3, %v10249_v33  ;;  %v579_v48 = vsel %vm12354_vm4, %v574_v34, %v578_v59  ;;  %v597_v53 = vor.u32 %v596_v25, %v593_v39  ;;  %v10283_v56 = vcombine.low %v252_v38, %v12550_v55  ;;  %v615_v6 = vshrl.u32 %v254_v57, 16  ;;  %v1218_v50 = vld [vmem:[%s12318_s8] sm:$0xe] }
  0x50   : > { %v589_v58 = vsel %vm12354_vm4, %v584_v37, %v588_v2  ;;  %v607_v63 = vor.u32 %v606_v43, %v602_v24  ;;  %v612_v1 = vrot.slane %v610_v17, 5  ;;  %v618_v3 = vshll.u32 %v254_v57, 16 }
  0x51   : > { %v10250_v52 = vcombine.low %v579_v48, %v589_v58  ;;  %v598_v8 = vrot.slane %v597_v53, 4  ;;  %11555 = vmatmul.mubr.msk.bf16.gmra.mxu1 %vm712_vm3, %v10283_v56  ;;  %v617_v16 = vrot.slane %v615_v6, 4  ;;  %v624_v59 = vshll.u32 %v12566_v30, 16  ;;  %v12599_v53 = vld [vmem:[%s17204_s1 + $0xa] sm:$0x3] }
  0x52   : > { %v608_v38 = vrot.slane %v607_v63, 4  ;;  %v620_v28 = vrot.slane %v618_v3, 5  ;;  %v628_v29 = vshrl.u32 %v12566_v30, 16  ;;  %v634_v2 = vshll.u32 %v12569_v41, 16  ;;  %12111 = vmatprep.subr.msk.bf16.mxu1 %vm761_vm0, %v12599_v53 }
  0x53   : > { %11520 = vmatprep.mubr.msk.bf16.mxu0 %vm712_vm3, %v10250_v52  ;;  %v603_v33 = vsel %vm12354_vm4, %v598_v8, %v602_v24  ;;  %v626_v34 = vrot.slane %v624_v59, 5  ;;  %v10284_v39 = vcombine.low %v254_v57, %v12566_v30  ;;  %v639_v25 = vshrl.u32 %v256_v46, 16  ;;  %v1219_v52 = vld [vmem:[%s12318_s8 + $0xc] sm:$0xe] }
  0x54   : > { %v613_v37 = vsel %vm12354_vm4, %v608_v38, %v612_v1  ;;  %v621_v43 = vor.u32 %v620_v28, %v617_v16  ;;  %v630_v17 = vrot.slane %v628_v29, 4  ;;  %v636_v48 = vrot.slane %v634_v2, 5  ;;  %v12150_v8 = vld [vmem:[%s12318_s8 + $0xc] sm:$0xff]   ;;  %v1220_v29 = vld [vmem:[%s12318_s8 + $0x18] sm:$0xe] }
  0x55   : > { %v10251_v56 = vcombine.low %v603_v33, %v613_v37  ;;  %11558 = vmatprep.mubr.msk.bf16.mxu1 %vm712_vm3, %v10284_v39  ;;  %v641_v24 = vrot.slane %v639_v25, 4  ;;  %v642_v57 = vshll.u32 %v256_v46, 16  ;;  %v648_v6 = vshll.u32 %v12580_v14, 16 }
  0x56   : > { %v622_v58 = vrot.slane %v621_v43, 4  ;;  %v631_v63 = vor.u32 %v630_v17, %v626_v34  ;;  %v652_v1 = vshrl.u32 %v12580_v14, 16  ;;  %v658_v3 = vshll.u32 %v12585_v23, 16 }
  0x57   : > { %11521 = vmatmul.mubr.msk.bf16.gmra.mxu0 %vm712_vm3, %v10251_v56  ;;  %v644_v16 = vrot.slane %v642_v57, 5  ;;  %v650_v59 = vrot.slane %v648_v6, 5  ;;  %v10285_v38 = vcombine.low %v256_v46, %v12580_v14  ;;  %v10302_v28 = vrot.slane %v1218_v50, 9 }
  0x58   : > { %v627_v2 = vsel %vm12354_vm4, %v622_v58, %v626_v34  ;;  %v632_v33 = vrot.slane %v631_v63, 4  ;;  %v654_v39 = vrot.slane %v652_v1, 4  ;;  %v660_v25 = vrot.slane %v658_v3, 5  ;;  %v1221_v1 = vld [vmem:[%s12318_s8 + $0x24] sm:$0xe] }
  0x59   : > { %v17238_v37 = vmov 0  ;;  %v645_v43 = vor.u32 %v644_v16, %v641_v24  ;;  %11559 = vmatmul.mubr.msk.bf16.gmra.mxu1 %vm712_vm3, %v10285_v38  ;;  %v1271_v46 = vrot.slane %v12330_v11, 5  ;;  %v10303_v50 = vrot.slane %v1219_v52, 9  ;;  %v1223_v38 = vld [vmem:[%s12318_s8 + $0x3c] sm:$0xe] }
  0x5a   : > { %v17239_v37 = vsel %vm12616_vm7, 4294967295, %v17238_v37  ;;  %v1280_v34 = vrot.slane %v1278_v40, 4  ;;  %v637_v17 = vsel %vm12354_vm4, %v632_v33, %v636_v48  ;;  %v655_v56 = vor.u32 %v654_v39, %v650_v59  ;;  %11598 = vmatprep.mubr.msk.bf16.mxu1 %vm712_vm3, %v12150_v8  ;;  %v1222_v8 = vld [vmem:[%s12318_s8 + $0x30] sm:$0xe]  ;;  %v12152_v39 = vld [vmem:[%s12318_s8 + $0x24] sm:$0xff]  }
  0x5b   : > { %17240 = vst [vmem:[#allocation4_spill] sm:$0xff] %v17239_v37  ;;  %v10304_v57 = vrot.slane %v1220_v29, 9  ;;  %v1285_v6 = vrot.slane %v12360_v45, 5  ;;  %v10252_v24 = vcombine.low %v627_v2, %v637_v17  ;;  %v646_v58 = vrot.slane %v645_v43, 4 }
  0x5c   : > { %v1272_v11 = vsel %vm12616_vm7, %v10302_v28, %v1271_v46  ;;  %v1273_v63 = vrot.slane %v1271_v46, 4  ;;  %v656_v3 = vrot.slane %v655_v56, 4  ;;  %v12635_v48 = vsel %vm12616_vm7, %v10303_v50, %v1278_v40  ;;  %v1224_v46 = vld [vmem:[%s12318_s8 + $0x48] sm:$0xe] }
  0x5d   : > { %v12641_v45 = vsel %vm12616_vm7, %v1280_v34, %v1281_v47  ;;  %v12645_v52 = vsel %vm12616_vm7, %v10304_v57, %v1285_v6  ;;  %11524 = vmatprep.mubr.msk.bf16.mxu0 %vm712_vm3, %v10252_v24  ;;  %v651_v21 = vsel %vm12354_vm4, %v646_v58, %v650_v59  ;;  %v12151_v47 = vld [vmem:[%s12318_s8 + $0x18] sm:$0xff]   ;;  %v1287_v16 = vrot.slane %v1285_v6, 4  ;;  %v1225_v57 = vld [vmem:[%s12318_s8 + $0x54] sm:$0xe] }
  0x5e   : > { %v1275_v22 = vsel %vm12616_vm7, %v1273_v63, %v1274_v19  ;;  %v10320_v40 = vcombine.low %v12635_v48, %v12641_v45  ;;  %v661_v28 = vsel %vm12354_vm4, %v656_v3, %v660_v25  ;;  %v1288_v2 = vrot.slane %v12365_v49, 5 }
  0x5f   : > { %v10319_v29 = vcombine.low %v1272_v11, %v1275_v22  ;;  %v10305_v33 = vrot.slane %v1221_v1, 9  ;;  %v10253_v59 = vcombine.low %v651_v21, %v661_v28  ;;  %v1292_v12 = vrot.slane %v12377_v0, 5  ;;  %v1226_v1 = vld [vmem:[%s12318_s8 + $0x60] sm:$0xe] }
  0x60   : > { %v1295_v19 = vrot.slane %v12384_v4, 5  ;;  %v10306_v43 = vrot.slane %v1222_v8, 9  ;;  %v1289_v50 = vsel %vm12616_vm7, %v1287_v16, %v1288_v2  ;;  %v1299_v34 = vrot.slane %v12394_v27, 5  ;;  %v12153_v8 = vld [vmem:[%s12318_s8 + $0x30] sm:$0xff]   ;;  %v12154_v2 = vld [vmem:[%s12318_s8 + $0x3c] sm:$0xff]  }
  0x61   : > { %v1302_v25 = vrot.slane %v12399_v31, 5  ;;  %v10307_v17 = vrot.slane %v1223_v38, 9  ;;  %11525 = vmatmul.mubr.msk.bf16.gmra.mxu0 %vm712_vm3, %v10253_v59  ;;  %11599 = vmatmul.mubr.msk.bf16.vlgmr.msra.gmra.mxu1 %vm712_vm3, %v12151_v47  ;;  %v10321_v49 = vcombine.low %v12645_v52, %v1289_v50  ;;  %v12675_v0 = vsel %vm12616_vm7, %v10305_v33, %v1292_v12  ;;  %v1227_v52 = vld [vmem:[%s12318_s8 + $0x6c] sm:$0xe] }
  0x62   : > { %v1294_v4 = vrot.slane %v1292_v12, 4  ;;  %v1306_v56 = vrot.slane %v12414_v54, 5  ;;  %11564 = vmatprep.mubr.msk.bf16.mxu0 %vm712_vm3, %v10319_v29  ;;  %11602 = vmatprep.mubr.msk.bf16.mxu1 %vm712_vm3, %v12152_v39  ;;  %v12683_v27 = vsel %vm12616_vm7, %v10306_v43, %v1299_v34  ;;  %v1301_v31 = vrot.slane %v1299_v34, 4  ;;  %v1228_v29 = vld [vmem:[%s12318_s8 + $0x78] sm:$0xe] }
  0x63   : > { %v1309_v6 = vrot.slane %v12421_v60, 5  ;;  %v10308_v24 = vrot.slane %v1224_v46, 9  ;;  %v1313_v63 = vrot.slane %v12431_v20, 5  ;;  %v1316_v48 = vrot.slane %v12438_v26, 5  ;;  %v1229_v46 = vld [vmem:[%s12318_s8 + $0x84] sm:$0xe] }
  0x64   : > { %v12688_v58 = vsel %vm12616_vm7, %v1294_v4, %v1295_v19  ;;  %v12692_v54 = vsel %vm12616_vm7, %v10307_v17, %v1306_v56  ;;  %v1308_v11 = vrot.slane %v1306_v56, 4  ;;  %v12700_v60 = vsel %vm12616_vm7, %v1301_v31, %v1302_v25  ;;  %v12738_v50 = vld [vmem:[%s17204_s1 + $0xc] sm:$0x3]  ;;  %v1230_v56 = vld [vmem:[%s12318_s8 + $0x90] sm:$0xe] }
  0x65   : > { %v10322_v3 = vcombine.low %v12675_v0, %v12688_v58  ;;  %v10309_v45 = vrot.slane %v1225_v57, 9  ;;  %v10323_v21 = vcombine.low %v12683_v27, %v12700_v60  ;;  %v12713_v22 = vsel %vm12616_vm7, %v10308_v24, %v1313_v63  ;;  %v1231_v31 = vld [vmem:[%s12318_s8 + $0x9c] sm:$0xe] }
  0x66   : > { %v12709_v20 = vsel %vm12616_vm7, %v1308_v11, %v1309_v6  ;;  %v1315_v47 = vrot.slane %v1313_v63, 4  ;;  %v1320_v26 = vrot.slane %v12448_v44, 5  ;;  %v1323_v38 = vrot.slane %v12455_v51, 5  ;;  %v12155_v63 = vld [vmem:[%s12318_s8 + $0x48] sm:$0xff]  }
  0x67   : > { %v10324_v16 = vcombine.low %v12692_v54, %v12709_v20  ;;  %v10310_v28 = vrot.slane %v1226_v1, 9  ;;  %v1327_v39 = vrot.slane %v12465_v5, 5  ;;  %v1330_v59 = vrot.slane %v12470_v15, 5 }
  0x68   : > { %v12723_v33 = vsel %vm12616_vm7, %v1315_v47, %v1316_v48  ;;  %v10311_v12 = vrot.slane %v1227_v52, 9  ;;  %v12731_v44 = vsel %vm12616_vm7, %v10309_v45, %v1320_v26  ;;  %v1322_v51 = vrot.slane %v1320_v26, 4  ;;  %v1232_v52 = vld [vmem:[%s12318_s8 + $0xa8] sm:$0xe] }
  0x69   : > { %v10325_v19 = vcombine.low %v12713_v22, %v12723_v33  ;;  %v1334_v43 = vrot.slane %v12478_v32, 5  ;;  %11565 = vmatmul.mubr.msk.bf16.vlgmr.msra.gmra.mxu0 %vm712_vm3, %v10320_v40  ;;  %11603 = vmatmul.mubr.msk.bf16.gmra.mxu1 %vm712_vm3, %v12153_v8  ;;  %v12744_v5 = vsel %vm12616_vm7, %v10310_v28, %v1327_v39  ;;  %v1329_v15 = vrot.slane %v1327_v39, 4  ;;  %v12156_v8 = vld [vmem:[%s12318_s8 + $0x54] sm:$0xff]  }
  0x6a   : > { %v1337_v34 = vrot.slane %v12485_v7, 5  ;;  %v10312_v25 = vrot.slane %v1228_v29, 9  ;;  %11631 = vmatpush3.bf16.msra.mxu0 %v12326_v9  ;;  %11568 = vmatprep.mubr.msk.bf16.mxu0 %vm712_vm3, %v10321_v49  ;;  %v12751_v32 = vsel %vm12616_vm7, %v1322_v51, %v1323_v38  ;;  %v1341_v4 = vrot.slane %v12498_v62, 5  ;;  %v1233_v39 = vld [vmem:[%s12318_s8 + $0xb4] sm:$0xe] }
  0x6b   : > { %v12755_v40 = vsel %vm12616_vm7, %v10311_v12, %v1334_v43  ;;  %v1336_v17 = vrot.slane %v1334_v43, 4  ;;  %11606 = vmatprep.mubr.msk.bf16.mxu1 %vm712_vm3, %v12154_v2  ;;  %v10326_v9 = vcombine.low %v12731_v44, %v12751_v32  ;;  %v12764_v7 = vsel %vm12616_vm7, %v1329_v15, %v1330_v59  ;;  %12112 = vmatprep.subr.msk.bf16.mxu0 %vm761_vm0, %v12738_v50  ;;  %v12834_v15 = vld [vmem:[%s12318_s8 + $0x10] sm:$0xf]  ;;  %v10498_v22 = vld [vmem:[%s12318_s8 + $0x18] sm:$0xe] }
  0x6c   : > { %v1344_v49 = vrot.slane %v12501_v10, 5  ;;  %v10313_v57 = vrot.slane %v1229_v46, 9  ;;  %v10327_v62 = vcombine.low %v12744_v5, %v12764_v7  ;;  %v12778_v24 = vsel %vm12616_vm7, %v10312_v25, %v1341_v4 }
  0x6d   : > { %v12774_v6 = vsel %vm12616_vm7, %v1336_v17, %v1337_v34  ;;  %v1343_v11 = vrot.slane %v1341_v4, 4  ;;  %v1348_v1 = vrot.slane %v12512_v35, 5  ;;  %v1351_v48 = vrot.slane %v12517_v42, 5  ;;  %v12849_v4 = vld [vmem:[%s12318_s8 + $0x14] sm:$0x1] }
  0x6e   : > { %v10328_v10 = vcombine.low %v12755_v40, %v12774_v6  ;;  %v10314_v45 = vrot.slane %v1230_v56, 9  ;;  %v1355_v26 = vrot.slane %v12531_v13, 5  ;;  %v1358_v38 = vrot.slane %v12536_v18, 5  ;;  %v12157_v56 = vld [vmem:[%s12318_s8 + $0x60] sm:$0xff]  }
  0x6f   : > { %v12789_v47 = vsel %vm12616_vm7, %v1343_v11, %v1344_v49  ;;  %v10315_v28 = vrot.slane %v1231_v31, 9  ;;  %v12797_v35 = vsel %vm12616_vm7, %v10313_v57, %v1348_v1  ;;  %v1350_v42 = vrot.slane %v1348_v1, 4 }
  0x70   : > { %v10329_v29 = vcombine.low %v12778_v24, %v12789_v47  ;;  %v1362_v2 = vrot.slane %v12550_v55, 5  ;;  %v12803_v59 = vsel %vm12616_vm7, %v10314_v45, %v1355_v26  ;;  %v1357_v13 = vrot.slane %v1355_v26, 4  ;;  %v12869_v45 = vld [vmem:[%s12318_s8 + $0x1c] sm:$0xf] }
  0x71   : > { %v1365_v18 = vrot.slane %v12553_v61, 5  ;;  %v10316_v12 = vrot.slane %v1232_v52, 9  ;;  %11569 = vmatmul.mubr.msk.bf16.gmra.mxu0 %vm712_vm3, %v10322_v3  ;;  %11607 = vmatmul.mubr.msk.bf16.gmra.mxu1 %vm712_vm3, %v12155_v63  ;;  %v12813_v55 = vsel %vm12616_vm7, %v1350_v42, %v1351_v48  ;;  %v1369_v46 = vrot.slane %v12566_v30, 5  ;;  %v10416_v30 = vld [vmem:[%s12318_s8 + $0xc] sm:$0xf] }
  0x72   : > { %v12817_v51 = vsel %vm12616_vm7, %v10315_v28, %v1362_v2  ;;  %v1364_v43 = vrot.slane %v1362_v2, 4  ;;  %11572 = vmatprep.mubr.msk.bf16.mxu0 %vm712_vm3, %v10323_v21  ;;  %11610 = vmatprep.mubr.msk.bf16.mxu1 %vm712_vm3, %v12156_v8  ;;  %v10330_v61 = vcombine.low %v12797_v35, %v12813_v55  ;;  %v12829_v0 = vsel %vm12616_vm7, %v1357_v13, %v1358_v38  ;;  %v12158_v63 = vld [vmem:[%s12318_s8 + $0x6c] sm:$0xff]   ;;  %v12877_v2 = vld [vmem:[%s12318_s8 + $0x20] sm:$0x1] }
  0x73   : > { %v1372_v58 = vrot.slane %v12569_v41, 5  ;;  %v10317_v3 = vrot.slane %v1233_v39, 9  ;;  %v10331_v27 = vcombine.low %v12803_v59, %v12829_v0  ;;  %v1371_v21 = vrot.slane %v1369_v46, 4 }
  0x74   : > { %v12840_v60 = vsel %vm12616_vm7, %v1364_v43, %v1365_v18  ;;  %v1376_v25 = vrot.slane %v12580_v14, 5  ;;  %v1379_v41 = vrot.slane %v12585_v23, 5  ;;  %v3035_v17 = vsel %vm761_vm0, %v12599_v53, 0  ;;  %v10419_v14 = vld [vmem:[%s12318_s8 + $0x18] sm:$0xf] }
  0x75   : > { %v10332_v34 = vcombine.low %v12817_v51, %v12840_v60  ;;  %v12854_v49 = vsel %vm12616_vm7, %v10316_v12, %v1369_v46  ;;  %11665 = vmatpush3.bf16.msra.mxu1 %v3035_v17  ;;  %v2083_v57 = vshrl.u32 %v10416_v30, 16  ;;  %v2086_v31 = vshll.u32 %v10416_v30, 16 }
  0x76   : > { %v2092_v11 = vshll.u32 %v12834_v15, 16  ;;  %v12861_v23 = vsel %vm12616_vm7, %v1371_v21, %v1372_v58  ;;  %v12865_v53 = vsel %vm12616_vm7, %v10317_v3, %v1376_v25  ;;  %v1378_v1 = vrot.slane %v1376_v25, 4  ;;  %v10497_v58 = vld [vmem:[%s12318_s8 + $0xc] sm:$0xe] }
  0x77   : > { %v2096_v48 = vshrl.u32 %v12834_v15, 16  ;;  %v2085_v52 = vrot.slane %v2083_v57, 4  ;;  %v2088_v8 = vrot.slane %v2086_v31, 5  ;;  %v2102_v38 = vshll.u32 %v12849_v4, 16  ;;  %v12159_v57 = vld [vmem:[%s12318_s8 + $0x78] sm:$0xff]  }
  0x78   : > { %v2094_v26 = vrot.slane %v2092_v11, 5  ;;  %v12874_v28 = vsel %vm12616_vm7, %v1378_v1, %v1379_v41  ;;  %v2107_v39 = vshrl.u32 %v10419_v14, 16  ;;  %v2110_v13 = vshll.u32 %v10419_v14, 16  ;;  %v10422_v1 = vld [vmem:[%s12318_s8 + $0x24] sm:$0xf] }
  0x79   : > { %v2098_v42 = vrot.slane %v2096_v48, 4  ;;  %11573 = vmatmul.mubr.msk.bf16.gmra.mxu0 %vm712_vm3, %v10324_v16  ;;  %11611 = vmatmul.mubr.msk.bf16.gmra.mxu1 %vm712_vm3, %v12157_v56  ;;  %v10334_v18 = vcombine.low %v12865_v53, %v12874_v28  ;;  %v2089_v12 = vor.u32 %v2088_v8, %v2085_v52  ;;  %v2104_v43 = vrot.slane %v2102_v38, 5  ;;  %v12160_v48 = vld [vmem:[%s12318_s8 + $0x84] sm:$0xff]  }
  0x7a   : > { %v2116_v46 = vshll.u32 %v12869_v45, 16  ;;  %11576 = vmatprep.mubr.msk.bf16.mxu0 %vm712_vm3, %v10325_v19  ;;  %11614 = vmatprep.mubr.msk.bf16.mxu1 %vm712_vm3, %v12158_v63  ;;  %v2109_v20 = vrot.slane %v2107_v39, 4  ;;  %v2112_v16 = vrot.slane %v2110_v13, 5  ;;  %v2120_v3 = vshrl.u32 %v12869_v45, 16  ;;  %v12908_v39 = vld [vmem:[%s12318_s8 + $0x28] sm:$0xf] }
  0x7b   : > { %v2099_v54 = vor.u32 %v2098_v42, %v2094_v26  ;;  %v10333_v30 = vcombine.low %v12854_v49, %v12861_v23  ;;  %v2090_v21 = vrot.slane %v2089_v12, 4  ;;  %v2126_v41 = vshll.u32 %v12877_v2, 16  ;;  %v12920_v12 = vld [vmem:[%s12318_s8 + $0x2c] sm:$0x1] }
  0x7c   : > { %v2118_v25 = vrot.slane %v2116_v46, 5  ;;  %v2113_v19 = vor.u32 %v2112_v16, %v2109_v20  ;;  %v2122_v17 = vrot.slane %v2120_v3, 4  ;;  %v10513_v56 = vrot.slane %v10497_v58, 9  ;;  %v10425_v46 = vld [vmem:[%s12318_s8 + $0x30] sm:$0xf] }
  0x7d   : > { %v2100_v33 = vrot.slane %v2099_v54, 4  ;;  %v2095_v31 = vsel %vm12354_vm4, %v2090_v21, %v2094_v26  ;;  %v2128_v11 = vrot.slane %v2126_v41, 5  ;;  %v2826_v14 = vrot.slane %v12834_v15, 5  ;;  %v12958_v41 = vld [vmem:[%s12318_s8 + $0x38] sm:$0x1] }
  0x7e   : > { %v2829_v63 = vrot.slane %v12849_v4, 5  ;;  %v2114_v8 = vrot.slane %v2113_v19, 4  ;;  %v2123_v38 = vor.u32 %v2122_v17, %v2118_v25  ;;  %v10514_v42 = vrot.slane %v10498_v22, 9 }
  0x7f   : > { %v2105_v52 = vsel %vm12354_vm4, %v2100_v33, %v2104_v43  ;;  %v12912_v26 = vsel %vm761_vm0, %v12738_v50, 0  ;;  %v12916_v15 = vsel %vm12616_vm7, %v10513_v56, %v2826_v14  ;;  %v2828_v4 = vrot.slane %v2826_v14, 4  ;;  %v12927_v50 = vld [vmem:[%s12318_s8 + $0x34] sm:$0xf] }
  0x80   : > { %v2833_v13 = vrot.slane %v12869_v45, 5  ;;  %v2119_v43 = vsel %vm12354_vm4, %v2114_v8, %v2118_v25  ;;  %v2124_v58 = vrot.slane %v2123_v38, 4  ;;  %v2836_v54 = vrot.slane %v12877_v2, 5  ;;  %v12943_v2 = vld [vmem:[%s17204_s1 + $0xe] sm:$0x3] }
  0x81   : > { %v2131_v20 = vshrl.u32 %v10422_v1, 16  ;;  %11577 = vmatmul.mubr.msk.bf16.gmra.mxu0 %vm712_vm3, %v10326_v9  ;;  %11615 = vmatmul.mubr.msk.bf16.gmra.mxu1 %vm712_vm3, %v12159_v57  ;;  %v12934_v45 = vcombine.low %v2095_v31, %v2105_v52  ;;  %v12938_v16 = vsel %vm12616_vm7, %v2828_v4, %v2829_v63  ;;  %v2134_v21 = vshll.u32 %v10422_v1, 16  ;;  %v12161_v57 = vld [vmem:[%s12318_s8 + $0x90] sm:$0xff]   ;;  %v10499_v1 = vld [vmem:[%s12318_s8 + $0x24] sm:$0xe] }
  0x82   : > { %v2835_v3 = vrot.slane %v2833_v13, 4  ;;  %11580 = vmatprep.mubr.msk.bf16.mxu0 %vm712_vm3, %v10327_v62  ;;  %11618 = vmatprep.mubr.msk.bf16.mxu1 %vm712_vm3, %v12160_v48  ;;  %v2129_v44 = vsel %vm12354_vm4, %v2124_v58, %v2128_v11  ;;  %v12954_v32 = vsel %vm12616_vm7, %v10514_v42, %v2833_v13  ;;  %v2140_v25 = vshll.u32 %v12908_v39, 16  ;;  %v12162_v48 = vld [vmem:[%s12318_s8 + $0x9c] sm:$0xff]  }
  0x83   : > { %v2133_v9 = vrot.slane %v2131_v20, 4  ;;  %v12960_v5 = vcombine.low %v2119_v43, %v2129_v44  ;;  %v10530_v7 = vcombine.low %v12916_v15, %v12938_v16  ;;  %v2136_v62 = vrot.slane %v2134_v21, 5  ;;  %12113 = vmatprep.subr.msk.bf16.mxu1 %vm761_vm0, %v12943_v2  ;;  %v10428_v44 = vld [vmem:[%s12318_s8 + $0x3c] sm:$0xf]  ;;  %v13120_v15 = vld [vmem:[%s12318_s8 + $0x68] sm:$0x1] }
  0x84   : > { %v2144_v22 = vshrl.u32 %v12908_v39, 16  ;;  %v12969_v33 = vsel %vm12616_vm7, %v2835_v3, %v2836_v54  ;;  %v2142_v19 = vrot.slane %v2140_v25, 5  ;;  %v2150_v17 = vshll.u32 %v12920_v12, 16  ;;  %v10500_v54 = vld [vmem:[%s12318_s8 + $0x30] sm:$0xe] }
  0x85   : > { %v2155_v56 = vshrl.u32 %v10425_v46, 16  ;;  %v2137_v31 = vor.u32 %v2136_v62, %v2133_v9  ;;  %v2158_v14 = vshll.u32 %v10425_v46, 16  ;;  %v2164_v63 = vshll.u32 %v12927_v50, 16 }
  0x86   : > { %v2146_v11 = vrot.slane %v2144_v22, 4  ;;  %v2152_v52 = vrot.slane %v2150_v17, 5  ;;  %v2168_v38 = vshrl.u32 %v12927_v50, 16  ;;  %v2174_v42 = vshll.u32 %v12958_v41, 16  ;;  %v12990_v17 = vld [vmem:[%s12318_s8 + $0x40] sm:$0xf] }
  0x87   : > { %v2157_v8 = vrot.slane %v2155_v56, 4  ;;  %v2138_v4 = vrot.slane %v2137_v31, 4  ;;  %v2160_v43 = vrot.slane %v2158_v14, 5  ;;  %v2166_v58 = vrot.slane %v2164_v63, 5  ;;  %v13012_v31 = vld [vmem:[%s12318_s8 + $0x44] sm:$0x1] }
  0x88   : > { %v2147_v13 = vor.u32 %v2146_v11, %v2142_v19  ;;  %v10531_v46 = vcombine.low %v12954_v32, %v12969_v33  ;;  %v2170_v20 = vrot.slane %v2168_v38, 4  ;;  %v10515_v3 = vrot.slane %v10499_v1, 9  ;;  %v12163_v14 = vld [vmem:[%s12318_s8 + $0xa8] sm:$0xff]   ;;  %v12164_v38 = vld [vmem:[%s12318_s8 + $0xb4] sm:$0xff]   ;;  %v13157_v33 = vld [vmem:[%s12318_s8 + $0x70] sm:$0xf] }
  0x89   : > { %v2840_v21 = vrot.slane %v12908_v39, 5  ;;  %11581 = vmatmul.mubr.msk.bf16.gmra.mxu0 %vm712_vm3, %v10328_v10  ;;  %11619 = vmatmul.mubr.msk.bf16.gmra.mxu1 %vm712_vm3, %v12161_v57  ;;  %v2161_v25 = vor.u32 %v2160_v43, %v2157_v8  ;;  %v2176_v62 = vrot.slane %v2174_v42, 5  ;;  %v2843_v22 = vrot.slane %v12920_v12, 5  ;;  %v13023_v8 = vld [vmem:[%s12318_s8 + $0x4c] sm:$0xf] }
  0x8a   : > { %v2148_v9 = vrot.slane %v2147_v13, 4  ;;  %11584 = vmatprep.mubr.msk.bf16.mxu0 %vm712_vm3, %v10329_v29  ;;  %11622 = vmatprep.mubr.msk.bf16.mxu1 %vm712_vm3, %v12162_v48  ;;  %v2143_v40 = vsel %vm12354_vm4, %v2138_v4, %v2142_v19  ;;  %v2171_v6 = vor.u32 %v2170_v20, %v2166_v58  ;;  %v10516_v47 = vrot.slane %v10500_v54, 9  ;;  %v13030_v43 = vld [vmem:[%s12318_s8 + $0x50] sm:$0x1] }
  0x8b   : > { %v13001_v10 = vsel %vm12616_vm7, %v10515_v3, %v2840_v21  ;;  %v2842_v39 = vrot.slane %v2840_v21, 4  ;;  %v2162_v24 = vrot.slane %v2161_v25, 4  ;;  %v2847_v29 = vrot.slane %v12927_v50, 5  ;;  %v10501_v21 = vld [vmem:[%s12318_s8 + $0x3c] sm:$0xe] }
  0x8c   : > { %v2153_v12 = vsel %vm12354_vm4, %v2148_v9, %v2152_v52  ;;  %v2172_v56 = vrot.slane %v2171_v6, 4  ;;  %v2850_v57 = vrot.slane %v12958_v41, 5  ;;  %v2179_v11 = vshrl.u32 %v10428_v44, 16  ;;  %v10431_v52 = vld [vmem:[%s12318_s8 + $0x48] sm:$0xf] }
  0x8d   : > { %v13008_v19 = vsel %vm12616_vm7, %v2842_v39, %v2843_v22  ;;  %v13015_v63 = vcombine.low %v2143_v40, %v2153_v12  ;;  %v2167_v1 = vsel %vm12354_vm4, %v2162_v24, %v2166_v58  ;;  %v2849_v48 = vrot.slane %v2847_v29, 4  ;;  %v10502_v22 = vld [vmem:[%s12318_s8 + $0x48] sm:$0xe] }
  0x8e   : > { %v10532_v50 = vcombine.low %v13001_v10, %v13008_v19  ;;  %v2177_v41 = vsel %vm12354_vm4, %v2172_v56, %v2176_v62  ;;  %v2181_v42 = vrot.slane %v2179_v11, 4  ;;  %v2182_v4 = vshll.u32 %v10428_v44, 16 }
  0x8f   : > { %v2188_v13 = vshll.u32 %v12990_v17, 16  ;;  %v13032_v54 = vcombine.low %v2167_v1, %v2177_v41  ;;  %v13036_v58 = vsel %vm12616_vm7, %v10516_v47, %v2847_v29  ;;  %v2192_v20 = vshrl.u32 %v12990_v17, 16  ;;  %v10434_v41 = vld [vmem:[%s12318_s8 + $0x54] sm:$0xf] }
  0x90   : > { %v2198_v3 = vshll.u32 %v13012_v31, 16  ;;  %v13043_v9 = vsel %vm12616_vm7, %v2849_v48, %v2850_v57  ;;  %v2184_v44 = vrot.slane %v2182_v4, 5  ;;  %v2203_v62 = vshrl.u32 %v10431_v52, 16 }
  0x91   : > { %v2190_v25 = vrot.slane %v2188_v13, 5  ;;  %11585 = vmatmul.mubr.msk.bf16.gmra.mxu0 %vm712_vm3, %v10330_v61  ;;  %11623 = vmatmul.mubr.msk.bf16.gmra.mxu1 %vm712_vm3, %v12163_v14  ;;  %v2194_v40 = vrot.slane %v2192_v20, 4  ;;  %v2206_v39 = vshll.u32 %v10431_v52, 16  ;;  %v2212_v12 = vshll.u32 %v13023_v8, 16 }
  0x92   : > { %v2200_v6 = vrot.slane %v2198_v3, 5  ;;  %11588 = vmatprep.mubr.msk.bf16.mxu0 %vm712_vm3, %v10331_v27  ;;  %11626 = vmatprep.mubr.msk.bf16.mxu1 %vm712_vm3, %v12164_v38  ;;  %v2185_v24 = vor.u32 %v2184_v44, %v2181_v42  ;;  %v2205_v47 = vrot.slane %v2203_v62, 4  ;;  %v2216_v35 = vshrl.u32 %v13023_v8, 16  ;;  %v12165_v27 = vld [vmem:[%s12318_s8 + $0xc0] sm:$0xff]   ;;  %v13070_v3 = vld [vmem:[%s12318_s8 + $0x58] sm:$0xf] }
  0x93   : > { %v2222_v55 = vshll.u32 %v13030_v43, 16  ;;  %v2195_v61 = vor.u32 %v2194_v40, %v2190_v25  ;;  %v2208_v29 = vrot.slane %v2206_v39, 5  ;;  %v2214_v56 = vrot.slane %v2212_v12, 5 }
  0x94   : > { %v10517_v57 = vrot.slane %v10501_v21, 9  ;;  %v2186_v11 = vrot.slane %v2185_v24, 4  ;;  %v2218_v14 = vrot.slane %v2216_v35, 4  ;;  %v2854_v0 = vrot.slane %v12990_v17, 5  ;;  %v13073_v17 = vld [vmem:[%s12318_s8 + $0x5c] sm:$0x1] }
  0x95   : > { %v2224_v59 = vrot.slane %v2222_v55, 5  ;;  %v2196_v1 = vrot.slane %v2195_v61, 4  ;;  %v2209_v48 = vor.u32 %v2208_v29, %v2205_v47  ;;  %v2857_v52 = vrot.slane %v13012_v31, 5  ;;  %v13109_v35 = vld [vmem:[%s12318_s8 + $0x64] sm:$0xf] }
  0x96   : > { %v10518_v38 = vrot.slane %v10502_v22, 9  ;;  %v2191_v42 = vsel %vm12354_vm4, %v2186_v11, %v2190_v25  ;;  %v2219_v4 = vor.u32 %v2218_v14, %v2214_v56  ;;  %v13067_v13 = vsel %vm12616_vm7, %v10517_v57, %v2854_v0  ;;  %v10437_v22 = vld [vmem:[%s12318_s8 + $0x60] sm:$0xf] }
  0x97   : > { %v2856_v20 = vrot.slane %v2854_v0, 4  ;;  %v2201_v21 = vsel %vm12354_vm4, %v2196_v1, %v2200_v6  ;;  %v2210_v44 = vrot.slane %v2209_v48, 4  ;;  %v2861_v31 = vrot.slane %v13023_v8, 5 }
  0x98   : > { %v2864_v62 = vrot.slane %v13030_v43, 5  ;;  %v10533_v25 = vcombine.low %v13036_v58, %v13043_v9  ;;  %v2220_v40 = vrot.slane %v2219_v4, 4  ;;  %v2227_v12 = vshrl.u32 %v10434_v41, 16  ;;  %v10506_v58 = vld [vmem:[%s12318_s8 + $0x78] sm:$0xe] }
  0x99   : > { %v13084_v39 = vsel %vm12616_vm7, %v2856_v20, %v2857_v52  ;;  %11589 = vmatmul.mubr.msk.bf16.gmra.mxu0 %vm712_vm3, %v10332_v34  ;;  %11627 = vmatmul.mubr.msk.bf16.gmra.mxu1 %vm712_vm3, %v12165_v27  ;;  %v13091_v8 = vcombine.low %v2191_v42, %v2201_v21  ;;  %v2215_v43 = vsel %vm12354_vm4, %v2210_v44, %v2214_v56  ;;  %v2863_v24 = vrot.slane %v2861_v31, 4  ;;  %v10503_v56 = vld [vmem:[%s12318_s8 + $0x54] sm:$0xe]  ;;  %v10504_v52 = vld [vmem:[%s12318_s8 + $0x60] sm:$0xe] }
  0x9a   : > { %v10534_v6 = vcombine.low %v13067_v13, %v13084_v39  ;;  %11592 = vmatprep.mubr.msk.bf16.mxu0 %vm712_vm3, %v10333_v30  ;;  %11666 = vmatprep.mubr.msk.bf16.mxu1 %vm712_vm3, %v10530_v7  ;;  %v2225_v51 = vsel %vm12354_vm4, %v2220_v40, %v2224_v59  ;;  %v2229_v60 = vrot.slane %v2227_v12, 4  ;;  %v2230_v34 = vshll.u32 %v10434_v41, 16  ;;  %v10440_v20 = vld [vmem:[%s12318_s8 + $0x6c] sm:$0xf] }
  0x9b   : > { %v2236_v47 = vshll.u32 %v13070_v3, 16  ;;  %v13111_v55 = vcombine.low %v2215_v43, %v2225_v51  ;;  %v13115_v49 = vsel %vm12616_vm7, %v10518_v38, %v2861_v31  ;;  %v2240_v23 = vshrl.u32 %v13070_v3, 16 }
  0x9c   : > { %v2246_v30 = vshll.u32 %v13073_v17, 16  ;;  %v13124_v16 = vsel %vm12616_vm7, %v2863_v24, %v2864_v62  ;;  %v2232_v7 = vrot.slane %v2230_v34, 5  ;;  %v2251_v29 = vshrl.u32 %v10437_v22, 16 }
  0x9d   : > { %v2238_v61 = vrot.slane %v2236_v47, 5  ;;  %v2242_v57 = vrot.slane %v2240_v23, 4  ;;  %v2254_v14 = vshll.u32 %v10437_v22, 16  ;;  %v2260_v59 = vshll.u32 %v13109_v35, 16 }
  0x9e   : > { %v2248_v11 = vrot.slane %v2246_v30, 5  ;;  %v2233_v0 = vor.u32 %v2232_v7, %v2229_v60  ;;  %v2253_v27 = vrot.slane %v2251_v29, 4  ;;  %v2264_v1 = vshrl.u32 %v13109_v35, 16  ;;  %v10443_v60 = vld [vmem:[%s12318_s8 + $0x78] sm:$0xf] }
  0x9f   : > { %v2270_v48 = vshll.u32 %v13120_v15, 16  ;;  %v2243_v38 = vor.u32 %v2242_v57, %v2238_v61  ;;  %v2256_v41 = vrot.slane %v2254_v14, 5  ;;  %v2262_v42 = vrot.slane %v2260_v59, 5  ;;  %v13178_v30 = vld [vmem:[%s12318_s8 + $0x7c] sm:$0xf] }
  0xa0   : > { %v10519_v4 = vrot.slane %v10503_v56, 9  ;;  %v10535_v21 = vcombine.low %v13115_v49, %v13124_v16  ;;  %v2234_v44 = vrot.slane %v2233_v0, 4  ;;  %v2266_v31 = vrot.slane %v2264_v1, 4  ;;  %v13181_v7 = vld [vmem:[%s12318_s8 + $0x80] sm:$0x1] }
  0xa1   : > { %v2868_v62 = vrot.slane %v13070_v3, 5  ;;  %11593 = vmatmul.mubr.msk.bf16.gmra.mxu0 %vm712_vm3, %v10334_v18  ;;  %11667 = vmatmul.mubr.msk.bf16.vlgmr.msra.gmra.mxu1 %vm712_vm3, %v10531_v46  ;;  %v2244_v22 = vrot.slane %v2243_v38, 4  ;;  %v2257_v40 = vor.u32 %v2256_v41, %v2253_v27  ;;  %v2272_v12 = vrot.slane %v2270_v48, 5  ;;  %v10505_v57 = vld [vmem:[%s12318_s8 + $0x6c] sm:$0xe] }
  0xa2   : > { %v2871_v43 = vrot.slane %v13073_v17, 5  ;;  %11632 = vmatprep.mubr.msk.bf16.mxu0 %vm712_vm3, %v12934_v45  ;;  %11670 = vmatprep.mubr.msk.bf16.mxu1 %vm712_vm3, %v10532_v50  ;;  %v2239_v53 = vsel %vm12354_vm4, %v2234_v44, %v2238_v61  ;;  %v2267_v28 = vor.u32 %v2266_v31, %v2262_v42  ;;  %v10520_v10 = vrot.slane %v10504_v52, 9  ;;  %v13163_v50 = vld [vmem:[%s12318_s8 + $0x74] sm:$0x1] }
  0xa3   : > { %v13154_v18 = vsel %vm12616_vm7, %v10519_v4, %v2868_v62  ;;  %v2870_v32 = vrot.slane %v2868_v62, 4  ;;  %v2249_v45 = vsel %vm12354_vm4, %v2244_v22, %v2248_v11  ;;  %v2258_v46 = vrot.slane %v2257_v40, 4  ;;  %v13190_v11 = vld [vmem:[%s17204_s1 + $0x10] sm:$0x3] }
  0xa4   : > { %v2875_v19 = vrot.slane %v13109_v35, 5  ;;  %v2268_v3 = vrot.slane %v2267_v28, 4  ;;  %v2878_v24 = vrot.slane %v13120_v15, 5  ;;  %v2275_v51 = vshrl.u32 %v10440_v20, 16 }
  0xa5   : > { %v13167_v17 = vsel %vm12616_vm7, %v2870_v32, %v2871_v43  ;;  %v13171_v34 = vcombine.low %v2239_v53, %v2249_v45  ;;  %v2263_v47 = vsel %vm12354_vm4, %v2258_v46, %v2262_v42  ;;  %v2278_v15 = vshll.u32 %v10440_v20, 16  ;;  %v10446_v53 = vld [vmem:[%s12318_s8 + $0x84] sm:$0xf] }
  0xa6   : > { %v10536_v35 = vcombine.low %v13154_v18, %v13167_v17  ;;  %v2877_v23 = vrot.slane %v2875_v19, 4  ;;  %v2273_v61 = vsel %vm12354_vm4, %v2268_v3, %v2272_v12  ;;  %v2277_v29 = vrot.slane %v2275_v51, 4  ;;  %v13234_v3 = vld [vmem:[%s12318_s8 + $0x8c] sm:$0x1]  ;;  %v10451_v17 = vld [vmem:[%s12318_s8 + $0x98] sm:$0x1] }
  0xa7   : > { %v2284_v56 = vshll.u32 %v13157_v33, 16  ;;  %v13192_v14 = vcombine.low %v2263_v47, %v2273_v61  ;;  %v13196_v59 = vsel %vm12616_vm7, %v10520_v10, %v2875_v19  ;;  %v2288_v0 = vshrl.u32 %v13157_v33, 16 }
  0xa8   : > { %v2294_v27 = vshll.u32 %v13163_v50, 16  ;;  %v13202_v1 = vsel %vm12616_vm7, %v2877_v23, %v2878_v24  ;;  %v2280_v48 = vrot.slane %v2278_v15, 5  ;;  %v2299_v38 = vshrl.u32 %v10443_v60, 16 }
  0xa9   : > { %v2286_v52 = vrot.slane %v2284_v56, 5  ;;  %11633 = vmatmul.mubr.msk.bf16.vlgmr.msra.gmra.mxu0 %vm712_vm3, %v12960_v5  ;;  %11671 = vmatmul.mubr.msk.bf16.gmra.mxu1 %vm712_vm3, %v10533_v25  ;;  %v2290_v41 = vrot.slane %v2288_v0, 4  ;;  %v2302_v4 = vshll.u32 %v10443_v60, 16  ;;  %v2308_v20 = vshll.u32 %v13178_v30, 16  ;;  %v10449_v56 = vld [vmem:[%s12318_s8 + $0x90] sm:$0xf] }
  0xaa   : > { %v2296_v42 = vrot.slane %v2294_v27, 5  ;;  %11699 = vmatpush3.bf16.msra.mxu0 %v12912_v26  ;;  %11636 = vmatprep.mubr.msk.bf16.mxu0 %vm712_vm3, %v13015_v63  ;;  %v2281_v44 = vor.u32 %v2280_v48, %v2277_v29  ;;  %v2301_v31 = vrot.slane %v2299_v38, 4  ;;  %v2312_v5 = vshrl.u32 %v13178_v30, 16  ;;  %v10508_v38 = vld [vmem:[%s12318_s8 + $0x90] sm:$0xe] }
  0xab   : > { %v2318_v62 = vshll.u32 %v13181_v7, 16  ;;  %11674 = vmatprep.mubr.msk.bf16.mxu1 %vm712_vm3, %v10534_v6  ;;  %v2291_v9 = vor.u32 %v2290_v41, %v2286_v52  ;;  %v2304_v25 = vrot.slane %v2302_v4, 5  ;;  %v2310_v26 = vrot.slane %v2308_v20, 5  ;;  %12114 = vmatprep.subr.msk.bf16.mxu0 %vm761_vm0, %v13190_v11  ;;  %v13227_v6 = vld [vmem:[%s12318_s8 + $0x88] sm:$0xf] }
  0xac   : > { %v10521_v22 = vrot.slane %v10505_v57, 9  ;;  %v2282_v63 = vrot.slane %v2281_v44, 4  ;;  %v2314_v40 = vrot.slane %v2312_v5, 4  ;;  %v2882_v43 = vrot.slane %v13157_v33, 5  ;;  %v10450_v57 = vld [vmem:[%s12318_s8 + $0x94] sm:$0xf] }
  0xad   : > { %v2320_v12 = vrot.slane %v2318_v62, 5  ;;  %v2292_v28 = vrot.slane %v2291_v9, 4  ;;  %v2305_v32 = vor.u32 %v2304_v25, %v2301_v31  ;;  %v2885_v13 = vrot.slane %v13163_v50, 5 }
  0xae   : > { %v10522_v39 = vrot.slane %v10506_v58, 9  ;;  %v2287_v45 = vsel %vm12354_vm4, %v2282_v63, %v2286_v52  ;;  %v2315_v46 = vor.u32 %v2314_v40, %v2310_v26  ;;  %v2883_v10 = vsel %vm12616_vm7, %v10521_v22, %v2882_v43 }
  0xaf   : > { %v2884_v19 = vrot.slane %v2882_v43, 4  ;;  %v2297_v33 = vsel %vm12354_vm4, %v2292_v28, %v2296_v42  ;;  %v2306_v24 = vrot.slane %v2305_v32, 4  ;;  %v2889_v50 = vrot.slane %v13178_v30, 5 }
  0xb0   : > { %v2892_v51 = vrot.slane %v13181_v7, 5  ;;  %v10537_v60 = vcombine.low %v13196_v59, %v13202_v1  ;;  %v2316_v47 = vrot.slane %v2315_v46, 4  ;;  %v2323_v61 = vshrl.u32 %v10446_v53, 16 }
  0xb1   : > { %v2886_v23 = vsel %vm12616_vm7, %v2884_v19, %v2885_v13  ;;  %11637 = vmatmul.mubr.msk.bf16.gmra.mxu0 %vm712_vm3, %v13032_v54  ;;  %11675 = vmatmul.mubr.msk.bf16.gmra.mxu1 %vm712_vm3, %v10535_v21  ;;  %v13250_v30 = vcombine.low %v2287_v45, %v2297_v33  ;;  %v2311_v7 = vsel %vm12354_vm4, %v2306_v24, %v2310_v26  ;;  %v2891_v15 = vrot.slane %v2889_v50, 4  ;;  %v10452_v13 = vld [vmem:[%s12318_s8 + $0x9c] sm:$0xf] }
  0xb2   : > { %v10538_v29 = vcombine.low %v2883_v10, %v2886_v23  ;;  %11640 = vmatprep.mubr.msk.bf16.mxu0 %vm712_vm3, %v13091_v8  ;;  %11678 = vmatprep.mubr.msk.bf16.mxu1 %vm712_vm3, %v10536_v35  ;;  %v2321_v54 = vsel %vm12354_vm4, %v2316_v47, %v2320_v12  ;;  %v2325_v49 = vrot.slane %v2323_v61, 4  ;;  %v2326_v16 = vshll.u32 %v10446_v53, 16  ;;  %v10507_v35 = vld [vmem:[%s12318_s8 + $0x84] sm:$0xe] }
  0xb3   : > { %v2332_v21 = vshll.u32 %v13227_v6, 16  ;;  %v13265_v59 = vcombine.low %v2311_v7, %v2321_v54  ;;  %v13269_v0 = vsel %vm12616_vm7, %v10522_v39, %v2889_v50  ;;  %v2336_v8 = vshrl.u32 %v13227_v6, 16 }
  0xb4   : > { %v2342_v18 = vshll.u32 %v13234_v3, 16  ;;  %v13277_v27 = vsel %vm12616_vm7, %v2891_v15, %v2892_v51  ;;  %v2328_v1 = vrot.slane %v2326_v16, 5  ;;  %v2347_v52 = vshrl.u32 %v10449_v56, 16  ;;  %v10454_v51 = vld [vmem:[%s12318_s8 + $0xa4] sm:$0x1] }
  0xb5   : > { %v2334_v48 = vrot.slane %v2332_v21, 5  ;;  %v2338_v41 = vrot.slane %v2336_v8, 4  ;;  %v2350_v4 = vshll.u32 %v10449_v56, 16  ;;  %v2356_v20 = vshll.u32 %v10450_v57, 16  ;;  %v10456_v16 = vld [vmem:[%s12318_s8 + $0xac] sm:$0xf] }
  0xb6   : > { %v2344_v42 = vrot.slane %v2342_v18, 5  ;;  %v2329_v44 = vor.u32 %v2328_v1, %v2325_v49  ;;  %v2349_v31 = vrot.slane %v2347_v52, 4  ;;  %v2360_v5 = vshrl.u32 %v10450_v57, 16  ;;  %v13324_v18 = vld [vmem:[%s12318_s8 + $0xb0] sm:$0x1] }
  0xb7   : > { %v2366_v62 = vshll.u32 %v10451_v17, 16  ;;  %v2339_v58 = vor.u32 %v2338_v41, %v2334_v48  ;;  %v2352_v9 = vrot.slane %v2350_v4, 5  ;;  %v13280_v25 = vrot.slane %v2356_v20, 5 }
  0xb8   : > { %v10523_v26 = vrot.slane %v10507_v35, 9  ;;  %v2330_v22 = vrot.slane %v2329_v44, 4  ;;  %v2362_v63 = vrot.slane %v2360_v5, 4  ;;  %v2896_v12 = vrot.slane %v13227_v6, 5  ;;  %v10510_v5 = vld [vmem:[%s12318_s8 + $0xa8] sm:$0xe] }
  0xb9   : > { %v13282_v40 = vrot.slane %v2366_v62, 5  ;;  %11641 = vmatmul.mubr.msk.bf16.gmra.mxu0 %vm712_vm3, %v13111_v55  ;;  %11679 = vmatmul.mubr.msk.bf16.gmra.mxu1 %vm712_vm3, %v10537_v60  ;;  %v2340_v43 = vrot.slane %v2339_v58, 4  ;;  %v2353_v53 = vor.u32 %v2352_v9, %v2349_v31  ;;  %v2899_v28 = vrot.slane %v13234_v3, 5 }
  0xba   : > { %v10524_v32 = vrot.slane %v10508_v38, 9  ;;  %11644 = vmatprep.mubr.msk.bf16.mxu0 %vm712_vm3, %v13171_v34  ;;  %11682 = vmatprep.mubr.msk.bf16.mxu1 %vm712_vm3, %v10538_v29  ;;  %v2335_v39 = vsel %vm12354_vm4, %v2330_v22, %v2334_v48  ;;  %v2363_v55 = vor.u32 %v2362_v63, %v13280_v25  ;;  %v2897_v6 = vsel %vm12616_vm7, %v10523_v26, %v2896_v12  ;;  %v10453_v34 = vld [vmem:[%s12318_s8 + $0xa0] sm:$0xf]  ;;  %v10455_v29 = vld [vmem:[%s12318_s8 + $0xa8] sm:$0xf] }
  0xbb   : > { %v2898_v45 = vrot.slane %v2896_v12, 4  ;;  %v2345_v46 = vsel %vm12354_vm4, %v2340_v43, %v2344_v42  ;;  %v13300_v10 = vrot.slane %v2353_v53, 4  ;;  %v2903_v19 = vrot.slane %v10450_v57, 5  ;;  %v10509_v48 = vld [vmem:[%s12318_s8 + $0x9c] sm:$0xe] }
  0xbc   : > { %v2906_v3 = vrot.slane %v10451_v17, 5  ;;  %v10539_v33 = vcombine.low %v13269_v0, %v13277_v27  ;;  %v2364_v24 = vrot.slane %v2363_v55, 4  ;;  %v2371_v60 = vshrl.u32 %v10452_v13, 16  ;;  %v10458_v53 = vld [vmem:[%s12318_s8 + $0xb4] sm:$0xf] }
  0xbd   : > { %v2900_v50 = vsel %vm12616_vm7, %v2898_v45, %v2899_v28  ;;  %v13308_v47 = vcombine.low %v2335_v39, %v2345_v46  ;;  %v2359_v23 = vsel %vm12354_vm4, %v13300_v10, %v13280_v25  ;;  %v2904_v61 = vsel %vm12616_vm7, %v10524_v32, %v2903_v19  ;;  %v10459_v10 = vld [vmem:[%s12318_s8 + $0xb8] sm:$0xf] }
  0xbe   : > { %v2905_v7 = vrot.slane %v2903_v19, 4  ;;  %v10540_v15 = vcombine.low %v2897_v6, %v2900_v50  ;;  %v2373_v56 = vrot.slane %v2371_v60, 4  ;;  %v2374_v54 = vshll.u32 %v10452_v13, 16 }
  0xbf   : > { %v2380_v49 = vshll.u32 %v10453_v34, 16  ;;  %v2369_v21 = vsel %vm12354_vm4, %v2364_v24, %v13282_v40  ;;  %v2384_v0 = vshrl.u32 %v10453_v34, 16  ;;  %v2390_v8 = vshll.u32 %v10454_v51, 16 }
  0xc0   : > { %v2907_v57 = vsel %vm12616_vm7, %v2905_v7, %v2906_v3  ;;  %v2376_v35 = vrot.slane %v2374_v54, 5  ;;  %v2395_v1 = vshrl.u32 %v10455_v29, 16  ;;  %v2398_v41 = vshll.u32 %v10455_v29, 16 }
  0xc1   : > { %v10541_v17 = vcombine.low %v2904_v61, %v2907_v57  ;;  %v2382_v27 = vrot.slane %v2380_v49, 5  ;;  %11645 = vmatmul.mubr.msk.bf16.gmra.mxu0 %vm712_vm3, %v13192_v14  ;;  %11683 = vmatmul.mubr.msk.bf16.gmra.mxu1 %vm712_vm3, %v10539_v33  ;;  %v2386_v52 = vrot.slane %v2384_v0, 4  ;;  %v2392_v38 = vrot.slane %v2390_v8, 5  ;;  %v10460_v33 = vld [vmem:[%s12318_s8 + $0xbc] sm:$0x1] }
  0xc2   : > { %v2404_v42 = vshll.u32 %v10456_v16, 16  ;;  %11648 = vmatprep.mubr.msk.bf16.mxu0 %vm712_vm3, %v13250_v30  ;;  %11686 = vmatprep.mubr.msk.bf16.mxu1 %vm712_vm3, %v10540_v15  ;;  %v2377_v4 = vor.u32 %v2376_v35, %v2373_v56  ;;  %v2397_v20 = vrot.slane %v2395_v1, 4  ;;  %v2408_v44 = vshrl.u32 %v10456_v16, 16  ;;  %v10461_v61 = vld [vmem:[%s12318_s8 + $0xc0] sm:$0xf] }
  0xc3   : > { %v2414_v31 = vshll.u32 %v13324_v18, 16  ;;  %v2387_v62 = vor.u32 %v2386_v52, %v2382_v27  ;;  %v2400_v14 = vrot.slane %v2398_v41, 5  ;;  %v10525_v9 = vrot.slane %v10509_v48, 9  ;;  %v10462_v56 = vld [vmem:[%s12318_s8 + $0xc4] sm:$0xf] }
  0xc4   : > { %v13335_v58 = vrot.slane %v2404_v42, 5  ;;  %v2378_v25 = vrot.slane %v2377_v4, 4  ;;  %v2410_v26 = vrot.slane %v2408_v44, 4  ;;  %v2910_v30 = vrot.slane %v10453_v34, 5  ;;  %v10512_v4 = vld [vmem:[%s12318_s8 + $0xc0] sm:$0xe] }
  0xc5   : > { %v13337_v22 = vrot.slane %v2414_v31, 5  ;;  %v2388_v63 = vrot.slane %v2387_v62, 4  ;;  %v2401_v40 = vor.u32 %v2400_v14, %v2397_v20  ;;  %v2913_v12 = vrot.slane %v10454_v51, 5 }
  0xc6   : > { %v10526_v43 = vrot.slane %v10510_v5, 9  ;;  %v2383_v28 = vsel %vm12354_vm4, %v2378_v25, %v2382_v27  ;;  %v2411_v32 = vor.u32 %v2410_v26, %v13335_v58  ;;  %v2911_v13 = vsel %vm12616_vm7, %v10525_v9, %v2910_v30 }
  0xc7   : > { %v2912_v39 = vrot.slane %v2910_v30, 4  ;;  %v2393_v55 = vsel %vm12354_vm4, %v2388_v63, %v2392_v38  ;;  %v13347_v6 = vrot.slane %v2401_v40, 4  ;;  %v2917_v45 = vrot.slane %v10456_v16, 5 }
  0xc8   : > { %v2920_v46 = vrot.slane %v13324_v18, 5  ;;  %v10476_v19 = vcombine.low %v2359_v23, %v2369_v21  ;;  %v13351_v3 = vrot.slane %v2411_v32, 4  ;;  %v2419_v24 = vshrl.u32 %v10458_v53, 16  ;;  %v10463_v21 = vld [vmem:[%s12318_s8 + $0xc8] sm:$0x1] }
  0xc9   : > { %v2914_v34 = vsel %vm12616_vm7, %v2912_v39, %v2913_v12  ;;  %11649 = vmatmul.mubr.msk.bf16.gmra.mxu0 %vm712_vm3, %v13265_v59  ;;  %11687 = vmatmul.mubr.msk.bf16.gmra.mxu1 %vm712_vm3, %v10541_v17  ;;  %v10477_v50 = vcombine.low %v2383_v28, %v2393_v55  ;;  %v2918_v60 = vsel %vm12616_vm7, %v10526_v43, %v2917_v45  ;;  %v2919_v23 = vrot.slane %v2917_v45, 4  ;;  %v10511_v17 = vld [vmem:[%s12318_s8 + $0xb4] sm:$0xe]  ;;  %v10627_v39 = vld [vmem:[%s12318_s8 + $0x18] sm:$0xf] }
  0xca   : > { %v10542_v51 = vcombine.low %v2911_v13, %v2914_v34  ;;  %11652 = vmatprep.mubr.msk.bf16.mxu0 %vm712_vm3, %v13308_v47  ;;  %v2407_v7 = vsel %vm12354_vm4, %v13347_v6, %v13335_v58  ;;  %v2421_v59 = vrot.slane %v2419_v24, 4  ;;  %v2422_v29 = vshll.u32 %v10458_v53, 16 }
  0xcb   : > { %v2428_v15 = vshll.u32 %v10459_v10, 16  ;;  %v2417_v54 = vsel %vm12354_vm4, %v13351_v3, %v13337_v22  ;;  %v2921_v47 = vsel %vm12616_vm7, %v2919_v23, %v2920_v46  ;;  %v2432_v49 = vshrl.u32 %v10459_v10, 16  ;;  %v13399_v46 = vld [vmem:[%s12318_s8 + $0x1c] sm:$0xf] }
  0xcc   : > { %11690 = vmatprep.mubr.msk.bf16.mxu1 %vm712_vm3, %v10542_v51  ;;  %v2438_v16 = vshll.u32 %v10460_v33, 16  ;;  %v10543_v57 = vcombine.low %v2918_v60, %v2921_v47  ;;  %v2424_v0 = vrot.slane %v2422_v29, 5  ;;  %v2443_v18 = vshrl.u32 %v10461_v61, 16  ;;  %v10630_v60 = vld [vmem:[%s12318_s8 + $0x24] sm:$0xf] }
  0xcd   : > { %v2430_v8 = vrot.slane %v2428_v15, 5  ;;  %v2434_v35 = vrot.slane %v2432_v49, 4  ;;  %v2446_v1 = vshll.u32 %v10461_v61, 16  ;;  %v2452_v48 = vshll.u32 %v10462_v56, 16  ;;  %v13419_v29 = vld [vmem:[%s12318_s8 + $0x28] sm:$0xf] }
  0xce   : > { %v2440_v27 = vrot.slane %v2438_v16, 5  ;;  %v2425_v52 = vor.u32 %v2424_v0, %v2421_v59  ;;  %v2445_v38 = vrot.slane %v2443_v18, 4  ;;  %v2456_v41 = vshrl.u32 %v10462_v56, 16  ;;  %v13423_v49 = vld [vmem:[%s12318_s8 + $0x2c] sm:$0x1] }
  0xcf   : > { %v2462_v42 = vshll.u32 %v10463_v21, 16  ;;  %v2435_v20 = vor.u32 %v2434_v35, %v2430_v8  ;;  %v2448_v44 = vrot.slane %v2446_v1, 5  ;;  %v13379_v31 = vrot.slane %v2452_v48, 5 }
  0xd0   : > { %v10527_v5 = vrot.slane %v10511_v17, 9  ;;  %v2426_v62 = vrot.slane %v2425_v52, 4  ;;  %v2458_v14 = vrot.slane %v2456_v41, 4  ;;  %v2924_v9 = vrot.slane %v10459_v10, 5  ;;  %v10633_v41 = vld [vmem:[%s12318_s8 + $0x30] sm:$0xf] }
  0xd1   : > { %v13381_v58 = vrot.slane %v2462_v42, 5  ;;  %11653 = vmatmul.mubr.msk.bf16.gmra.mxu0 %vm712_vm3, %v10476_v19  ;;  %11691 = vmatmul.mubr.msk.bf16.gmra.mxu1 %vm712_vm3, %v10543_v57  ;;  %v2436_v25 = vrot.slane %v2435_v20, 4  ;;  %v2449_v26 = vor.u32 %v2448_v44, %v2445_v38  ;;  %v2927_v22 = vrot.slane %v10460_v33, 5  ;;  %v13404_v33 = vld [vmem:[%s12318_s8 + $0x20] sm:$0x1] }
  0xd2   : > { %v10528_v30 = vrot.slane %v10512_v4, 9  ;;  %11656 = vmatprep.mubr.msk.bf16.mxu0 %vm712_vm3, %v10477_v50  ;;  %v2431_v63 = vsel %vm12354_vm4, %v2426_v62, %v2430_v8  ;;  %v2459_v40 = vor.u32 %v2458_v14, %v13379_v31  ;;  %v2925_v12 = vsel %vm12616_vm7, %v10527_v5, %v2924_v9  ;;  %v13433_v44 = vld [vmem:[%s12318_s8 + $0x34] sm:$0xf] }
  0xd3   : > { %v2926_v43 = vrot.slane %v2924_v9, 4  ;;  %v2441_v53 = vsel %vm12354_vm4, %v2436_v25, %v2440_v27  ;;  %v2450_v28 = vrot.slane %v2449_v26, 4  ;;  %v2931_v32 = vrot.slane %v10462_v56, 5  ;;  %v12166_v9 = vld [vmem:[%s12318_s8 + $0x18] sm:$0xff]  }
  0xd4   : > { %v2934_v13 = vrot.slane %v10463_v21, 5  ;;  %v2460_v55 = vrot.slane %v2459_v40, 4  ;;  %v4120_v45 = vsel %vm761_vm0, %v12943_v2, 0  ;;  %v10478_v10 = vcombine.low %v2407_v7, %v2417_v54 }
  0xd5   : > { %v2928_v6 = vsel %vm12616_vm7, %v2926_v43, %v2927_v22  ;;  %v2932_v3 = vsel %vm12616_vm7, %v10528_v30, %v2931_v32  ;;  %v2933_v34 = vrot.slane %v2931_v32, 4  ;;  %11733 = vmatpush3.bf16.msra.mxu1 %v4120_v45  ;;  %v10479_v24 = vcombine.low %v2431_v63, %v2441_v53  ;;  %v13439_v22 = vld [vmem:[%s12318_s8 + $0x38] sm:$0x1]  ;;  %v10636_v32 = vld [vmem:[%s12318_s8 + $0x3c] sm:$0xf] }
  0xd6   : > { %v10544_v19 = vcombine.low %v2925_v12, %v2928_v6  ;;  %v2455_v50 = vsel %vm12354_vm4, %v2450_v28, %v13379_v31  ;;  %v3638_v51 = vshrl.u32 %v10627_v39, 16  ;;  %v3641_v2 = vshll.u32 %v10627_v39, 16 }
  0xd7   : > { %v2465_v23 = vsel %vm12354_vm4, %v2460_v55, %v13381_v58  ;;  %v2935_v61 = vsel %vm12616_vm7, %v2933_v34, %v2934_v13  ;;  %v3647_v7 = vshll.u32 %v13399_v46, 16  ;;  %v3651_v59 = vshrl.u32 %v13399_v46, 16 }
  0xd8   : > { %11694 = vmatprep.mubr.msk.bf16.mxu1 %vm712_vm3, %v10544_v19  ;;  %v10545_v15 = vcombine.low %v2932_v3, %v2935_v61  ;;  %v3640_v56 = vrot.slane %v3638_v51, 4  ;;  %v3643_v54 = vrot.slane %v3641_v2, 5  ;;  %v3657_v47 = vshll.u32 %v13404_v33, 16 }
  0xd9   : > { %11657 = vmatmul.mubr.msk.bf16.gmra.mxu0 %vm712_vm3, %v10478_v10  ;;  %v3649_v16 = vrot.slane %v3647_v7, 5  ;;  %v3653_v21 = vrot.slane %v3651_v59, 4  ;;  %v3662_v57 = vshrl.u32 %v10630_v60, 16  ;;  %v3665_v0 = vshll.u32 %v10630_v60, 16 }
  0xda   : > { %11660 = vmatprep.mubr.msk.bf16.mxu0 %vm712_vm3, %v10479_v24  ;;  %11695 = vmatmul.mubr.msk.bf16.gmra.mxu1 %vm712_vm3, %v10545_v15  ;;  %v3644_v8 = vor.u32 %v3643_v54, %v3640_v56  ;;  %v3659_v18 = vrot.slane %v3657_v47, 5  ;;  %v3671_v17 = vshll.u32 %v13419_v29, 16  ;;  %v3675_v35 = vshrl.u32 %v13419_v29, 16 }
  0xdb   : > { %v11532_v27 = vpop.f32.mrf.mxu1  ;;  %v3654_v1 = vor.u32 %v3653_v21, %v3649_v16  ;;  %v3664_v48 = vrot.slane %v3662_v57, 4  ;;  %v3667_v52 = vrot.slane %v3665_v0, 5  ;;  %v3681_v38 = vshll.u32 %v13423_v49, 16 }
  0xdc   : > { %v3645_v42 = vrot.slane %v3644_v8, 4  ;;  %v3673_v4 = vrot.slane %v3671_v17, 5  ;;  %v3677_v20 = vrot.slane %v3675_v35, 4  ;;  %v10480_v31 = vcombine.low %v2455_v50, %v2465_v23  ;;  %v13451_v50 = vld [vmem:[%s12318_s8 + $0x40] sm:$0xf] }
  0xdd   : > { %v3655_v5 = vrot.slane %v3654_v1, 4  ;;  %v1091_v62 = vpop.f32.mrf.mxu1  ;;  %v3668_v14 = vor.u32 %v3667_v52, %v3664_v48  ;;  %v3683_v58 = vrot.slane %v3681_v38, 5  ;;  %v3686_v30 = vshrl.u32 %v10633_v41, 16  ;;  %v13460_v23 = vld [vmem:[%s12318_s8 + $0x44] sm:$0x1] }
  0xde   : > { %v3650_v25 = vsel %vm12354_vm4, %v3645_v42, %v3649_v16  ;;  %v3678_v26 = vor.u32 %v3677_v20, %v3673_v4  ;;  %v3689_v63 = vshll.u32 %v10633_v41, 16  ;;  %v3695_v53 = vshll.u32 %v13433_v44, 16  ;;  %v12167_v16 = vld [vmem:[%s12318_s8 + $0x24] sm:$0xff]   ;;  %v12168_v42 = vld [vmem:[%s12318_s8 + $0x30] sm:$0xff]  }
  0xdf   : > { %v3660_v40 = vsel %vm12354_vm4, %v3655_v5, %v3659_v18  ;;  %v3669_v12 = vrot.slane %v3668_v14, 4  ;;  %v11533_v43 = vpop.f32.mrf.mxu1  ;;  %v3699_v28 = vshrl.u32 %v13433_v44, 16  ;;  %v3688_v55 = vrot.slane %v3686_v30, 4  ;;  %v10639_v52 = vld [vmem:[%s12318_s8 + $0x48] sm:$0xf] }
  0xe0   : > { %v10676_v13 = vcombine.low %v3650_v25, %v3660_v40  ;;  %v3679_v39 = vrot.slane %v3678_v26, 4  ;;  %v3691_v6 = vrot.slane %v3689_v63, 5  ;;  %v3697_v3 = vrot.slane %v3695_v53, 5  ;;  %v13483_v26 = vld [vmem:[%s12318_s8 + $0x50] sm:$0x1] }
  0xe1   : > { %11661 = vmatmul.mubr.msk.bf16.gmra.mxu0 %vm712_vm3, %v10480_v31  ;;  %v11498_v45 = vpop.f32.mrf.mxu0  ;;  %v3674_v10 = vsel %vm12354_vm4, %v3669_v12, %v3673_v4  ;;  %v1094_v19 = vpop.f32.mrf.mxu1  ;;  %v3701_v34 = vrot.slane %v3699_v28, 4  ;;  %v3705_v24 = vshll.u32 %v13439_v22, 16  ;;  %v3710_v61 = vshrl.u32 %v10636_v32, 16  ;;  %v13478_v31 = vld [vmem:[%s12318_s8 + $0x4c] sm:$0xf] }
  0xe2   : > { %11700 = vmatprep.mubr.msk.bf16.mxu0 %vm712_vm3, %v12166_v9  ;;  %v13454_v51 = vadd.f32 %v11532_v27, %v11498_v45  ;;  %11734 = vmatprep.mubr.msk.bf16.mxu1 %vm712_vm3, %v10676_v13  ;;  %v3684_v2 = vsel %vm12354_vm4, %v3679_v39, %v3683_v58  ;;  %v3692_v60 = vor.u32 %v3691_v6, %v3688_v55  ;;  %v3713_v47 = vshll.u32 %v10636_v32, 16  ;;  %v13494_v45 = vld [vmem:[%s12318_s8 + $0x58] sm:$0xf] }
  0xe3   : > { %v799_v7 = vpop.f32.mrf.mxu0  ;;  %v10677_v59 = vcombine.low %v3674_v10, %v3684_v2  ;;  %v11536_v15 = vpop.f32.mrf.mxu1  ;;  %v3702_v56 = vor.u32 %v3701_v34, %v3697_v3  ;;  %v3707_v54 = vrot.slane %v3705_v24, 5  ;;  %v3712_v0 = vrot.slane %v3710_v61, 4 }
  0xe4   : > { %v13463_v21 = vadd.f32 %v1091_v62, %v799_v7  ;;  %v3693_v57 = vrot.slane %v3692_v60, 4  ;;  %v3719_v8 = vshll.u32 %v13451_v50, 16  ;;  %v3715_v27 = vrot.slane %v3713_v47, 5 }
  0xe5   : > { %11735 = vmatmul.mubr.msk.bf16.vlgmr.msra.gmra.mxu1 %vm712_vm3, %v10677_v59  ;;  %v11499_v18 = vpop.f32.mrf.mxu0  ;;  %v3703_v17 = vrot.slane %v3702_v56, 4  ;;  %v1107_v35 = vpop.f32.mrf.mxu1  ;;  %v3723_v1 = vshrl.u32 %v13451_v50, 16  ;;  %v3729_v48 = vshll.u32 %v13460_v23, 16  ;;  %v4590_v38 = vsel %vm761_vm0, %v13190_v11, 0  ;;  %v10642_v11 = vld [vmem:[%s12318_s8 + $0x54] sm:$0xf] }
  0xe6   : > { %v13472_v41 = vadd.f32 %v11533_v43, %v11499_v18  ;;  %v3698_v4 = vsel %vm12354_vm4, %v3693_v57, %v3697_v3  ;;  %v3721_v20 = vrot.slane %v3719_v8, 5  ;;  %v3716_v14 = vor.u32 %v3715_v27, %v3712_v0  ;;  %v13502_v59 = vld [vmem:[%s12318_s8 + $0x5c] sm:$0x1]  ;;  %v12170_v27 = vld [vmem:[%s12318_s8 + $0x48] sm:$0xff]  }
  0xe7   : > { %v802_v5 = vpop.f32.mrf.mxu0  ;;  %v3708_v62 = vsel %vm12354_vm4, %v3703_v17, %v3707_v54  ;;  %v3725_v58 = vrot.slane %v3723_v1, 4  ;;  %v3731_v9 = vrot.slane %v3729_v48, 5  ;;  %v11537_v25 = vpop.f32.mrf.mxu1  ;;  %v3734_v40 = vshrl.u32 %v10639_v52, 16  ;;  %v12169_v54 = vld [vmem:[%s12318_s8 + $0x3c] sm:$0xff]  }
  0xe8   : > { %v13486_v30 = vadd.f32 %v1094_v19, %v802_v5  ;;  %v10678_v63 = vcombine.low %v3698_v4, %v3708_v62  ;;  %v3737_v12 = vshll.u32 %v10639_v52, 16  ;;  %v3717_v43 = vrot.slane %v3716_v14, 4  ;;  %v10645_v52 = vld [vmem:[%s12318_s8 + $0x60] sm:$0xf] }
  0xe9   : > { %11701 = vmatmul.mubr.msk.bf16.vlgmr.msra.gmra.mxu0 %vm712_vm3, %v12167_v16  ;;  %v3726_v53 = vor.u32 %v3725_v58, %v3721_v20  ;;  %v1110_v28 = vpop.f32.mrf.mxu1  ;;  %v3743_v32 = vshll.u32 %v13478_v31, 16  ;;  %v3747_v13 = vshrl.u32 %v13478_v31, 16  ;;  %v3736_v39 = vrot.slane %v3734_v40, 4 }
  0xea   : > { %11767 = vmatpush3.bf16.msra.mxu0 %v4590_v38  ;;  %11704 = vmatprep.mubr.msk.bf16.mxu0 %vm712_vm3, %v12168_v42  ;;  %v3739_v55 = vrot.slane %v3737_v12, 5  ;;  %v3753_v6 = vshll.u32 %v13483_v26, 16  ;;  %v3758_v10 = vshrl.u32 %v10642_v11, 16  ;;  %v3722_v3 = vsel %vm12354_vm4, %v3717_v43, %v3721_v20 }
  0xeb   : > { %v11502_v19 = vpop.f32.mrf.mxu0  ;;  %11738 = vmatprep.mubr.msk.bf16.mxu1 %vm712_vm3, %v10678_v63  ;;  %v3727_v34 = vrot.slane %v3726_v53, 4  ;;  %v3745_v24 = vrot.slane %v3743_v32, 5  ;;  %v3749_v2 = vrot.slane %v3747_v13, 4  ;;  %v3761_v8 = vshll.u32 %v10642_v11, 16  ;;  %v13526_v53 = vld [vmem:[%s12318_s8 + $0x68] sm:$0x1] }
  0xec   : > { %v13499_v60 = vadd.f32 %v11536_v15, %v11502_v19  ;;  %v3740_v61 = vor.u32 %v3739_v55, %v3736_v39  ;;  %v3755_v7 = vrot.slane %v3753_v6, 5  ;;  %v3760_v56 = vrot.slane %v3758_v10, 4  ;;  %v10648_v6 = vld [vmem:[%s12318_s8 + $0x6c] sm:$0xf] }
  0xed   : > { %v815_v47 = vpop.f32.mrf.mxu0  ;;  %v3732_v16 = vsel %vm12354_vm4, %v3727_v34, %v3731_v9  ;;  %v11540_v57 = vpop.f32.mrf.mxu1  ;;  %v3750_v0 = vor.u32 %v3749_v2, %v3745_v24  ;;  %v3767_v18 = vshll.u32 %v13494_v45, 16  ;;  %v3771_v48 = vshrl.u32 %v13494_v45, 16  ;;  %v13520_v9 = vld [vmem:[%s12318_s8 + $0x64] sm:$0xf] }
  0xee   : > { %v13508_v17 = vadd.f32 %v1107_v35, %v815_v47  ;;  %v10679_v15 = vcombine.low %v3722_v3, %v3732_v16  ;;  %v3741_v1 = vrot.slane %v3740_v61, 4  ;;  %v3763_v20 = vrot.slane %v3761_v8, 5 }
  0xef   : > { %v11503_v38 = vpop.f32.mrf.mxu0  ;;  %v3751_v42 = vrot.slane %v3750_v0, 4  ;;  %v1123_v4 = vpop.f32.mrf.mxu1  ;;  %v3769_v5 = vrot.slane %v3767_v18, 5  ;;  %v3777_v62 = vshll.u32 %v13502_v59, 16  ;;  %v3773_v58 = vrot.slane %v3771_v48, 4  ;;  %v12172_v48 = vld [vmem:[%s12318_s8 + $0x60] sm:$0xff]  }
  0xf0   : > { %11739 = vmatmul.mubr.msk.bf16.gmra.mxu1 %vm712_vm3, %v10679_v15  ;;  %v13515_v14 = vadd.f32 %v11537_v25, %v11503_v38  ;;  %v3746_v35 = vsel %vm12354_vm4, %v3741_v1, %v3745_v24  ;;  %v3764_v40 = vor.u32 %v3763_v20, %v3760_v56  ;;  %v3782_v25 = vshrl.u32 %v10645_v52, 16  ;;  %v13542_v15 = vld [vmem:[%s12318_s8 + $0x70] sm:$0xf] }
  0xf1   : > { %11705 = vmatmul.mubr.msk.bf16.gmra.mxu0 %vm712_vm3, %v12169_v54  ;;  %v818_v11 = vpop.f32.mrf.mxu0  ;;  %v3756_v63 = vsel %vm12354_vm4, %v3751_v42, %v3755_v7  ;;  %v3779_v12 = vrot.slane %v3777_v62, 5  ;;  %v11541_v43 = vpop.f32.mrf.mxu1  ;;  %v3774_v39 = vor.u32 %v3773_v58, %v3769_v5  ;;  %v3785_v55 = vshll.u32 %v10645_v52, 16  ;;  %v12171_v54 = vld [vmem:[%s12318_s8 + $0x54] sm:$0xff]  }
  0xf2   : > { %v13528_v32 = vadd.f32 %v1110_v28, %v818_v11  ;;  %11708 = vmatprep.mubr.msk.bf16.mxu0 %vm712_vm3, %v12170_v27  ;;  %v10680_v13 = vcombine.low %v3746_v35, %v3756_v63  ;;  %v3765_v19 = vrot.slane %v3764_v40, 4  ;;  %v3784_v34 = vrot.slane %v3782_v25, 4  ;;  %v13550_v42 = vld [vmem:[%s12318_s8 + $0x74] sm:$0x1]  ;;  %v10651_v25 = vld [vmem:[%s12318_s8 + $0x78] sm:$0xf] }
  0xf3   : > { %v11506_v10 = vpop.f32.mrf.mxu0  ;;  %v1126_v3 = vpop.f32.mrf.mxu1  ;;  %v3791_v24 = vshll.u32 %v13520_v9, 16  ;;  %v3795_v2 = vshrl.u32 %v13520_v9, 16  ;;  %v3775_v28 = vrot.slane %v3774_v39, 4  ;;  %v3787_v7 = vrot.slane %v3785_v55, 5 }
  0xf4   : > { %v13534_v61 = vadd.f32 %v11540_v57, %v11506_v10  ;;  %11742 = vmatprep.mubr.msk.bf16.mxu1 %vm712_vm3, %v10680_v13  ;;  %v3801_v56 = vshll.u32 %v13526_v53, 16  ;;  %v3770_v16 = vsel %vm12354_vm4, %v3765_v19, %v3769_v5  ;;  %v3806_v27 = vshrl.u32 %v10648_v6, 16 }
  0xf5   : > { %v831_v47 = vpop.f32.mrf.mxu0  ;;  %v11544_v0 = vpop.f32.mrf.mxu1  ;;  %v3793_v8 = vrot.slane %v3791_v24, 5  ;;  %v3797_v18 = vrot.slane %v3795_v2, 4  ;;  %v3780_v1 = vsel %vm12354_vm4, %v3775_v28, %v3779_v12  ;;  %v3788_v52 = vor.u32 %v3787_v7, %v3784_v34  ;;  %v13569_v28 = vld [vmem:[%s12318_s8 + $0x80] sm:$0x1] }
  0xf6   : > { %v13544_v57 = vadd.f32 %v1123_v4, %v831_v47  ;;  %v3803_v38 = vrot.slane %v3801_v56, 5  ;;  %v10681_v20 = vcombine.low %v3770_v16, %v3780_v1  ;;  %v3808_v58 = vrot.slane %v3806_v27, 4 }
  0xf7   : > { %v11507_v62 = vpop.f32.mrf.mxu0  ;;  %v3798_v5 = vor.u32 %v3797_v18, %v3793_v8  ;;  %v1139_v35 = vpop.f32.mrf.mxu1  ;;  %v3809_v11 = vshll.u32 %v10648_v6, 16  ;;  %v3789_v4 = vrot.slane %v3788_v52, 4  ;;  %v3815_v40 = vshll.u32 %v13542_v15, 16  ;;  %v13561_v6 = vld [vmem:[%s12318_s8 + $0x7c] sm:$0xf]  ;;  %v12173_v52 = vld [vmem:[%s12318_s8 + $0x6c] sm:$0xff]  }
  0xf8   : > { %v13552_v63 = vadd.f32 %v11541_v43, %v11507_v62  ;;  %v3819_v12 = vshrl.u32 %v13542_v15, 16  ;;  %11743 = vmatmul.mubr.msk.bf16.gmra.mxu1 %vm712_vm3, %v10681_v20  ;;  %v3825_v10 = vshll.u32 %v13550_v42, 16  ;;  %v3830_v16 = vshrl.u32 %v10651_v25, 16 }
  0xf9   : > { %11709 = vmatmul.mubr.msk.bf16.gmra.mxu0 %vm712_vm3, %v12171_v54  ;;  %v834_v13 = vpop.f32.mrf.mxu0  ;;  %v3799_v39 = vrot.slane %v3798_v5, 4  ;;  %v3811_v55 = vrot.slane %v3809_v11, 5  ;;  %v11545_v19 = vpop.f32.mrf.mxu1  ;;  %v3794_v34 = vsel %vm12354_vm4, %v3789_v4, %v3793_v8  ;;  %v3817_v24 = vrot.slane %v3815_v40, 5  ;;  %v12174_v4 = vld [vmem:[%s12318_s8 + $0x78] sm:$0xff]  }
  0xfa   : > { %v13563_v43 = vadd.f32 %v1126_v3, %v834_v13  ;;  %11712 = vmatprep.mubr.msk.bf16.mxu0 %vm712_vm3, %v12172_v48  ;;  %v3821_v2 = vrot.slane %v3819_v12, 4  ;;  %v3827_v54 = vrot.slane %v3825_v10, 5  ;;  %v3833_v27 = vshll.u32 %v10651_v25, 16  ;;  %v10654_v48 = vld [vmem:[%s12318_s8 + $0x84] sm:$0xf] }
  0xfb   : > { %v3804_v7 = vsel %vm12354_vm4, %v3799_v39, %v3803_v38  ;;  %v3812_v56 = vor.u32 %v3811_v55, %v3808_v58  ;;  %v1142_v47 = vpop.f32.mrf.mxu1  ;;  %v3839_v1 = vshll.u32 %v13561_v6, 16  ;;  %v3832_v62 = vrot.slane %v3830_v16, 4  ;;  %v13583_v25 = vld [vmem:[%s12318_s8 + $0x88] sm:$0xf]  ;;  %v13592_v16 = vld [vmem:[%s12318_s8 + $0x8c] sm:$0x1] }
  0xfc   : > { %17241 = vst [vmem:[#allocation5_spill] sm:$0xff] %v13563_v43  ;;  %v10682_v3 = vcombine.low %v3794_v34, %v3804_v7  ;;  %v3822_v18 = vor.u32 %v3821_v2, %v3817_v24  ;;  %v3843_v5 = vshrl.u32 %v13561_v6, 16  ;;  %v3849_v38 = vshll.u32 %v13569_v28, 16 }
  0xfd   : > { %v11510_v8 = vpop.f32.mrf.mxu0  ;;  %v3813_v20 = vrot.slane %v3812_v56, 4  ;;  %v3835_v40 = vrot.slane %v3833_v27, 5  ;;  %v3841_v12 = vrot.slane %v3839_v1, 5  ;;  %v3854_v2 = vshrl.u32 %v10654_v48, 16 }
  0xfe   : > { %v13578_v58 = vadd.f32 %v11544_v0, %v11510_v8  ;;  %11746 = vmatprep.mubr.msk.bf16.mxu1 %vm712_vm3, %v10682_v3  ;;  %v3823_v11 = vrot.slane %v3822_v18, 4  ;;  %v3845_v10 = vrot.slane %v3843_v5, 4  ;;  %v3851_v34 = vrot.slane %v3849_v38, 5  ;;  %v10657_v18 = vld [vmem:[%s12318_s8 + $0x90] sm:$0xf] }
  0xff   : > { %v847_v13 = vpop.f32.mrf.mxu0  ;;  %v3818_v39 = vsel %vm12354_vm4, %v3813_v20, %v3817_v24  ;;  %v11548_v55 = vpop.f32.mrf.mxu1  ;;  %v3836_v56 = vor.u32 %v3835_v40, %v3832_v62  ;;  %v3857_v3 = vshll.u32 %v10654_v48, 16  ;;  %v3856_v20 = vrot.slane %v3854_v2, 4 }
 0x100   : > { %17242 = vst [vmem:[#allocation6_spill] sm:$0xff] %v13578_v58  ;;  %v13587_v0 = vadd.f32 %v1139_v35, %v847_v13  ;;  %v3828_v7 = vsel %vm12354_vm4, %v3823_v11, %v3827_v54  ;;  %v3846_v8 = vor.u32 %v3845_v10, %v3841_v12  ;;  %v3863_v5 = vshll.u32 %v13583_v25, 16 }
 0x101   : > { %11713 = vmatmul.mubr.msk.bf16.gmra.mxu0 %vm712_vm3, %v12173_v52  ;;  %v10683_v27 = vcombine.low %v3818_v39, %v3828_v7  ;;  %v11511_v1 = vpop.f32.mrf.mxu0  ;;  %v1155_v24 = vpop.f32.mrf.mxu1  ;;  %v3837_v35 = vrot.slane %v3836_v56, 4  ;;  %v3859_v54 = vrot.slane %v3857_v3, 5  ;;  %v3867_v48 = vshrl.u32 %v13583_v25, 16  ;;  %v13608_v7 = vld [vmem:[%s12318_s8 + $0x94] sm:$0xf] }
 0x102   : > { %17243 = vst [vmem:[#allocation7_spill] sm:$0xff] %v13587_v0  ;;  %v13597_v38 = vadd.f32 %v11545_v19, %v11511_v1  ;;  %11716 = vmatprep.mubr.msk.bf16.mxu0 %vm712_vm3, %v12174_v4  ;;  %v3847_v62 = vrot.slane %v3846_v8, 4  ;;  %v3865_v11 = vrot.slane %v3863_v5, 5  ;;  %v3873_v40 = vshll.u32 %v13592_v16, 16  ;;  %v13611_v56 = vld [vmem:[%s12318_s8 + $0x98] sm:$0x1] }
 0x103   : > { %11747 = vmatmul.mubr.msk.bf16.gmra.mxu1 %vm712_vm3, %v10683_v27  ;;  %v850_v52 = vpop.f32.mrf.mxu0  ;;  %v11549_v13 = vpop.f32.mrf.mxu1  ;;  %v3878_v19 = vshrl.u32 %v10657_v18, 16  ;;  %v3842_v4 = vsel %vm12354_vm4, %v3837_v35, %v3841_v12  ;;  %v3860_v10 = vor.u32 %v3859_v54, %v3856_v20  ;;  %v3869_v2 = vrot.slane %v3867_v48, 4  ;;  %17246 = vst [vmem:[#allocation10_spill] sm:$0xff] %v13611_v56  ;;  %v12175_v27 = vld [vmem:[%s12318_s8 + $0x84] sm:$0xff]   ;;  %v12176_v48 = vld [vmem:[%s12318_s8 + $0x90] sm:$0xff]  }
 0x104   : > { %17244 = vst [vmem:[#allocation8_spill] sm:$0xff] %v13597_v38  ;;  %v13603_v39 = vadd.f32 %v1142_v47, %v850_v52  ;;  %v3852_v1 = vsel %vm12354_vm4, %v3847_v62, %v3851_v34  ;;  %v3875_v8 = vrot.slane %v3873_v40, 5  ;;  %v3881_v52 = vshll.u32 %v10657_v18, 16 }
 0x105   : > { %v11514_v3 = vpop.f32.mrf.mxu0  ;;  %v13616_v5 = vpop.f32.mrf.mxu1  ;;  %v3880_v47 = vrot.slane %v3878_v19, 4  ;;  %v10684_v20 = vcombine.low %v3842_v4, %v3852_v1  ;;  %v3861_v35 = vrot.slane %v3860_v10, 4  ;;  %v3870_v54 = vor.u32 %v3869_v2, %v3865_v11  ;;  %v13631_v19 = vld [vmem:[%s12318_s8 + $0xa0] sm:$0xf] }
 0x106   : > { %17245 = vst [vmem:[#allocation9_spill] sm:$0xff] %v13603_v39  ;;  %17247 = vst [vmem:[#allocation11_spill] sm:$0xff] %v13616_v5  ;;  %v10660_v39 = vld [vmem:[%s12318_s8 + $0x9c] sm:$0xf]  ;;  %v13619_v12 = vadd.f32 %v11548_v55, %v11514_v3  ;;  %v3883_v58 = vrot.slane %v3881_v52, 5  ;;  %v3887_v43 = vshll.u32 %v13608_v7, 16 }
 0x107   : > { %v863_v38 = vpop.f32.mrf.mxu0  ;;  %v11552_v0 = vpop.f32.mrf.mxu1  ;;  %v3891_v34 = vshrl.u32 %v13608_v7, 16  ;;  %v3897_v62 = vshll.u32 %v13611_v56, 16  ;;  %11750 = vmatprep.mubr.msk.bf16.mxu1 %vm712_vm3, %v10684_v20  ;;  %v3866_v55 = vsel %vm12354_vm4, %v3861_v35, %v3865_v11  ;;  %v3871_v40 = vrot.slane %v3870_v54, 4  ;;  %17250 = vst [vmem:[#allocation14_spill] sm:$0xff] %v13631_v19 }
 0x108   : > { %17248 = vst [vmem:[#allocation12_spill] sm:$0xff] %v13619_v12  ;;  %v13626_v18 = vadd.f32 %v1155_v24, %v863_v38  ;;  %v3902_v4 = vshrl.u32 %v10660_v39, 16  ;;  %v3884_v2 = vor.u32 %v3883_v58, %v3880_v47  ;;  %v3889_v3 = vrot.slane %v3887_v43, 5  ;;  %v13635_v12 = vld [vmem:[%s12318_s8 + $0xa4] sm:$0x1] }
 0x109   : > { %11717 = vmatmul.mubr.msk.bf16.gmra.mxu0 %vm712_vm3, %v12175_v27  ;;  %v11515_v10 = vpop.f32.mrf.mxu0  ;;  %v3893_v1 = vrot.slane %v3891_v34, 4  ;;  %v3899_v52 = vrot.slane %v3897_v62, 5  ;;  %v1171_v5 = vpop.f32.mrf.mxu1  ;;  %17251 = vst [vmem:[#allocation15_spill] sm:$0xff] %v13635_v12  ;;  %v3876_v24 = vsel %vm12354_vm4, %v3871_v40, %v3875_v8  ;;  %v3905_v20 = vshll.u32 %v10660_v39, 16  ;;  %v10663_v27 = vld [vmem:[%s12318_s8 + $0xa8] sm:$0xf] }
 0x10a   : > { %17249 = vst [vmem:[#allocation13_spill] sm:$0xff] %v13626_v18  ;;  %v13639_v38 = vadd.f32 %v11549_v13, %v11515_v10  ;;  %11720 = vmatprep.mubr.msk.bf16.mxu0 %vm712_vm3, %v12176_v48  ;;  %v3904_v11 = vrot.slane %v3902_v4, 4  ;;  %v10685_v35 = vcombine.low %v3866_v55, %v3876_v24  ;;  %v3885_v43 = vrot.slane %v3884_v2, 4  ;;  %v13649_v40 = vld [vmem:[%s12318_s8 + $0xac] sm:$0xf]  ;;  %v12177_v39 = vld [vmem:[%s12318_s8 + $0x9c] sm:$0xff]  }
 0x10b   : > { %v13643_v58 = vpop.f32.mrf.mxu0  ;;  %v3894_v47 = vor.u32 %v3893_v1, %v3889_v3  ;;  %v3911_v54 = vshll.u32 %v13631_v19, 16  ;;  %v11553_v34 = vpop.f32.mrf.mxu1  ;;  %v3907_v62 = vrot.slane %v3905_v20, 5  ;;  %v3915_v13 = vshrl.u32 %v13631_v19, 16  ;;  %17254 = vst [vmem:[#allocation18_spill] sm:$0xff] %v13649_v40 }
 0x10c   : > { %17252 = vst [vmem:[#allocation16_spill] sm:$0xff] %v13639_v38  ;;  %17253 = vst [vmem:[#allocation17_spill] sm:$0xff] %v13643_v58  ;;  %v3921_v8 = vshll.u32 %v13635_v12, 16  ;;  %11751 = vmatmul.mubr.msk.bf16.gmra.mxu1 %vm712_vm3, %v10685_v35  ;;  %v3890_v48 = vsel %vm12354_vm4, %v3885_v43, %v3889_v3  ;;  %v3926_v2 = vshrl.u32 %v10663_v27, 16  ;;  %v12178_v58 = vld [vmem:[%s12318_s8 + $0xa8] sm:$0xff]   ;;  %v3929_v18 = vshll.u32 %v10663_v27, 16 }
 0x10d   : > { %v3895_v55 = vrot.slane %v3894_v47, 4  ;;  %v3913_v4 = vrot.slane %v3911_v54, 5  ;;  %v13655_v10 = vpop.f32.mrf.mxu1  ;;  %v3908_v1 = vor.u32 %v3907_v62, %v3904_v11  ;;  %v3917_v24 = vrot.slane %v3915_v13, 4  ;;  %v13659_v38 = vld [vmem:[%s12318_s8 + $0xb0] sm:$0x1] }
 0x10e   : > { %17255 = vst [vmem:[#allocation19_spill] sm:$0xff] %v13655_v10  ;;  %v3923_v20 = vrot.slane %v3921_v8, 5  ;;  %17256 = vst [vmem:[#allocation20_spill] sm:$0xff] %v13659_v38  ;;  %v3928_v19 = vrot.slane %v3926_v2, 4  ;;  %v3935_v3 = vshll.u32 %v13649_v40, 16  ;;  %v3939_v43 = vshrl.u32 %v13649_v40, 16 }
 0x10f   : > { %v11518_v12 = vpop.f32.mrf.mxu0  ;;  %v3900_v35 = vsel %vm12354_vm4, %v3895_v55, %v3899_v52  ;;  %v10666_v47 = vld [vmem:[%s12318_s8 + $0xb4] sm:$0xf]  ;;  %v3909_v62 = vrot.slane %v3908_v1, 4  ;;  %v3918_v13 = vor.u32 %v3917_v24, %v3913_v4  ;;  %v3931_v10 = vrot.slane %v3929_v18, 5  ;;  %v13671_v2 = vld [vmem:[%s12318_s8 + $0xb8] sm:$0xf] }
 0x110   : > { %v13666_v54 = vadd.f32 %v11552_v0, %v11518_v12  ;;  %v10686_v11 = vcombine.low %v3890_v48, %v3900_v35  ;;  %v3937_v56 = vrot.slane %v3935_v3, 5  ;;  %v3941_v52 = vrot.slane %v3939_v43, 4  ;;  %17258 = vst [vmem:[#allocation22_spill] sm:$0xff] %v13671_v2  ;;  %v13680_v3 = vld [vmem:[%s12318_s8 + $0xbc] sm:$0x1] }
 0x111   : > { %11721 = vmatmul.mubr.msk.bf16.gmra.mxu0 %vm712_vm3, %v12177_v39  ;;  %v879_v8 = vpop.f32.mrf.mxu0  ;;  %v11556_v27 = vpop.f32.mrf.mxu1  ;;  %v3945_v55 = vshll.u32 %v13659_v38, 16  ;;  %v3914_v0 = vsel %vm12354_vm4, %v3909_v62, %v3913_v4  ;;  %v3919_v12 = vrot.slane %v3918_v13, 4  ;;  %v3950_v18 = vshrl.u32 %v10666_v47, 16  ;;  %17260 = vst [vmem:[#allocation24_spill] sm:$0xff] %v13680_v3  ;;  %v10669_v62 = vld [vmem:[%s12318_s8 + $0xc0] sm:$0xf] }
 0x112   : > { %17257 = vst [vmem:[#allocation21_spill] sm:$0xff] %v13666_v54  ;;  %11754 = vmatprep.mubr.msk.bf16.mxu1 %vm712_vm3, %v10686_v11  ;;  %v13674_v40 = vadd.f32 %v1171_v5, %v879_v8  ;;  %11724 = vmatprep.mubr.msk.bf16.mxu0 %vm712_vm3, %v12178_v58  ;;  %v3932_v48 = vor.u32 %v3931_v10, %v3928_v19  ;;  %v3953_v43 = vshll.u32 %v10666_v47, 16  ;;  %v3959_v58 = vshll.u32 %v13671_v2, 16  ;;  %v12179_v19 = vld [vmem:[%s12318_s8 + $0xb4] sm:$0xff]   ;;  %v12180_v47 = vld [vmem:[%s12318_s8 + $0xc0] sm:$0xff]  }
 0x113   : > { %v11519_v39 = vpop.f32.mrf.mxu0  ;;  %v3942_v1 = vor.u32 %v3941_v52, %v3937_v56  ;;  %v3947_v24 = vrot.slane %v3945_v55, 5  ;;  %v1187_v35 = vpop.f32.mrf.mxu1  ;;  %v3924_v5 = vsel %vm12354_vm4, %v3919_v12, %v3923_v20  ;;  %v3952_v4 = vrot.slane %v3950_v18, 4  ;;  %v13696_v18 = vld [vmem:[%s12318_s8 + $0xc4] sm:$0xf] }
 0x114   : > { %17259 = vst [vmem:[#allocation23_spill] sm:$0xff] %v13674_v40  ;;  %v13684_v11 = vadd.f32 %v11553_v34, %v11519_v39  ;;  %v10687_v13 = vcombine.low %v3914_v0, %v3924_v5  ;;  %v3933_v10 = vrot.slane %v3932_v48, 4  ;;  %v3955_v55 = vrot.slane %v3953_v43, 5  ;;  %17263 = vst [vmem:[#allocation27_spill] sm:$0xff] %v13696_v18  ;;  %v13706_v5 = vld [vmem:[%s12318_s8 + $0xc8] sm:$0x1] }
 0x115   : > { %v13688_v8 = vpop.f32.mrf.mxu0  ;;  %v3943_v52 = vrot.slane %v3942_v1, 4  ;;  %v11557_v40 = vpop.f32.mrf.mxu1  ;;  %v3961_v20 = vrot.slane %v3959_v58, 5  ;;  %v3963_v34 = vshrl.u32 %v13671_v2, 16  ;;  %v3969_v12 = vshll.u32 %v13680_v3, 16  ;;  %17265 = vst [vmem:[#allocation29_spill] sm:$0xff] %v13706_v5 }
 0x116   : > { %17261 = vst [vmem:[#allocation25_spill] sm:$0xff] %v13684_v11  ;;  %17262 = vst [vmem:[#allocation26_spill] sm:$0xff] %v13688_v8  ;;  %11755 = vmatmul.mubr.msk.bf16.gmra.mxu1 %vm712_vm3, %v10687_v13  ;;  %v3938_v39 = vsel %vm12354_vm4, %v3933_v10, %v3937_v56  ;;  %v3956_v1 = vor.u32 %v3955_v55, %v3952_v4  ;;  %v3974_v58 = vshrl.u32 %v10669_v62, 16  ;;  %v10672_v13 = vld [vmem:[%s12318_s8 + $0xcc] sm:$0xf]  ;;  %v3983_v4 = vshll.u32 %v13696_v18, 16 }
 0x117   : > { %v11522_v0 = vpop.f32.mrf.mxu0  ;;  %v3948_v48 = vsel %vm12354_vm4, %v3943_v52, %v3947_v24  ;;  %v13703_v43 = vpop.f32.mrf.mxu1  ;;  %v3965_v11 = vrot.slane %v3963_v34, 4  ;;  %v3971_v3 = vrot.slane %v3969_v12, 5  ;;  %v3977_v24 = vshll.u32 %v10669_v62, 16  ;;  %v13720_v34 = vld [vmem:[%s12318_s8 + $0xd0] sm:$0xf] }
 0x118   : > { %17264 = vst [vmem:[#allocation28_spill] sm:$0xff] %v13703_v43  ;;  %v13708_v54 = vadd.f32 %v11556_v27, %v11522_v0  ;;  %v10688_v8 = vcombine.low %v3938_v39, %v3948_v48  ;;  %v3957_v56 = vrot.slane %v3956_v1, 4  ;;  %v3976_v38 = vrot.slane %v3974_v58, 4  ;;  %v13728_v1 = vld [vmem:[%s12318_s8 + $0xd4] sm:$0x1]  ;;  %v12181_v43 = vld [vmem:[%s12318_s8 + $0xcc] sm:$0xff]  }
 0x119   : > { %11725 = vmatmul.mubr.msk.bf16.gmra.mxu0 %vm712_vm3, %v12179_v19  ;;  %v895_v2 = vpop.f32.mrf.mxu0  ;;  %v11560_v10 = vpop.f32.mrf.mxu1  ;;  %v3966_v27 = vor.u32 %v3965_v11, %v3961_v20  ;;  %v3987_v55 = vshrl.u32 %v13696_v18, 16  ;;  %v3993_v19 = vshll.u32 %v13706_v5, 16  ;;  %v3979_v0 = vrot.slane %v3977_v24, 5  ;;  %v10708_v5 = vld [vmem:[%s12318_s8 + $0x18] sm:$0xe] }
 0x11a   : > { %17266 = vst [vmem:[#allocation30_spill] sm:$0xff] %v13708_v54  ;;  %11758 = vmatprep.mubr.msk.bf16.mxu1 %vm712_vm3, %v10688_v8  ;;  %v13714_v52 = vadd.f32 %v1187_v35, %v895_v2  ;;  %11728 = vmatprep.mubr.msk.bf16.mxu0 %vm712_vm3, %v12180_v47  ;;  %v3985_v39 = vrot.slane %v3983_v4, 5  ;;  %v3998_v2 = vshrl.u32 %v10672_v13, 16  ;;  %v3962_v35 = vsel %vm12354_vm4, %v3957_v56, %v3961_v20 }
 0x11b   : > { %v11523_v62 = vpop.f32.mrf.mxu0  ;;  %v1203_v8 = vpop.f32.mrf.mxu1  ;;  %v3967_v11 = vrot.slane %v3966_v27, 4  ;;  %v3989_v48 = vrot.slane %v3987_v55, 4  ;;  %v4001_v54 = vshll.u32 %v10672_v13, 16  ;;  %v4007_v24 = vshll.u32 %v13720_v34, 16 }
 0x11c   : > { %17267 = vst [vmem:[#allocation31_spill] sm:$0xff] %v13714_v52  ;;  %v13725_v47 = vadd.f32 %v11557_v40, %v11523_v62  ;;  %v3980_v52 = vor.u32 %v3979_v0, %v3976_v38  ;;  %v4000_v12 = vrot.slane %v3998_v2, 4  ;;  %v3995_v56 = vrot.slane %v3993_v19, 5 }
 0x11d   : > { %v13730_v58 = vpop.f32.mrf.mxu0  ;;  %v11561_v4 = vpop.f32.mrf.mxu1  ;;  %v3972_v18 = vsel %vm12354_vm4, %v3967_v11, %v3971_v3  ;;  %v3990_v20 = vor.u32 %v3989_v48, %v3985_v39  ;;  %v4011_v40 = vshrl.u32 %v13720_v34, 16  ;;  %v4003_v62 = vrot.slane %v4001_v54, 5 }
 0x11e   : > { %17268 = vst [vmem:[#allocation32_spill] sm:$0xff] %v13725_v47  ;;  %17269 = vst [vmem:[#allocation33_spill] sm:$0xff] %v13730_v58  ;;  %v10689_v27 = vcombine.low %v3962_v35, %v3972_v18  ;;  %v3981_v55 = vrot.slane %v3980_v52, 4  ;;  %v4009_v58 = vrot.slane %v4007_v24, 5  ;;  %v4017_v0 = vshll.u32 %v13728_v1, 16 }
 0x11f   : > { %v13738_v47 = vpop.f32.mrf.mxu1  ;;  %v3991_v38 = vrot.slane %v3990_v20, 4  ;;  %v4013_v13 = vrot.slane %v4011_v40, 4  ;;  %v10724_v2 = vrot.slane %v10708_v5, 9  ;;  %v4004_v19 = vor.u32 %v4003_v62, %v4000_v12  ;;  %v10709_v35 = vld [vmem:[%s12318_s8 + $0x24] sm:$0xe] }
 0x120   : > { %17270 = vst [vmem:[#allocation34_spill] sm:$0xff] %v13738_v47  ;;  %11759 = vmatmul.mubr.msk.bf16.gmra.mxu1 %vm712_vm3, %v10689_v27  ;;  %v3986_v18 = vsel %vm12354_vm4, %v3981_v55, %v3985_v39  ;;  %v4381_v54 = vrot.slane %v13399_v46, 5  ;;  %v4384_v52 = vrot.slane %v13404_v33, 5  ;;  %v4019_v20 = vrot.slane %v4017_v0, 5  ;;  %v10710_v40 = vld [vmem:[%s12318_s8 + $0x30] sm:$0xe] }
 0x121   : > { %v11526_v3 = vpop.f32.mrf.mxu0  ;;  %11729 = vmatmul.mubr.msk.bf16.gmra.mxu0 %vm712_vm3, %v12181_v43  ;;  %v11600_v11 = vpop.f32.mrf.mxu1  ;;  %v3996_v5 = vsel %vm12354_vm4, %v3991_v38, %v3995_v56  ;;  %v4014_v24 = vor.u32 %v4013_v13, %v4009_v58  ;;  %v4005_v47 = vrot.slane %v4004_v19, 4  ;;  %v10725_v55 = vrot.slane %v10709_v35, 9 }
 0x122   : > { %v13748_v48 = vadd.f32 %v11560_v10, %v11526_v3  ;;  %v10690_v27 = vcombine.low %v3986_v18, %v3996_v5  ;;  %v4382_v12 = vsel %vm12616_vm7, %v10724_v2, %v4381_v54  ;;  %v4383_v46 = vrot.slane %v4381_v54, 4  ;;  %v10711_v18 = vld [vmem:[%s12318_s8 + $0x3c] sm:$0xe] }
 0x123   : > { %v911_v43 = vpop.f32.mrf.mxu0  ;;  %v1875_v39 = vpop.f32.mrf.mxu1  ;;  %v4015_v10 = vrot.slane %v4014_v24, 4  ;;  %v17271_v62 = vrot.slane %v13419_v29, 5  ;;  %v4010_v38 = vsel %vm12354_vm4, %v4005_v47, %v4009_v58  ;;  %v4395_v3 = vrot.slane %v13433_v44, 5  ;;  %v10712_v58 = vld [vmem:[%s12318_s8 + $0x48] sm:$0xe] }
 0x124   : > { %v13755_v33 = vadd.f32 %v1203_v8, %v911_v43  ;;  %11762 = vmatprep.mubr.msk.bf16.mxu1 %vm712_vm3, %v10690_v27  ;;  %v4385_v0 = vsel %vm12616_vm7, %v4383_v46, %v4384_v52  ;;  %v10726_v8 = vrot.slane %v10710_v40, 9  ;;  %v4405_v52 = vrot.slane %v13460_v23, 5  ;;  %v10713_v43 = vld [vmem:[%s12318_s8 + $0x54] sm:$0xe] }
 0x125   : > { %v4390_v56 = vrot.slane %v17271_v62, 4  ;;  %v11527_v13 = vpop.f32.mrf.mxu0  ;;  %v13764_v2 = vpop.f32.mrf.mxu1  ;;  %v4020_v19 = vsel %vm12354_vm4, %v4015_v10, %v4019_v20  ;;  %v10741_v35 = vcombine.low %v4382_v12, %v4385_v0  ;;  %v17272_v5 = vmov %v17271_v62 }
 0x126   : > { %v13770_v54 = vadd.f32 %v11561_v4, %v11527_v13  ;;  %v4389_v47 = vsel %vm12616_vm7, %v10725_v55, %v17272_v5  ;;  %v10691_v24 = vcombine.low %v4010_v38, %v4020_v19  ;;  %v17273_v44 = vrot.slane %v13423_v49, 5 }
 0x127   : > { %v13778_v27 = vpop.f32.mrf.mxu0  ;;  %v4397_v20 = vrot.slane %v4395_v3, 4  ;;  %v13784_v4 = vpop.f32.mrf.mxu1  ;;  %11768 = vmatprep.mubr.msk.bf16.mxu0 %vm712_vm3, %v10741_v35  ;;  %v4396_v12 = vsel %vm12616_vm7, %v10726_v8, %v4395_v3  ;;  %v4398_v23 = vrot.slane %v13439_v22, 5  ;;  %v10727_v46 = vrot.slane %v10711_v18, 9 }
 0x128   : > { %v4392_v40 = vsel %vm12616_vm7, %v4390_v56, %v17273_v44  ;;  %11763 = vmatmul.mubr.msk.bf16.gmra.mxu1 %vm712_vm3, %v10691_v24  ;;  %v4402_v49 = vrot.slane %v13451_v50, 5  ;;  %v10728_v62 = vrot.slane %v10712_v58, 9  ;;  %v4409_v56 = vrot.slane %v13478_v31, 5  ;;  %v10714_v58 = vld [vmem:[%s12318_s8 + $0x60] sm:$0xe] }
 0x129   : > { %v10742_v29 = vcombine.low %v4389_v47, %v4392_v40  ;;  %v11566_v10 = vpop.f32.mrf.mxu0  ;;  %v11604_v55 = vpop.f32.mrf.mxu1  ;;  %v4412_v38 = vrot.slane %v13483_v26, 5  ;;  %v4399_v22 = vsel %vm12616_vm7, %v4397_v20, %v4398_v23  ;;  %v10729_v0 = vrot.slane %v10713_v43, 9 }
 0x12a   : > { %v1645_v13 = vadd.f32 %v11566_v10, %v13454_v51  ;;  %v4416_v8 = vrot.slane %v13494_v45, 5  ;;  %v4419_v3 = vrot.slane %v13502_v59, 5  ;;  %v10743_v18 = vcombine.low %v4396_v12, %v4399_v22  ;;  %v10715_v12 = vld [vmem:[%s12318_s8 + $0x6c] sm:$0xe] }
 0x12b   : > { %11769 = vmatmul.mubr.msk.bf16.vlgmr.msra.gmra.mxu0 %vm712_vm3, %v10742_v29  ;;  %v1516_v50 = vpop.f32.mrf.mxu0  ;;  %v4403_v31 = vsel %vm12616_vm7, %v10727_v46, %v4402_v49  ;;  %v4404_v19 = vrot.slane %v4402_v49, 4  ;;  %v1891_v26 = vpop.f32.mrf.mxu1  ;;  %v4410_v5 = vsel %vm12616_vm7, %v10728_v62, %v4409_v56  ;;  %v4411_v47 = vrot.slane %v4409_v56, 4 }
 0x12c   : > { %v1643_v35 = vadd.f32 %v1516_v50, %v13463_v21  ;;  %v13804_v51 = vadd.f32 %v11600_v11, %v1645_v13  ;;  %11772 = vmatprep.mubr.msk.bf16.mxu0 %vm712_vm3, %v10743_v18  ;;  %v4417_v44 = vsel %vm12616_vm7, %v10729_v0, %v4416_v8  ;;  %v4418_v40 = vrot.slane %v4416_v8, 4 }
 0x12d   : > { %v11567_v45 = vpop.f32.mrf.mxu0  ;;  %v4406_v59 = vsel %vm12616_vm7, %v4404_v19, %v4405_v52  ;;  %v11605_v24 = vpop.f32.mrf.mxu1  ;;  %v4423_v21 = vrot.slane %v13520_v9, 5  ;;  %v4413_v29 = vsel %vm12616_vm7, %v4411_v47, %v4412_v38  ;;  %v10730_v49 = vrot.slane %v10714_v58, 9 }
 0x12e   : > { %v1646_v11 = vadd.f32 %v11567_v45, %v13472_v41  ;;  %v13816_v20 = vadd.f32 %v1875_v39, %v1643_v35  ;;  %v10744_v43 = vcombine.low %v4403_v31, %v4406_v59  ;;  %v10745_v46 = vcombine.low %v4410_v5, %v4413_v29 }
 0x12f   : > { %v1519_v23 = vpop.f32.mrf.mxu0  ;;  %v13821_v10 = vpop.f32.mrf.mxu1  ;;  %v4420_v52 = vsel %vm12616_vm7, %v4418_v40, %v4419_v3  ;;  %v4425_v62 = vrot.slane %v4423_v21, 4  ;;  %v4426_v56 = vrot.slane %v13526_v53, 5  ;;  %v4433_v38 = vrot.slane %v13550_v42, 5 }
 0x130   : > { %v13826_v9 = vadd.f32 %v1519_v23, %v13486_v30  ;;  %v13829_v41 = vadd.f32 %v13764_v2, %v1646_v11  ;;  %v10746_v39 = vcombine.low %v4417_v44, %v4420_v52  ;;  %v10731_v0 = vrot.slane %v10715_v12, 9 }
 0x131   : > { %v11570_v13 = vpop.f32.mrf.mxu0  ;;  %v11608_v22 = vpop.f32.mrf.mxu1  ;;  %v4430_v8 = vrot.slane %v13542_v15, 5  ;;  %v4424_v50 = vsel %vm12616_vm7, %v10730_v49, %v4423_v21  ;;  %v10716_v15 = vld [vmem:[%s12318_s8 + $0x78] sm:$0xe]  ;;  %v4437_v19 = vrot.slane %v13561_v6, 5  ;;  %vm5368_vm12 = vsmask.f32 7938 }
 0x132   : > { %v1649_v3 = vadd.f32 %v11570_v13, %v13499_v60  ;;  %v4427_v60 = vsel %vm12616_vm7, %v4425_v62, %v4426_v56  ;;  %v10732_v40 = vrot.slane %v10716_v15, 9  ;;  %v4451_v62 = vrot.slane %v13608_v7, 5  ;;  %v17276_v15 = vld [vmem:[#allocation6_spill] sm:$0xff]  ;;  %vm14571_vm15 = vmand %vm4891_vm9, %vm5368_vm12 }
 0x133   : > { %11773 = vmatmul.mubr.msk.bf16.gmra.mxu0 %vm712_vm3, %v10744_v43  ;;  %v1532_v30 = vpop.f32.mrf.mxu0  ;;  %v1907_v2 = vpop.f32.mrf.mxu1  ;;  %v4431_v53 = vsel %vm12616_vm7, %v10731_v0, %v4430_v8  ;;  %v4432_v42 = vrot.slane %v4430_v8, 4  ;;  %v4439_v11 = vrot.slane %v4437_v19, 4  ;;  %v4440_v43 = vrot.slane %v13569_v28, 5 }
 0x134   : > { %11776 = vmatprep.mubr.msk.bf16.mxu0 %vm712_vm3, %v10745_v46  ;;  %v1647_v18 = vadd.f32 %v1532_v30, %v13508_v17  ;;  %v13842_v31 = vadd.f32 %v11604_v55, %v1649_v3  ;;  %v10747_v17 = vcombine.low %v4424_v50, %v4427_v60  ;;  %v10717_v46 = vld [vmem:[%s12318_s8 + $0x84] sm:$0xe]  ;;  %v17274_v50 = vld [vmem:[#allocation5_spill] sm:$0xff]  ;;  %vm5043_vm13 = vsmask.f32 256 }
 0x135   : > { %v11571_v35 = vpop.f32.mrf.mxu0  ;;  %v11609_v5 = vpop.f32.mrf.mxu1  ;;  %v4434_v47 = vsel %vm12616_vm7, %v4432_v42, %v4433_v38  ;;  %v4441_v28 = vsel %vm12616_vm7, %v4439_v11, %v4440_v43  ;;  %v10733_v0 = vrot.slane %v10717_v46, 9  ;;  %v4453_v42 = vrot.slane %v4451_v62, 4  ;;  %v17278_v11 = vld [vmem:[#allocation7_spill] sm:$0xff]  ;;  %vm14589_vm1 = vmand %vm4894_vm10, %vm5043_vm13 }
 0x136   : > { %v1650_v58 = vadd.f32 %v11571_v35, %v13515_v14  ;;  %v13851_v45 = vadd.f32 %v1891_v26, %v1647_v18  ;;  %v10748_v59 = vcombine.low %v4431_v53, %v4434_v47  ;;  %v17275_v18 = vld [vmem:[#allocation10_spill] sm:$0xff]  ;;  %vm5044_vm14 = vsmask.f32 4368 }
 0x137   : > { %v1535_v44 = vpop.f32.mrf.mxu0  ;;  %v13853_v55 = vpop.f32.mrf.mxu1  ;;  %vm14583_vm0 = vmor %vm5043_vm13, %vm5044_vm14 }
 0x138   : > { %v13856_v21 = vadd.f32 %v1535_v44, %v13528_v32  ;;  %v13858_v6 = vadd.f32 %v11605_v24, %v1650_v58  ;;  %v4438_v32 = vsel %vm12616_vm7, %v10732_v40, %v4437_v19  ;;  %v4444_v24 = vrot.slane %v13583_v25, 5  ;;  %v10719_v44 = vld [vmem:[%s12318_s8 + $0x9c] sm:$0xe] }
 0x139   : > { %v11574_v29 = vpop.f32.mrf.mxu0  ;;  %v11612_v14 = vpop.f32.mrf.mxu1  ;;  %v10749_v3 = vcombine.low %v4438_v32, %v4441_v28 }
 0x13a   : > { %v1653_v26 = vadd.f32 %v11574_v29, %v13534_v61  ;;  %v10718_v61 = vld [vmem:[%s12318_s8 + $0x90] sm:$0xe] }
 0x13b   : > { %11777 = vmatmul.mubr.msk.bf16.gmra.mxu0 %vm712_vm3, %v10746_v39  ;;  %v1548_v12 = vpop.f32.mrf.mxu0  ;;  %v1923_v23 = vpop.f32.mrf.mxu1  ;;  %v10734_v30 = vrot.slane %v10718_v61, 9 }
 0x13c   : > { %11780 = vmatprep.mubr.msk.bf16.mxu0 %vm712_vm3, %v10747_v17  ;;  %v1651_v52 = vadd.f32 %v1548_v12, %v13544_v57  ;;  %v13869_v49 = vadd.f32 %v11608_v22, %v1653_v26  ;;  %v4446_v57 = vrot.slane %v4444_v24, 4  ;;  %v4447_v22 = vrot.slane %v13592_v16, 5  ;;  %v17277_v17 = vld [vmem:[#allocation14_spill] sm:$0xff]  ;;  %v10720_v26 = vld [vmem:[%s12318_s8 + $0xa8] sm:$0xe] }
 0x13d   : > { %v11575_v39 = vpop.f32.mrf.mxu0  ;;  %v11613_v56 = vpop.f32.mrf.mxu1  ;;  %v4445_v16 = vsel %vm12616_vm7, %v10733_v0, %v4444_v24  ;;  %v4452_v58 = vsel %vm12616_vm7, %v10734_v30, %v4451_v62  ;;  %v4458_v40 = vrot.slane %v17277_v17, 5  ;;  %v17279_v12 = vld [vmem:[#allocation18_spill] sm:$0xff]  ;;  %v17282_v30 = vld [vmem:[#allocation9_spill] sm:$0xff] }
 0x13e   : > { %v1654_v38 = vadd.f32 %v11575_v39, %v13552_v63  ;;  %v13876_v13 = vadd.f32 %v1907_v2, %v1651_v52  ;;  %v4454_v63 = vrot.slane %v17275_v18, 5  ;;  %v4465_v32 = vrot.slane %v17279_v12, 5  ;;  %v17280_v52 = vld [vmem:[#allocation8_spill] sm:$0xff]  ;;  %v17285_v17 = vld [vmem:[#allocation22_spill] sm:$0xff] }
 0x13f   : > { %v1551_v8 = vpop.f32.mrf.mxu0  ;;  %v13878_v25 = vpop.f32.mrf.mxu1  ;;  %v10735_v39 = vrot.slane %v10719_v44, 9 }
 0x140   : > { %v13882_v53 = vadd.f32 %v1551_v8, %v17274_v50  ;;  %v13884_v7 = vadd.f32 %v11609_v5, %v1654_v38  ;;  %v4448_v5 = vsel %vm12616_vm7, %v4446_v57, %v4447_v22  ;;  %v10736_v22 = vrot.slane %v10720_v26, 9 }
 0x141   : > { %v11578_v2 = vpop.f32.mrf.mxu0  ;;  %v11616_v60 = vpop.f32.mrf.mxu1  ;;  %v10750_v62 = vcombine.low %v4445_v16, %v4448_v5  ;;  %v4467_v18 = vrot.slane %v4465_v32, 4  ;;  %v4459_v5 = vsel %vm12616_vm7, %v10735_v39, %v4458_v40  ;;  %v10722_v39 = vld [vmem:[%s12318_s8 + $0xc0] sm:$0xe] }
 0x142   : > { %v1657_v19 = vadd.f32 %v11578_v2, %v17276_v15  ;;  %v4466_v44 = vsel %vm12616_vm7, %v10736_v22, %v4465_v32 }
 0x143   : > { %11781 = vmatmul.mubr.msk.bf16.gmra.mxu0 %vm712_vm3, %v10748_v59  ;;  %v1564_v35 = vpop.f32.mrf.mxu0  ;;  %v1939_v47 = vpop.f32.mrf.mxu1  ;;  %v4455_v59 = vsel %vm12616_vm7, %v4453_v42, %v4454_v63  ;;  %v17283_v63 = vld [vmem:[#allocation20_spill] sm:$0xff] }
 0x144   : > { %11784 = vmatprep.mubr.msk.bf16.mxu0 %vm712_vm3, %v10749_v3  ;;  %v1655_v43 = vadd.f32 %v1564_v35, %v17278_v11  ;;  %v13899_v29 = vadd.f32 %v11612_v14, %v1657_v19  ;;  %v10751_v0 = vcombine.low %v4452_v58, %v4455_v59  ;;  %v4460_v14 = vrot.slane %v4458_v40, 4  ;;  %v17281_v3 = vld [vmem:[#allocation15_spill] sm:$0xff]  ;;  %v17284_v19 = vld [vmem:[#allocation12_spill] sm:$0xff] }
 0x145   : > { %v11579_v46 = vpop.f32.mrf.mxu0  ;;  %v11617_v24 = vpop.f32.mrf.mxu1  ;;  %v4461_v57 = vrot.slane %v17281_v3, 5  ;;  %v4472_v11 = vrot.slane %v17285_v17, 5 }
 0x146   : > { %v1658_v28 = vadd.f32 %v11579_v46, %v17280_v52  ;;  %v13906_v61 = vadd.f32 %v1923_v23, %v1655_v43  ;;  %v4468_v23 = vrot.slane %v17283_v63, 5  ;;  %v17286_v43 = vld [vmem:[#allocation13_spill] sm:$0xff]  ;;  %v10721_v46 = vld [vmem:[%s12318_s8 + $0xb4] sm:$0xe]  ;;  %v17287_v52 = vld [vmem:[#allocation27_spill] sm:$0xff] }
 0x147   : > { %v1567_v38 = vpop.f32.mrf.mxu0  ;;  %v13908_v8 = vpop.f32.mrf.mxu1  ;;  %v17289_v63 = vld [vmem:[#allocation24_spill] sm:$0xff] }
 0x148   : > { %v13912_v50 = vadd.f32 %v1567_v38, %v17282_v30  ;;  %v13914_v42 = vadd.f32 %v11613_v56, %v1658_v28  ;;  %v4462_v56 = vsel %vm12616_vm7, %v4460_v14, %v4461_v57  ;;  %v4469_v12 = vsel %vm12616_vm7, %v4467_v18, %v4468_v23  ;;  %v17288_v38 = vld [vmem:[#allocation16_spill] sm:$0xff] }
 0x149   : > { %v11582_v2 = vpop.f32.mrf.mxu0  ;;  %v11620_v15 = vpop.f32.mrf.mxu1  ;;  %v4479_v28 = vrot.slane %v17287_v52, 5  ;;  %v10752_v32 = vcombine.low %v4459_v5, %v4462_v56  ;;  %v10753_v57 = vcombine.low %v4466_v44, %v4469_v12  ;;  %v4474_v30 = vrot.slane %v4472_v11, 4 }
 0x14a   : > { %v1661_v35 = vadd.f32 %v11582_v2, %v17284_v19  ;;  %v4475_v18 = vrot.slane %v17289_v63, 5  ;;  %v10738_v2 = vrot.slane %v10722_v39, 9  ;;  %v4486_v12 = vrot.slane %v13720_v34, 5 }
 0x14b   : > { %11785 = vmatmul.mubr.msk.bf16.gmra.mxu0 %vm712_vm3, %v10750_v62  ;;  %v1580_v16 = vpop.f32.mrf.mxu0  ;;  %v1955_v58 = vpop.f32.mrf.mxu1  ;;  %v4481_v19 = vrot.slane %v4479_v28, 4 }
 0x14c   : > { %11788 = vmatprep.mubr.msk.bf16.mxu0 %vm712_vm3, %v10751_v0  ;;  %v1659_v59 = vadd.f32 %v1580_v16, %v17286_v43  ;;  %v13928_v26 = vadd.f32 %v11616_v60, %v1661_v35  ;;  %v10737_v60 = vrot.slane %v10721_v46, 9  ;;  %v17290_v35 = vld [vmem:[#allocation29_spill] sm:$0xff]  ;;  %v17292_v46 = vld [vmem:[#allocation23_spill] sm:$0xff]  ;;  %v4480_v39 = vsel %vm12616_vm7, %v10738_v2, %v4479_v28 }
 0x14d   : > { %v11583_v40 = vpop.f32.mrf.mxu0  ;;  %v11621_v62 = vpop.f32.mrf.mxu1  ;;  %v4482_v16 = vrot.slane %v17290_v35, 5  ;;  %v17291_v43 = vld [vmem:[#allocation21_spill] sm:$0xff]  ;;  %v4489_v28 = vrot.slane %v13728_v1, 5 }
 0x14e   : > { %v1662_v0 = vadd.f32 %v11583_v40, %v17288_v38  ;;  %v13936_v14 = vadd.f32 %v1939_v47, %v1659_v59  ;;  %v4473_v44 = vsel %vm12616_vm7, %v10737_v60, %v4472_v11  ;;  %v17293_v11 = vld [vmem:[#allocation25_spill] sm:$0xff] }
 0x14f   : > { %v13938_v3 = vpop.f32.mrf.mxu0  ;;  %v13940_v22 = vpop.f32.mrf.mxu1  ;;  %v4483_v38 = vsel %vm12616_vm7, %v4481_v19, %v4482_v16  ;;  %v10807_v19 = vld [vmem:[%s17206_s3 + $0x4] sm:$0xf] }
 0x150   : > { %v13943_v23 = vadd.f32 %v11617_v24, %v1662_v0  ;;  %v4476_v24 = vsel %vm12616_vm7, %v4474_v30, %v4475_v18  ;;  %v10723_v0 = vld [vmem:[%s12318_s8 + $0xcc] sm:$0xe]  ;;  %v10755_v34 = vcombine.low %v4480_v39, %v4483_v38  ;;  %12115 = vmatprep.subr.msk.bf16.mxu1 %vm6016_vm8, %v10807_v19 }
 0x151   : > { %v11586_v17 = vpop.f32.mrf.mxu0  ;;  %v11624_v47 = vpop.f32.mrf.mxu1  ;;  %v10754_v30 = vcombine.low %v4473_v44, %v4476_v24 }
 0x152   : > { %v1665_v5 = vadd.f32 %v11586_v17, %v17291_v43  ;;  %v4488_v17 = vrot.slane %v4486_v12, 4  ;;  %v6018_v43 = vsel %vm6016_vm8, %v10807_v19, 0 }
 0x153   : > { %11789 = vmatmul.mubr.msk.bf16.gmra.mxu0 %vm712_vm3, %v10752_v32  ;;  %v1596_v56 = vpop.f32.mrf.mxu0  ;;  %v1971_v59 = vpop.f32.mrf.mxu1  ;;  %11801 = vmatpush3.bf16.msra.mxu1 %v6018_v43 }
 0x154   : > { %11792 = vmatprep.mubr.msk.bf16.mxu0 %vm712_vm3, %v10753_v57  ;;  %v1663_v52 = vadd.f32 %v1596_v56, %v17292_v46  ;;  %v13955_v40 = vadd.f32 %v11620_v15, %v1665_v5  ;;  %v10739_v15 = vrot.slane %v10723_v0, 9  ;;  %v17294_v5 = vld [vmem:[#allocation30_spill] sm:$0xff]  ;;  %v17295_v46 = vld [vmem:[#allocation31_spill] sm:$0xff] }
 0x155   : > { %v11587_v32 = vpop.f32.mrf.mxu0  ;;  %v11625_v57 = vpop.f32.mrf.mxu1 }
 0x156   : > { %v1666_v60 = vadd.f32 %v11587_v32, %v17293_v11  ;;  %v13963_v63 = vadd.f32 %v1955_v58, %v1663_v52  ;;  %v4487_v1 = vsel %vm12616_vm7, %v10739_v15, %v4486_v12  ;;  %v17296_v32 = vld [vmem:[#allocation32_spill] sm:$0xff] }
 0x157   : > { %v13965_v18 = vpop.f32.mrf.mxu0  ;;  %v13967_v35 = vpop.f32.mrf.mxu1 }
 0x158   : > { %v13970_v2 = vadd.f32 %v11621_v62, %v1666_v60  ;;  %v4490_v62 = vsel %vm12616_vm7, %v4488_v17, %v4489_v28 }
 0x159   : > { %v11590_v16 = vpop.f32.mrf.mxu0  ;;  %v11628_v58 = vpop.f32.mrf.mxu1 }
 0x15a   : > { %v1669_v56 = vadd.f32 %v11590_v16, %v17294_v5 }
 0x15b   : > { %11793 = vmatmul.mubr.msk.bf16.gmra.mxu0 %vm712_vm3, %v10754_v30  ;;  %v1612_v44 = vpop.f32.mrf.mxu0  ;;  %v1987_v24 = vpop.f32.mrf.mxu1  ;;  %v10756_v30 = vcombine.low %v4487_v1, %v4490_v62 }
 0x15c   : > { %11796 = vmatprep.mubr.msk.bf16.mxu0 %vm712_vm3, %v10755_v34  ;;  %v1667_v52 = vadd.f32 %v1612_v44, %v17295_v46  ;;  %v13985_v39 = vadd.f32 %v11624_v47, %v1669_v56 }
 0x15d   : > { %v11591_v38 = vpop.f32.mrf.mxu0  ;;  %v11629_v0 = vpop.f32.mrf.mxu1 }
 0x15e   : > { %v1670_v11 = vadd.f32 %v11591_v38, %v17296_v32  ;;  %v13988_v60 = vadd.f32 %v1971_v59, %v1667_v52 }
 0x15f   : > { %v13990_v19 = vpop.f32.mrf.mxu0  ;;  %v13992_v34 = vpop.f32.mrf.mxu1 }
 0x160   : > { %v13994_v12 = vadd.f32 %v11625_v57, %v1670_v11 }
 0x161   : > { %v11594_v15 = vpop.f32.mrf.mxu0  ;;  %v13996_v17 = vpop.f32.mrf.mxu1 }
 0x162   : > { %v1673_v28 = vadd.f32 %v11594_v15, %v13748_v48 }
 0x163   : > { %11797 = vmatmul.mubr.msk.bf16.gmra.mxu0 %vm712_vm3, %v10756_v30  ;;  %v1628_v47 = vpop.f32.mrf.mxu0  ;;  %v14000_v16 = vpop.f32.mrf.mxu1 }
 0x164   : > { %v1671_v59 = vadd.f32 %v1628_v47, %v13755_v33  ;;  %v14003_v43 = vadd.f32 %v11628_v58, %v1673_v28  ;;  %v17220_v47 = vmov 0  }
 0x165   : > { %v11595_v5 = vpop.f32.mrf.mxu0  ;;  %v14005_v56 = vpop.f32.mrf.mxu1  ;;  %4899 = vst.msk [vmem:[#allocation2 + $0x18] sm:$0xf] %vm4891_vm9, %v17220_v47  ;;  %4892 = vst.msk [vmem:[#allocation2] sm:$0xf] %vm4891_vm9, %v17220_v47 }
 0x166   : > { %17297 = vst [vmem:[#allocation5_spill] sm:$0xff] %v14005_v56  ;;  %v1674_v57 = vadd.f32 %v11595_v5, %v13770_v54  ;;  %v14008_v44 = vadd.f32 %v1987_v24, %v1671_v59  ;;  %4893 = vst.msk [vmem:[#allocation2 + $0x4] sm:$0xf] %vm4891_vm9, %v17220_v47 }
 0x167   : > { %v14010_v1 = vpop.f32.mrf.mxu0  ;;  %v14012_v62 = vpop.f32.mrf.mxu1  ;;  %4896 = vst.msk [vmem:[#allocation2 + $0xc] sm:$0xf] %vm4891_vm9, %v17220_v47  ;;  %4897 = vst.msk [vmem:[#allocation2 + $0x10] sm:$0xf] %vm4891_vm9, %v17220_v47 }
 0x168   : > { %17298 = vst [vmem:[#allocation10_spill] sm:$0xff] %v14012_v62  ;;  %v14014_v48 = vadd.f32 %v11629_v0, %v1674_v57  ;;  %4900 = vst.msk [vmem:[#allocation2 + $0x1c] sm:$0xf] %vm4891_vm9, %v17220_v47 }
 0x169   : > { %v11634_v46 = vpop.f32.mrf.mxu0  ;;  %v14016_v52 = vpop.f32.mrf.mxu1  ;;  %4902 = vst.msk [vmem:[#allocation2 + $0x24] sm:$0xf] %vm4891_vm9, %v17220_v47  ;;  %4903 = vst.msk [vmem:[#allocation2 + $0x28] sm:$0xf] %vm4891_vm9, %v17220_v47 }
 0x16a   : > { %17299 = vst [vmem:[#allocation6_spill] sm:$0xff] %v14016_v52  ;;  %v14019_v33 = vadd.f32 %v11634_v46, %v13804_v51  ;;  %4905 = vst.msk [vmem:[#allocation2 + $0x30] sm:$0xf] %vm4891_vm9, %v17220_v47 }
 0x16b   : > { %v2601_v58 = vpop.f32.mrf.mxu0  ;;  %v14021_v38 = vpop.f32.mrf.mxu1  ;;  %4906 = vst.msk [vmem:[#allocation2 + $0x34] sm:$0xf] %vm4891_vm9, %v17220_v47  ;;  %4908 = vst.msk [vmem:[#allocation2 + $0x3c] sm:$0xf] %vm4891_vm9, %v17220_v47 }
 0x16c   : > { %17300 = vst [vmem:[#allocation14_spill] sm:$0xff] %v14021_v38  ;;  %v14024_v32 = vadd.f32 %v2601_v58, %v13816_v20  ;;  %4909 = vst.msk [vmem:[#allocation2 + $0x40] sm:$0xf] %vm4891_vm9, %v17220_v47 }
 0x16d   : > { %v11635_v54 = vpop.f32.mrf.mxu0  ;;  %v11673_v24 = vpop.f32.mrf.mxu1  ;;  %4911 = vst.msk [vmem:[#allocation2 + $0x48] sm:$0xf] %vm4891_vm9, %v17220_v47  ;;  %4912 = vst.msk [vmem:[#allocation2 + $0x4c] sm:$0xf] %vm4891_vm9, %v17220_v47 }
 0x16e   : > { %v14027_v11 = vadd.f32 %v11635_v54, %v13829_v41  ;;  %4914 = vst.msk [vmem:[#allocation2 + $0x54] sm:$0xf] %vm4891_vm9, %v17220_v47  ;;  %4915 = vst.msk [vmem:[#allocation2 + $0x58] sm:$0xf] %vm4891_vm9, %v17220_v47 }
 0x16f   : > { %v14029_v30 = vpop.f32.mrf.mxu0  ;;  %v14031_v0 = vpop.f32.mrf.mxu1  ;;  %4917 = vst.msk [vmem:[#allocation2 + $0x60] sm:$0xf] %vm4891_vm9, %v17220_v47  ;;  %4918 = vst.msk [vmem:[#allocation2 + $0x64] sm:$0xf] %vm4891_vm9, %v17220_v47 }
 0x170   : > { %17301 = vst [vmem:[#allocation7_spill] sm:$0xff] %v14031_v0  ;;  %4920 = vst.msk [vmem:[#allocation2 + $0x6c] sm:$0xf] %vm4891_vm9, %v17220_v47 }
 0x171   : > { %v11638_v15 = vpop.f32.mrf.mxu0  ;;  %v11676_v28 = vpop.f32.mrf.mxu1  ;;  %4921 = vst.msk [vmem:[#allocation2 + $0x70] sm:$0xf] %vm4891_vm9, %v17220_v47  ;;  %4923 = vst.msk [vmem:[#allocation2 + $0x78] sm:$0xf] %vm4891_vm9, %v17220_v47 }
 0x172   : > { %v14034_v51 = vadd.f32 %v11638_v15, %v13842_v31  ;;  %4924 = vst.msk [vmem:[#allocation2 + $0x7c] sm:$0xf] %vm4891_vm9, %v17220_v47  ;;  %4926 = vst.msk [vmem:[#allocation2 + $0x84] sm:$0xf] %vm4891_vm9, %v17220_v47 }
 0x173   : > { %4927 = vst.msk [vmem:[#allocation2 + $0x88] sm:$0xf] %vm4891_vm9, %v17220_v47  ;;  %4929 = vst.msk [vmem:[#allocation2 + $0x90] sm:$0xf] %vm4891_vm9, %v17220_v47  ;;  %v2617_v20 = vpop.f32.mrf.mxu0  ;;  %v3103_v41 = vpop.f32.mrf.mxu1 }
 0x174   : > { %17302 = vst [vmem:[#allocation18_spill] sm:$0xff] %v14034_v51  ;;  %4930 = vst.msk [vmem:[#allocation2 + $0x94] sm:$0xf] %vm4891_vm9, %v17220_v47  ;;  %v14109_v31 = vadd.f32 %v2617_v20, %v13851_v45 }
 0x175   : > { %4932 = vst.msk [vmem:[#allocation2 + $0x9c] sm:$0xf] %vm4891_vm9, %v17220_v47  ;;  %4933 = vst.msk [vmem:[#allocation2 + $0xa0] sm:$0xf] %vm4891_vm9, %v17220_v47  ;;  %v11639_v59 = vpop.f32.mrf.mxu0  ;;  %v11677_v5 = vpop.f32.mrf.mxu1 }
 0x176   : > { %4935 = vst.msk [vmem:[#allocation2 + $0xa8] sm:$0xf] %vm4891_vm9, %v17220_v47  ;;  %4936 = vst.msk [vmem:[#allocation2 + $0xac] sm:$0xf] %vm4891_vm9, %v17220_v47  ;;  %v2735_v57 = vadd.f32 %v11639_v59, %v13858_v6 }
 0x177   : > { %4938 = vst.msk [vmem:[#allocation2 + $0xb4] sm:$0xf] %vm4891_vm9, %v17220_v47  ;;  %4939 = vst.msk [vmem:[#allocation2 + $0xb8] sm:$0xf] %vm4891_vm9, %v17220_v47  ;;  %v14112_v46 = vpop.f32.mrf.mxu0  ;;  %v14114_v58 = vpop.f32.mrf.mxu1 }
 0x178   : > { %4941 = vst.msk [vmem:[#allocation2 + $0xc0] sm:$0xf] %vm4891_vm9, %v17220_v47  ;;  %4942 = vst.msk [vmem:[#allocation2 + $0xc4] sm:$0xf] %vm4891_vm9, %v17220_v47  ;;  %v14116_v54 = vadd.f32 %v11673_v24, %v2735_v57 }
 0x179   : > { %4944 = vst.msk [vmem:[#allocation2 + $0xcc] sm:$0xf] %vm4891_vm9, %v17220_v47  ;;  %4945 = vst.msk [vmem:[#allocation2 + $0xd0] sm:$0xf] %vm4891_vm9, %v17220_v47  ;;  %v11642_v15 = vpop.f32.mrf.mxu0  ;;  %v11680_v37 = vpop.f32.mrf.mxu1 }
 0x17a   : > { %17303 = vst [vmem:[#allocation8_spill] sm:$0xff] %v14109_v31  ;;  %17304 = vst [vmem:[#allocation15_spill] sm:$0xff] %v14114_v58  ;;  %v2738_v0 = vadd.f32 %v11642_v15, %v13869_v49  ;;  %v17305_v31 = vmov 0  }
 0x17b   : > { %v2633_v47 = vpop.f32.mrf.mxu0  ;;  %v3119_v38 = vpop.f32.mrf.mxu1  ;;  %4901 = vst.msk [vmem:[#allocation2 + $0x20] sm:$0x1] %vm4894_vm10, %v17305_v31  ;;  %4895 = vst.msk [vmem:[#allocation2 + $0x8] sm:$0x1] %vm4894_vm10, %v17305_v31 }
 0x17c   : > { %v2736_v45 = vadd.f32 %v2633_v47, %v13876_v13  ;;  %v14120_v20 = vadd.f32 %v11676_v28, %v2738_v0  ;;  %4898 = vst.msk [vmem:[#allocation2 + $0x14] sm:$0x1] %vm4894_vm10, %v17305_v31  ;;  %4904 = vst.msk [vmem:[#allocation2 + $0x2c] sm:$0x1] %vm4894_vm10, %v17305_v31 }
 0x17d   : > { %4907 = vst.msk [vmem:[#allocation2 + $0x38] sm:$0x1] %vm4894_vm10, %v17305_v31  ;;  %4910 = vst.msk [vmem:[#allocation2 + $0x44] sm:$0x1] %vm4894_vm10, %v17305_v31  ;;  %v11643_v6 = vpop.f32.mrf.mxu0  ;;  %v11681_v49 = vpop.f32.mrf.mxu1 }
 0x17e   : > { %4913 = vst.msk [vmem:[#allocation2 + $0x50] sm:$0x1] %vm4894_vm10, %v17305_v31  ;;  %4916 = vst.msk [vmem:[#allocation2 + $0x5c] sm:$0x1] %vm4894_vm10, %v17305_v31  ;;  %v2739_v13 = vadd.f32 %v11643_v6, %v13884_v7  ;;  %v14159_v24 = vadd.f32 %v3103_v41, %v2736_v45 }
 0x17f   : > { %4919 = vst.msk [vmem:[#allocation2 + $0x68] sm:$0x1] %vm4894_vm10, %v17305_v31  ;;  %4922 = vst.msk [vmem:[#allocation2 + $0x74] sm:$0x1] %vm4894_vm10, %v17305_v31  ;;  %v14161_v0 = vpop.f32.mrf.mxu0  ;;  %v14163_v28 = vpop.f32.mrf.mxu1 }
 0x180   : > { %4925 = vst.msk [vmem:[#allocation2 + $0x80] sm:$0x1] %vm4894_vm10, %v17305_v31  ;;  %4928 = vst.msk [vmem:[#allocation2 + $0x8c] sm:$0x1] %vm4894_vm10, %v17305_v31  ;;  %v14165_v47 = vadd.f32 %v11677_v5, %v2739_v13 }
 0x181   : > { %4931 = vst.msk [vmem:[#allocation2 + $0x98] sm:$0x1] %vm4894_vm10, %v17305_v31  ;;  %4934 = vst.msk [vmem:[#allocation2 + $0xa4] sm:$0x1] %vm4894_vm10, %v17305_v31  ;;  %v11646_v59 = vpop.f32.mrf.mxu0  ;;  %v11684_v57 = vpop.f32.mrf.mxu1 }
 0x182   : > { %4937 = vst.msk [vmem:[#allocation2 + $0xb0] sm:$0x1] %vm4894_vm10, %v17305_v31  ;;  %4940 = vst.msk [vmem:[#allocation2 + $0xbc] sm:$0x1] %vm4894_vm10, %v17305_v31  ;;  %v2742_v15 = vadd.f32 %v11646_v59, %v13899_v29 }
 0x183   : > { %4943 = vst.msk [vmem:[#allocation2 + $0xc8] sm:$0x1] %vm4894_vm10, %v17305_v31  ;;  %4946 = vst.msk [vmem:[#allocation2 + $0xd4] sm:$0x1] %vm4894_vm10, %v17305_v31  ;;  %v2649_v58 = vpop.f32.mrf.mxu0  ;;  %v3135_v52 = vpop.f32.mrf.mxu1 }
 0x184   : > { %17306 = vst [vmem:[#allocation9_spill] sm:$0xff] %v14161_v0  ;;  %17307 = vst [vmem:[#allocation20_spill] sm:$0xff] %v14163_v28  ;;  %v2740_v31 = vadd.f32 %v2649_v58, %v13906_v61  ;;  %v14169_v51 = vadd.f32 %v11680_v37, %v2742_v15 }
 0x185   : > { %v11647_v62 = vpop.f32.mrf.mxu0  ;;  %v11685_v7 = vpop.f32.mrf.mxu1 }
 0x186   : > { %v2743_v41 = vadd.f32 %v11647_v62, %v13914_v42  ;;  %v14172_v45 = vadd.f32 %v3119_v38, %v2740_v31 }
 0x187   : > { %v14174_v6 = vpop.f32.mrf.mxu0  ;;  %v14176_v5 = vpop.f32.mrf.mxu1 }
 0x188   : > { %17308 = vst [vmem:[#allocation12_spill] sm:$0xff] %v14174_v6  ;;  %17309 = vst [vmem:[#allocation22_spill] sm:$0xff] %v14176_v5  ;;  %v14178_v13 = vadd.f32 %v11681_v49, %v2743_v41 }
 0x189   : > { %v11650_v28 = vpop.f32.mrf.mxu0  ;;  %v11688_v29 = vpop.f32.mrf.mxu1 }
 0x18a   : > { %v2746_v59 = vadd.f32 %v11650_v28, %v13928_v26 }
 0x18b   : > { %v2665_v0 = vpop.f32.mrf.mxu0  ;;  %v3151_v61 = vpop.f32.mrf.mxu1 }
 0x18c   : > { %v2744_v37 = vadd.f32 %v2665_v0, %v13936_v14  ;;  %v14182_v58 = vadd.f32 %v11684_v57, %v2746_v59 }
 0x18d   : > { %v11651_v15 = vpop.f32.mrf.mxu0  ;;  %v11689_v42 = vpop.f32.mrf.mxu1 }
 0x18e   : > { %v2747_v62 = vadd.f32 %v11651_v15, %v13943_v23  ;;  %v14185_v38 = vadd.f32 %v3135_v52, %v2744_v37 }
 0x18f   : > { %v14187_v31 = vpop.f32.mrf.mxu0  ;;  %v14189_v49 = vpop.f32.mrf.mxu1 }
 0x190   : > { %17310 = vst [vmem:[#allocation13_spill] sm:$0xff] %v14187_v31  ;;  %17311 = vst [vmem:[#allocation27_spill] sm:$0xff] %v14189_v49  ;;  %v14191_v41 = vadd.f32 %v11685_v7, %v2747_v62  ;;  %v5516_v7 = vld [vmem:[%s17206_s3] sm:$0xf] }
 0x191   : > { %v11654_v5 = vpop.f32.mrf.mxu0  ;;  %v11692_v26 = vpop.f32.mrf.mxu1  ;;  %12116 = vmatprep.subr.msk.bf16.mxu0 %vm6016_vm8, %v5516_v7 }
 0x192   : > { %v2750_v28 = vadd.f32 %v11654_v5, %v13955_v40  ;;  %v6310_v40 = vsel %vm6016_vm8, %v5516_v7, 0  ;;  %v5485_v5 = vld [vmem:[#allocation2 + $0x4] sm:$0xf] }
 0x193   : > { %v2681_v6 = vpop.f32.mrf.mxu0  ;;  %v3167_v14 = vpop.f32.mrf.mxu1  ;;  %11835 = vmatpush3.bf16.msra.mxu0 %v6310_v40 }
 0x194   : > { %v2748_v0 = vadd.f32 %v2681_v6, %v13963_v63  ;;  %v14195_v57 = vadd.f32 %v11688_v29, %v2750_v28  ;;  %v5484_v63 = vld [vmem:[#allocation2] sm:$0xf] }
 0x195   : > { %v11655_v59 = vpop.f32.mrf.mxu0  ;;  %v11693_v23 = vpop.f32.mrf.mxu1  ;;  %v10840_v29 = vcombine.low %v5484_v63, %v5485_v5 }
 0x196   : > { %v2751_v52 = vadd.f32 %v11655_v59, %v13970_v2  ;;  %v14198_v37 = vadd.f32 %v3151_v61, %v2748_v0 }
 0x197   : > { %v14203_v15 = vpop.f32.mrf.mxu0  ;;  %v14205_v62 = vpop.f32.mrf.mxu1  ;;  %11836 = vmatprep.mubr.msk.bf16.mxu0 %vm5967_vm11, %v10840_v29 }
 0x198   : > { %17312 = vst [vmem:[#allocation16_spill] sm:$0xff] %v14203_v15  ;;  %17313 = vst [vmem:[#allocation24_spill] sm:$0xff] %v14205_v62  ;;  %v14209_v6 = vadd.f32 %v11689_v42, %v2751_v52 }
 0x199   : > { %v11658_v2 = vpop.f32.mrf.mxu0 }
 0x19a   : > { %v2754_v61 = vadd.f32 %v11658_v2, %v13985_v39  ;;  %v11696_v28 = vpop.f32.mrf.mxu1 }
 0x19b   : > { %v2697_v0 = vpop.f32.mrf.mxu0 }
 0x19c   : > { %v2752_v59 = vadd.f32 %v2697_v0, %v13988_v60  ;;  %v14214_v62 = vadd.f32 %v11692_v26, %v2754_v61  ;;  %v3183_v49 = vpop.f32.mrf.mxu1  ;;  %v5534_v60 = vshrl.u32 %v5484_v63, 16  ;;  %v5537_v26 = vshll.u32 %v5484_v63, 16 }
 0x19d   : > { %v11659_v7 = vpop.f32.mrf.mxu0 }
 0x19e   : > { %v2755_v42 = vadd.f32 %v11659_v7, %v13994_v12  ;;  %v14217_v52 = vadd.f32 %v3167_v14, %v2752_v59  ;;  %v11697_v40 = vpop.f32.mrf.mxu1  ;;  %v5547_v59 = vshrl.u32 %v5485_v5, 16 }
 0x19f   : > { %v14219_v15 = vpop.f32.mrf.mxu0 }
 0x1a0   : > { %17314 = vst [vmem:[#allocation29_spill] sm:$0xff] %v14219_v15  ;;  %v14221_v31 = vadd.f32 %v11693_v23, %v2755_v42  ;;  %v14223_v2 = vpop.f32.mrf.mxu1  ;;  %v5543_v15 = vshll.u32 %v5485_v5, 16 }
 0x1a1   : > { %v11662_v39 = vpop.f32.mrf.mxu0  ;;  %17315 = vst [vmem:[#allocation21_spill] sm:$0xff] %v14223_v2 }
 0x1a2   : > { %v2758_v29 = vadd.f32 %v11662_v39, %v14003_v43  ;;  %v5536_v43 = vrot.slane %v5534_v60, 4  ;;  %v5539_v39 = vrot.slane %v5537_v26, 5 }
 0x1a3   : > { %v2713_v56 = vpop.f32.mrf.mxu0 }
 0x1a4   : > { %v2756_v61 = vadd.f32 %v2713_v56, %v14008_v44  ;;  %v14227_v0 = vadd.f32 %v11696_v28, %v2758_v29  ;;  %v5545_v28 = vrot.slane %v5543_v15, 5  ;;  %v5549_v29 = vrot.slane %v5547_v59, 4 }
 0x1a5   : > { %v11663_v12 = vpop.f32.mrf.mxu0  ;;  %v14229_v14 = vpop.f32.mrf.mxu1 }
 0x1a6   : > { %17316 = vst [vmem:[#allocation23_spill] sm:$0xff] %v14227_v0  ;;  %17317 = vst [vmem:[#allocation25_spill] sm:$0xff] %v14229_v14  ;;  %v2759_v7 = vadd.f32 %v11663_v12, %v14014_v48  ;;  %v14232_v23 = vadd.f32 %v3183_v49, %v2756_v61  ;;  %v5517_v14 = vld [vmem:[#allocation2 + $0x8] sm:$0x1]  ;;  %v5540_v48 = vor.u32 %v5539_v39, %v5536_v43 }
 0x1a7   : > { %v14234_v42 = vpop.f32.mrf.mxu0  ;;  %v14236_v2 = vpop.f32.mrf.mxu1  ;;  %v5550_v49 = vor.u32 %v5549_v29, %v5545_v28  ;;  %v5553_v61 = vshll.u32 %v5517_v14, 16 }
 0x1a8   : > { %17318 = vst [vmem:[#allocation30_spill] sm:$0xff] %v14236_v2  ;;  %v14238_v63 = vadd.f32 %v11697_v40, %v2759_v7  ;;  %v5541_v60 = vrot.slane %v5540_v48, 4 }
 0x1a9   : > { %v14240_v56 = vpop.f32.mrf.mxu0  ;;  %v14242_v44 = vpop.f32.mrf.mxu1  ;;  %v5551_v5 = vrot.slane %v5550_v49, 4  ;;  %v5555_v40 = vrot.slane %v5553_v61, 5 }
 0x1aa   : > { %v5546_v7 = vsel %vm12354_vm4, %v5541_v60, %v5545_v28 }
 0x1ab   : > { %v14244_v0 = vpop.f32.mrf.mxu0  ;;  %v14246_v12 = vpop.f32.mrf.mxu1  ;;  %v5556_v15 = vsel %vm12354_vm4, %v5551_v5, %v5555_v40 }
 0x1ac   : > { %v10808_v43 = vcombine.low %v5546_v7, %v5556_v15  ;;  %v14279_v7 = vld [vmem:[%s17206_s3 + $0x8] sm:$0xf] }
 0x1ad   : > { %v14248_v2 = vpop.f32.mrf.mxu0  ;;  %17323 = vst [vmem:[#allocation37_spill] sm:$0xff] %v14279_v7  ;;  %12117 = vmatprep.subr.msk.bf16.mxu1 %vm6016_vm8, %v14279_v7 }
 0x1ae   : > { %11802 = vmatprep.mubr.msk.bf16.mxu1 %vm5967_vm11, %v10808_v43 }
 0x1af   : > { %v14250_v26 = vpop.f32.mrf.mxu0 }
 0x1b0   : > { %v14256_v59 = vpop.f32.mrf.mxu1 }
 0x1b1   : > { %v14258_v39 = vpop.f32.mrf.mxu0 }
 0x1b2   : > { %v14260_v14 = vpop.f32.mrf.mxu1 }
 0x1b3   : > { %v14263_v29 = vpop.f32.mrf.mxu0 }
 0x1b4   : > { %v14265_v48 = vpop.f32.mrf.mxu1 }
 0x1b5   : > { %17319 = vst [vmem:[#allocation31_spill] sm:$0xff] %v14265_v48  ;;  %v11707_v49 = vpop.f32.mrf.mxu0 }
 0x1b6   : > { %v14268_v61 = vadd.f32 %v11707_v49, %v14116_v54  ;;  %v14270_v28 = vpop.f32.mrf.mxu1 }
 0x1b7   : > { %17321 = vst [vmem:[#allocation35_spill] sm:$0xff] %v14270_v28  ;;  %v14272_v60 = vpop.f32.mrf.mxu0 }
 0x1b8   : > { %17320 = vst [vmem:[#allocation32_spill] sm:$0xff] %v14268_v61  ;;  %v14274_v40 = vpop.f32.mrf.mxu1 }
 0x1b9   : > { %v11710_v5 = vpop.f32.mrf.mxu0  ;;  %17322 = vst [vmem:[#allocation36_spill] sm:$0xff] %v14274_v40 }
 0x1ba   : > { %v14282_v15 = vadd.f32 %v11710_v5, %v14120_v20  ;;  %v14286_v43 = vpop.f32.mrf.mxu1 }
 0x1bb   : > { %v3462_v54 = vpop.f32.mrf.mxu0  ;;  %17325 = vst [vmem:[#allocation39_spill] sm:$0xff] %v14286_v43 }
 0x1bc   : > { %17324 = vst [vmem:[#allocation38_spill] sm:$0xff] %v14282_v15  ;;  %v14289_v49 = vadd.f32 %v3462_v54, %v14159_v24  ;;  %v14291_v28 = vpop.f32.mrf.mxu1 }
 0x1bd   : > { %v11711_v36 = vpop.f32.mrf.mxu0  ;;  %17326 = vst [vmem:[#allocation40_spill] sm:$0xff] %v14291_v28 }
 0x1be   : > { %v14294_v40 = vadd.f32 %v11711_v36, %v14165_v47  ;;  %v14298_v61 = vpop.f32.mrf.mxu1 }
 0x1bf   : > { %v14296_v48 = vpop.f32.mrf.mxu0  ;;  %17328 = vst [vmem:[#allocation42_spill] sm:$0xff] %v14298_v61 }
 0x1c0   : > { %17327 = vst [vmem:[#allocation41_spill] sm:$0xff] %v14294_v40 }
 0x1c1   : > { %v11714_v20 = vpop.f32.mrf.mxu0 }
 0x1c2   : > { %v14301_v5 = vadd.f32 %v11714_v20, %v14169_v51 }
 0x1c3   : > { %v3478_v7 = vpop.f32.mrf.mxu0  ;;  %v14303_v15 = vpop.f32.mrf.mxu1 }
 0x1c4   : > { %17329 = vst [vmem:[#allocation43_spill] sm:$0xff] %v14303_v15  ;;  %v14306_v24 = vadd.f32 %v3478_v7, %v14172_v45 }
 0x1c5   : > { %v11715_v54 = vpop.f32.mrf.mxu0  ;;  %v14308_v43 = vpop.f32.mrf.mxu1 }
 0x1c6   : > { %17330 = vst [vmem:[#allocation44_spill] sm:$0xff] %v14306_v24  ;;  %17331 = vst [vmem:[#allocation45_spill] sm:$0xff] %v14308_v43  ;;  %v14311_v36 = vadd.f32 %v11715_v54, %v14178_v13 }
 0x1c7   : > { %v14313_v47 = vpop.f32.mrf.mxu0  ;;  %v14315_v28 = vpop.f32.mrf.mxu1 }
 0x1c8   : > { %17332 = vst [vmem:[#allocation46_spill] sm:$0xff] %v14311_v36  ;;  %17333 = vst [vmem:[#allocation47_spill] sm:$0xff] %v14315_v28 }
 0x1c9   : > { %v11718_v61 = vpop.f32.mrf.mxu0  ;;  %v14317_v40 = vpop.f32.mrf.mxu1 }
 0x1ca   : > { %17334 = vst [vmem:[#allocation48_spill] sm:$0xff] %v14317_v40  ;;  %v14320_v51 = vadd.f32 %v11718_v61, %v14182_v58 }
 0x1cb   : > { %v3494_v20 = vpop.f32.mrf.mxu0 }
 0x1cc   : > { %17335 = vst [vmem:[#allocation49_spill] sm:$0xff] %v14320_v51  ;;  %v14323_v45 = vadd.f32 %v3494_v20, %v14185_v38  ;;  %v14325_v7 = vpop.f32.mrf.mxu1  ;;  %v17346_v51 = vld [vmem:[#allocation26_spill] sm:$0xff] }
 0x1cd   : > { %17337 = vst [vmem:[#allocation51_spill] sm:$0xff] %v14325_v7  ;;  %v11719_v43 = vpop.f32.mrf.mxu0 }
 0x1ce   : > { %17336 = vst [vmem:[#allocation50_spill] sm:$0xff] %v14323_v45  ;;  %v14328_v13 = vadd.f32 %v11719_v43, %v14191_v41  ;;  %v14330_v54 = vpop.f32.mrf.mxu1 }
 0x1cf   : > { %17339 = vst [vmem:[#allocation53_spill] sm:$0xff] %v14330_v54  ;;  %v14332_v36 = vpop.f32.mrf.mxu0  ;;  %v17344_v54 = vld [vmem:[#allocation17_spill] sm:$0xff] }
 0x1d0   : > { %17338 = vst [vmem:[#allocation52_spill] sm:$0xff] %v14328_v13  ;;  %v14334_v28 = vpop.f32.mrf.mxu1 }
 0x1d1   : > { %17340 = vst [vmem:[#allocation54_spill] sm:$0xff] %v14334_v28  ;;  %v11722_v40 = vpop.f32.mrf.mxu0  ;;  %v17345_v28 = vld [vmem:[#allocation11_spill] sm:$0xff] }
 0x1d2   : > { %v14337_v58 = vadd.f32 %v11722_v40, %v14195_v57  ;;  %v14339_v61 = vpop.f32.mrf.mxu1  ;;  %v1159_v7 = vadd.f32 %v17345_v28, %v17344_v54  ;;  %v17347_v57 = vld [vmem:[#allocation19_spill] sm:$0xff] }
 0x1d3   : > { %17342 = vst [vmem:[#allocation56_spill] sm:$0xff] %v14339_v61  ;;  %v3510_v38 = vpop.f32.mrf.mxu0  ;;  %v1175_v40 = vadd.f32 %v17347_v57, %v17346_v51  ;;  %v17349_v61 = vld [vmem:[#allocation28_spill] sm:$0xff] }
 0x1d4   : > { %17341 = vst [vmem:[#allocation55_spill] sm:$0xff] %v14337_v58  ;;  %v14342_v20 = vadd.f32 %v3510_v38, %v14198_v37  ;;  %v17348_v58 = vld [vmem:[#allocation33_spill] sm:$0xff]  ;;  %v17350_v38 = vld [vmem:[#allocation34_spill] sm:$0xff]  ;;  %v1660_v28 = vadd.f32 %v13938_v3, %v1159_v7  ;;  %v2011_v3 = vadd.f32 %v13853_v55, %v13882_v53  ;;  %v3200_v55 = vadd.f32 %v13996_v17, %v14019_v33  ;;  %v17358_v17 = vld [vmem:[#allocation7_spill] sm:$0xff] }
 0x1d5   : > { %v11723_v45 = vpop.f32.mrf.mxu0  ;;  %v1191_v24 = vadd.f32 %v17349_v61, %v17348_v58  ;;  %v1664_v54 = vadd.f32 %v13965_v18, %v1175_v40  ;;  %v2007_v61 = vadd.f32 %v13821_v10, %v13856_v21  ;;  %v2015_v10 = vadd.f32 %v13878_v25, %v13912_v50  ;;  %v17352_v25 = vld [vmem:[#allocation10_spill] sm:$0xff] }
 0x1d6   : > { %v14345_v41 = vadd.f32 %v11723_v45, %v14209_v6  ;;  %v14347_v43 = vpop.f32.mrf.mxu1  ;;  %v1207_v6 = vadd.f32 %v17350_v38, %v13778_v27  ;;  %v2019_v21 = vadd.f32 %v13908_v8, %v1660_v28  ;;  %v3198_v53 = vadd.f32 %v14000_v16, %v14024_v32  ;;  %v17353_v8 = vld [vmem:[#allocation18_spill] sm:$0xff]  ;;  %v17357_v38 = vld [vmem:[#allocation9_spill] sm:$0xff] }
 0x1d7   : > { %v14349_v13 = vpop.f32.mrf.mxu0  ;;  %v1668_v51 = vadd.f32 %v13990_v19, %v1191_v24  ;;  %v2733_v18 = vadd.f32 %v14112_v46, %v2007_v61  ;;  %v17351_v46 = vld [vmem:[#allocation5_spill] sm:$0xff]  ;;  %v17354_v7 = vld [vmem:[#allocation6_spill] sm:$0xff]  ;;  %v17362_v61 = vld [vmem:[#allocation16_spill] sm:$0xff] }
 0x1d8   : > { %17343 = vst [vmem:[#allocation57_spill] sm:$0xff] %v14345_v41  ;;  %v14357_v15 = vpop.f32.mrf.mxu1  ;;  %v2003_v41 = vadd.f32 %v13784_v4, %v13826_v9  ;;  %v1672_v27 = vadd.f32 %v14010_v1, %v1207_v6  ;;  %v2023_v1 = vadd.f32 %v13940_v22, %v1664_v54  ;;  %v3204_v22 = vadd.f32 %v17354_v7, %v17353_v8  ;;  %v17359_v54 = vld [vmem:[#allocation12_spill] sm:$0xff]  ;;  %v17360_v32 = vld [vmem:[#allocation13_spill] sm:$0xff] }
 0x1d9   : > { %v11726_v37 = vpop.f32.mrf.mxu0  ;;  %v2737_v6 = vadd.f32 %v17357_v38, %v2011_v3  ;;  %v3203_v33 = vadd.f32 %v17358_v17, %v2733_v18  ;;  %v2741_v16 = vadd.f32 %v17359_v54, %v2015_v10  ;;  %v3559_v3 = vadd.f32 %v14240_v56, %v3200_v55  ;;  %v17365_v55 = vld [vmem:[#allocation20_spill] sm:$0xff]  ;;  %v17366_v38 = vld [vmem:[#allocation22_spill] sm:$0xff] }
 0x1da   : > { %v14362_v45 = vadd.f32 %v11726_v37, %v14214_v62  ;;  %v14369_v57 = vpop.f32.mrf.mxu1  ;;  %v2729_v37 = vadd.f32 %v14029_v30, %v2003_v41  ;;  %v2027_v30 = vadd.f32 %v13967_v35, %v1668_v51  ;;  %v2031_v24 = vadd.f32 %v13992_v34, %v1672_v27  ;;  %v17355_v41 = vld [vmem:[#allocation8_spill] sm:$0xff]  ;;  %v17356_v35 = vld [vmem:[#allocation14_spill] sm:$0xff] }
 0x1db   : > { %v3526_v58 = vpop.f32.mrf.mxu0  ;;  %v3202_v40 = vadd.f32 %v17356_v35, %v17355_v41  ;;  %v2745_v51 = vadd.f32 %v17360_v32, %v2019_v21  ;;  %v2749_v27 = vadd.f32 %v17362_v61, %v2023_v1  ;;  %v3557_v18 = vadd.f32 %v14244_v0, %v3198_v53  ;;  %v17364_v41 = vld [vmem:[#allocation15_spill] sm:$0xff]  ;;  %v17371_v54 = vld [vmem:[#allocation30_spill] sm:$0xff] }
 0x1dc   : > { %v14375_v62 = vadd.f32 %v3526_v58, %v14217_v52  ;;  %v14378_v4 = vpop.f32.mrf.mxu1  ;;  %v3199_v50 = vadd.f32 %v17352_v25, %v2729_v37  ;;  %v17363_v37 = vld [vmem:[#allocation29_spill] sm:$0xff]  ;;  %v3207_v1 = vadd.f32 %v17364_v41, %v2737_v6  ;;  %v3211_v35 = vadd.f32 %v17365_v55, %v2741_v16  ;;  %v17380_v41 = vld [vmem:[#allocation40_spill] sm:$0xff]  ;;  %v17382_v55 = vld [vmem:[#allocation43_spill] sm:$0xff] }
 0x1dd   : > { %v11727_v9 = vpop.f32.mrf.mxu0  ;;  %v3215_v0 = vadd.f32 %v17366_v38, %v2745_v51  ;;  %v17369_v6 = vld [vmem:[#allocation21_spill] sm:$0xff]  ;;  %v4283_v16 = vadd.f32 %v17371_v54, %v3557_v18  ;;  %v17372_v51 = vld [vmem:[#allocation32_spill] sm:$0xff] }
 0x1de   : > { %v14384_v19 = vadd.f32 %v11727_v9, %v14221_v31  ;;  %v3201_v31 = vadd.f32 %v17351_v46, %v14027_v11  ;;  %v17361_v11 = vld [vmem:[#allocation23_spill] sm:$0xff]  ;;  %v2753_v9 = vadd.f32 %v17363_v37, %v2027_v30  ;;  %v2757_v46 = vadd.f32 %v14234_v42, %v2031_v24  ;;  %v17383_v38 = vld [vmem:[#allocation44_spill] sm:$0xff] }
 0x1df   : > { %v14391_v52 = vpop.f32.mrf.mxu0  ;;  %v3558_v21 = vadd.f32 %v14250_v26, %v3199_v50  ;;  %v3563_v30 = vadd.f32 %v14258_v39, %v3204_v22  ;;  %v3561_v42 = vadd.f32 %v14263_v29, %v3202_v40  ;;  %v3566_v29 = vadd.f32 %v14296_v48, %v3207_v1  ;;  %v17374_v37 = vld [vmem:[#allocation35_spill] sm:$0xff] }
 0x1e0   : > { %v14406_v34 = vpop.f32.mrf.mxu1  ;;  %v3560_v10 = vadd.f32 %v14248_v2, %v3201_v31  ;;  %v3562_v2 = vadd.f32 %v14272_v60, %v3203_v33  ;;  %v17368_v31 = vld [vmem:[#allocation24_spill] sm:$0xff]  ;;  %v3227_v39 = vadd.f32 %v17369_v6, %v2757_v46  ;;  %v3570_v48 = vadd.f32 %v14313_v47, %v3211_v35  ;;  %v17375_v46 = vld [vmem:[#allocation38_spill] sm:$0xff]  ;;  %v17378_v47 = vld [vmem:[#allocation39_spill] sm:$0xff] }
 0x1e1   : > { %v11730_v28 = vpop.f32.mrf.mxu0  ;;  %v3223_v50 = vadd.f32 %v17368_v31, %v2753_v9  ;;  %v4284_v60 = vadd.f32 %v14246_v12, %v3558_v21  ;;  %v14447_v33 = vadd.f32 %v14260_v14, %v3561_v42  ;;  %v3574_v12 = vadd.f32 %v14332_v36, %v3215_v0  ;;  %v14465_v14 = vld [vmem:[%s17205_s2] ss:$0 sm:$0xff]  ;;  %v17379_v21 = vld [vmem:[#allocation41_spill] sm:$0xff] }
 0x1e2   : > { %v14412_v58 = vadd.f32 %v11730_v28, %v17361_v11  ;;  %v14418_v25 = vpop.f32.mrf.mxu1  ;;  %v17370_v28 = vld [vmem:[#allocation25_spill] sm:$0xff]  ;;  %v4286_v32 = vadd.f32 %v14242_v44, %v3560_v10  ;;  %v17373_v11 = vld [vmem:[#allocation31_spill] sm:$0xff]  ;;  %v14455_v9 = vadd.f32 %v17374_v37, %v3562_v2  ;;  %v14473_v10 = vadd.f32 %v17378_v47, %v14289_v49 }
 0x1e3   : > { %v3542_v8 = vpop.f32.mrf.mxu0  ;;  %v4285_v17 = vadd.f32 %v17370_v28, %v3559_v3  ;;  %v14451_v61 = vadd.f32 %v17373_v11, %v17372_v51  ;;  %v17376_v3 = vld [vmem:[#allocation36_spill] sm:$0xff]  ;;  %v14477_v1 = vadd.f32 %v17380_v41, %v17379_v21  ;;  %v14484_v35 = vadd.f32 %v17382_v55, %v14301_v5  ;;  %v17384_v0 = vld [vmem:[#allocation45_spill] sm:$0xff]  ;;  %v17386_v49 = vld [vmem:[#allocation47_spill] sm:$0xff] }
 0x1e4   : > { %v14424_v7 = vadd.f32 %v3542_v8, %v14232_v23  ;;  %v14429_v24 = vpop.f32.mrf.mxu1  ;;  %v17367_v23 = vld [vmem:[#allocation27_spill] sm:$0xff]  ;;  %v14459_v44 = vadd.f32 %v17376_v3, %v17375_v46  ;;  %v17377_v8 = vld [vmem:[#allocation37_spill] sm:$0xff]  ;;  %v14488_v2 = vadd.f32 %v17384_v0, %v17383_v38  ;;  %v17390_v3 = vld [vmem:[#allocation50_spill] sm:$0xff] }
 0x1e5   : > { %v11731_v56 = vpop.f32.mrf.mxu0  ;;  %v3219_v53 = vadd.f32 %v17367_v23, %v2749_v27  ;;  %v14469_v18 = vsel %vm6016_vm8, %v17377_v8, 0  ;;  %v17385_v23 = vld [vmem:[#allocation46_spill] sm:$0xff]  ;;  %v17388_v5 = vld [vmem:[#allocation49_spill] sm:$0xff]  ;;  %v17389_v51 = vld [vmem:[#allocation51_spill] sm:$0xff] }
 0x1e6   : > { %v14435_v26 = vadd.f32 %v11731_v56, %v14238_v63  ;;  %v4255_v22 = vpop.f32.mrf.mxu1  ;;  %v4289_v63 = vadd.f32 %v14256_v59, %v3563_v30  ;;  %v17381_v30 = vld [vmem:[#allocation42_spill] sm:$0xff]  ;;  %v14492_v31 = vadd.f32 %v17386_v49, %v17385_v23  ;;  %v14505_v11 = vadd.f32 %v17389_v51, %v17388_v5  ;;  %v17394_v21 = vld [vmem:[#allocation56_spill] sm:$0xff]  ;;  %v17395_v38 = vld [vmem:[#allocation55_spill] sm:$0xff] }
 0x1e7   : > { %v3545_v40 = vpop.f32.mrf.mxu0  ;;  %v14480_v36 = vadd.f32 %v17381_v30, %v3566_v29  ;;  %v3578_v6 = vadd.f32 %v14349_v13, %v3219_v53  ;;  %v14498_v29 = vld [vmem:[%s17205_s2 + $0x1] ss:$0 sm:$0xff]  ;;  %v17393_v8 = vld [vmem:[#allocation54_spill] sm:$0xff]  ;;  %v14517_v41 = vadd.f32 %v17394_v21, %v3574_v12  ;;  %v14528_v49 = vadd.f32 %v14357_v15, %v14342_v20 }
 0x1e8   : > { %v11764_v27 = vpop.f32.mrf.mxu1  ;;  %v17392_v53 = vld [vmem:[#allocation52_spill] sm:$0xff]  ;;  %v14541_v15 = vadd.f32 %v14406_v34, %v14362_v45  ;;  %v14545_v20 = vadd.f32 %v14418_v25, %v14375_v62 }
 0x1e9   : > { %v14514_v47 = vadd.f32 %v17393_v8, %v17392_v53  ;;  %v14556_v45 = vadd.f32 %v11764_v27, %v14412_v58 }
 0x1ea   : > { %v4268_v42 = vpop.f32.mrf.mxu1 }
 0x1eb   : > { %v11770_v59 = vpop.f32.mrf.mxu0  ;;  %v14559_v62 = vadd.f32 %v4268_v42, %v14424_v7 }
 0x1ec   : > { %v4755_v56 = vadd.f32 %v11770_v59, %v4285_v17  ;;  %v17387_v17 = vld [vmem:[#allocation48_spill] sm:$0xff]  ;;  %v17391_v59 = vld [vmem:[#allocation53_spill] sm:$0xff]  ;;  %v11765_v30 = vpop.f32.mrf.mxu1 }
 0x1ed   : > { %v4626_v28 = vpop.f32.mrf.mxu0  ;;  %v14501_v54 = vadd.f32 %v17387_v17, %v3570_v48  ;;  %v14510_v13 = vadd.f32 %v17391_v59, %v17390_v3  ;;  %v3582_v48 = vadd.f32 %v14391_v52, %v3223_v50  ;;  %v14535_v52 = vadd.f32 %v14378_v4, %v3578_v6 }
 0x1ee   : > { %v4792_v37 = vmul.f32 %v14465_v14, %v4755_v56  ;;  %v4753_v46 = vadd.f32 %v4626_v28, %v4283_v16  ;;  %v14522_v56 = vadd.f32 %v14347_v43, %v17395_v38  ;;  %v17396_v28 = vld [vmem:[#allocation57_spill] sm:$0xff]  ;;  %v3586_v50 = vadd.f32 %v3545_v40, %v3227_v39  ;;  %v4271_v39 = vpop.f32.mrf.mxu1 }
 0x1ef   : > { %v11771_v55 = vpop.f32.mrf.mxu0  ;;  %v14532_v12 = vadd.f32 %v14369_v57, %v17396_v28  ;;  %v14549_v57 = vadd.f32 %v14429_v24, %v14384_v19  ;;  %v14551_v4 = vadd.f32 %v4255_v22, %v3582_v48  ;;  %v14562_v34 = vadd.f32 %v11765_v30, %v14435_v26  ;;  %v5379_v30 = vld [vmem:[#allocation2 + $0x18] sm:$0xf] }
 0x1f0   : > { %v4829_v16 = vadd.f32 %v14498_v29, %v4792_v37  ;;  %v4790_v0 = vmul.f32 %v14465_v14, %v4753_v46  ;;  %v4756_v23 = vadd.f32 %v11771_v55, %v4286_v32  ;;  %v14564_v24 = vadd.f32 %v4271_v39, %v3586_v50 }
 0x1f1   : > { %v4629_v43 = vpop.f32.mrf.mxu0 }
 0x1f2   : > { %v4861_v17 = vmax.f32 %v4829_v16, 0.0  ;;  %v4827_v5 = vadd.f32 %v14498_v29, %v4790_v0  ;;  %v4793_v32 = vmul.f32 %v14465_v14, %v4756_v23  ;;  %v4754_v51 = vadd.f32 %v4629_v43, %v4284_v60 }
 0x1f3   : > { %v11774_v40 = vpop.f32.mrf.mxu0 }
 0x1f4   : > { %v11158_v6 = vpack.c.bf16 %v4861_v17, %v4861_v17  ;;  %v4859_v37 = vmax.f32 %v4827_v5, 0.0  ;;  %v4830_v60 = vadd.f32 %v14498_v29, %v4793_v32  ;;  %v4791_v46 = vmul.f32 %v14465_v14, %v4754_v51  ;;  %v5370_v17 = vld [vmem:[#allocation2 + $0xc] sm:$0xf] }
 0x1f5   : > { %v4759_v19 = vadd.f32 %v11774_v40, %v4289_v63  ;;  %v4642_v25 = vpop.f32.mrf.mxu0 }
 0x1f6   : > { %v5064_v22 = vshrl.u32 %v11158_v6, 16  ;;  %v11156_v3 = vpack.c.bf16 %v4859_v37, %v4859_v37  ;;  %v4862_v59 = vmax.f32 %v4830_v60, 0.0  ;;  %v5067_v53 = vshll.u32 %v11158_v6, 16 }
 0x1f7   : > { %v4828_v8 = vadd.f32 %v14498_v29, %v4791_v46  ;;  %v4796_v21 = vmul.f32 %v14465_v14, %v4759_v19  ;;  %v4757_v58 = vadd.f32 %v4642_v25, %v14447_v33  ;;  %v11775_v27 = vpop.f32.mrf.mxu0  ;;  %v5383_v25 = vld [vmem:[#allocation2 + $0x20] sm:$0x1] }
 0x1f8   : > { %v5066_v7 = vrot.slane %v5064_v22, 7  ;;  %v5047_v42 = vshrl.u32 %v11156_v3, 16  ;;  %v5050_v48 = vshll.u32 %v11156_v3, 16  ;;  %v11159_v26 = vpack.c.bf16 %v4862_v59, %v4862_v59 }
 0x1f9   : > { %v4860_v55 = vmax.f32 %v4828_v8, 0.0  ;;  %v4833_v38 = vadd.f32 %v14498_v29, %v4796_v21  ;;  %v4794_v16 = vmul.f32 %v14465_v14, %v4757_v58  ;;  %v4760_v0 = vadd.f32 %v11775_v27, %v14451_v61  ;;  %v4645_v33 = vpop.f32.mrf.mxu0 }
 0x1fa   : > { %v5069_v23 = vor.u32 %v5067_v53, %v5066_v7  ;;  %v5070_v28 = vrot.slane %v5066_v7, 4  ;;  %v5049_v50 = vrot.slane %v5047_v42, 7  ;;  %v5072_v43 = vshrl.u32 %v11159_v26, 16 }
 0x1fb   : > { %v5075_v5 = vshll.u32 %v11159_v26, 16  ;;  %v11157_v32 = vpack.c.bf16 %v4860_v55, %v4860_v55  ;;  %v4865_v51 = vmax.f32 %v4833_v38, 0.0  ;;  %v4831_v39 = vadd.f32 %v14498_v29, %v4794_v16  ;;  %v11778_v40 = vpop.f32.mrf.mxu0 }
 0x1fc   : > { %v5380_v6 = vsel %vm14571_vm15, %v5069_v23, %v5379_v30  ;;  %v5052_v37 = vor.u32 %v5050_v48, %v5049_v50  ;;  %v5053_v60 = vrot.slane %v5049_v50, 4  ;;  %v5074_v46 = vrot.slane %v5072_v43, 7  ;;  %v5376_v23 = vld [vmem:[#allocation2 + $0x14] sm:$0x1] }
 0x1fd   : > { %5381 = vst [vmem:[#allocation2 + $0x18] sm:$0xf] %v5380_v6  ;;  %v5055_v22 = vshrl.u32 %v11157_v32, 16  ;;  %v5058_v3 = vshll.u32 %v11157_v32, 16  ;;  %v11162_v59 = vpack.c.bf16 %v4865_v51, %v4865_v51  ;;  %v4863_v53 = vmax.f32 %v4831_v39, 0.0  ;;  %v4658_v8 = vpop.f32.mrf.mxu0 }
 0x1fe   : > { %v5371_v21 = vsel %vm14571_vm15, %v5052_v37, %v5370_v17  ;;  %v5077_v58 = vor.u32 %v5075_v5, %v5074_v46  ;;  %v5079_v27 = vrot.slane %v5074_v46, 4  ;;  %v4797_v7 = vmul.f32 %v14465_v14, %v4760_v0  ;;  %v5393_v39 = vld [vmem:[#allocation2 + $0x30] sm:$0xf] }
 0x1ff   : > { %5372 = vst [vmem:[#allocation2 + $0xc] sm:$0xf] %v5371_v21  ;;  %v5057_v42 = vrot.slane %v5055_v22, 7  ;;  %v5098_v48 = vshrl.u32 %v11162_v59, 16  ;;  %v5101_v26 = vshll.u32 %v11162_v59, 16  ;;  %v11160_v30 = vpack.c.bf16 %v4863_v53, %v4863_v53  ;;  %v11779_v55 = vpop.f32.mrf.mxu0 }
 0x200   : > { %v5078_v38 = vsel %vm14583_vm0, %v5070_v28, %v5077_v58  ;;  %v5384_v16 = vsel %vm14589_vm1, %v5079_v27, %v5383_v25  ;;  %v4834_v50 = vadd.f32 %v14498_v29, %v4797_v7  ;;  %v4758_v43 = vadd.f32 %v4645_v33, %v14455_v9 }
 0x201   : > { %5382 = vst.msk [vmem:[#allocation2 + $0x1c] sm:$0xf] %vm4891_vm9, %v5078_v38  ;;  %5385 = vst [vmem:[#allocation2 + $0x20] sm:$0x1] %v5384_v16  ;;  %v5060_v0 = vor.u32 %v5058_v3, %v5057_v42  ;;  %v5062_v17 = vrot.slane %v5057_v42, 4  ;;  %v5100_v5 = vrot.slane %v5098_v48, 7  ;;  %v4661_v51 = vpop.f32.mrf.mxu0  ;;  %v4763_v46 = vadd.f32 %v11778_v40, %v14459_v44 }
 0x202   : > { %v5081_v32 = vshrl.u32 %v11160_v30, 16  ;;  %v5084_v6 = vshll.u32 %v11160_v30, 16  ;;  %v4866_v37 = vmax.f32 %v4834_v50, 0.0  ;;  %v4795_v28 = vmul.f32 %v14465_v14, %v4758_v43  ;;  %v5386_v40 = vld [vmem:[#allocation2 + $0x24] sm:$0xf] }
 0x203   : > { %v5061_v25 = vsel %vm14583_vm0, %v5053_v60, %v5060_v0  ;;  %v5377_v9 = vsel %vm14589_vm1, %v5062_v17, %v5376_v23  ;;  %v5103_v33 = vor.u32 %v5101_v26, %v5100_v5  ;;  %v5104_v22 = vrot.slane %v5100_v5, 4  ;;  %v11782_v3 = vpop.f32.mrf.mxu0 }
 0x204   : > { %5373 = vst.msk [vmem:[#allocation2 + $0x10] sm:$0xf] %vm4891_vm9, %v5061_v25  ;;  %5378 = vst [vmem:[#allocation2 + $0x14] sm:$0x1] %v5377_v9  ;;  %v14610_v59 = vrot.slane %v5081_v32, 7  ;;  %v11163_v53 = vpack.c.bf16 %v4866_v37, %v4866_v37  ;;  %v4832_v21 = vadd.f32 %v14498_v29, %v4795_v28  ;;  %v4800_v58 = vmul.f32 %v14465_v14, %v4763_v46 }
 0x205   : > { %v5394_v44 = vsel %vm14571_vm15, %v5103_v33, %v5393_v39  ;;  %v4761_v60 = vadd.f32 %v4658_v8, %v14473_v10  ;;  %v4764_v27 = vadd.f32 %v11779_v55, %v14477_v1  ;;  %v4762_v7 = vadd.f32 %v4661_v51, %v14480_v36  ;;  %v4674_v38 = vpop.f32.mrf.mxu0  ;;  %v5397_v36 = vld [vmem:[#allocation2 + $0x38] sm:$0x1] }
 0x206   : > { %5395 = vst [vmem:[#allocation2 + $0x30] sm:$0xf] %v5394_v44  ;;  %v5086_v42 = vor.u32 %v5084_v6, %v14610_v59  ;;  %v5087_v48 = vrot.slane %v14610_v59, 4  ;;  %v5106_v26 = vshrl.u32 %v11163_v53, 16  ;;  %v5109_v30 = vshll.u32 %v11163_v53, 16 }
 0x207   : > { %v4864_v16 = vmax.f32 %v4832_v21, 0.0  ;;  %v4837_v23 = vadd.f32 %v14498_v29, %v4800_v58  ;;  %v4798_v50 = vmul.f32 %v14465_v14, %v4761_v60  ;;  %v4801_v43 = vmul.f32 %v14465_v14, %v4764_v27  ;;  %v11783_v28 = vpop.f32.mrf.mxu0  ;;  %v5390_v60 = vld [vmem:[#allocation2 + $0x2c] sm:$0x1] }
 0x208   : > { %v5387_v10 = vsel %vm14571_vm15, %v5086_v42, %v5386_v40  ;;  %v5108_v1 = vrot.slane %v5106_v26, 7  ;;  %v4799_v8 = vmul.f32 %v14465_v14, %v4762_v7  ;;  %v4767_v55 = vadd.f32 %v11782_v3, %v14484_v35 }
 0x209   : > { %5388 = vst [vmem:[#allocation2 + $0x24] sm:$0xf] %v5387_v10  ;;  %v11161_v0 = vpack.c.bf16 %v4864_v16, %v4864_v16  ;;  %v4869_v17 = vmax.f32 %v4837_v23, 0.0  ;;  %v4835_v5 = vadd.f32 %v14498_v29, %v4798_v50  ;;  %v4838_v32 = vadd.f32 %v14498_v29, %v4801_v43  ;;  %v5407_v43 = vld [vmem:[#allocation2 + $0x48] sm:$0xf] }
 0x20a   : > { %v5111_v51 = vor.u32 %v5109_v30, %v5108_v1  ;;  %v5113_v39 = vrot.slane %v5108_v1, 4  ;;  %v4836_v6 = vadd.f32 %v14498_v29, %v4799_v8  ;;  %v4804_v37 = vmul.f32 %v14465_v14, %v4767_v55 }
 0x20b   : > { %v5089_v46 = vshrl.u32 %v11161_v0, 16  ;;  %v5092_v25 = vshll.u32 %v11161_v0, 16  ;;  %v11166_v9 = vpack.c.bf16 %v4869_v17, %v4869_v17  ;;  %v4867_v33 = vmax.f32 %v4835_v5, 0.0 }
 0x20c   : > { %v5112_v35 = vsel %vm14583_vm0, %v5104_v22, %v5111_v51  ;;  %v5398_v3 = vsel %vm14589_vm1, %v5113_v39, %v5397_v36  ;;  %v4870_v59 = vmax.f32 %v4838_v32, 0.0  ;;  %v4868_v53 = vmax.f32 %v4836_v6, 0.0  ;;  %v4677_v22 = vpop.f32.mrf.mxu0 }
 0x20d   : > { %5396 = vst.msk [vmem:[#allocation2 + $0x34] sm:$0xf] %vm4891_vm9, %v5112_v35  ;;  %5399 = vst [vmem:[#allocation2 + $0x38] sm:$0x1] %v5398_v3  ;;  %v5091_v21 = vrot.slane %v5089_v46, 7  ;;  %v5132_v58 = vshrl.u32 %v11166_v9, 16  ;;  %v11164_v40 = vpack.c.bf16 %v4867_v33, %v4867_v33  ;;  %v4841_v42 = vadd.f32 %v14498_v29, %v4804_v37 }
 0x20e   : > { %v5135_v44 = vshll.u32 %v11166_v9, 16  ;;  %v11167_v27 = vpack.c.bf16 %v4870_v59, %v4870_v59  ;;  %v11165_v7 = vpack.c.bf16 %v4868_v53, %v4868_v53  ;;  %v4765_v26 = vadd.f32 %v4674_v38, %v14488_v2  ;;  %v11786_v39 = vpop.f32.mrf.mxu0  ;;  %v5400_v37 = vld [vmem:[#allocation2 + $0x3c] sm:$0xf]  ;;  %v5411_v46 = vld [vmem:[#allocation2 + $0x50] sm:$0x1] }
 0x20f   : > { %v5094_v30 = vor.u32 %v5092_v25, %v5091_v21  ;;  %v5096_v16 = vrot.slane %v5091_v21, 4  ;;  %v5134_v23 = vrot.slane %v5132_v58, 7  ;;  %v5115_v50 = vshrl.u32 %v11164_v40, 16  ;;  %v5404_v53 = vld [vmem:[#allocation2 + $0x44] sm:$0x1] }
 0x210   : > { %v5118_v10 = vshll.u32 %v11164_v40, 16  ;;  %v5140_v1 = vshrl.u32 %v11167_v27, 16  ;;  %v5143_v36 = vshll.u32 %v11167_v27, 16  ;;  %v5123_v8 = vshrl.u32 %v11165_v7, 16 }
 0x211   : > { %v5095_v55 = vsel %vm14583_vm0, %v5087_v48, %v5094_v30  ;;  %v5391_v0 = vsel %vm14589_vm1, %v5096_v16, %v5390_v60  ;;  %v5137_v17 = vor.u32 %v5135_v44, %v5134_v23  ;;  %v5138_v5 = vrot.slane %v5134_v23, 4  ;;  %v10921_v60 = vld [vmem:[%s17206_s3 + $0xc] sm:$0xf] }
 0x212   : > { %5389 = vst.msk [vmem:[#allocation2 + $0x28] sm:$0xf] %vm4891_vm9, %v5095_v55  ;;  %5392 = vst [vmem:[#allocation2 + $0x2c] sm:$0x1] %v5391_v0  ;;  %v5117_v2 = vrot.slane %v5115_v50, 7  ;;  %v5142_v38 = vrot.slane %v5140_v1, 7  ;;  %v4802_v48 = vmul.f32 %v14465_v14, %v4765_v26  ;;  %v4768_v9 = vadd.f32 %v11783_v28, %v14492_v31  ;;  %12118 = vmatprep.subr.msk.bf16.mxu0 %vm6016_vm8, %v10921_v60 }
 0x213   : > { %v5125_v32 = vrot.slane %v5123_v8, 7  ;;  %v5126_v51 = vshll.u32 %v11165_v7, 16  ;;  %v5408_v6 = vsel %vm14571_vm15, %v5137_v17, %v5407_v43  ;;  %v4873_v25 = vmax.f32 %v4841_v42, 0.0  ;;  %v4690_v42 = vpop.f32.mrf.mxu0  ;;  %v5486_v26 = vld [vmem:[#allocation2 + $0xc] sm:$0xf] }
 0x214   : > { %5409 = vst [vmem:[#allocation2 + $0x48] sm:$0xf] %v5408_v6  ;;  %v5120_v33 = vor.u32 %v5118_v10, %v5117_v2  ;;  %v5121_v35 = vrot.slane %v5117_v2, 4  ;;  %v5145_v3 = vor.u32 %v5143_v36, %v5142_v38  ;;  %v5147_v59 = vrot.slane %v5142_v38, 4  ;;  %v5414_v60 = vld [vmem:[#allocation2 + $0x54] sm:$0xf] }
 0x215   : > { %v5128_v21 = vor.u32 %v5126_v51, %v5125_v32  ;;  %v5130_v58 = vrot.slane %v5125_v32, 4  ;;  %v11170_v44 = vpack.c.bf16 %v4873_v25, %v4873_v25  ;;  %v4839_v40 = vadd.f32 %v14498_v29, %v4802_v48  ;;  %v14672_v6 = vpop.f32.mrf.mxu0  ;;  %v14678_v48 = vld [vmem:[#allocation2 + $0x10] sm:$0xf] }
 0x216   : > { %v5401_v27 = vsel %vm14571_vm15, %v5120_v33, %v5400_v37  ;;  %v5146_v31 = vsel %vm14583_vm0, %v5138_v5, %v5145_v3  ;;  %v5412_v28 = vsel %vm14589_vm1, %v5147_v59, %v5411_v46  ;;  %v4805_v7 = vmul.f32 %v14465_v14, %v4768_v9  ;;  %v5421_v5 = vld [vmem:[#allocation2 + $0x60] sm:$0xf] }
 0x217   : > { %5402 = vst [vmem:[#allocation2 + $0x3c] sm:$0xf] %v5401_v27  ;;  %5410 = vst.msk [vmem:[#allocation2 + $0x4c] sm:$0xf] %vm4891_vm9, %v5146_v31  ;;  %v5129_v30 = vsel %vm14583_vm0, %v5121_v35, %v5128_v21  ;;  %v5405_v16 = vsel %vm14589_vm1, %v5130_v58, %v5404_v53  ;;  %v5166_v23 = vshrl.u32 %v11170_v44, 16  ;;  %v5169_v50 = vshll.u32 %v11170_v44, 16 }
 0x218   : > { %5413 = vst [vmem:[#allocation2 + $0x50] sm:$0x1] %v5412_v28  ;;  %5403 = vst.msk [vmem:[#allocation2 + $0x40] sm:$0xf] %vm4891_vm9, %v5129_v30  ;;  %v4871_v43 = vmax.f32 %v4839_v40, 0.0  ;;  %v4842_v10 = vadd.f32 %v14498_v29, %v4805_v7  ;;  %v4766_v1 = vadd.f32 %v4677_v22, %v14501_v54  ;;  %v4771_v36 = vadd.f32 %v11786_v39, %v14505_v11  ;;  %v4693_v40 = vpop.f32.mrf.mxu0 }
 0x219   : > { %5406 = vst [vmem:[#allocation2 + $0x44] sm:$0x1] %v5405_v16  ;;  %v5168_v8 = vrot.slane %v5166_v23, 7  ;;  %v4769_v55 = vadd.f32 %v4690_v42, %v14510_v13  ;;  %v5558_v0 = vshrl.u32 %v5486_v26, 16  ;;  %v5561_v17 = vshll.u32 %v5486_v26, 16 }
 0x21a   : > { %v11168_v2 = vpack.c.bf16 %v4871_v43, %v4871_v43  ;;  %v4874_v38 = vmax.f32 %v4842_v10, 0.0  ;;  %v4803_v32 = vmul.f32 %v14465_v14, %v4766_v1  ;;  %v4808_v51 = vmul.f32 %v14465_v14, %v4771_v36  ;;  %v5488_v44 = vld [vmem:[#allocation2 + $0x18] sm:$0xf] }
 0x21b   : > { %v5171_v37 = vor.u32 %v5169_v50, %v5168_v8  ;;  %v5172_v46 = vrot.slane %v5168_v8, 4  ;;  %v4806_v54 = vmul.f32 %v14465_v14, %v4769_v55  ;;  %v14675_v22 = vrot.slane %v5558_v0, 4  ;;  %v5425_v50 = vld [vmem:[#allocation2 + $0x68] sm:$0x1] }
 0x21c   : > { %v5149_v11 = vshrl.u32 %v11168_v2, 16  ;;  %v5152_v39 = vshll.u32 %v11168_v2, 16  ;;  %v11171_v13 = vpack.c.bf16 %v4874_v38, %v4874_v38  ;;  %v4840_v25 = vadd.f32 %v14498_v29, %v4803_v32 }
 0x21d   : > { %v5422_v9 = vsel %vm14571_vm15, %v5171_v37, %v5421_v5  ;;  %v4845_v33 = vadd.f32 %v14498_v29, %v4808_v51  ;;  %v4843_v35 = vadd.f32 %v14498_v29, %v4806_v54  ;;  %v14684_v3 = vrot.slane %v5561_v17, 5  ;;  %v11790_v5 = vpop.f32.mrf.mxu0  ;;  %v14691_v51 = vld [vmem:[#allocation2 + $0x1c] sm:$0xf] }
 0x21e   : > { %5423 = vst [vmem:[#allocation2 + $0x60] sm:$0xf] %v5422_v9  ;;  %v5151_v59 = vrot.slane %v5149_v11, 7  ;;  %v5174_v53 = vshrl.u32 %v11171_v13, 16  ;;  %v5177_v21 = vshll.u32 %v11171_v13, 16  ;;  %v4872_v58 = vmax.f32 %v4840_v25, 0.0 }
 0x21f   : > { %v4877_v27 = vmax.f32 %v4845_v33, 0.0  ;;  %v4875_v31 = vmax.f32 %v4843_v35, 0.0  ;;  %v5571_v28 = vshrl.u32 %v14678_v48, 16  ;;  %v10841_v7 = vcombine.low %v5486_v26, %v14678_v48  ;;  %v5435_v9 = vld [vmem:[#allocation2 + $0x78] sm:$0xf] }
 0x220   : > { %v5154_v42 = vor.u32 %v5152_v39, %v5151_v59  ;;  %v5155_v30 = vrot.slane %v5151_v59, 4  ;;  %v5176_v16 = vrot.slane %v5174_v53, 7  ;;  %v11169_v23 = vpack.c.bf16 %v4872_v58, %v4872_v58  ;;  %v5418_v39 = vld [vmem:[#allocation2 + $0x5c] sm:$0x1] }
 0x221   : > { %v11174_v43 = vpack.c.bf16 %v4877_v27, %v4877_v27  ;;  %v11172_v10 = vpack.c.bf16 %v4875_v31, %v4875_v31  ;;  %11837 = vmatmul.mubr.msk.bf16.vlgmr.msra.gmra.mxu0 %vm5967_vm11, %v10841_v7  ;;  %v5582_v1 = vshrl.u32 %v5488_v44, 16  ;;  %v5585_v36 = vshll.u32 %v5488_v44, 16  ;;  %v4706_v27 = vpop.f32.mrf.mxu0 }
 0x222   : > { %v5415_v8 = vsel %vm14571_vm15, %v5154_v42, %v5414_v60  ;;  %v5179_v55 = vor.u32 %v5177_v21, %v5176_v16  ;;  %v5181_v0 = vrot.slane %v5176_v16, 4  ;;  %v5157_v17 = vshrl.u32 %v11169_v23, 16  ;;  %v5428_v21 = vld [vmem:[#allocation2 + $0x6c] sm:$0xf] }
 0x223   : > { %5416 = vst [vmem:[#allocation2 + $0x54] sm:$0xf] %v5415_v8  ;;  %v5160_v26 = vshll.u32 %v11169_v23, 16  ;;  %v5200_v2 = vshrl.u32 %v11174_v43, 16  ;;  %v5203_v38 = vshll.u32 %v11174_v43, 16  ;;  %v5183_v32 = vshrl.u32 %v11172_v10, 16 }
 0x224   : > { %v5180_v37 = vsel %vm14583_vm0, %v5172_v46, %v5179_v55  ;;  %v5426_v54 = vsel %vm14589_vm1, %v5181_v0, %v5425_v50  ;;  %v5159_v11 = vrot.slane %v5157_v17, 7  ;;  %v5186_v13 = vshll.u32 %v11172_v10, 16  ;;  %v5490_v23 = vld [vmem:[#allocation2 + $0x24] sm:$0xf] }
 0x225   : > { %5424 = vst.msk [vmem:[#allocation2 + $0x64] sm:$0xf] %vm4891_vm9, %v5180_v37  ;;  %5427 = vst [vmem:[#allocation2 + $0x68] sm:$0x1] %v5426_v54  ;;  %v14698_v25 = vrot.slane %v5200_v2, 7  ;;  %v14700_v33 = vrot.slane %v5183_v32, 7  ;;  %v10842_v60 = vcombine.low %v5488_v44, %v14691_v51  ;;  %v4772_v44 = vadd.f32 %v14672_v6, %v14514_v47 }
 0x226   : > { %v14702_v35 = vrot.slane %v5582_v1, 4  ;;  %v14704_v59 = vrot.slane %v5585_v36, 5  ;;  %v5162_v53 = vor.u32 %v5160_v26, %v5159_v11  ;;  %v5164_v46 = vrot.slane %v5159_v11, 4  ;;  %v14720_v1 = vld [vmem:[#allocation2 + $0x28] sm:$0xf] }
 0x227   : > { %v5595_v58 = vshrl.u32 %v14691_v51, 16  ;;  %v5205_v31 = vor.u32 %v5203_v38, %v14698_v25  ;;  %v5206_v7 = vrot.slane %v14698_v25, 4  ;;  %v5188_v42 = vor.u32 %v5186_v13, %v14700_v33  ;;  %11840 = vmatprep.mubr.msk.bf16.mxu0 %vm5967_vm11, %v10842_v60  ;;  %v5518_v38 = vld [vmem:[#allocation2 + $0x14] sm:$0x1]  ;;  %v14747_v13 = vld [vmem:[#allocation2 + $0x30] sm:$0xf] }
 0x228   : > { %v5189_v16 = vrot.slane %v14700_v33, 4  ;;  %v5163_v50 = vsel %vm14583_vm0, %v5155_v30, %v5162_v53  ;;  %v5419_v43 = vsel %vm14589_vm1, %v5164_v46, %v5418_v39  ;;  %v4770_v10 = vadd.f32 %v4693_v40, %v14517_v41 }
 0x229   : > { %5417 = vst.msk [vmem:[#allocation2 + $0x58] sm:$0xf] %vm4891_vm9, %v5163_v50  ;;  %5420 = vst [vmem:[#allocation2 + $0x5c] sm:$0x1] %v5419_v43  ;;  %v5436_v36 = vsel %vm14571_vm15, %v5205_v31, %v5435_v9  ;;  %v5429_v30 = vsel %vm14571_vm15, %v5188_v42, %v5428_v21  ;;  %v4775_v8 = vadd.f32 %v11790_v5, %v14522_v56  ;;  %v5606_v6 = vshrl.u32 %v5490_v23, 16  ;;  %v14749_v9 = vpop.f32.mrf.mxu0 }
 0x22a   : > { %v4773_v55 = vadd.f32 %v4706_v27, %v14528_v49  ;;  %5437 = vst [vmem:[#allocation2 + $0x78] sm:$0xf] %v5436_v36  ;;  %5430 = vst [vmem:[#allocation2 + $0x6c] sm:$0xf] %v5429_v30  ;;  %v4809_v47 = vmul.f32 %v14465_v14, %v4772_v44  ;;  %v4807_v41 = vmul.f32 %v14465_v14, %v4770_v10  ;;  %v5609_v40 = vshll.u32 %v5490_v23, 16 }
 0x22b   : > { %v4812_v0 = vmul.f32 %v14465_v14, %v4775_v8  ;;  %v5619_v26 = vshrl.u32 %v14720_v1, 16  ;;  %v10843_v2 = vcombine.low %v5490_v23, %v14720_v1  ;;  %v14737_v5 = vrot.slane %v5606_v6, 4  ;;  %v14756_v6 = vld [vmem:[#allocation2 + $0x34] sm:$0xf] }
 0x22c   : > { %v4810_v17 = vmul.f32 %v14465_v14, %v4773_v55  ;;  %v4846_v56 = vadd.f32 %v14498_v29, %v4809_v47  ;;  %v4844_v49 = vadd.f32 %v14498_v29, %v4807_v41  ;;  %v14739_v32 = vrot.slane %v5609_v40, 5  ;;  %v4709_v55 = vpop.f32.mrf.mxu0  ;;  %v5439_v40 = vld [vmem:[#allocation2 + $0x80] sm:$0x1] }
 0x22d   : > { %v4849_v37 = vadd.f32 %v14498_v29, %v4812_v0  ;;  %11841 = vmatmul.mubr.msk.bf16.gmra.mxu0 %vm5967_vm11, %v10843_v2  ;;  %v5564_v11 = vor.u32 %v14684_v3, %v14675_v22  ;;  %v5567_v39 = vshll.u32 %v14678_v48, 16  ;;  %v5573_v21 = vrot.slane %v5571_v28, 4 }
 0x22e   : > { %v4847_v54 = vadd.f32 %v14498_v29, %v4810_v17  ;;  %v4878_v53 = vmax.f32 %v4846_v56, 0.0  ;;  %v4876_v46 = vmax.f32 %v4844_v49, 0.0  ;;  %v5577_v60 = vshll.u32 %v5518_v38, 16 }
 0x22f   : > { %v4881_v27 = vmax.f32 %v4849_v37, 0.0  ;;  %v5565_v42 = vrot.slane %v5564_v11, 4  ;;  %v5569_v23 = vrot.slane %v5567_v39, 5  ;;  %v5630_v22 = vshrl.u32 %v14747_v13, 16  ;;  %v5432_v11 = vld [vmem:[#allocation2 + $0x74] sm:$0x1] }
 0x230   : > { %v4879_v31 = vmax.f32 %v4847_v54, 0.0  ;;  %v11175_v50 = vpack.c.bf16 %v4878_v53, %v4878_v53  ;;  %v11173_v43 = vpack.c.bf16 %v4876_v46, %v4876_v46  ;;  %v5579_v44 = vrot.slane %v5577_v60, 5  ;;  %v11794_v60 = vpop.f32.mrf.mxu0 }
 0x231   : > { %v11178_v3 = vpack.c.bf16 %v4881_v27, %v4881_v27  ;;  %v5570_v30 = vsel %vm12354_vm4, %v5565_v42, %v5569_v23  ;;  %v5574_v8 = vor.u32 %v5573_v21, %v5569_v23  ;;  %v14758_v54 = vrot.slane %v5630_v22, 4 }
 0x232   : > { %v11176_v10 = vpack.c.bf16 %v4879_v31, %v4879_v31  ;;  %v5208_v47 = vshrl.u32 %v11175_v50, 16  ;;  %v5211_v48 = vshll.u32 %v11175_v50, 16  ;;  %v5191_v28 = vshrl.u32 %v11173_v43, 16  ;;  %v5449_v50 = vld [vmem:[#allocation2 + $0x90] sm:$0xf] }
 0x233   : > { %v5194_v41 = vshll.u32 %v11173_v43, 16  ;;  %v5234_v0 = vshrl.u32 %v11178_v3, 16  ;;  %v5237_v17 = vshll.u32 %v11178_v3, 16  ;;  %v5575_v37 = vrot.slane %v5574_v8, 4  ;;  %v5442_v43 = vld [vmem:[#allocation2 + $0x84] sm:$0xf] }
 0x234   : > { %v5217_v2 = vshrl.u32 %v11176_v10, 16  ;;  %v5220_v38 = vshll.u32 %v11176_v10, 16  ;;  %v5210_v56 = vrot.slane %v5208_v47, 7  ;;  %v5193_v49 = vrot.slane %v5191_v28, 7  ;;  %v5519_v47 = vld [vmem:[#allocation2 + $0x20] sm:$0x1] }
 0x235   : > { %v14760_v39 = vrot.slane %v5234_v0, 7  ;;  %v5633_v46 = vshll.u32 %v14747_v13, 16  ;;  %v5643_v21 = vshrl.u32 %v14756_v6, 16  ;;  %v5580_v33 = vsel %vm12354_vm4, %v5575_v37, %v5579_v44 }
 0x236   : > { %v14762_v53 = vrot.slane %v5217_v2, 7  ;;  %v5213_v27 = vor.u32 %v5211_v48, %v5210_v56  ;;  %v5215_v31 = vrot.slane %v5210_v56, 4  ;;  %v5196_v42 = vor.u32 %v5194_v41, %v5193_v49 }
 0x237   : > { %v5198_v23 = vrot.slane %v5193_v49, 4  ;;  %v5239_v3 = vor.u32 %v5237_v17, %v14760_v39  ;;  %v5240_v22 = vrot.slane %v14760_v39, 4  ;;  %v10809_v17 = vcombine.low %v5570_v30, %v5580_v33  ;;  %v5494_v49 = vld [vmem:[#allocation2 + $0x3c] sm:$0xf]  ;;  %v14805_v30 = vld [vmem:[%s17206_s3 + $0x10] sm:$0xf] }
 0x238   : > { %v5222_v10 = vor.u32 %v5220_v38, %v14762_v53  ;;  %v5223_v8 = vrot.slane %v14762_v53, 4  ;;  %v5214_v28 = vsel %vm14583_vm0, %v5206_v7, %v5213_v27  ;;  %v5440_v48 = vsel %vm14589_vm1, %v5215_v31, %v5439_v40 }
 0x239   : > { %v5197_v41 = vsel %vm14583_vm0, %v5189_v16, %v5196_v42  ;;  %v5433_v0 = vsel %vm14589_vm1, %v5198_v23, %v5432_v11  ;;  %5438 = vst.msk [vmem:[#allocation2 + $0x7c] sm:$0xf] %vm4891_vm9, %v5214_v28  ;;  %5441 = vst [vmem:[#allocation2 + $0x80] sm:$0x1] %v5440_v48  ;;  %v5450_v25 = vsel %vm14571_vm15, %v5239_v3, %v5449_v50  ;;  %v14790_v40 = vrot.slane %v5633_v46, 5  ;;  %v4722_v16 = vpop.f32.mrf.mxu0 }
 0x23a   : > { %5431 = vst.msk [vmem:[#allocation2 + $0x70] sm:$0xf] %vm4891_vm9, %v5197_v41  ;;  %5434 = vst [vmem:[#allocation2 + $0x74] sm:$0x1] %v5433_v0  ;;  %v5443_v7 = vsel %vm14571_vm15, %v5222_v10, %v5442_v43  ;;  %v10844_v2 = vcombine.low %v14747_v13, %v14756_v6  ;;  %v4776_v38 = vadd.f32 %v14749_v9, %v14532_v12  ;;  %v5591_v11 = vshll.u32 %v14691_v51, 16 }
 0x23b   : > { %5451 = vst [vmem:[#allocation2 + $0x90] sm:$0xf] %v5450_v25  ;;  %5444 = vst [vmem:[#allocation2 + $0x84] sm:$0xf] %v5443_v7  ;;  %v5588_v56 = vor.u32 %v14704_v59, %v14702_v35  ;;  %v5597_v44 = vrot.slane %v5595_v58, 4  ;;  %v5601_v37 = vshll.u32 %v5519_v47, 16  ;;  %v4774_v46 = vadd.f32 %v4709_v55, %v14535_v52  ;;  %11803 = vmatmul.mubr.msk.bf16.vlgmr.msra.gmra.mxu1 %vm5967_vm11, %v10809_v17  ;;  %v14834_v33 = vpop.f32.mrf.mxu0 }
 0x23c   : > { %11844 = vmatprep.mubr.msk.bf16.mxu0 %vm5967_vm11, %v10844_v2  ;;  %v4813_v12 = vmul.f32 %v14465_v14, %v4776_v38  ;;  %v4779_v59 = vadd.f32 %v11794_v60, %v14541_v15  ;;  %v4777_v51 = vadd.f32 %v4722_v16, %v14545_v20  ;;  %11869 = vmatpush3.bf16.msra.mxu1 %v14469_v18  ;;  %v5593_v58 = vrot.slane %v5591_v11, 5  ;;  %v14817_v42 = vld [vmem:[#allocation2 + $0x40] sm:$0xf] }
 0x23d   : > { %v5589_v35 = vrot.slane %v5588_v56, 4  ;;  %v5603_v52 = vrot.slane %v5601_v37, 5  ;;  %v4811_v13 = vmul.f32 %v14465_v14, %v4774_v46  ;;  %v5654_v9 = vshrl.u32 %v5494_v49, 16  ;;  %12119 = vmatprep.subr.msk.bf16.mxu1 %vm6016_vm8, %v14805_v30 }
 0x23e   : > { %v4850_v55 = vadd.f32 %v14498_v29, %v4813_v12  ;;  %v4816_v27 = vmul.f32 %v14465_v14, %v4779_v59  ;;  %v4814_v31 = vmul.f32 %v14465_v14, %v4777_v51  ;;  %v5657_v23 = vshll.u32 %v5494_v49, 16 }
 0x23f   : > { %v5594_v18 = vsel %vm12354_vm4, %v5589_v35, %v5593_v58  ;;  %v5598_v15 = vor.u32 %v5597_v44, %v5593_v58  ;;  %v4848_v20 = vadd.f32 %v14498_v29, %v4811_v13  ;;  %v14824_v60 = vrot.slane %v5654_v9, 4  ;;  %v14842_v44 = vld [vmem:[#allocation2 + $0x2c] sm:$0x1]  ;;  %v4725_v58 = vpop.f32.mrf.mxu0 }
 0x240   : > { %v4882_v50 = vmax.f32 %v4850_v55, 0.0  ;;  %v4853_v43 = vadd.f32 %v14498_v29, %v4816_v27  ;;  %v4851_v3 = vadd.f32 %v14498_v29, %v4814_v31  ;;  %v14828_v14 = vrot.slane %v5657_v23, 5  ;;  %v5446_v31 = vld [vmem:[#allocation2 + $0x8c] sm:$0x1] }
 0x241   : > { %v5599_v10 = vrot.slane %v5598_v15, 4  ;;  %v4880_v47 = vmax.f32 %v4848_v20, 0.0  ;;  %v5667_v28 = vshrl.u32 %v14817_v42, 16  ;;  %v10845_v48 = vcombine.low %v5494_v49, %v14817_v42 }
 0x242   : > { %v11179_v41 = vpack.c.bf16 %v4882_v50, %v4882_v50  ;;  %v4885_v0 = vmax.f32 %v4853_v43, 0.0  ;;  %v4883_v25 = vmax.f32 %v4851_v3, 0.0  ;;  %v5612_v7 = vor.u32 %v14739_v32, %v14737_v5  ;;  %v5463_v50 = vld [vmem:[#allocation2 + $0xa8] sm:$0xf] }
 0x243   : > { %v5604_v16 = vsel %vm12354_vm4, %v5599_v10, %v5603_v52  ;;  %v11177_v29 = vpack.c.bf16 %v4880_v47, %v4880_v47  ;;  %11845 = vmatmul.mubr.msk.bf16.gmra.mxu0 %vm5967_vm11, %v10845_v48  ;;  %v5615_v17 = vshll.u32 %v14720_v1, 16  ;;  %v5621_v2 = vrot.slane %v5619_v26, 4  ;;  %v5453_v52 = vld [vmem:[#allocation2 + $0x98] sm:$0x1]  ;;  %v5496_v10 = vld [vmem:[#allocation2 + $0x48] sm:$0xf] }
 0x244   : > { %v5242_v38 = vshrl.u32 %v11179_v41, 16  ;;  %v5245_v56 = vshll.u32 %v11179_v41, 16  ;;  %v10810_v49 = vcombine.low %v5594_v18, %v5604_v16  ;;  %v11182_v11 = vpack.c.bf16 %v4885_v0, %v4885_v0  ;;  %v11798_v16 = vpop.f32.mrf.mxu0 }
 0x245   : > { %v5225_v5 = vshrl.u32 %v11177_v29, 16  ;;  %v5228_v32 = vshll.u32 %v11177_v29, 16  ;;  %v11180_v37 = vpack.c.bf16 %v4883_v25, %v4883_v25  ;;  %v5613_v46 = vrot.slane %v5612_v7, 4  ;;  %v5456_v25 = vld [vmem:[#allocation2 + $0x9c] sm:$0xf] }
 0x246   : > { %v5244_v12 = vrot.slane %v5242_v38, 7  ;;  %11806 = vmatprep.mubr.msk.bf16.mxu1 %vm5967_vm11, %v10810_v49  ;;  %v5268_v35 = vshrl.u32 %v11182_v11, 16  ;;  %v5271_v59 = vshll.u32 %v11182_v11, 16  ;;  %v5617_v51 = vrot.slane %v5615_v17, 5  ;;  %v14860_v7 = vld [vmem:[#allocation2 + $0x4c] sm:$0xf] }
 0x247   : > { %v5227_v1 = vrot.slane %v5225_v5, 7  ;;  %v5251_v26 = vshrl.u32 %v11180_v37, 16  ;;  %v5254_v13 = vshll.u32 %v11180_v37, 16  ;;  %v5625_v9 = vshll.u32 %v14842_v44, 16  ;;  %v5498_v37 = vld [vmem:[#allocation2 + $0x54] sm:$0xf] }
 0x248   : > { %v5247_v55 = vor.u32 %v5245_v56, %v5244_v12  ;;  %v5249_v27 = vrot.slane %v5244_v12, 4  ;;  %v14846_v23 = vrot.slane %v5268_v35, 7  ;;  %v5618_v18 = vsel %vm12354_vm4, %v5613_v46, %v5617_v51 }
 0x249   : > { %v5230_v15 = vor.u32 %v5228_v32, %v5227_v1  ;;  %v5232_v20 = vrot.slane %v5227_v1, 4  ;;  %v14850_v43 = vrot.slane %v5251_v26, 7  ;;  %v5622_v3 = vor.u32 %v5621_v2, %v5617_v51  ;;  %v14878_v32 = vld [vmem:[#allocation2 + $0x38] sm:$0x1]  ;;  %v4738_v51 = vpop.f32.mrf.mxu0 }
 0x24a   : > { %v5248_v47 = vsel %vm14583_vm0, %v5240_v22, %v5247_v55  ;;  %v5454_v48 = vsel %vm14589_vm1, %v5249_v27, %v5453_v52  ;;  %v5273_v41 = vor.u32 %v5271_v59, %v14846_v23  ;;  %v5274_v0 = vrot.slane %v14846_v23, 4 }
 0x24b   : > { %5452 = vst.msk [vmem:[#allocation2 + $0x94] sm:$0xf] %vm4891_vm9, %v5248_v47  ;;  %5455 = vst [vmem:[#allocation2 + $0x98] sm:$0x1] %v5454_v48  ;;  %v5231_v39 = vsel %vm14583_vm0, %v5223_v8, %v5230_v15  ;;  %v5447_v22 = vsel %vm14589_vm1, %v5232_v20, %v5446_v31  ;;  %v5256_v29 = vor.u32 %v5254_v13, %v14850_v43  ;;  %v5257_v17 = vrot.slane %v14850_v43, 4 }
 0x24c   : > { %5445 = vst.msk [vmem:[#allocation2 + $0x88] sm:$0xf] %vm4891_vm9, %v5231_v39  ;;  %5448 = vst [vmem:[#allocation2 + $0x8c] sm:$0x1] %v5447_v22  ;;  %v5464_v2 = vsel %vm14571_vm15, %v5273_v41, %v5463_v50  ;;  %v5623_v38 = vrot.slane %v5622_v3, 4  ;;  %v5627_v56 = vrot.slane %v5625_v9, 5  ;;  %v10846_v5 = vcombine.low %v5496_v10, %v14860_v7 }
 0x24d   : > { %v5678_v49 = vshrl.u32 %v5496_v10, 16  ;;  %5465 = vst [vmem:[#allocation2 + $0xa8] sm:$0xf] %v5464_v2  ;;  %v5457_v53 = vsel %vm14571_vm15, %v5256_v29, %v5456_v25  ;;  %v5681_v8 = vshll.u32 %v5496_v10, 16  ;;  %v5691_v11 = vshrl.u32 %v14860_v7, 16 }
 0x24e   : > { %5458 = vst [vmem:[#allocation2 + $0x9c] sm:$0xf] %v5457_v53  ;;  %v5628_v46 = vsel %vm12354_vm4, %v5623_v38, %v5627_v56  ;;  %v4780_v35 = vadd.f32 %v14834_v33, %v14549_v57  ;;  %v5636_v59 = vor.u32 %v14790_v40, %v14758_v54  ;;  %11848 = vmatprep.mubr.msk.bf16.mxu0 %vm5967_vm11, %v10846_v5  ;;  %v5639_v26 = vshll.u32 %v14756_v6, 16  ;;  %v14897_v9 = vld [vmem:[%s17205_s2] ss:$0 sm:$0xff] }
 0x24f   : > { %v14882_v12 = vrot.slane %v5678_v49, 4  ;;  %v10811_v52 = vcombine.low %v5618_v18, %v5628_v46  ;;  %v14888_v1 = vrot.slane %v5681_v8, 5  ;;  %v5645_v13 = vrot.slane %v5643_v21, 4  ;;  %v14908_v31 = vld [vmem:[%s17205_s2 + $0x1] ss:$0 sm:$0xff] }
 0x250   : > { %v4817_v57 = vmul.f32 %v14897_v9, %v4780_v35  ;;  %v5637_v33 = vrot.slane %v5636_v59, 4  ;;  %v5649_v54 = vshll.u32 %v14878_v32, 16  ;;  %v4778_v40 = vadd.f32 %v4725_v58, %v14551_v4  ;;  %v14912_v50 = vld [vmem:[#allocation2 + $0x58] sm:$0xf] }
 0x251   : > { %11807 = vmatmul.mubr.msk.bf16.gmra.mxu1 %vm5967_vm11, %v10811_v52  ;;  %v5641_v55 = vrot.slane %v5639_v26, 5  ;;  %v4783_v27 = vadd.f32 %v11798_v16, %v14556_v45  ;;  %v4781_v6 = vadd.f32 %v4738_v51, %v14559_v62  ;;  %v5702_v21 = vshrl.u32 %v5498_v37, 16 }
 0x252   : > { %v4854_v18 = vadd.f32 %v14908_v31, %v4817_v57  ;;  %v5651_v15 = vrot.slane %v5649_v54, 5  ;;  %v4815_v20 = vmul.f32 %v14897_v9, %v4778_v40  ;;  %v5705_v4 = vshll.u32 %v5498_v37, 16  ;;  %v5467_v40 = vld [vmem:[#allocation2 + $0xb0] sm:$0x1] }
 0x253   : > { %v5642_v58 = vsel %vm12354_vm4, %v5637_v33, %v5641_v55  ;;  %v5646_v45 = vor.u32 %v5645_v13, %v5641_v55  ;;  %v4820_v62 = vmul.f32 %v14897_v9, %v4783_v27  ;;  %v4818_v3 = vmul.f32 %v14897_v9, %v4781_v6  ;;  %v14934_v33 = vld [vmem:[#allocation2 + $0x44] sm:$0x1] }
 0x254   : > { %v4886_v10 = vmax.f32 %v4854_v18, 0.0  ;;  %v4852_v47 = vadd.f32 %v14908_v31, %v4815_v20  ;;  %v14919_v48 = vrot.slane %v5702_v21, 4  ;;  %v14921_v41 = vrot.slane %v5705_v4, 5  ;;  %v5460_v4 = vld [vmem:[#allocation2 + $0xa4] sm:$0x1] }
 0x255   : > { %v5647_v25 = vrot.slane %v5646_v45, 4  ;;  %v4857_v16 = vadd.f32 %v14908_v31, %v4820_v62  ;;  %v4855_v39 = vadd.f32 %v14908_v31, %v4818_v3  ;;  %v5715_v22 = vshrl.u32 %v14912_v50, 16  ;;  %v5477_v62 = vld [vmem:[#allocation2 + $0xc0] sm:$0xf] }
 0x256   : > { %v11183_v29 = vpack.c.bf16 %v4886_v10, %v4886_v10  ;;  %v4884_v2 = vmax.f32 %v4852_v47, 0.0  ;;  %v10847_v38 = vcombine.low %v5498_v37, %v14912_v50  ;;  %v5660_v56 = vor.u32 %v14828_v14, %v14824_v60 }
 0x257   : > { %v5652_v49 = vsel %vm12354_vm4, %v5647_v25, %v5651_v15  ;;  %v4889_v53 = vmax.f32 %v4857_v16, 0.0  ;;  %v4887_v8 = vmax.f32 %v4855_v39, 0.0  ;;  %v5663_v5 = vshll.u32 %v14817_v42, 16 }
 0x258   : > { %v5276_v46 = vshrl.u32 %v11183_v29, 16  ;;  %v5279_v35 = vshll.u32 %v11183_v29, 16  ;;  %v10812_v59 = vcombine.low %v5642_v58, %v5652_v49  ;;  %v11181_v51 = vpack.c.bf16 %v4884_v2, %v4884_v2  ;;  %11849 = vmatmul.mubr.msk.bf16.gmra.mxu0 %vm5967_vm11, %v10847_v38  ;;  %v5470_v29 = vld [vmem:[#allocation2 + $0xb4] sm:$0xf]  ;;  %v5500_v2 = vld [vmem:[#allocation2 + $0x60] sm:$0xf]  ;;  %v11799_v38 = vpop.f32.mrf.mxu0 }
 0x259   : > { %v11186_v52 = vpack.c.bf16 %v4889_v53, %v4889_v53  ;;  %v11184_v26 = vpack.c.bf16 %v4887_v8, %v4887_v8  ;;  %v5661_v13 = vrot.slane %v5660_v56, 4  ;;  %v5665_v37 = vrot.slane %v5663_v5, 5 }
 0x25a   : > { %v5278_v57 = vrot.slane %v5276_v46, 7  ;;  %11810 = vmatprep.mubr.msk.bf16.mxu1 %vm5967_vm11, %v10812_v59  ;;  %v5259_v60 = vshrl.u32 %v11181_v51, 16  ;;  %v5262_v14 = vshll.u32 %v11181_v51, 16  ;;  %v5669_v54 = vrot.slane %v5667_v28, 4  ;;  %v14964_v59 = vld [vmem:[#allocation2 + $0x50] sm:$0x1] }
 0x25b   : > { %v5302_v55 = vshrl.u32 %v11186_v52, 16  ;;  %v5305_v27 = vshll.u32 %v11186_v52, 16  ;;  %v5285_v6 = vshrl.u32 %v11184_v26, 16  ;;  %v5288_v21 = vshll.u32 %v11184_v26, 16 }
 0x25c   : > { %v5281_v18 = vor.u32 %v5279_v35, %v5278_v57  ;;  %v5283_v15 = vrot.slane %v5278_v57, 4  ;;  %v5261_v20 = vrot.slane %v5259_v60, 7  ;;  %v5666_v58 = vsel %vm12354_vm4, %v5661_v13, %v5665_v37  ;;  %v5502_v13 = vld [vmem:[#allocation2 + $0x6c] sm:$0xf] }
 0x25d   : > { %v14940_v45 = vrot.slane %v5302_v55, 7  ;;  %v14942_v3 = vrot.slane %v5285_v6, 7  ;;  %v5670_v10 = vor.u32 %v5669_v54, %v5665_v37  ;;  %v5673_v28 = vshll.u32 %v14934_v33, 16 }
 0x25e   : > { %v5282_v47 = vsel %vm14583_vm0, %v5274_v0, %v5281_v18  ;;  %v5468_v25 = vsel %vm14589_vm1, %v5283_v15, %v5467_v40  ;;  %v5264_v16 = vor.u32 %v5262_v14, %v5261_v20  ;;  %v5266_v39 = vrot.slane %v5261_v20, 4  ;;  %v14956_v0 = vld [vmem:[#allocation2 + $0x64] sm:$0xf]  ;;  %v4741_v14 = vpop.f32.mrf.mxu0 }
 0x25f   : > { %5466 = vst.msk [vmem:[#allocation2 + $0xac] sm:$0xf] %vm4891_vm9, %v5282_v47  ;;  %5469 = vst [vmem:[#allocation2 + $0xb0] sm:$0x1] %v5468_v25  ;;  %v5307_v56 = vor.u32 %v5305_v27, %v14940_v45  ;;  %v5308_v49 = vrot.slane %v14940_v45, 4  ;;  %v5290_v23 = vor.u32 %v5288_v21, %v14942_v3  ;;  %v5291_v53 = vrot.slane %v14942_v3, 4 }
 0x260   : > { %v5265_v8 = vsel %vm14583_vm0, %v5257_v17, %v5264_v16  ;;  %v5461_v5 = vsel %vm14589_vm1, %v5266_v39, %v5460_v4  ;;  %v5671_v46 = vrot.slane %v5670_v10, 4  ;;  %v5675_v35 = vrot.slane %v5673_v28, 5  ;;  %v14982_v27 = vld [vmem:[#allocation2 + $0x70] sm:$0xf]  ;;  %v14994_v28 = vld [vmem:[#allocation2 + $0x5c] sm:$0x1] }
 0x261   : > { %5459 = vst.msk [vmem:[#allocation2 + $0xa0] sm:$0xf] %vm4891_vm9, %v5265_v8  ;;  %5462 = vst [vmem:[#allocation2 + $0xa4] sm:$0x1] %v5461_v5  ;;  %v5478_v51 = vsel %vm14571_vm15, %v5307_v56, %v5477_v62  ;;  %v5471_v52 = vsel %vm14571_vm15, %v5290_v23, %v5470_v29  ;;  %v5726_v43 = vshrl.u32 %v5500_v2, 16  ;;  %v5729_v26 = vshll.u32 %v5500_v2, 16 }
 0x262   : > { %5479 = vst [vmem:[#allocation2 + $0xc0] sm:$0xf] %v5478_v51  ;;  %5472 = vst [vmem:[#allocation2 + $0xb4] sm:$0xf] %v5471_v52  ;;  %v5676_v17 = vsel %vm12354_vm4, %v5671_v46, %v5675_v35  ;;  %v5739_v37 = vshrl.u32 %v14956_v0, 16  ;;  %v10848_v57 = vcombine.low %v5500_v2, %v14956_v0  ;;  %v4784_v60 = vadd.f32 %v11799_v38, %v14562_v34 }
 0x263   : > { %v10813_v54 = vcombine.low %v5666_v58, %v5676_v17  ;;  %v14976_v40 = vrot.slane %v5726_v43, 4  ;;  %v14978_v63 = vrot.slane %v5729_v26, 5  ;;  %v5684_v55 = vor.u32 %v14888_v1, %v14882_v12  ;;  %v5504_v39 = vld [vmem:[#allocation2 + $0x78] sm:$0xf]  ;;  %v15012_v5 = vld [vmem:[#allocation2 + $0x7c] sm:$0xf] }
 0x264   : > { %11852 = vmatprep.mubr.msk.bf16.mxu0 %vm5967_vm11, %v10848_v57  ;;  %v4821_v6 = vmul.f32 %v14897_v9, %v4784_v60  ;;  %v5687_v21 = vshll.u32 %v14860_v7, 16  ;;  %v5693_v34 = vrot.slane %v5691_v11, 4  ;;  %v5697_v18 = vshll.u32 %v14964_v59, 16 }
 0x265   : > { %11811 = vmatmul.mubr.msk.bf16.gmra.mxu1 %vm5967_vm11, %v10813_v54  ;;  %v5685_v15 = vrot.slane %v5684_v55, 4  ;;  %v4782_v20 = vadd.f32 %v4741_v14, %v14564_v24  ;;  %v5750_v4 = vshrl.u32 %v5502_v13, 16  ;;  %v5753_v12 = vshll.u32 %v5502_v13, 16 }
 0x266   : > { %v4858_v1 = vadd.f32 %v14908_v31, %v4821_v6  ;;  %v5689_v58 = vrot.slane %v5687_v21, 5  ;;  %v5699_v62 = vrot.slane %v5697_v18, 5  ;;  %v5763_v10 = vshrl.u32 %v14982_v27, 16  ;;  %v15024_v18 = vld [vmem:[#allocation2 + $0x68] sm:$0x1] }
 0x267   : > { %v4819_v47 = vmul.f32 %v14897_v9, %v4782_v20  ;;  %v14997_v11 = vrot.slane %v5750_v4, 4  ;;  %v14999_v25 = vrot.slane %v5753_v12, 5  ;;  %v10849_v16 = vcombine.low %v5502_v13, %v14982_v27 }
 0x268   : > { %v4890_v24 = vmax.f32 %v4858_v1, 0.0  ;;  %v5690_v29 = vsel %vm12354_vm4, %v5685_v15, %v5689_v58  ;;  %v5694_v2 = vor.u32 %v5693_v34, %v5689_v58  ;;  %v5708_v38 = vor.u32 %v14921_v41, %v14919_v48  ;;  %v5481_v15 = vld [vmem:[#allocation2 + $0xc8] sm:$0x1] }
 0x269   : > { %v4856_v56 = vadd.f32 %v14908_v31, %v4819_v47  ;;  %11853 = vmatmul.mubr.msk.bf16.gmra.mxu0 %vm5967_vm11, %v10849_v16  ;;  %v5711_v9 = vshll.u32 %v14912_v50, 16  ;;  %v5717_v23 = vrot.slane %v5715_v22, 4  ;;  %v5721_v8 = vshll.u32 %v14994_v28, 16 }
 0x26a   : > { %v11187_v46 = vpack.c.bf16 %v4890_v24, %v4890_v24  ;;  %v5695_v35 = vrot.slane %v5694_v2, 4  ;;  %v5709_v51 = vrot.slane %v5708_v38, 4  ;;  %v5774_v52 = vshrl.u32 %v5504_v39, 16 }
 0x26b   : > { %v4888_v43 = vmax.f32 %v4856_v56, 0.0  ;;  %v5713_v26 = vrot.slane %v5711_v9, 5  ;;  %v5723_v48 = vrot.slane %v5721_v8, 5  ;;  %v5777_v41 = vshll.u32 %v5504_v39, 16  ;;  %v15036_v56 = vld [vmem:[#allocation2 + $0x88] sm:$0xf] }
 0x26c   : > { %v5310_v31 = vshrl.u32 %v11187_v46, 16  ;;  %v5313_v13 = vshll.u32 %v11187_v46, 16  ;;  %v5700_v17 = vsel %vm12354_vm4, %v5695_v35, %v5699_v62  ;;  %v15016_v57 = vrot.slane %v5774_v52, 4  ;;  %v5474_v9 = vld [vmem:[#allocation2 + $0xbc] sm:$0x1] }
 0x26d   : > { %v10814_v22 = vcombine.low %v5690_v29, %v5700_v17  ;;  %v11185_v60 = vpack.c.bf16 %v4888_v43, %v4888_v43  ;;  %v5714_v14 = vsel %vm12354_vm4, %v5709_v51, %v5713_v26  ;;  %v5718_v54 = vor.u32 %v5717_v23, %v5713_v26  ;;  %v15044_v8 = vld [vmem:[#allocation2 + $0x74] sm:$0x1]  ;;  %v5508_v43 = vld [vmem:[#allocation2 + $0x90] sm:$0xf] }
 0x26e   : > { %v5312_v55 = vrot.slane %v5310_v31, 7  ;;  %v15020_v6 = vrot.slane %v5777_v41, 5  ;;  %v5787_v21 = vshrl.u32 %v15012_v5, 16  ;;  %v10850_v34 = vcombine.low %v5504_v39, %v15012_v5  ;;  %v5506_v39 = vld [vmem:[#allocation2 + $0x84] sm:$0xf] }
 0x26f   : > { %11814 = vmatprep.mubr.msk.bf16.mxu1 %vm5967_vm11, %v10814_v22  ;;  %v5293_v20 = vshrl.u32 %v11185_v60, 16  ;;  %v5296_v4 = vshll.u32 %v11185_v60, 16  ;;  %v5719_v12 = vrot.slane %v5718_v54, 4  ;;  %v5732_v1 = vor.u32 %v14978_v63, %v14976_v40  ;;  %v15051_v41 = vld [vmem:[#allocation2 + $0x94] sm:$0xf] }
 0x270   : > { %v5315_v58 = vor.u32 %v5313_v13, %v5312_v55  ;;  %v5317_v62 = vrot.slane %v5312_v55, 4  ;;  %11856 = vmatprep.mubr.msk.bf16.mxu0 %vm5967_vm11, %v10850_v34  ;;  %v5735_v47 = vshll.u32 %v14956_v0, 16  ;;  %v5741_v16 = vrot.slane %v5739_v37, 4  ;;  %v15068_v34 = vld [vmem:[#allocation2 + $0x80] sm:$0x1] }
 0x271   : > { %v5295_v24 = vrot.slane %v5293_v20, 7  ;;  %v5724_v29 = vsel %vm12354_vm4, %v5719_v12, %v5723_v48  ;;  %v5733_v2 = vrot.slane %v5732_v1, 4  ;;  %v5745_v38 = vshll.u32 %v15024_v18, 16 }
 0x272   : > { %v5316_v40 = vsel %vm14583_vm0, %v5308_v49, %v5315_v58  ;;  %v5482_v63 = vsel %vm14589_vm1, %v5317_v62, %v5481_v15  ;;  %v10815_v37 = vcombine.low %v5714_v14, %v5724_v29  ;;  %v5737_v23 = vrot.slane %v5735_v47, 5  ;;  %v15073_v47 = vld [vmem:[#allocation2 + $0xa0] sm:$0xf] }
 0x273   : > { %5480 = vst.msk [vmem:[#allocation2 + $0xc4] sm:$0xf] %vm4891_vm9, %v5316_v40  ;;  %5483 = vst [vmem:[#allocation2 + $0xc8] sm:$0x1] %v5482_v63  ;;  %v5298_v46 = vor.u32 %v5296_v4, %v5295_v24  ;;  %v5300_v35 = vrot.slane %v5295_v24, 4  ;;  %v5747_v51 = vrot.slane %v5745_v38, 5  ;;  %v10851_v22 = vcombine.low %v5506_v39, %v15036_v56 }
 0x274   : > { %v5798_v52 = vshrl.u32 %v5506_v39, 16  ;;  %11815 = vmatmul.mubr.msk.bf16.gmra.mxu1 %vm5967_vm11, %v10815_v37  ;;  %v5738_v45 = vsel %vm12354_vm4, %v5733_v2, %v5737_v23  ;;  %v5742_v49 = vor.u32 %v5741_v16, %v5737_v23  ;;  %v5801_v26 = vshll.u32 %v5506_v39, 16 }
 0x275   : > { %v5811_v48 = vshrl.u32 %v15036_v56, 16  ;;  %v5299_v31 = vsel %vm14583_vm0, %v5291_v53, %v5298_v46  ;;  %v5475_v13 = vsel %vm14589_vm1, %v5300_v35, %v5474_v9  ;;  %v5756_v54 = vor.u32 %v14999_v25, %v14997_v11  ;;  %11857 = vmatmul.mubr.msk.bf16.gmra.mxu0 %vm5967_vm11, %v10851_v22  ;;  %v5510_v25 = vld [vmem:[#allocation2 + $0x9c] sm:$0xf]  ;;  %v15087_v46 = vld [vmem:[#allocation2 + $0x8c] sm:$0x1] }
 0x276   : > { %v5800_v17 = vrot.slane %v5798_v52, 4  ;;  %5473 = vst.msk [vmem:[#allocation2 + $0xb8] sm:$0xf] %vm4891_vm9, %v5299_v31  ;;  %5476 = vst [vmem:[#allocation2 + $0xbc] sm:$0x1] %v5475_v13  ;;  %v5743_v60 = vrot.slane %v5742_v49, 4  ;;  %v10852_v39 = vcombine.low %v5508_v43, %v15051_v41  ;;  %v5780_v24 = vor.u32 %v15020_v6, %v15016_v57 }
 0x277   : > { %v5803_v14 = vrot.slane %v5801_v26, 5  ;;  %v5759_v55 = vshll.u32 %v14982_v27, 16  ;;  %v5765_v61 = vrot.slane %v5763_v10, 4  ;;  %v5769_v19 = vshll.u32 %v15044_v8, 16  ;;  %v5512_v52 = vld [vmem:[#allocation2 + $0xa8] sm:$0xf] }
 0x278   : > { %v5822_v3 = vshrl.u32 %v5508_v43, 16  ;;  %v5825_v53 = vshll.u32 %v5508_v43, 16  ;;  %v5748_v15 = vsel %vm12354_vm4, %v5743_v60, %v5747_v51  ;;  %v5757_v20 = vrot.slane %v5756_v54, 4  ;;  %11860 = vmatprep.mubr.msk.bf16.mxu0 %vm5967_vm11, %v10852_v39  ;;  %v15095_v26 = vld [vmem:[#allocation2 + $0xac] sm:$0xf] }
 0x279   : > { %v5761_v4 = vrot.slane %v5759_v55, 5  ;;  %v5835_v11 = vshrl.u32 %v15051_v41, 16  ;;  %v10816_v12 = vcombine.low %v5738_v45, %v5748_v15  ;;  %v5771_v1 = vrot.slane %v5769_v19, 5  ;;  %v15104_v15 = vld [vmem:[#allocation2 + $0x98] sm:$0x1] }
 0x27a   : > { %v5824_v58 = vrot.slane %v5822_v3, 4  ;;  %v5827_v62 = vrot.slane %v5825_v53, 5  ;;  %v5783_v29 = vshll.u32 %v15012_v5, 16  ;;  %v5789_v2 = vrot.slane %v5787_v21, 4 }
 0x27b   : > { %v5762_v10 = vsel %vm12354_vm4, %v5757_v20, %v5761_v4  ;;  %v5766_v16 = vor.u32 %v5765_v61, %v5761_v4  ;;  %11818 = vmatprep.mubr.msk.bf16.mxu1 %vm5967_vm11, %v10816_v12  ;;  %v5793_v38 = vshll.u32 %v15068_v34, 16  ;;  %v5846_v40 = vshrl.u32 %v5510_v25, 16  ;;  %v5514_v12 = vld [vmem:[#allocation2 + $0xb4] sm:$0xf] }
 0x27c   : > { %v5781_v9 = vrot.slane %v5780_v24, 4  ;;  %v5849_v37 = vshll.u32 %v5510_v25, 16  ;;  %v5859_v23 = vshrl.u32 %v15073_v47, 16  ;;  %v5785_v57 = vrot.slane %v5783_v29, 5 }
 0x27d   : > { %v5767_v63 = vrot.slane %v5766_v16, 4  ;;  %v5795_v6 = vrot.slane %v5793_v38, 5  ;;  %v15089_v35 = vrot.slane %v5846_v40, 4  ;;  %v10853_v51 = vcombine.low %v5510_v25, %v15073_v47  ;;  %v15112_v24 = vld [vmem:[#allocation2 + $0xb8] sm:$0xf] }
 0x27e   : > { %v5851_v43 = vrot.slane %v5849_v37, 5  ;;  %v5804_v45 = vor.u32 %v5803_v14, %v5800_v17  ;;  %v5807_v49 = vshll.u32 %v15036_v56, 16  ;;  %v5786_v13 = vsel %vm12354_vm4, %v5781_v9, %v5785_v57 }
 0x27f   : > { %v5772_v21 = vsel %vm12354_vm4, %v5767_v63, %v5771_v1  ;;  %v5790_v22 = vor.u32 %v5789_v2, %v5785_v57  ;;  %11861 = vmatmul.mubr.msk.bf16.gmra.mxu0 %vm5967_vm11, %v10853_v51  ;;  %v5813_v60 = vrot.slane %v5811_v48, 4  ;;  %v5817_v61 = vshll.u32 %v15087_v46, 16 }
 0x280   : > { %v10817_v31 = vcombine.low %v5762_v10, %v5772_v21  ;;  %v5805_v54 = vrot.slane %v5804_v45, 4  ;;  %v5809_v55 = vrot.slane %v5807_v49, 5  ;;  %v5870_v19 = vshrl.u32 %v5512_v52, 16 }
 0x281   : > { %v5791_v17 = vrot.slane %v5790_v22, 4  ;;  %v5873_v14 = vshll.u32 %v5512_v52, 16  ;;  %v5883_v3 = vshrl.u32 %v15095_v26, 16  ;;  %v10854_v53 = vcombine.low %v5512_v52, %v15095_v26  ;;  %v15120_v52 = vld [vmem:[#allocation2 + $0xa4] sm:$0x1] }
 0x282   : > { %11819 = vmatmul.mubr.msk.bf16.gmra.mxu1 %vm5967_vm11, %v10817_v31  ;;  %v5810_v20 = vsel %vm12354_vm4, %v5805_v54, %v5809_v55  ;;  %v5814_v4 = vor.u32 %v5813_v60, %v5809_v55  ;;  %v5819_v48 = vrot.slane %v5817_v61, 5  ;;  %v5872_v25 = vrot.slane %v5870_v19, 4  ;;  %v12198_v31 = vld [vmem:[#allocation2 + $0xc] sm:$0xff]  }
 0x283   : > { %v5796_v1 = vsel %vm12354_vm4, %v5791_v17, %v5795_v6  ;;  %v5875_v10 = vrot.slane %v5873_v14, 5  ;;  %11864 = vmatprep.mubr.msk.bf16.mxu0 %vm5967_vm11, %v10854_v53  ;;  %v5828_v16 = vor.u32 %v5827_v62, %v5824_v58  ;;  %v5831_v39 = vshll.u32 %v15051_v41, 16 }
 0x284   : > { %v10818_v29 = vcombine.low %v5786_v13, %v5796_v1  ;;  %v5815_v2 = vrot.slane %v5814_v4, 4  ;;  %v5837_v38 = vrot.slane %v5835_v11, 4  ;;  %v5841_v40 = vshll.u32 %v15104_v15, 16  ;;  %v15124_v13 = vld [vmem:[#allocation2 + $0xb0] sm:$0x1] }
 0x285   : > { %v5829_v63 = vrot.slane %v5828_v16, 4  ;;  %v5833_v9 = vrot.slane %v5831_v39, 5  ;;  %v5894_v37 = vshrl.u32 %v5514_v12, 16  ;;  %v5897_v57 = vshll.u32 %v5514_v12, 16  ;;  %v15136_v1 = vld [vmem:[#allocation2 + $0xbc] sm:$0x1] }
 0x286   : > { %11822 = vmatprep.mubr.msk.bf16.mxu1 %vm5967_vm11, %v10818_v29  ;;  %v5820_v6 = vsel %vm12354_vm4, %v5815_v2, %v5819_v48  ;;  %v5843_v51 = vrot.slane %v5841_v40, 5  ;;  %v5907_v58 = vshrl.u32 %v15112_v24, 16  ;;  %v10855_v62 = vcombine.low %v5514_v12, %v15112_v24  ;;  %v6473_v29 = vld [vmem:[#allocation2] sm:$0xe]  ;;  %v12232_v40 = vld [vmem:[%s17206_s3 + $0xc] sm:$0xf] }
 0x287   : > { %v10819_v21 = vcombine.low %v5810_v20, %v5820_v6  ;;  %v5834_v11 = vsel %vm12354_vm4, %v5829_v63, %v5833_v9  ;;  %v5838_v45 = vor.u32 %v5837_v38, %v5833_v9  ;;  %v5896_v49 = vrot.slane %v5894_v37, 4 }
 0x288   : > { %v5899_v22 = vrot.slane %v5897_v57, 5  ;;  %11865 = vmatmul.mubr.msk.bf16.gmra.mxu0 %vm5967_vm11, %v10855_v62  ;;  %v5852_v60 = vor.u32 %v5851_v43, %v15089_v35  ;;  %v5855_v54 = vshll.u32 %v15073_v47, 16  ;;  %v5861_v55 = vrot.slane %v5859_v23, 4  ;;  %v6474_v62 = vld [vmem:[#allocation2 + $0xc] sm:$0xe] }
 0x289   : > { %v5839_v61 = vrot.slane %v5838_v45, 4  ;;  %v5865_v19 = vshll.u32 %v15120_v52, 16  ;;  %11904 = vmatprep.mubr.msk.bf16.mxu0 %vm5967_vm11, %v12198_v31  ;;  %v5876_v17 = vor.u32 %v5875_v10, %v5872_v25  ;;  %v5879_v14 = vshll.u32 %v15095_v26, 16 }
 0x28a   : > { %11823 = vmatmul.mubr.msk.bf16.gmra.mxu1 %vm5967_vm11, %v10819_v21  ;;  %v5853_v53 = vrot.slane %v5852_v60, 4  ;;  %v5857_v20 = vrot.slane %v5855_v54, 5  ;;  %v5885_v4 = vrot.slane %v5883_v3, 4  ;;  %v5889_v48 = vshll.u32 %v15124_v13, 16  ;;  %v15143_v3 = vld [vmem:[%s17206_s3 + $0x14] sm:$0xf] }
 0x28b   : > { %v5844_v35 = vsel %vm12354_vm4, %v5839_v61, %v5843_v51  ;;  %v5867_v43 = vrot.slane %v5865_v19, 5  ;;  %v5877_v23 = vrot.slane %v5876_v17, 4  ;;  %v5881_v12 = vrot.slane %v5879_v14, 5  ;;  %v12233_v60 = vld [vmem:[#allocation2 + $0x4] sm:$0xf] }
 0x28c   : > { %v10820_v16 = vcombine.low %v5834_v11, %v5844_v35  ;;  %v5858_v39 = vsel %vm12354_vm4, %v5853_v53, %v5857_v20  ;;  %v5862_v25 = vor.u32 %v5861_v55, %v5857_v20  ;;  %v5891_v10 = vrot.slane %v5889_v48, 5  ;;  %v12199_v11 = vld [vmem:[#allocation2 + $0x18] sm:$0xff]   ;;  %v12200_v61 = vld [vmem:[#allocation2 + $0x24] sm:$0xff]  }
 0x28d   : > { %v5882_v2 = vsel %vm12354_vm4, %v5877_v23, %v5881_v12  ;;  %v5886_v38 = vor.u32 %v5885_v4, %v5881_v12  ;;  %v7090_v63 = vsel %vm6016_vm8, %v12232_v40, 0  ;;  %v5900_v9 = vor.u32 %v5899_v22, %v5896_v49  ;;  %v12234_v19 = vld [vmem:[#allocation2 + $0x8] sm:$0x1]  ;;  %v6475_v48 = vld [vmem:[#allocation2 + $0x18] sm:$0xe] }
 0x28e   : > { %11826 = vmatprep.mubr.msk.bf16.mxu1 %vm5967_vm11, %v10820_v16  ;;  %v5863_v37 = vrot.slane %v5862_v25, 4  ;;  %11903 = vmatpush3.bf16.msra.mxu0 %v7090_v63  ;;  %v5903_v57 = vshll.u32 %v15112_v24, 16  ;;  %v5909_v6 = vrot.slane %v5907_v58, 4  ;;  %v5913_v51 = vshll.u32 %v15136_v1, 16  ;;  %v6476_v16 = vld [vmem:[#allocation2 + $0x24] sm:$0xe] }
 0x28f   : > { %v5887_v21 = vrot.slane %v5886_v38, 4  ;;  %v5901_v45 = vrot.slane %v5900_v9, 4  ;;  %v10872_v31 = vrot.slane %v6473_v29, 9  ;;  %v6523_v54 = vrot.slane %v12233_v60, 5  ;;  %12120 = vmatprep.subr.msk.bf16.mxu0 %vm6016_vm8, %v15143_v3  ;;  %v12235_v25 = vld [vmem:[#allocation2 + $0x10] sm:$0xf] }
 0x290   : > { %v5868_v49 = vsel %vm12354_vm4, %v5863_v37, %v5867_v43  ;;  %v5905_v22 = vrot.slane %v5903_v57, 5  ;;  %v5915_v55 = vrot.slane %v5913_v51, 5  ;;  %v6526_v58 = vrot.slane %v12234_v19, 5  ;;  %v12236_v29 = vld [vmem:[#allocation2 + $0x14] sm:$0x1] }
 0x291   : > { %v10821_v17 = vcombine.low %v5858_v39, %v5868_v49  ;;  %v5892_v14 = vsel %vm12354_vm4, %v5887_v21, %v5891_v10  ;;  %11905 = vmatmul.mubr.msk.bf16.vlgmr.msra.gmra.mxu0 %vm5967_vm11, %v12199_v11  ;;  %v15163_v20 = vsel %vm12616_vm7, %v10872_v31, %v6523_v54  ;;  %v6525_v4 = vrot.slane %v6523_v54, 4  ;;  %v12237_v37 = vld [vmem:[#allocation2 + $0x1c] sm:$0xf]  ;;  %v12238_v21 = vld [vmem:[#allocation2 + $0x20] sm:$0x1]  ;;  %v12201_v19 = vld [vmem:[#allocation2 + $0x30] sm:$0xff]  }
 0x292   : > { %v10822_v35 = vcombine.low %v5882_v2, %v5892_v14  ;;  %v5906_v43 = vsel %vm12354_vm4, %v5901_v45, %v5905_v22  ;;  %v5910_v23 = vor.u32 %v5909_v6, %v5905_v22  ;;  %11908 = vmatprep.mubr.msk.bf16.mxu0 %vm5967_vm11, %v12200_v61  ;;  %v10873_v12 = vrot.slane %v6474_v62, 9  ;;  %v6477_v6 = vld [vmem:[#allocation2 + $0x30] sm:$0xe]  ;;  %v12239_v54 = vld [vmem:[#allocation2 + $0x28] sm:$0xf] }
 0x293   : > { %11827 = vmatmul.mubr.msk.bf16.gmra.mxu1 %vm5967_vm11, %v10821_v17  ;;  %v6527_v39 = vsel %vm12616_vm7, %v6525_v4, %v6526_v58  ;;  %v6530_v10 = vrot.slane %v12235_v25, 5  ;;  %v6533_v38 = vrot.slane %v12236_v29, 5  ;;  %v15173_v2 = vsel %vm6016_vm8, %v14805_v30, 0  ;;  %v6478_v22 = vld [vmem:[#allocation2 + $0x3c] sm:$0xe] }
 0x294   : > { %11830 = vmatprep.mubr.msk.bf16.mxu1 %vm5967_vm11, %v10822_v35  ;;  %v5911_v40 = vrot.slane %v5910_v23, 4  ;;  %v10889_v63 = vcombine.low %v15163_v20, %v6527_v39  ;;  %v10874_v9 = vrot.slane %v6475_v48, 9  ;;  %v6537_v57 = vrot.slane %v12237_v37, 5  ;;  %v6479_v20 = vld [vmem:[#allocation2 + $0x48] sm:$0xe]  ;;  %v12202_v4 = vld [vmem:[#allocation2 + $0x3c] sm:$0xff]  }
 0x295   : > { %v15179_v51 = vsel %vm12616_vm7, %v10873_v12, %v6530_v10  ;;  %v6532_v62 = vrot.slane %v6530_v10, 4  ;;  %v6540_v11 = vrot.slane %v12238_v21, 5  ;;  %v10875_v45 = vrot.slane %v6476_v16, 9  ;;  %v12240_v23 = vld [vmem:[#allocation2 + $0x34] sm:$0xf] }
 0x296   : > { %v5916_v30 = vsel %vm12354_vm4, %v5911_v40, %v5915_v55  ;;  %v15185_v31 = vsel %vm12616_vm7, %v10874_v9, %v6537_v57  ;;  %v6539_v60 = vrot.slane %v6537_v57, 4  ;;  %v6544_v49 = vrot.slane %v12239_v54, 5  ;;  %v6480_v25 = vld [vmem:[#allocation2 + $0x54] sm:$0xe]  ;;  %v6483_v54 = vld [vmem:[#allocation2 + $0x78] sm:$0xe] }
 0x297   : > { %v10823_v61 = vcombine.low %v5906_v43, %v5916_v30  ;;  %v15189_v58 = vsel %vm12616_vm7, %v6532_v62, %v6533_v38  ;;  %v6547_v17 = vrot.slane %v14842_v44, 5  ;;  %v10876_v14 = vrot.slane %v6477_v6, 9  ;;  %v6481_v6 = vld [vmem:[#allocation2 + $0x60] sm:$0xe] }
 0x298   : > { %v10890_v55 = vcombine.low %v15179_v51, %v15189_v58  ;;  %v15196_v48 = vsel %vm12616_vm7, %v6539_v60, %v6540_v11  ;;  %v15200_v35 = vsel %vm12616_vm7, %v10875_v45, %v6544_v49  ;;  %v6546_v43 = vrot.slane %v6544_v49, 4  ;;  %v12203_v49 = vld [vmem:[#allocation2 + $0x48] sm:$0xff]   ;;  %v12204_v58 = vld [vmem:[#allocation2 + $0x54] sm:$0xff]  }
 0x299   : > { %11909 = vmatmul.mubr.msk.bf16.gmra.mxu0 %vm5967_vm11, %v12201_v19  ;;  %v10891_v44 = vcombine.low %v15185_v31, %v15196_v48  ;;  %v6551_v12 = vrot.slane %v12240_v23, 5  ;;  %v6554_v16 = vrot.slane %v14878_v32, 5  ;;  %v10877_v39 = vrot.slane %v6478_v22, 9 }
 0x29a   : > { %11912 = vmatprep.mubr.msk.bf16.mxu0 %vm5967_vm11, %v12202_v4  ;;  %v15209_v10 = vsel %vm12616_vm7, %v6546_v43, %v6547_v17  ;;  %v6558_v29 = vrot.slane %v14817_v42, 5  ;;  %v6561_v38 = vrot.slane %v14934_v33, 5  ;;  %v10878_v40 = vrot.slane %v6479_v20, 9  ;;  %v6484_v4 = vld [vmem:[#allocation2 + $0x84] sm:$0xe] }
 0x29b   : > { %11831 = vmatmul.mubr.msk.bf16.gmra.mxu1 %vm5967_vm11, %v10823_v61  ;;  %v10892_v9 = vcombine.low %v15200_v35, %v15209_v10  ;;  %v15218_v32 = vsel %vm12616_vm7, %v10876_v14, %v6551_v12  ;;  %v6553_v37 = vrot.slane %v6551_v12, 4  ;;  %v6565_v57 = vrot.slane %v14860_v7, 5 }
 0x29c   : > { %11870 = vmatprep.mubr.msk.bf16.mxu1 %vm5967_vm11, %v10889_v63  ;;  %v15224_v42 = vsel %vm12616_vm7, %v10877_v39, %v6558_v29  ;;  %v6560_v33 = vrot.slane %v6558_v29, 4  ;;  %v6568_v51 = vrot.slane %v14964_v59, 5  ;;  %v10879_v62 = vrot.slane %v6480_v25, 9  ;;  %v6482_v63 = vld [vmem:[#allocation2 + $0x6c] sm:$0xe] }
 0x29d   : > { %v15229_v21 = vsel %vm12616_vm7, %v6553_v37, %v6554_v16  ;;  %v15233_v11 = vsel %vm12616_vm7, %v10878_v40, %v6565_v57  ;;  %v6567_v7 = vrot.slane %v6565_v57, 4  ;;  %v6572_v45 = vrot.slane %v14912_v50, 5  ;;  %v6485_v25 = vld [vmem:[#allocation2 + $0x90] sm:$0xe] }
 0x29e   : > { %v10893_v30 = vcombine.low %v15218_v32, %v15229_v21  ;;  %v15240_v31 = vsel %vm12616_vm7, %v6560_v33, %v6561_v38  ;;  %v6575_v59 = vrot.slane %v14994_v28, 5  ;;  %v10880_v60 = vrot.slane %v6481_v6, 9  ;;  %v6486_v6 = vld [vmem:[#allocation2 + $0x9c] sm:$0xe] }
 0x29f   : > { %v10894_v22 = vcombine.low %v15224_v42, %v15240_v31  ;;  %v15247_v61 = vsel %vm12616_vm7, %v6567_v7, %v6568_v51  ;;  %v15251_v50 = vsel %vm12616_vm7, %v10879_v62, %v6572_v45  ;;  %v6574_v19 = vrot.slane %v6572_v45, 4  ;;  %v8011_v51 = vld [vmem:[#allocation2 + $0xc] sm:$0xe] }
 0x2a0   : > { %v10895_v17 = vcombine.low %v15233_v11, %v15247_v61  ;;  %v6579_v28 = vrot.slane %v14956_v0, 5  ;;  %v6582_v14 = vrot.slane %v15024_v18, 5  ;;  %v10881_v20 = vrot.slane %v6482_v63, 9  ;;  %v15313_v63 = vld [vmem:[#allocation2 + $0x10] sm:$0xf] }
 0x2a1   : > { %11913 = vmatmul.mubr.msk.bf16.gmra.mxu0 %vm5967_vm11, %v12203_v49  ;;  %v15260_v48 = vsel %vm12616_vm7, %v6574_v19, %v6575_v59  ;;  %v6586_v43 = vrot.slane %v14982_v27, 5  ;;  %v6589_v23 = vrot.slane %v15044_v8, 5  ;;  %v10882_v12 = vrot.slane %v6483_v54, 9  ;;  %v15275_v27 = vld [vmem:[%s17206_s3 + $0x18] sm:$0xf]  ;;  %v12205_v59 = vld [vmem:[#allocation2 + $0x60] sm:$0xff]  }
 0x2a2   : > { %11916 = vmatprep.mubr.msk.bf16.mxu0 %vm5967_vm11, %v12204_v58  ;;  %v10896_v0 = vcombine.low %v15251_v50, %v15260_v48  ;;  %v15269_v18 = vsel %vm12616_vm7, %v10880_v60, %v6579_v28  ;;  %v6581_v16 = vrot.slane %v6579_v28, 4  ;;  %v6593_v39 = vrot.slane %v15012_v5, 5  ;;  %v6487_v58 = vld [vmem:[#allocation2 + $0xa8] sm:$0xe]  ;;  %v12206_v28 = vld [vmem:[#allocation2 + $0x6c] sm:$0xff]  }
 0x2a3   : > { %11871 = vmatmul.mubr.msk.bf16.vlgmr.msra.gmra.mxu1 %vm5967_vm11, %v10890_v55  ;;  %v15280_v8 = vsel %vm12616_vm7, %v10881_v20, %v6586_v43  ;;  %v6588_v29 = vrot.slane %v6586_v43, 4  ;;  %v6596_v38 = vrot.slane %v15068_v34, 5  ;;  %v10883_v40 = vrot.slane %v6484_v4, 9 }
 0x2a4   : > { %11937 = vmatpush3.bf16.msra.mxu1 %v15173_v2  ;;  %11874 = vmatprep.mubr.msk.bf16.mxu1 %vm5967_vm11, %v10891_v44  ;;  %v15287_v5 = vsel %vm12616_vm7, %v6581_v16, %v6582_v14  ;;  %v15291_v37 = vsel %vm12616_vm7, %v10882_v12, %v6593_v39  ;;  %v6595_v55 = vrot.slane %v6593_v39, 4  ;;  %v6600_v57 = vrot.slane %v15036_v56, 5  ;;  %v8012_v16 = vld [vmem:[#allocation2 + $0x18] sm:$0xe] }
 0x2a5   : > { %v10897_v34 = vcombine.low %v15269_v18, %v15287_v5  ;;  %v15298_v2 = vsel %vm12616_vm7, %v6588_v29, %v6589_v23  ;;  %v6603_v44 = vrot.slane %v15087_v46, 5  ;;  %v10884_v33 = vrot.slane %v6485_v25, 9  ;;  %12121 = vmatprep.subr.msk.bf16.mxu1 %vm6016_vm8, %v15275_v27  ;;  %v15315_v46 = vld [vmem:[#allocation2 + $0x14] sm:$0x1]  ;;  %v15341_v29 = vld [vmem:[#allocation2 + $0x1c] sm:$0xf] }
 0x2a6   : > { %v10898_v62 = vcombine.low %v15280_v8, %v15298_v2  ;;  %v15307_v56 = vsel %vm12616_vm7, %v6595_v55, %v6596_v38  ;;  %v15311_v7 = vsel %vm12616_vm7, %v10883_v40, %v6600_v57  ;;  %v6602_v45 = vrot.slane %v6600_v57, 4  ;;  %v8017_v8 = vld [vmem:[#allocation2 + $0x54] sm:$0xe] }
 0x2a7   : > { %v10899_v60 = vcombine.low %v15291_v37, %v15307_v56  ;;  %v6607_v54 = vrot.slane %v15051_v41, 5  ;;  %v6610_v49 = vrot.slane %v15104_v15, 5  ;;  %v10885_v19 = vrot.slane %v6486_v6, 9  ;;  %v15356_v6 = vld [vmem:[#allocation2 + $0x20] sm:$0x1] }
 0x2a8   : > { %v15323_v14 = vsel %vm12616_vm7, %v6602_v45, %v6603_v44  ;;  %v6614_v20 = vrot.slane %v15073_v47, 5  ;;  %v6617_v4 = vrot.slane %v15120_v52, 5  ;;  %v10987_v43 = vrot.slane %v8011_v51, 9  ;;  %v11069_v44 = vld [vmem:[%s17206_s3 + $0x1c] sm:$0xf] }
 0x2a9   : > { %11917 = vmatmul.mubr.msk.bf16.gmra.mxu0 %vm5967_vm11, %v12205_v59  ;;  %v10900_v23 = vcombine.low %v15311_v7, %v15323_v14  ;;  %v15332_v41 = vsel %vm12616_vm7, %v10884_v33, %v6607_v54  ;;  %v6609_v15 = vrot.slane %v6607_v54, 4  ;;  %v8077_v12 = vrot.slane %v15313_v63, 5  ;;  %v6488_v33 = vld [vmem:[#allocation2 + $0xb4] sm:$0xe]  ;;  %v15384_v45 = vld [vmem:[#allocation2 + $0x28] sm:$0xf] }
 0x2aa   : > { %11920 = vmatprep.mubr.msk.bf16.mxu0 %vm5967_vm11, %v12206_v28  ;;  %v15338_v47 = vsel %vm12616_vm7, %v10885_v19, %v6614_v20  ;;  %v6616_v52 = vrot.slane %v6614_v20, 4  ;;  %v8080_v39 = vrot.slane %v15315_v46, 5  ;;  %v10886_v25 = vrot.slane %v6487_v58, 9  ;;  %v15390_v19 = vld [vmem:[#allocation2 + $0x2c] sm:$0x1]  ;;  %v12207_v58 = vld [vmem:[#allocation2 + $0x78] sm:$0xff]  }
 0x2ab   : > { %11875 = vmatmul.mubr.msk.bf16.gmra.mxu1 %vm5967_vm11, %v10892_v9  ;;  %v15349_v38 = vsel %vm12616_vm7, %v6609_v15, %v6610_v49  ;;  %v15353_v40 = vsel %vm12616_vm7, %v10987_v43, %v8077_v12  ;;  %v8079_v55 = vrot.slane %v8077_v12, 4  ;;  %v6621_v57 = vrot.slane %v15095_v26, 5  ;;  %v7285_v15 = vld [vmem:[#allocation2 + $0xc] sm:$0xf]  ;;  %v12208_v12 = vld [vmem:[#allocation2 + $0x84] sm:$0xff]  }
 0x2ac   : > { %11878 = vmatprep.mubr.msk.bf16.mxu1 %vm5967_vm11, %v10893_v30  ;;  %v10901_v35 = vcombine.low %v15332_v41, %v15349_v38  ;;  %v15369_v10 = vsel %vm12616_vm7, %v6616_v52, %v6617_v4  ;;  %v6624_v26 = vrot.slane %v15124_v13, 5  ;;  %v8286_v9 = vsel %vm6016_vm8, %v15143_v3, 0  ;;  %v8013_v13 = vld [vmem:[#allocation2 + $0x24] sm:$0xe] }
 0x2ad   : > { %v15378_v32 = vsel %vm12616_vm7, %v8079_v55, %v8080_v39  ;;  %v15382_v21 = vsel %vm12616_vm7, %v10886_v25, %v6621_v57  ;;  %v6623_v30 = vrot.slane %v6621_v57, 4  ;;  %11971 = vmatpush3.bf16.msra.mxu0 %v8286_v9  ;;  %v10988_v59 = vrot.slane %v8012_v16, 9 }
 0x2ae   : > { %v11004_v3 = vcombine.low %v15353_v40, %v15378_v32  ;;  %v8084_v54 = vrot.slane %v15341_v29, 5  ;;  %v8087_v49 = vrot.slane %v15356_v6, 5  ;;  %12122 = vmatprep.subr.msk.bf16.mxu0 %vm6016_vm8, %v11069_v44  ;;  %v10887_v20 = vrot.slane %v6488_v33, 9  ;;  %v8018_v32 = vld [vmem:[#allocation2 + $0x60] sm:$0xe] }
 0x2af   : > { %v15395_v28 = vsel %vm12616_vm7, %v6623_v30, %v6624_v26  ;;  %v6628_v4 = vrot.slane %v15112_v24, 5  ;;  %v6631_v43 = vrot.slane %v15136_v1, 5  ;;  %v10989_v25 = vrot.slane %v8013_v13, 9  ;;  %v8014_v30 = vld [vmem:[#allocation2 + $0x30] sm:$0xe] }
 0x2b0   : > { %v15403_v52 = vsel %vm12616_vm7, %v10988_v59, %v8084_v54  ;;  %v8086_v39 = vrot.slane %v8084_v54, 4  ;;  %v8091_v1 = vrot.slane %v15384_v45, 5  ;;  %v8094_v57 = vrot.slane %v15390_v19, 5 }
 0x2b1   : > { %11921 = vmatmul.mubr.msk.bf16.gmra.mxu0 %vm5967_vm11, %v12207_v58  ;;  %v15408_v55 = vsel %vm12616_vm7, %v10887_v20, %v6628_v4  ;;  %v6630_v24 = vrot.slane %v6628_v4, 4  ;;  %v7334_v26 = vshrl.u32 %v7285_v15, 16  ;;  %v7337_v9 = vshll.u32 %v7285_v15, 16  ;;  %v15432_v58 = vld [vmem:[#allocation2 + $0x34] sm:$0xf] }
 0x2b2   : > { %11924 = vmatprep.mubr.msk.bf16.mxu0 %vm5967_vm11, %v12208_v12  ;;  %v15415_v44 = vsel %vm12616_vm7, %v8086_v39, %v8087_v49  ;;  %v7343_v33 = vshll.u32 %v15313_v63, 16  ;;  %v15430_v54 = vsel %vm12616_vm7, %v10989_v25, %v8091_v1  ;;  %v8093_v49 = vrot.slane %v8091_v1, 4  ;;  %v15434_v20 = vld [vmem:[#allocation2 + $0x38] sm:$0x1]  ;;  %v12209_v1 = vld [vmem:[#allocation2 + $0x90] sm:$0xff]  }
 0x2b3   : > { %11879 = vmatmul.mubr.msk.bf16.gmra.mxu1 %vm5967_vm11, %v10894_v22  ;;  %v11005_v13 = vcombine.low %v15403_v52, %v15415_v44  ;;  %v15426_v59 = vsel %vm12616_vm7, %v6630_v24, %v6631_v43  ;;  %v7336_v31 = vrot.slane %v7334_v26, 4  ;;  %v7339_v22 = vrot.slane %v7337_v9, 5  ;;  %v7288_v43 = vld [vmem:[#allocation2 + $0x18] sm:$0xf] }
 0x2b4   : > { %11882 = vmatprep.mubr.msk.bf16.mxu1 %vm5967_vm11, %v10895_v17  ;;  %v7345_v4 = vrot.slane %v7343_v33, 5  ;;  %v15444_v15 = vsel %vm12616_vm7, %v8093_v49, %v8094_v57  ;;  %v7347_v12 = vshrl.u32 %v15313_v63, 16  ;;  %v7353_v39 = vshll.u32 %v15315_v46, 16  ;;  %v8015_v57 = vld [vmem:[#allocation2 + $0x3c] sm:$0xe] }
 0x2b5   : > { %v10990_v25 = vrot.slane %v8014_v30, 9  ;;  %v7340_v61 = vor.u32 %v7339_v22, %v7336_v31  ;;  %v8098_v17 = vrot.slane %v15432_v58, 5  ;;  %v8101_v24 = vrot.slane %v15434_v20, 5  ;;  %v12210_v49 = vld [vmem:[#allocation2 + $0x9c] sm:$0xff]  }
 0x2b6   : > { %v7349_v26 = vrot.slane %v7347_v12, 4  ;;  %v7355_v9 = vrot.slane %v7353_v39, 5  ;;  %v7358_v33 = vshrl.u32 %v7288_v43, 16  ;;  %v7361_v42 = vshll.u32 %v7288_v43, 16  ;;  %v15457_v31 = vld [vmem:[#allocation2 + $0x40] sm:$0xf] }
 0x2b7   : > { %v7341_v16 = vrot.slane %v7340_v61, 4  ;;  %v15454_v63 = vsel %vm12616_vm7, %v10990_v25, %v8098_v17  ;;  %v8100_v46 = vrot.slane %v8098_v17, 4  ;;  %v7367_v30 = vshll.u32 %v15341_v29, 16  ;;  %v15461_v43 = vld [vmem:[#allocation2 + $0x44] sm:$0x1] }
 0x2b8   : > { %v7350_v22 = vor.u32 %v7349_v26, %v7345_v4  ;;  %v7360_v51 = vrot.slane %v7358_v33, 4  ;;  %v7363_v12 = vrot.slane %v7361_v42, 5  ;;  %v7371_v39 = vshrl.u32 %v15341_v29, 16  ;;  %v7291_v33 = vld [vmem:[#allocation2 + $0x24] sm:$0xf] }
 0x2b9   : > { %11925 = vmatmul.mubr.msk.bf16.gmra.mxu0 %vm5967_vm11, %v12209_v1  ;;  %v7346_v25 = vsel %vm12354_vm4, %v7341_v16, %v7345_v4  ;;  %v15468_v61 = vsel %vm12616_vm7, %v8100_v46, %v8101_v24  ;;  %v7369_v17 = vrot.slane %v7367_v30, 5  ;;  %v7377_v11 = vshll.u32 %v15356_v6, 16  ;;  %v12211_v46 = vld [vmem:[#allocation2 + $0xa8] sm:$0xff]  }
 0x2ba   : > { %11928 = vmatprep.mubr.msk.bf16.mxu0 %vm5967_vm11, %v12210_v49  ;;  %v7351_v29 = vrot.slane %v7350_v22, 4  ;;  %v11007_v42 = vcombine.low %v15454_v63, %v15468_v61  ;;  %v7364_v1 = vor.u32 %v7363_v12, %v7360_v51  ;;  %v7373_v26 = vrot.slane %v7371_v39, 4  ;;  %v12212_v39 = vld [vmem:[#allocation2 + $0xb4] sm:$0xff]  }
 0x2bb   : > { %11883 = vmatmul.mubr.msk.bf16.gmra.mxu1 %vm5967_vm11, %v10896_v0  ;;  %v7379_v16 = vrot.slane %v7377_v11, 5  ;;  %v10991_v4 = vrot.slane %v8015_v57, 9  ;;  %v8105_v6 = vrot.slane %v15457_v31, 5  ;;  %v8108_v50 = vrot.slane %v15461_v43, 5  ;;  %v8016_v11 = vld [vmem:[#allocation2 + $0x48] sm:$0xe] }
 0x2bc   : > { %11886 = vmatprep.mubr.msk.bf16.mxu1 %vm5967_vm11, %v10897_v34  ;;  %v7356_v48 = vsel %vm12354_vm4, %v7351_v29, %v7355_v9  ;;  %v7365_v0 = vrot.slane %v7364_v1, 4  ;;  %v7374_v24 = vor.u32 %v7373_v26, %v7369_v17  ;;  %v15487_v51 = vsel %vm6016_vm8, %v15275_v27, 0  ;;  %v7294_v57 = vld [vmem:[#allocation2 + $0x30] sm:$0xf]  ;;  %v15498_v27 = vld [vmem:[#allocation2 + $0x4c] sm:$0xf] }
 0x2bd   : > { %v15489_v49 = vcombine.low %v7346_v25, %v7356_v48  ;;  %v15493_v18 = vsel %vm12616_vm7, %v10991_v4, %v8105_v6  ;;  %v8107_v5 = vrot.slane %v8105_v6, 4  ;;  %v7382_v34 = vshrl.u32 %v7291_v33, 16  ;;  %v15506_v4 = vld [vmem:[#allocation2 + $0x50] sm:$0x1] }
 0x2be   : > { %v7370_v9 = vsel %vm12354_vm4, %v7365_v0, %v7369_v17  ;;  %v7375_v30 = vrot.slane %v7374_v24, 4  ;;  %v7385_v22 = vshll.u32 %v7291_v33, 16  ;;  %v7391_v12 = vshll.u32 %v15384_v45, 16 }
 0x2bf   : > { %v15502_v25 = vsel %vm12616_vm7, %v8107_v5, %v8108_v50  ;;  %v7384_v29 = vrot.slane %v7382_v34, 4  ;;  %v7395_v1 = vshrl.u32 %v15384_v45, 16  ;;  %v7401_v26 = vshll.u32 %v15390_v19, 16 }
 0x2c0   : > { %v7380_v17 = vsel %vm12354_vm4, %v7375_v30, %v7379_v16  ;;  %v11008_v33 = vcombine.low %v15493_v18, %v15502_v25  ;;  %v7387_v6 = vrot.slane %v7385_v22, 5  ;;  %v7393_v48 = vrot.slane %v7391_v12, 5 }
 0x2c1   : > { %11929 = vmatmul.mubr.msk.bf16.gmra.mxu0 %vm5967_vm11, %v12211_v46  ;;  %v15514_v50 = vcombine.low %v7370_v9, %v7380_v17  ;;  %v7397_v0 = vrot.slane %v7395_v1, 4  ;;  %v7403_v45 = vrot.slane %v7401_v26, 5  ;;  %v10992_v24 = vrot.slane %v8016_v11, 9  ;;  %v15534_v1 = vld [vmem:[#allocation2 + $0x5c] sm:$0x1] }
 0x2c2   : > { %11932 = vmatprep.mubr.msk.bf16.mxu0 %vm5967_vm11, %v12212_v39  ;;  %v7388_v19 = vor.u32 %v7387_v6, %v7384_v29  ;;  %v8112_v16 = vrot.slane %v15498_v27, 5  ;;  %v8115_v5 = vrot.slane %v15506_v4, 5  ;;  %v7406_v34 = vshrl.u32 %v7294_v57, 16  ;;  %v15532_v39 = vld [vmem:[#allocation2 + $0x58] sm:$0xf] }
 0x2c3   : > { %11887 = vmatmul.mubr.msk.bf16.gmra.mxu1 %vm5967_vm11, %v10898_v62  ;;  %v7398_v46 = vor.u32 %v7397_v0, %v7393_v48  ;;  %v7409_v9 = vshll.u32 %v7294_v57, 16  ;;  %v7415_v11 = vshll.u32 %v15432_v58, 16  ;;  %v7419_v30 = vshrl.u32 %v15432_v58, 16  ;;  %v12213_v57 = vld [vmem:[#allocation2 + $0xc0] sm:$0xff]   ;;  %v7297_v0 = vld [vmem:[#allocation2 + $0x3c] sm:$0xf] }
 0x2c4   : > { %11890 = vmatprep.mubr.msk.bf16.mxu1 %vm5967_vm11, %v10899_v60  ;;  %v7389_v2 = vrot.slane %v7388_v19, 4  ;;  %v15530_v62 = vsel %vm12616_vm7, %v10992_v24, %v8112_v16  ;;  %v8114_v22 = vrot.slane %v8112_v16, 4  ;;  %v7408_v12 = vrot.slane %v7406_v34, 4 }
 0x2c5   : > { %v7399_v29 = vrot.slane %v7398_v46, 4  ;;  %v7411_v37 = vrot.slane %v7409_v9, 5  ;;  %v7417_v56 = vrot.slane %v7415_v11, 5  ;;  %v7421_v60 = vrot.slane %v7419_v30, 4 }
 0x2c6   : > { %v7394_v58 = vsel %vm12354_vm4, %v7389_v2, %v7393_v48  ;;  %v15540_v26 = vsel %vm12616_vm7, %v8114_v22, %v8115_v5  ;;  %v7425_v17 = vshll.u32 %v15434_v20, 16  ;;  %v10993_v6 = vrot.slane %v8017_v8, 9  ;;  %v7300_v8 = vld [vmem:[#allocation2 + $0x48] sm:$0xf] }
 0x2c7   : > { %v7404_v24 = vsel %vm12354_vm4, %v7399_v29, %v7403_v45  ;;  %v11009_v19 = vcombine.low %v15530_v62, %v15540_v26  ;;  %v7412_v16 = vor.u32 %v7411_v37, %v7408_v12  ;;  %v7422_v34 = vor.u32 %v7421_v60, %v7417_v56  ;;  %v15574_v29 = vld [vmem:[#allocation2 + $0x64] sm:$0xf]  ;;  %v15576_v37 = vld [vmem:[#allocation2 + $0x68] sm:$0x1]  ;;  %v15707_v26 = vld [vmem:[%s17206_s3 + $0x20] sm:$0xf] }
 0x2c8   : > { %v15548_v46 = vcombine.low %v7394_v58, %v7404_v24  ;;  %v7427_v48 = vrot.slane %v7425_v17, 5  ;;  %v8119_v5 = vrot.slane %v15532_v39, 5  ;;  %v8122_v9 = vrot.slane %v15534_v1, 5 }
 0x2c9   : > { %11933 = vmatmul.mubr.msk.bf16.gmra.mxu0 %vm5967_vm11, %v12213_v57  ;;  %v7413_v20 = vrot.slane %v7412_v16, 4  ;;  %v7423_v45 = vrot.slane %v7422_v34, 4  ;;  %v7430_v11 = vshrl.u32 %v7297_v0, 16  ;;  %v7433_v30 = vshll.u32 %v7297_v0, 16 }
 0x2ca   : > { %11972 = vmatprep.mubr.msk.bf16.mxu0 %vm5967_vm11, %v11004_v3  ;;  %v15562_v2 = vsel %vm12616_vm7, %v10993_v6, %v8119_v5  ;;  %v8121_v22 = vrot.slane %v8119_v5, 4  ;;  %v7439_v12 = vshll.u32 %v15457_v31, 16  ;;  %v7443_v40 = vshrl.u32 %v15457_v31, 16 }
 0x2cb   : > { %11891 = vmatmul.mubr.msk.bf16.gmra.mxu1 %vm5967_vm11, %v10900_v23  ;;  %v7418_v7 = vsel %vm12354_vm4, %v7413_v20, %v7417_v56  ;;  %v7428_v14 = vsel %vm12354_vm4, %v7423_v45, %v7427_v48  ;;  %v7432_v23 = vrot.slane %v7430_v11, 4  ;;  %v7435_v3 = vrot.slane %v7433_v30, 5  ;;  %v7303_v20 = vld [vmem:[#allocation2 + $0x54] sm:$0xf] }
 0x2cc   : > { %11894 = vmatprep.mubr.msk.bf16.mxu1 %vm5967_vm11, %v10901_v35  ;;  %v15578_v60 = vcombine.low %v7418_v7, %v7428_v14  ;;  %v15582_v31 = vsel %vm12616_vm7, %v8121_v22, %v8122_v9  ;;  %v7441_v41 = vrot.slane %v7439_v12, 5  ;;  %v7445_v38 = vrot.slane %v7443_v40, 4  ;;  %v8019_v9 = vld [vmem:[#allocation2 + $0x6c] sm:$0xe]  ;;  %v15598_v22 = vld [vmem:[#allocation2 + $0x70] sm:$0xf] }
 0x2cd   : > { %v11010_v35 = vcombine.low %v15562_v2, %v15582_v31  ;;  %v7436_v56 = vor.u32 %v7435_v3, %v7432_v23  ;;  %v7449_v57 = vshll.u32 %v15461_v43, 16  ;;  %v10994_v58 = vrot.slane %v8018_v32, 9  ;;  %v15607_v40 = vld [vmem:[#allocation2 + $0x74] sm:$0x1] }
 0x2ce   : > { %v7446_v17 = vor.u32 %v7445_v38, %v7441_v41  ;;  %v8126_v6 = vrot.slane %v15574_v29, 5  ;;  %v8129_v0 = vrot.slane %v15576_v37, 5  ;;  %v7454_v24 = vshrl.u32 %v7300_v8, 16 }
 0x2cf   : > { %v7437_v16 = vrot.slane %v7436_v56, 4  ;;  %v7451_v34 = vrot.slane %v7449_v57, 5  ;;  %v7457_v48 = vshll.u32 %v7300_v8, 16  ;;  %v7463_v5 = vshll.u32 %v15498_v27, 16 }
 0x2d0   : > { %v7447_v43 = vrot.slane %v7446_v17, 4  ;;  %v15596_v45 = vsel %vm12616_vm7, %v10994_v58, %v8126_v6  ;;  %v8128_v11 = vrot.slane %v8126_v6, 4  ;;  %v7456_v30 = vrot.slane %v7454_v24, 4 }
 0x2d1   : > { %11973 = vmatmul.mubr.msk.bf16.vlgmr.msra.gmra.mxu0 %vm5967_vm11, %v11005_v13  ;;  %v17405_v8 = vcombine.low %v15430_v54, %v15444_v15  ;;  %v7442_v12 = vsel %vm12354_vm4, %v7437_v16, %v7441_v41  ;;  %v7459_v52 = vrot.slane %v7457_v48, 5  ;;  %v7465_v44 = vrot.slane %v7463_v5, 5 }
 0x2d2   : > { %v7467_v13 = vshrl.u32 %v15498_v27, 16  ;;  %v17406_v32 = vcombine.low %v15338_v47, %v15369_v10  ;;  %v7452_v7 = vsel %vm12354_vm4, %v7447_v43, %v7451_v34  ;;  %v15617_v54 = vsel %vm12616_vm7, %v8128_v11, %v8129_v0  ;;  %v15636_v34 = vld [vmem:[#allocation2 + $0x7c] sm:$0xf] }
 0x2d3   : > { %11976 = vmatprep.mubr.msk.bf16.mxu0 %vm5967_vm11, %v17405_v8  ;;  %v7473_v15 = vshll.u32 %v15506_v4, 16  ;;  %v10995_v14 = vrot.slane %v8019_v9, 9  ;;  %v17407_v27 = vcombine.low %v15382_v21, %v15395_v28  ;;  %v15624_v23 = vcombine.low %v7442_v12, %v7452_v7  ;;  %v8020_v28 = vld [vmem:[#allocation2 + $0x78] sm:$0xe]  ;;  %v7306_v12 = vld [vmem:[#allocation2 + $0x60] sm:$0xf] }
 0x2d4   : > { %11895 = vmatmul.mubr.msk.bf16.gmra.mxu1 %vm5967_vm11, %v17406_v32  ;;  %v11011_v47 = vcombine.low %v15596_v45, %v15617_v54  ;;  %v7460_v10 = vor.u32 %v7459_v52, %v7456_v30  ;;  %v7469_v3 = vrot.slane %v7467_v13, 4  ;;  %v8133_v38 = vrot.slane %v15598_v22, 5 }
 0x2d5   : > { %11898 = vmatprep.mubr.msk.bf16.mxu1 %vm5967_vm11, %v17407_v27  ;;  %v7475_v41 = vrot.slane %v7473_v15, 5  ;;  %v8136_v56 = vrot.slane %v15607_v40, 5  ;;  %v7478_v57 = vshrl.u32 %v7303_v20, 16  ;;  %v7481_v17 = vshll.u32 %v7303_v20, 16  ;;  %v15640_v20 = vld [vmem:[#allocation2 + $0x80] sm:$0x1] }
 0x2d6   : > { %v7461_v4 = vrot.slane %v7460_v10, 4  ;;  %v7470_v58 = vor.u32 %v7469_v3, %v7465_v44  ;;  %v7487_v21 = vshll.u32 %v15532_v39, 16  ;;  %v15633_v6 = vsel %vm12616_vm7, %v10995_v14, %v8133_v38  ;;  %v7309_v14 = vld [vmem:[#allocation2 + $0x6c] sm:$0xf]  ;;  %v8021_v3 = vld [vmem:[#allocation2 + $0x84] sm:$0xe] }
 0x2d7   : > { %v8135_v0 = vrot.slane %v8133_v38, 4  ;;  %v7480_v24 = vrot.slane %v7478_v57, 4  ;;  %v7491_v16 = vshrl.u32 %v15532_v39, 16  ;;  %v7483_v9 = vrot.slane %v7481_v17, 5  ;;  %v15682_v57 = vld [vmem:[#allocation2 + $0x88] sm:$0xf] }
 0x2d8   : > { %v7466_v48 = vsel %vm12354_vm4, %v7461_v4, %v7465_v44  ;;  %v7471_v5 = vrot.slane %v7470_v58, 4  ;;  %v7489_v43 = vrot.slane %v7487_v21, 5  ;;  %v7497_v30 = vshll.u32 %v15534_v1, 16  ;;  %v15684_v4 = vld [vmem:[#allocation2 + $0x8c] sm:$0x1] }
 0x2d9   : > { %11977 = vmatmul.mubr.msk.bf16.gmra.mxu0 %vm5967_vm11, %v11007_v42  ;;  %v15648_v11 = vsel %vm12616_vm7, %v8135_v0, %v8136_v56  ;;  %v7493_v39 = vrot.slane %v7491_v16, 4  ;;  %v10996_v8 = vrot.slane %v8020_v28, 9  ;;  %v7484_v61 = vor.u32 %v7483_v9, %v7480_v24 }
 0x2da   : > { %11980 = vmatprep.mubr.msk.bf16.mxu0 %vm5967_vm11, %v11008_v33  ;;  %v7476_v52 = vsel %vm12354_vm4, %v7471_v5, %v7475_v41  ;;  %v11012_v63 = vcombine.low %v15633_v6, %v15648_v11  ;;  %v8140_v42 = vrot.slane %v15636_v34, 5  ;;  %v17408_v44 = vcombine.low %v15408_v55, %v15426_v59 }
 0x2db   : > { %v15664_v1 = vcombine.low %v7466_v48, %v7476_v52  ;;  %v7494_v13 = vor.u32 %v7493_v39, %v7489_v43  ;;  %v7499_v18 = vrot.slane %v7497_v30, 5  ;;  %v8143_v25 = vrot.slane %v15640_v20, 5 }
 0x2dc   : > { %11899 = vmatmul.mubr.msk.bf16.gmra.mxu1 %vm5967_vm11, %v17408_v44  ;;  %v7485_v33 = vrot.slane %v7484_v61, 4  ;;  %v15671_v32 = vsel %vm12616_vm7, %v10996_v8, %v8140_v42  ;;  %v8142_v7 = vrot.slane %v8140_v42, 4  ;;  %v7502_v15 = vshrl.u32 %v7306_v12, 16  ;;  %v15720_v44 = vld [vmem:[#allocation2 + $0x98] sm:$0x1] }
 0x2dd   : > { %11938 = vmatprep.mubr.msk.bf16.mxu1 %vm5967_vm11, %v15489_v49  ;;  %v7495_v55 = vrot.slane %v7494_v13, 4  ;;  %v7505_v59 = vshll.u32 %v7306_v12, 16  ;;  %v7511_v27 = vshll.u32 %v15574_v29, 16  ;;  %v7515_v10 = vshrl.u32 %v15574_v29, 16  ;;  %v15715_v12 = vld [vmem:[#allocation2 + $0x94] sm:$0xf] }
 0x2de   : > { %v7490_v41 = vsel %vm12354_vm4, %v7485_v33, %v7489_v43  ;;  %v15679_v49 = vsel %vm12616_vm7, %v8142_v7, %v8143_v25  ;;  %v7504_v38 = vrot.slane %v7502_v15, 4  ;;  %v7521_v56 = vshll.u32 %v15576_v37, 16  ;;  %v8022_v43 = vld [vmem:[#allocation2 + $0x90] sm:$0xe] }
 0x2df   : > { %v7500_v58 = vsel %vm12354_vm4, %v7495_v55, %v7499_v18  ;;  %v11013_v29 = vcombine.low %v15671_v32, %v15679_v49  ;;  %v7507_v17 = vrot.slane %v7505_v59, 5  ;;  %v7513_v21 = vrot.slane %v7511_v27, 5 }
 0x2e0   : > { %v15690_v28 = vcombine.low %v7490_v41, %v7500_v58  ;;  %v7517_v0 = vrot.slane %v7515_v10, 4  ;;  %v7523_v24 = vrot.slane %v7521_v56, 5  ;;  %v10997_v16 = vrot.slane %v8021_v3, 9 }
 0x2e1   : > { %11981 = vmatmul.mubr.msk.bf16.gmra.mxu0 %vm5967_vm11, %v11009_v19  ;;  %v7508_v37 = vor.u32 %v7507_v17, %v7504_v38  ;;  %v8147_v48 = vrot.slane %v15682_v57, 5  ;;  %v8150_v5 = vrot.slane %v15684_v4, 5  ;;  %v7526_v9 = vshrl.u32 %v7309_v14, 16  ;;  %v7315_v38 = vld [vmem:[#allocation2 + $0x84] sm:$0xf] }
 0x2e2   : > { %11984 = vmatprep.mubr.msk.bf16.mxu0 %vm5967_vm11, %v11010_v35  ;;  %v7518_v39 = vor.u32 %v7517_v0, %v7513_v21  ;;  %v7529_v30 = vshll.u32 %v7309_v14, 16  ;;  %v7535_v8 = vshll.u32 %v15598_v22, 16  ;;  %v7539_v62 = vshrl.u32 %v15598_v22, 16  ;;  %v8023_v0 = vld [vmem:[#allocation2 + $0x9c] sm:$0xe] }
 0x2e3   : > { %v7509_v19 = vrot.slane %v7508_v37, 4  ;;  %v15713_v2 = vsel %vm12616_vm7, %v10997_v16, %v8147_v48  ;;  %v8149_v31 = vrot.slane %v8147_v48, 4  ;;  %v7528_v35 = vrot.slane %v7526_v9, 4  ;;  %v15759_v37 = vld [vmem:[#allocation2 + $0xa0] sm:$0xf] }
 0x2e4   : > { %11939 = vmatmul.mubr.msk.bf16.vlgmr.msra.gmra.mxu1 %vm5967_vm11, %v15514_v50  ;;  %v7519_v22 = vrot.slane %v7518_v39, 4  ;;  %v7531_v52 = vrot.slane %v7529_v30, 5  ;;  %v7537_v61 = vrot.slane %v7535_v8, 5  ;;  %v7541_v42 = vrot.slane %v7539_v62, 4  ;;  %v15761_v48 = vld [vmem:[#allocation2 + $0xa4] sm:$0x1] }
 0x2e5   : > { %12005 = vmatpush3.bf16.msra.mxu1 %v15487_v51  ;;  %11942 = vmatprep.mubr.msk.bf16.mxu1 %vm5967_vm11, %v15548_v46  ;;  %v7514_v50 = vsel %vm12354_vm4, %v7509_v19, %v7513_v21  ;;  %v15726_v13 = vsel %vm12616_vm7, %v8149_v31, %v8150_v5  ;;  %v7545_v18 = vshll.u32 %v15607_v40, 16  ;;  %v10998_v25 = vrot.slane %v8022_v43, 9  ;;  %v7312_v51 = vld [vmem:[#allocation2 + $0x78] sm:$0xf] }
 0x2e6   : > { %12123 = vmatprep.subr.msk.bf16.mxu1 %vm6016_vm8, %v15707_v26  ;;  %v7524_v46 = vsel %vm12354_vm4, %v7519_v22, %v7523_v24  ;;  %v11014_v33 = vcombine.low %v15713_v2, %v15726_v13  ;;  %v7532_v7 = vor.u32 %v7531_v52, %v7528_v35  ;;  %v7542_v15 = vor.u32 %v7541_v42, %v7537_v61  ;;  %v15749_v24 = vpop.f32.mrf.mxu0  ;;  %v8024_v52 = vld [vmem:[#allocation2 + $0xa8] sm:$0xe] }
 0x2e7   : > { %v15735_v14 = vcombine.low %v7514_v50, %v7524_v46  ;;  %v7547_v55 = vrot.slane %v7545_v18, 5  ;;  %v8154_v59 = vrot.slane %v15715_v12, 5  ;;  %v8157_v40 = vrot.slane %v15720_v44, 5 }
 0x2e8   : > { %v7533_v27 = vrot.slane %v7532_v7, 4  ;;  %v7543_v10 = vrot.slane %v7542_v15, 4  ;;  %v7550_v3 = vshrl.u32 %v7312_v51, 16  ;;  %v7553_v41 = vshll.u32 %v7312_v51, 16  ;;  %v15778_v19 = vpop.f32.mrf.mxu0 }
 0x2e9   : > { %11985 = vmatmul.mubr.msk.bf16.gmra.mxu0 %vm5967_vm11, %v11011_v47  ;;  %v15745_v56 = vsel %vm12616_vm7, %v10998_v25, %v8154_v59  ;;  %v8156_v58 = vrot.slane %v8154_v59, 4  ;;  %v7559_v17 = vshll.u32 %v15636_v34, 16  ;;  %v7563_v21 = vshrl.u32 %v15636_v34, 16  ;;  %v15783_v25 = vld [vmem:[#allocation2 + $0xac] sm:$0xf] }
 0x2ea   : > { %11988 = vmatprep.mubr.msk.bf16.mxu0 %vm5967_vm11, %v11012_v63  ;;  %v7538_v45 = vsel %vm12354_vm4, %v7533_v27, %v7537_v61  ;;  %v7548_v54 = vsel %vm12354_vm4, %v7543_v10, %v7547_v55  ;;  %v7552_v47 = vrot.slane %v7550_v3, 4  ;;  %v7555_v16 = vrot.slane %v7553_v41, 5  ;;  %v7318_v61 = vld [vmem:[#allocation2 + $0x90] sm:$0xf]  ;;  %v15799_v3 = vpop.f32.mrf.mxu0 }
 0x2eb   : > { %v15765_v34 = vcombine.low %v7538_v45, %v7548_v54  ;;  %v15769_v6 = vsel %vm12616_vm7, %v8156_v58, %v8157_v40  ;;  %v7561_v11 = vrot.slane %v7559_v17, 5  ;;  %v7565_v63 = vrot.slane %v7563_v21, 4  ;;  %v15788_v55 = vld [vmem:[#allocation2 + $0xb0] sm:$0x1]  ;;  %v8025_v21 = vld [vmem:[#allocation2 + $0xb4] sm:$0xe] }
 0x2ec   : > { %11943 = vmatmul.mubr.msk.bf16.gmra.mxu1 %vm5967_vm11, %v15578_v60  ;;  %v11015_v5 = vcombine.low %v15745_v56, %v15769_v6  ;;  %v7556_v9 = vor.u32 %v7555_v16, %v7552_v47  ;;  %v7569_v43 = vshll.u32 %v15640_v20, 16  ;;  %v10999_v39 = vrot.slane %v8023_v0, 9  ;;  %v15819_v47 = vld [vmem:[#allocation2 + $0xb8] sm:$0xf]  ;;  %v15821_v16 = vpop.f32.mrf.mxu0 }
 0x2ed   : > { %11946 = vmatprep.mubr.msk.bf16.mxu1 %vm5967_vm11, %v15624_v23  ;;  %v7566_v30 = vor.u32 %v7565_v63, %v7561_v11  ;;  %v8161_v60 = vrot.slane %v15759_v37, 5  ;;  %v8164_v8 = vrot.slane %v15761_v48, 5  ;;  %v7574_v62 = vshrl.u32 %v7315_v38, 16 }
 0x2ee   : > { %v7557_v31 = vrot.slane %v7556_v9, 4  ;;  %v7571_v35 = vrot.slane %v7569_v43, 5  ;;  %v7577_v22 = vshll.u32 %v7315_v38, 16  ;;  %v7583_v23 = vshll.u32 %v15682_v57, 16  ;;  %v15825_v43 = vld [vmem:[#allocation2 + $0xbc] sm:$0x1] }
 0x2ef   : > { %v7567_v42 = vrot.slane %v7566_v30, 4  ;;  %v8162_v20 = vsel %vm12616_vm7, %v10999_v39, %v8161_v60  ;;  %v8163_v50 = vrot.slane %v8161_v60, 4  ;;  %v7576_v18 = vrot.slane %v7574_v62, 4 }
 0x2f0   : > { %v7562_v51 = vsel %vm12354_vm4, %v7557_v31, %v7561_v11  ;;  %v7579_v46 = vrot.slane %v7577_v22, 5  ;;  %v7585_v7 = vrot.slane %v7583_v23, 5  ;;  %v7587_v15 = vshrl.u32 %v15682_v57, 16 }
 0x2f1   : > { %11989 = vmatmul.mubr.msk.bf16.gmra.mxu0 %vm5967_vm11, %v11013_v29  ;;  %v7572_v59 = vsel %vm12354_vm4, %v7567_v42, %v7571_v35  ;;  %v8165_v40 = vsel %vm12616_vm7, %v8163_v50, %v8164_v8  ;;  %v7593_v27 = vshll.u32 %v15684_v4, 16  ;;  %v11000_v10 = vrot.slane %v8024_v52, 9  ;;  %v15839_v42 = vpop.f32.mrf.mxu0 }
 0x2f2   : > { %11992 = vmatprep.mubr.msk.bf16.mxu0 %vm5967_vm11, %v11014_v33  ;;  %v15805_v57 = vcombine.low %v7562_v51, %v7572_v59  ;;  %v11016_v32 = vcombine.low %v8162_v20, %v8165_v40  ;;  %v7580_v49 = vor.u32 %v7579_v46, %v7576_v18  ;;  %v7589_v29 = vrot.slane %v7587_v15, 4  ;;  %v7324_v46 = vld [vmem:[#allocation2 + $0xa8] sm:$0xf]  ;;  %v8026_v15 = vld [vmem:[#allocation2 + $0xc0] sm:$0xe] }
 0x2f3   : > { %v7595_v41 = vrot.slane %v7593_v27, 5  ;;  %v8168_v38 = vrot.slane %v15783_v25, 5  ;;  %v8171_v4 = vrot.slane %v15788_v55, 5  ;;  %v7598_v58 = vshrl.u32 %v7318_v61, 16 }
 0x2f4   : > { %11947 = vmatmul.mubr.msk.bf16.gmra.mxu1 %vm5967_vm11, %v15664_v1  ;;  %v7581_v2 = vrot.slane %v7580_v49, 4  ;;  %v7590_v13 = vor.u32 %v7589_v29, %v7585_v7  ;;  %v7601_v33 = vshll.u32 %v7318_v61, 16  ;;  %v7607_v17 = vshll.u32 %v15715_v12, 16 }
 0x2f5   : > { %11950 = vmatprep.mubr.msk.bf16.mxu1 %vm5967_vm11, %v15690_v28  ;;  %v15816_v0 = vsel %vm12616_vm7, %v11000_v10, %v8168_v38  ;;  %v8170_v1 = vrot.slane %v8168_v38, 4  ;;  %v7600_v45 = vrot.slane %v7598_v58, 4  ;;  %v7611_v54 = vshrl.u32 %v15715_v12, 16  ;;  %v7321_v12 = vld [vmem:[#allocation2 + $0x9c] sm:$0xf] }
 0x2f6   : > { %v7586_v28 = vsel %vm12354_vm4, %v7581_v2, %v7585_v7  ;;  %v7591_v11 = vrot.slane %v7590_v13, 4  ;;  %v7603_v63 = vrot.slane %v7601_v33, 5  ;;  %v7609_v9 = vrot.slane %v7607_v17, 5 }
 0x2f7   : > { %v8172_v39 = vsel %vm12616_vm7, %v8170_v1, %v8171_v4  ;;  %v7613_v30 = vrot.slane %v7611_v54, 4  ;;  %v7617_v60 = vshll.u32 %v15720_v44, 16  ;;  %v11001_v8 = vrot.slane %v8025_v21, 9  ;;  %v8840_v54 = vld [vmem:[#allocation2 + $0x18] sm:$0xf] }
 0x2f8   : > { %v7596_v62 = vsel %vm12354_vm4, %v7591_v11, %v7595_v41  ;;  %v11017_v31 = vcombine.low %v15816_v0, %v8172_v39  ;;  %v7604_v35 = vor.u32 %v7603_v63, %v7600_v45  ;;  %v8175_v22 = vrot.slane %v15819_v47, 5 }
 0x2f9   : > { %11993 = vmatmul.mubr.msk.bf16.gmra.mxu0 %vm5967_vm11, %v11015_v5  ;;  %v10965_v23 = vcombine.low %v7586_v28, %v7596_v62  ;;  %v7614_v52 = vor.u32 %v7613_v30, %v7609_v9  ;;  %v7619_v61 = vrot.slane %v7617_v60, 5  ;;  %v8178_v44 = vrot.slane %v15825_v43, 5 }
 0x2fa   : > { %11996 = vmatprep.mubr.msk.bf16.mxu0 %vm5967_vm11, %v11016_v32  ;;  %v7605_v20 = vrot.slane %v7604_v35, 4  ;;  %v8176_v50 = vsel %vm12616_vm7, %v11001_v8, %v8175_v22  ;;  %v8177_v18 = vrot.slane %v8175_v22, 4  ;;  %v7622_v51 = vshrl.u32 %v7321_v12, 16  ;;  %v15857_v32 = vld [vmem:[#allocation2 + $0xc8] sm:$0x1] }
 0x2fb   : > { %v7615_v56 = vrot.slane %v7614_v52, 4  ;;  %v7625_v6 = vshll.u32 %v7321_v12, 16  ;;  %v7631_v5 = vshll.u32 %v15759_v37, 16  ;;  %v7635_v7 = vshrl.u32 %v15759_v37, 16  ;;  %v15882_v35 = vld [vmem:[#allocation2 + $0x1c] sm:$0xf] }
 0x2fc   : > { %11951 = vmatmul.mubr.msk.bf16.gmra.mxu1 %vm5967_vm11, %v15735_v14  ;;  %v7610_v59 = vsel %vm12354_vm4, %v7605_v20, %v7609_v9  ;;  %v8179_v40 = vsel %vm12616_vm7, %v8177_v18, %v8178_v44  ;;  %v7624_v27 = vrot.slane %v7622_v51, 4  ;;  %v7641_v10 = vshll.u32 %v15761_v48, 16  ;;  %v15855_v14 = vld [vmem:[#allocation2 + $0xc4] sm:$0xf] }
 0x2fd   : > { %11954 = vmatprep.mubr.msk.bf16.mxu1 %vm5967_vm11, %v15765_v34  ;;  %v7620_v37 = vsel %vm12354_vm4, %v7615_v56, %v7619_v61  ;;  %v11018_v49 = vcombine.low %v8176_v50, %v8179_v40  ;;  %v7627_v29 = vrot.slane %v7625_v6, 5  ;;  %v7633_v41 = vrot.slane %v7631_v5, 5  ;;  %v15861_v34 = vpop.f32.mrf.mxu0  ;;  %v7327_v50 = vld [vmem:[#allocation2 + $0xb4] sm:$0xf]  ;;  %v15889_v6 = vpop.f32.mrf.mxu1 }
 0x2fe   : > { %v15863_v38 = vcombine.low %v7610_v59, %v7620_v37  ;;  %v7637_v4 = vrot.slane %v7635_v7, 4  ;;  %v7643_v58 = vrot.slane %v7641_v10, 5  ;;  %v11002_v2 = vrot.slane %v8026_v15, 9 }
 0x2ff   : > { %v7628_v13 = vor.u32 %v7627_v29, %v7624_v27  ;;  %v8182_v48 = vrot.slane %v15855_v14, 5  ;;  %v8185_v33 = vrot.slane %v15857_v32, 5  ;;  %v7646_v17 = vshrl.u32 %v7324_v46, 16  ;;  %v15872_v39 = vpop.f32.mrf.mxu0 }
 0x300   : > { %v7638_v21 = vor.u32 %v7637_v4, %v7633_v41  ;;  %v7649_v0 = vshll.u32 %v7324_v46, 16  ;;  %v7655_v1 = vshll.u32 %v15783_v25, 16  ;;  %v7659_v45 = vshrl.u32 %v15783_v25, 16  ;;  %v8843_v4 = vld [vmem:[#allocation2 + $0x24] sm:$0xf] }
 0x301   : > { %11997 = vmatmul.mubr.msk.bf16.gmra.mxu0 %vm5967_vm11, %v11017_v31  ;;  %v7629_v28 = vrot.slane %v7628_v13, 4  ;;  %v8183_v11 = vsel %vm12616_vm7, %v11002_v2, %v8182_v48  ;;  %v8184_v63 = vrot.slane %v8182_v48, 4  ;;  %v7648_v9 = vrot.slane %v7646_v17, 4 }
 0x302   : > { %12000 = vmatprep.mubr.msk.bf16.mxu0 %vm5967_vm11, %v11018_v49  ;;  %v7639_v30 = vrot.slane %v7638_v21, 4  ;;  %v7651_v60 = vrot.slane %v7649_v0, 5  ;;  %v7657_v8 = vrot.slane %v7655_v1, 5  ;;  %v7661_v12 = vrot.slane %v7659_v45, 4 }
 0x303   : > { %v7634_v25 = vsel %vm12354_vm4, %v7629_v28, %v7633_v41  ;;  %v8186_v62 = vsel %vm12616_vm7, %v8184_v63, %v8185_v33  ;;  %v7665_v31 = vshll.u32 %v15788_v55, 16  ;;  %v8889_v22 = vshrl.u32 %v8840_v54, 16  ;;  %v15891_v55 = vpop.f32.mrf.mxu0  ;;  %v15901_v33 = vpop.f32.mrf.mxu1 }
 0x304   : > { %11955 = vmatmul.mubr.msk.bf16.gmra.mxu1 %vm5967_vm11, %v15805_v57  ;;  %v7644_v52 = vsel %vm12354_vm4, %v7639_v30, %v7643_v58  ;;  %v11019_v61 = vcombine.low %v8183_v11, %v8186_v62  ;;  %v7652_v44 = vor.u32 %v7651_v60, %v7648_v9  ;;  %v7662_v20 = vor.u32 %v7661_v12, %v7657_v8  ;;  %v15887_v57 = vld [vmem:[#allocation2 + $0x20] sm:$0x1]  ;;  %v12241_v11 = vld [vmem:[%s17206_s3 + $0x1c] sm:$0xf]  ;;  %v15914_v9 = vld [vmem:[#allocation2 + $0x28] sm:$0xf] }
 0x305   : > { %11958 = vmatprep.mubr.msk.bf16.mxu1 %vm5967_vm11, %v10965_v23  ;;  %v10967_v18 = vcombine.low %v7634_v25, %v7644_v52  ;;  %v7667_v51 = vrot.slane %v7665_v31, 5  ;;  %v8891_v46 = vrot.slane %v8889_v22, 4  ;;  %v8892_v56 = vshll.u32 %v8840_v54, 16  ;;  %17409 = vst [vmem:[#allocation17_spill] sm:$0xff] %v15891_v55  ;;  %v15903_v17 = vpop.f32.mrf.mxu0  ;;  %v7330_v22 = vld [vmem:[#allocation2 + $0xc0] sm:$0xf]  ;;  %v15921_v52 = vpop.f32.mrf.mxu1 }
 0x306   : > { %v7653_v5 = vrot.slane %v7652_v44, 4  ;;  %v7663_v7 = vrot.slane %v7662_v20, 4  ;;  %v8898_v23 = vshll.u32 %v15882_v35, 16  ;;  %v8902_v15 = vshrl.u32 %v15882_v35, 16 }
 0x307   : > { %v8894_v59 = vrot.slane %v8892_v56, 5  ;;  %v8908_v40 = vshll.u32 %v15887_v57, 16  ;;  %v7670_v27 = vshrl.u32 %v7327_v50, 16  ;;  %v7673_v10 = vshll.u32 %v7327_v50, 16 }
 0x308   : > { %v7658_v37 = vsel %vm12354_vm4, %v7653_v5, %v7657_v8  ;;  %v7668_v49 = vsel %vm12354_vm4, %v7663_v7, %v7667_v51  ;;  %v8900_v29 = vrot.slane %v8898_v23, 5  ;;  %v8904_v41 = vrot.slane %v8902_v15, 4 }
 0x309   : > { %12001 = vmatmul.mubr.msk.bf16.gmra.mxu0 %vm5967_vm11, %v11019_v61  ;;  %v10968_v58 = vcombine.low %v7658_v37, %v7668_v49  ;;  %v8895_v2 = vor.u32 %v8894_v59, %v8891_v46  ;;  %v8910_v13 = vrot.slane %v8908_v40, 5  ;;  %v7672_v48 = vrot.slane %v7670_v27, 4  ;;  %v15923_v61 = vpop.f32.mrf.mxu0  ;;  %v8846_v49 = vld [vmem:[#allocation2 + $0x30] sm:$0xf] }
 0x30a   : > { %v8905_v21 = vor.u32 %v8904_v41, %v8900_v29  ;;  %v7675_v0 = vrot.slane %v7673_v10, 5  ;;  %v7679_v1 = vshll.u32 %v15819_v47, 16  ;;  %v7683_v45 = vshrl.u32 %v15819_v47, 16 }
 0x30b   : > { %v8896_v54 = vrot.slane %v8895_v2, 4  ;;  %v7689_v28 = vshll.u32 %v15825_v43, 16  ;;  %v9371_v63 = vsel %vm6016_vm8, %v12241_v11, 0  ;;  %v8913_v30 = vshrl.u32 %v8843_v4, 16  ;;  %v15935_v41 = vpop.f32.mrf.mxu0 }
 0x30c   : > { %11959 = vmatmul.mubr.msk.bf16.gmra.mxu1 %vm5967_vm11, %v15863_v38  ;;  %v8906_v60 = vrot.slane %v8905_v21, 4  ;;  %v7676_v8 = vor.u32 %v7675_v0, %v7672_v48  ;;  %v7681_v47 = vrot.slane %v7679_v1, 5  ;;  %v7685_v12 = vrot.slane %v7683_v45, 4  ;;  %12039 = vmatpush3.bf16.msra.mxu0 %v9371_v63  ;;  %v15917_v38 = vld [vmem:[#allocation2 + $0x2c] sm:$0x1] }
 0x30d   : > { %11962 = vmatprep.mubr.msk.bf16.mxu1 %vm5967_vm11, %v10967_v18  ;;  %v8901_v43 = vsel %vm12354_vm4, %v8896_v54, %v8900_v29  ;;  %v7691_v25 = vrot.slane %v7689_v28, 5  ;;  %v8915_v62 = vrot.slane %v8913_v30, 4  ;;  %v8916_v31 = vshll.u32 %v8843_v4, 16  ;;  %v15933_v29 = vpop.f32.mrf.mxu1  ;;  %v15942_v54 = vld [vmem:[#allocation2 + $0x34] sm:$0xf] }
 0x30e   : > { %v8911_v44 = vsel %vm12354_vm4, %v8906_v60, %v8910_v13  ;;  %v7677_v20 = vrot.slane %v7676_v8, 4  ;;  %v7686_v50 = vor.u32 %v7685_v12, %v7681_v47  ;;  %v8922_v18 = vshll.u32 %v15914_v9, 16 }
 0x30f   : > { %v11070_v51 = vcombine.low %v8901_v43, %v8911_v44  ;;  %v8918_v46 = vrot.slane %v8916_v31, 5  ;;  %v8926_v56 = vshrl.u32 %v15914_v9, 16  ;;  %v8932_v5 = vshll.u32 %v15917_v38, 16  ;;  %v15952_v43 = vpop.f32.mrf.mxu0 }
 0x310   : > { %v7682_v7 = vsel %vm12354_vm4, %v7677_v20, %v7681_v47  ;;  %v7687_v23 = vrot.slane %v7686_v50, 4  ;;  %v8924_v15 = vrot.slane %v8922_v18, 5  ;;  %v7694_v59 = vshrl.u32 %v7330_v22, 16  ;;  %v15948_v47 = vld [vmem:[#allocation2 + $0x38] sm:$0x1] }
 0x311   : > { %12040 = vmatprep.mubr.msk.bf16.mxu0 %vm5967_vm11, %v11070_v51  ;;  %v8919_v40 = vor.u32 %v8918_v46, %v8915_v62  ;;  %v8928_v27 = vrot.slane %v8926_v56, 4  ;;  %v8934_v10 = vrot.slane %v8932_v5, 5  ;;  %v7697_v37 = vshll.u32 %v7330_v22, 16  ;;  %v15950_v12 = vpop.f32.mrf.mxu1  ;;  %v8849_v22 = vld [vmem:[#allocation2 + $0x3c] sm:$0xf] }
 0x312   : > { %v7692_v4 = vsel %vm12354_vm4, %v7687_v23, %v7691_v25  ;;  %v7696_v2 = vrot.slane %v7694_v59, 4  ;;  %v7703_v13 = vshll.u32 %v15855_v14, 16  ;;  %v7707_v48 = vshrl.u32 %v15855_v14, 16  ;;  %v15958_v51 = vld [vmem:[#allocation2 + $0x40] sm:$0xf] }
 0x313   : > { %v10969_v21 = vcombine.low %v7682_v7, %v7692_v4  ;;  %v8920_v0 = vrot.slane %v8919_v40, 4  ;;  %v8929_v1 = vor.u32 %v8928_v27, %v8924_v15  ;;  %v7699_v45 = vrot.slane %v7697_v37, 5  ;;  %v15961_v40 = vpop.f32.mrf.mxu1 }
 0x314   : > { %11963 = vmatmul.mubr.msk.bf16.gmra.mxu1 %vm5967_vm11, %v10968_v58  ;;  %v7705_v28 = vrot.slane %v7703_v13, 5  ;;  %v7709_v11 = vrot.slane %v7707_v48, 4  ;;  %v7713_v63 = vshll.u32 %v15857_v32, 16  ;;  %v8937_v30 = vshrl.u32 %v8846_v49, 16  ;;  %v8852_v13 = vld [vmem:[#allocation2 + $0x48] sm:$0xf] }
 0x315   : > { %11966 = vmatprep.mubr.msk.bf16.mxu1 %vm5967_vm11, %v10969_v21  ;;  %v8925_v60 = vsel %vm12354_vm4, %v8920_v0, %v8924_v15  ;;  %v8930_v8 = vrot.slane %v8929_v1, 4  ;;  %v7700_v14 = vor.u32 %v7699_v45, %v7696_v2  ;;  %v8940_v58 = vshll.u32 %v8846_v49, 16  ;;  %v15970_v49 = vld [vmem:[#allocation2 + $0x44] sm:$0x1]  ;;  %v12214_v1 = vld [vmem:[#allocation2 + $0x18] sm:$0xff]  }
 0x316   : > { %v7710_v25 = vor.u32 %v7709_v11, %v7705_v28  ;;  %v7715_v62 = vrot.slane %v7713_v63, 5  ;;  %v8939_v31 = vrot.slane %v8937_v30, 4  ;;  %v8946_v32 = vshll.u32 %v15942_v54, 16 }
 0x317   : > { %v8935_v44 = vsel %vm12354_vm4, %v8930_v8, %v8934_v10  ;;  %v7701_v20 = vrot.slane %v7700_v14, 4  ;;  %v8942_v50 = vrot.slane %v8940_v58, 5  ;;  %v8950_v18 = vshrl.u32 %v15942_v54, 16 }
 0x318   : > { %v11071_v46 = vcombine.low %v8925_v60, %v8935_v44  ;;  %v7711_v56 = vrot.slane %v7710_v25, 4  ;;  %v8948_v5 = vrot.slane %v8946_v32, 5  ;;  %v8956_v7 = vshll.u32 %v15948_v47, 16  ;;  %v15963_v27 = vpop.f32.mrf.mxu0 }
 0x319   : > { %v8943_v23 = vor.u32 %v8942_v50, %v8939_v31  ;;  %v8952_v15 = vrot.slane %v8950_v18, 4  ;;  %v8961_v59 = vshrl.u32 %v8849_v22, 16  ;;  %v7706_v10 = vsel %vm12354_vm4, %v7701_v20, %v7705_v28  ;;  %v15974_v28 = vld [vmem:[#allocation2 + $0x4c] sm:$0xf]  ;;  %v15989_v20 = vld [vmem:[#allocation2 + $0x50] sm:$0x1] }
 0x31a   : > { %12041 = vmatmul.mubr.msk.bf16.vlgmr.msra.gmra.mxu0 %vm5967_vm11, %v11071_v46  ;;  %v7716_v37 = vsel %vm12354_vm4, %v7711_v56, %v7715_v62  ;;  %v8964_v4 = vshll.u32 %v8849_v22, 16  ;;  %v8970_v2 = vshll.u32 %v15958_v51, 16  ;;  %v8958_v11 = vrot.slane %v8956_v7, 5  ;;  %v15982_v62 = vpop.f32.mrf.mxu1  ;;  %v15984_v31 = vpop.f32.mrf.mxu0 }
 0x31b   : > { %v10970_v48 = vcombine.low %v7706_v10, %v7716_v37  ;;  %v8944_v21 = vrot.slane %v8943_v23, 4  ;;  %v8953_v0 = vor.u32 %v8952_v15, %v8948_v5  ;;  %v8963_v45 = vrot.slane %v8961_v59, 4 }
 0x31c   : > { %v8966_v63 = vrot.slane %v8964_v4, 5  ;;  %v8972_v30 = vrot.slane %v8970_v2, 5  ;;  %v8974_v60 = vshrl.u32 %v15958_v51, 16  ;;  %v8980_v14 = vshll.u32 %v15970_v49, 16  ;;  %v8855_v4 = vld [vmem:[#allocation2 + $0x54] sm:$0xf]  ;;  %v15996_v2 = vpop.f32.mrf.mxu1 }
 0x31d   : > { %11967 = vmatmul.mubr.msk.bf16.gmra.mxu1 %vm5967_vm11, %v10970_v48  ;;  %v8954_v8 = vrot.slane %v8953_v0, 4  ;;  %v15980_v58 = vadd.f32 %v15749_v24, %v15889_v6  ;;  %v8985_v25 = vshrl.u32 %v8852_v13, 16  ;;  %v8949_v32 = vsel %vm12354_vm4, %v8944_v21, %v8948_v5  ;;  %17410 = vst [vmem:[#allocation11_spill] sm:$0xff] %v15996_v2  ;;  %v8867_v2 = vld [vmem:[#allocation2 + $0x84] sm:$0xf] }
 0x31e   : > { %12006 = vmatprep.mubr.msk.bf16.mxu1 %vm5967_vm11, %v12214_v1  ;;  %v8967_v22 = vor.u32 %v8966_v63, %v8963_v45  ;;  %v8976_v44 = vrot.slane %v8974_v60, 4  ;;  %v8988_v50 = vshll.u32 %v8852_v13, 16  ;;  %v8994_v6 = vshll.u32 %v15974_v28, 16  ;;  %v15998_v13 = vpop.f32.mrf.mxu0  ;;  %v16007_v45 = vld [vmem:[#allocation2 + $0x58] sm:$0xf]  ;;  %v12215_v63 = vld [vmem:[#allocation2 + $0x24] sm:$0xff]  }
 0x31f   : > { %v8959_v18 = vsel %vm12354_vm4, %v8954_v8, %v8958_v11  ;;  %v8987_v24 = vrot.slane %v8985_v25, 4  ;;  %v8998_v46 = vshrl.u32 %v15974_v28, 16  ;;  %v8982_v5 = vrot.slane %v8980_v14, 5  ;;  %v16015_v25 = vld [vmem:[#allocation2 + $0x5c] sm:$0x1] }
 0x320   : > { %v11072_v56 = vcombine.low %v8949_v32, %v8959_v18  ;;  %v8968_v7 = vrot.slane %v8967_v22, 4  ;;  %v8977_v23 = vor.u32 %v8976_v44, %v8972_v30  ;;  %v8990_v15 = vrot.slane %v8988_v50, 5 }
 0x321   : > { %v8996_v59 = vrot.slane %v8994_v6, 5  ;;  %v9000_v10 = vrot.slane %v8998_v46, 4  ;;  %v9004_v37 = vshll.u32 %v15989_v20, 16  ;;  %v9841_v0 = vsel %vm6016_vm8, %v15707_v26, 0 }
 0x322   : > { %12044 = vmatprep.mubr.msk.bf16.mxu0 %vm5967_vm11, %v11072_v56  ;;  %v8978_v48 = vrot.slane %v8977_v23, 4  ;;  %v8991_v21 = vor.u32 %v8990_v15, %v8987_v24  ;;  %v16005_v1 = vadd.f32 %v15778_v19, %v15901_v33  ;;  %v8973_v11 = vsel %vm12354_vm4, %v8968_v7, %v8972_v30  ;;  %v12216_v19 = vld [vmem:[#allocation2 + $0x30] sm:$0xff]   ;;  %v8858_v24 = vld [vmem:[#allocation2 + $0x60] sm:$0xf]  ;;  %v16030_v23 = vld [vmem:[#allocation2 + $0x64] sm:$0xf] }
 0x323   : > { %v9001_v60 = vor.u32 %v9000_v10, %v8996_v59  ;;  %v9006_v8 = vrot.slane %v9004_v37, 5  ;;  %v16013_v14 = vadd.f32 %v15799_v3, %v15921_v52  ;;  %v9009_v33 = vshrl.u32 %v8855_v4, 16  ;;  %v16024_v52 = vpop.f32.mrf.mxu0 }
 0x324   : > { %v8983_v26 = vsel %vm12354_vm4, %v8978_v48, %v8982_v5  ;;  %v8992_v32 = vrot.slane %v8991_v21, 4  ;;  %v9012_v22 = vshll.u32 %v8855_v4, 16  ;;  %v9018_v50 = vshll.u32 %v16007_v45, 16 }
 0x325   : > { %v11073_v44 = vcombine.low %v8973_v11, %v8983_v26  ;;  %12007 = vmatmul.mubr.msk.bf16.vlgmr.msra.gmra.mxu1 %vm5967_vm11, %v12215_v63  ;;  %v9002_v30 = vrot.slane %v9001_v60, 4  ;;  %v9022_v18 = vshrl.u32 %v16007_v45, 16  ;;  %v16022_v3 = vpop.f32.mrf.mxu1  ;;  %v9011_v46 = vrot.slane %v9009_v33, 4 }
 0x326   : > { %v8997_v6 = vsel %vm12354_vm4, %v8992_v32, %v8996_v59  ;;  %12073 = vmatpush3.bf16.msra.mxu1 %v9841_v0  ;;  %12010 = vmatprep.mubr.msk.bf16.mxu1 %vm5967_vm11, %v12216_v19  ;;  %v9014_v56 = vrot.slane %v9012_v22, 5  ;;  %v9028_v7 = vshll.u32 %v16015_v25, 16  ;;  %v9020_v5 = vrot.slane %v9018_v50, 5  ;;  %v16039_v59 = vld [vmem:[#allocation2 + $0x68] sm:$0x1] }
 0x327   : > { %12045 = vmatmul.mubr.msk.bf16.gmra.mxu0 %vm5967_vm11, %v11073_v44  ;;  %v9007_v15 = vsel %vm12354_vm4, %v9002_v30, %v9006_v8  ;;  %v9024_v10 = vrot.slane %v9022_v18, 4  ;;  %v16037_v37 = vadd.f32 %v15839_v42, %v15950_v12  ;;  %v9033_v0 = vshrl.u32 %v8858_v24, 16  ;;  %v16041_v11 = vpop.f32.mrf.mxu1  ;;  %v12217_v12 = vld [vmem:[#allocation2 + $0x3c] sm:$0xff]   ;;  %v8861_v44 = vld [vmem:[#allocation2 + $0x6c] sm:$0xf] }
 0x328   : > { %v11074_v4 = vcombine.low %v8997_v6, %v9007_v15  ;;  %v9015_v48 = vor.u32 %v9014_v56, %v9011_v46  ;;  %v9030_v21 = vrot.slane %v9028_v7, 5  ;;  %v9036_v60 = vshll.u32 %v8858_v24, 16  ;;  %v16053_v6 = vld [vmem:[#allocation2 + $0x70] sm:$0xf]  ;;  %v12218_v15 = vld [vmem:[#allocation2 + $0x48] sm:$0xff]  }
 0x329   : > { %17411 = vst [vmem:[#allocation26_spill] sm:$0xff] %v16037_v37  ;;  %v9025_v63 = vor.u32 %v9024_v10, %v9020_v5  ;;  %v9042_v26 = vshll.u32 %v16030_v23, 16  ;;  %v9046_v8 = vshrl.u32 %v16030_v23, 16  ;;  %v16045_v32 = vpop.f32.mrf.mxu0  ;;  %v9035_v19 = vrot.slane %v9033_v0, 4 }
 0x32a   : > { %12048 = vmatprep.mubr.msk.bf16.mxu0 %vm5967_vm11, %v11074_v4  ;;  %v9016_v42 = vrot.slane %v9015_v48, 4  ;;  %v9052_v33 = vshll.u32 %v16039_v59, 16  ;;  %v16051_v22 = vadd.f32 %v15861_v34, %v15961_v40  ;;  %v9038_v50 = vrot.slane %v9036_v60, 5  ;;  %v16063_v34 = vld [vmem:[#allocation2 + $0x74] sm:$0x1]  ;;  %v11813_v40 = vpop.f32.mrf.mxu1 }
 0x32b   : > { %v9026_v30 = vrot.slane %v9025_v63, 4  ;;  %v9044_v18 = vrot.slane %v9042_v26, 5  ;;  %v9048_v24 = vrot.slane %v9046_v8, 4  ;;  %v16055_v46 = vpop.f32.mrf.mxu0  ;;  %v16061_v10 = vadd.f32 %v15872_v39, %v15982_v62  ;;  %v8864_v62 = vld [vmem:[#allocation2 + $0x78] sm:$0xf] }
 0x32c   : > { %17412 = vst [vmem:[#allocation19_spill] sm:$0xff] %v16051_v22  ;;  %v9021_v56 = vsel %vm12354_vm4, %v9016_v42, %v9020_v5  ;;  %v9054_v7 = vrot.slane %v9052_v33, 5  ;;  %v9039_v48 = vor.u32 %v9038_v50, %v9035_v19  ;;  %v9057_v63 = vshrl.u32 %v8861_v44, 16 }
 0x32d   : > { %17413 = vst [vmem:[#allocation33_spill] sm:$0xff] %v16061_v10  ;;  %v9031_v4 = vsel %vm12354_vm4, %v9026_v30, %v9030_v21  ;;  %12011 = vmatmul.mubr.msk.bf16.gmra.mxu1 %vm5967_vm11, %v12217_v12  ;;  %v9049_v0 = vor.u32 %v9048_v24, %v9044_v18  ;;  %v9060_v5 = vshll.u32 %v8861_v44, 16  ;;  %v9066_v26 = vshll.u32 %v16053_v6, 16  ;;  %v16072_v21 = vld [vmem:[#allocation2 + $0x7c] sm:$0xf]  ;;  %v16074_v12 = vpop.f32.mrf.mxu0 }
 0x32e   : > { %v11075_v60 = vcombine.low %v9021_v56, %v9031_v4  ;;  %12014 = vmatprep.mubr.msk.bf16.mxu1 %vm5967_vm11, %v12218_v15  ;;  %v9070_v39 = vshrl.u32 %v16053_v6, 16  ;;  %v9040_v8 = vrot.slane %v9039_v48, 4  ;;  %v9059_v33 = vrot.slane %v9057_v63, 4  ;;  %v16081_v24 = vld [vmem:[#allocation2 + $0x80] sm:$0x1]  ;;  %v6089_v56 = vpop.f32.mrf.mxu1 }
 0x32f   : > { %v9050_v42 = vrot.slane %v9049_v0, 4  ;;  %v9076_v10 = vshll.u32 %v16063_v34, 16  ;;  %v9062_v19 = vrot.slane %v9060_v5, 5  ;;  %v9068_v30 = vrot.slane %v9066_v26, 5  ;;  %v12219_v26 = vld [vmem:[#allocation2 + $0x54] sm:$0xff]   ;;  %v16090_v22 = vpop.f32.mrf.mxu0 }
 0x330   : > { %12049 = vmatmul.mubr.msk.bf16.gmra.mxu0 %vm5967_vm11, %v11075_v60  ;;  %v9072_v50 = vrot.slane %v9070_v39, 4  ;;  %v16079_v44 = vadd.f32 %v15903_v17, %v16022_v3  ;;  %v9045_v15 = vsel %vm12354_vm4, %v9040_v8, %v9044_v18  ;;  %v9081_v0 = vshrl.u32 %v8864_v62, 16  ;;  %v12220_v8 = vld [vmem:[#allocation2 + $0x60] sm:$0xff]  }
 0x331   : > { %v9055_v4 = vsel %vm12354_vm4, %v9050_v42, %v9054_v7  ;;  %v9078_v48 = vrot.slane %v9076_v10, 5  ;;  %v9063_v60 = vor.u32 %v9062_v19, %v9059_v33  ;;  %v9084_v39 = vshll.u32 %v8864_v62, 16  ;;  %v16097_v62 = vld [vmem:[#allocation2 + $0x88] sm:$0xf] }
 0x332   : > { %17414 = vst [vmem:[#allocation28_spill] sm:$0xff] %v16079_v44  ;;  %v11076_v63 = vcombine.low %v9045_v15, %v9055_v4  ;;  %v9073_v5 = vor.u32 %v9072_v50, %v9068_v30  ;;  %v9083_v55 = vrot.slane %v9081_v0, 4  ;;  %v9090_v17 = vshll.u32 %v16072_v21, 16  ;;  %17416 = vst [vmem:[#allocation5_spill] sm:$0xff] %v16097_v62  ;;  %v16103_v0 = vld [vmem:[#allocation2 + $0x8c] sm:$0x1] }
 0x333   : > { %v9094_v3 = vshrl.u32 %v16072_v21, 16  ;;  %v9100_v44 = vshll.u32 %v16081_v24, 16  ;;  %v9064_v18 = vrot.slane %v9063_v60, 4  ;;  %v9086_v10 = vrot.slane %v9084_v39, 5  ;;  %17418 = vst [vmem:[#allocation18_spill] sm:$0xff] %v16103_v0 }
 0x334   : > { %12052 = vmatprep.mubr.msk.bf16.mxu0 %vm5967_vm11, %v11076_v63  ;;  %v9074_v7 = vrot.slane %v9073_v5, 4  ;;  %v16095_v42 = vadd.f32 %v15923_v61, %v16041_v11  ;;  %v11816_v33 = vpop.f32.mrf.mxu1  ;;  %v9092_v19 = vrot.slane %v9090_v17, 5  ;;  %v16101_v4 = vadd.f32 %v15935_v41, %v11813_v40 }
 0x335   : > { %12015 = vmatmul.mubr.msk.bf16.gmra.mxu1 %vm5967_vm11, %v12219_v26  ;;  %v9096_v50 = vrot.slane %v9094_v3, 4  ;;  %v9102_v15 = vrot.slane %v9100_v44, 5  ;;  %v9069_v63 = vsel %vm12354_vm4, %v9064_v18, %v9068_v30  ;;  %v9087_v11 = vor.u32 %v9086_v10, %v9083_v55  ;;  %v16113_v40 = vpop.f32.mrf.mxu0  ;;  %v8870_v55 = vld [vmem:[#allocation2 + $0x90] sm:$0xf]  ;;  %v16122_v10 = vld [vmem:[#allocation2 + $0x94] sm:$0xf] }
 0x336   : > { %17415 = vst [vmem:[#allocation34_spill] sm:$0xff] %v16095_v42  ;;  %17417 = vst [vmem:[#allocation10_spill] sm:$0xff] %v16101_v4  ;;  %v9079_v61 = vsel %vm12354_vm4, %v9074_v7, %v9078_v48  ;;  %12018 = vmatprep.mubr.msk.bf16.mxu1 %vm5967_vm11, %v12220_v8  ;;  %v16111_v60 = vadd.f32 %v15952_v43, %v6089_v56  ;;  %v6102_v5 = vpop.f32.mrf.mxu1  ;;  %v9105_v39 = vshrl.u32 %v8867_v2, 16  ;;  %v9108_v41 = vshll.u32 %v8867_v2, 16 }
 0x337   : > { %v11077_v26 = vcombine.low %v9069_v63, %v9079_v61  ;;  %v9097_v44 = vor.u32 %v9096_v50, %v9092_v19  ;;  %v9088_v17 = vrot.slane %v9087_v11, 4  ;;  %v9114_v3 = vshll.u32 %v16097_v62, 16  ;;  %17421 = vst [vmem:[#allocation14_spill] sm:$0xff] %v16122_v10  ;;  %v16124_v8 = vpop.f32.mrf.mxu0 }
 0x338   : > { %17419 = vst [vmem:[#allocation6_spill] sm:$0xff] %v16111_v60  ;;  %v9118_v30 = vshrl.u32 %v16097_v62, 16  ;;  %v9124_v48 = vshll.u32 %v16103_v0, 16  ;;  %v9107_v43 = vrot.slane %v9105_v39, 4  ;;  %v9110_v56 = vrot.slane %v9108_v41, 5  ;;  %v11817_v2 = vpop.f32.mrf.mxu1  ;;  %v12221_v39 = vld [vmem:[#allocation2 + $0x6c] sm:$0xff]  }
 0x339   : > { %12053 = vmatmul.mubr.msk.bf16.gmra.mxu0 %vm5967_vm11, %v11077_v26  ;;  %v9098_v18 = vrot.slane %v9097_v44, 4  ;;  %v16120_v7 = vadd.f32 %v15963_v27, %v11816_v33  ;;  %v9093_v50 = vsel %vm12354_vm4, %v9088_v17, %v9092_v19  ;;  %v9116_v63 = vrot.slane %v9114_v3, 5  ;;  %v16128_v60 = vld [vmem:[#allocation2 + $0x98] sm:$0x1]  ;;  %v16132_v41 = vpop.f32.mrf.mxu0 }
 0x33a   : > { %v9120_v61 = vrot.slane %v9118_v30, 4  ;;  %v9126_v11 = vrot.slane %v9124_v48, 5  ;;  %17422 = vst [vmem:[#allocation9_spill] sm:$0xff] %v16128_v60  ;;  %v9111_v44 = vor.u32 %v9110_v56, %v9107_v43  ;;  %v9129_v27 = vshrl.u32 %v8870_v55, 16  ;;  %v12222_v17 = vld [vmem:[#allocation2 + $0x78] sm:$0xff]  }
 0x33b   : > { %17420 = vst [vmem:[#allocation8_spill] sm:$0xff] %v16120_v7  ;;  %v9103_v26 = vsel %vm12354_vm4, %v9098_v18, %v9102_v15  ;;  %v9132_v33 = vshll.u32 %v8870_v55, 16  ;;  %v9138_v42 = vshll.u32 %v16122_v10, 16  ;;  %v9142_v19 = vshrl.u32 %v16122_v10, 16  ;;  %v6105_v18 = vpop.f32.mrf.mxu1  ;;  %v8873_v43 = vld [vmem:[#allocation2 + $0x9c] sm:$0xf]  ;;  %v16138_v56 = vpop.f32.mrf.mxu0 }
 0x33c   : > { %v11078_v7 = vcombine.low %v9093_v50, %v9103_v26  ;;  %v9121_v4 = vor.u32 %v9120_v61, %v9116_v63  ;;  %v9112_v3 = vrot.slane %v9111_v44, 4  ;;  %v9131_v30 = vrot.slane %v9129_v27, 4  ;;  %v16145_v44 = vld [vmem:[#allocation2 + $0xa0] sm:$0xf]  ;;  %v16152_v10 = vld [vmem:[#allocation2 + $0xa4] sm:$0x1] }
 0x33d   : > { %12019 = vmatmul.mubr.msk.bf16.gmra.mxu1 %vm5967_vm11, %v12221_v39  ;;  %v9134_v48 = vrot.slane %v9132_v33, 5  ;;  %v9148_v15 = vshll.u32 %v16128_v60, 16  ;;  %v9140_v50 = vrot.slane %v9138_v42, 5  ;;  %v9144_v61 = vrot.slane %v9142_v19, 4  ;;  %17424 = vst [vmem:[#allocation12_spill] sm:$0xff] %v16145_v44  ;;  %17426 = vst [vmem:[#allocation23_spill] sm:$0xff] %v16152_v10 }
 0x33e   : > { %12056 = vmatprep.mubr.msk.bf16.mxu0 %vm5967_vm11, %v11078_v7  ;;  %v9122_v55 = vrot.slane %v9121_v4, 4  ;;  %12022 = vmatprep.mubr.msk.bf16.mxu1 %vm5967_vm11, %v12222_v17  ;;  %v16143_v26 = vadd.f32 %v15984_v31, %v6102_v5  ;;  %v9117_v39 = vsel %vm12354_vm4, %v9112_v3, %v9116_v63  ;;  %v16150_v60 = vadd.f32 %v15998_v13, %v11817_v2  ;;  %v8876_v13 = vld [vmem:[#allocation2 + $0xa8] sm:$0xf] }
 0x33f   : > { %v9135_v27 = vor.u32 %v9134_v48, %v9131_v30  ;;  %v9150_v33 = vrot.slane %v9148_v15, 5  ;;  %v16154_v4 = vpop.f32.mrf.mxu0  ;;  %v9145_v7 = vor.u32 %v9144_v61, %v9140_v50  ;;  %v16159_v31 = vadd.f32 %v16024_v52, %v6105_v18 }
 0x340   : > { %17423 = vst [vmem:[#allocation7_spill] sm:$0xff] %v16143_v26  ;;  %17425 = vst [vmem:[#allocation13_spill] sm:$0xff] %v16150_v60  ;;  %v9127_v42 = vsel %vm12354_vm4, %v9122_v55, %v9126_v11  ;;  %v9153_v5 = vshrl.u32 %v8873_v43, 16  ;;  %v9156_v63 = vshll.u32 %v8873_v43, 16  ;;  %v9162_v3 = vshll.u32 %v16145_v44, 16 }
 0x341   : > { %17427 = vst [vmem:[#allocation16_spill] sm:$0xff] %v16159_v31  ;;  %v11079_v19 = vcombine.low %v9117_v39, %v9127_v42  ;;  %v9136_v17 = vrot.slane %v9135_v27, 4  ;;  %v16162_v2 = vpop.f32.mrf.mxu0  ;;  %v9146_v48 = vrot.slane %v9145_v7, 4  ;;  %v9166_v60 = vshrl.u32 %v16145_v44, 16  ;;  %v16166_v55 = vld [vmem:[#allocation2 + $0xac] sm:$0xf] }
 0x342   : > { %v11820_v30 = vpop.f32.mrf.mxu1  ;;  %v9155_v15 = vrot.slane %v9153_v5, 4  ;;  %v9172_v11 = vshll.u32 %v16152_v10, 16  ;;  %17428 = vst [vmem:[#allocation29_spill] sm:$0xff] %v16166_v55  ;;  %v9158_v18 = vrot.slane %v9156_v63, 5  ;;  %v9164_v43 = vrot.slane %v9162_v3, 5  ;;  %v12223_v39 = vld [vmem:[#allocation2 + $0x84] sm:$0xff]  }
 0x343   : > { %12057 = vmatmul.mubr.msk.bf16.gmra.mxu0 %vm5967_vm11, %v11079_v19  ;;  %v9141_v52 = vsel %vm12354_vm4, %v9136_v17, %v9140_v50  ;;  %v16172_v61 = vadd.f32 %v16045_v32, %v11820_v30  ;;  %v16174_v27 = vld [vmem:[#allocation2 + $0xb0] sm:$0x1]  ;;  %v16176_v7 = vpop.f32.mrf.mxu0  ;;  %v9151_v5 = vsel %vm12354_vm4, %v9146_v48, %v9150_v33  ;;  %v9168_v31 = vrot.slane %v9166_v60, 4  ;;  %v8879_v60 = vld [vmem:[#allocation2 + $0xb4] sm:$0xf] }
 0x344   : > { %17430 = vst [vmem:[#allocation20_spill] sm:$0xff] %v16174_v27  ;;  %v6118_v42 = vpop.f32.mrf.mxu1  ;;  %v9174_v26 = vrot.slane %v9172_v11, 5  ;;  %v9177_v19 = vshrl.u32 %v8876_v13, 16  ;;  %v12224_v10 = vld [vmem:[#allocation2 + $0x90] sm:$0xff]   ;;  %v11080_v44 = vcombine.low %v9141_v52, %v9151_v5  ;;  %v9159_v50 = vor.u32 %v9158_v18, %v9155_v15  ;;  %v16191_v18 = vld [vmem:[#allocation2 + $0xb8] sm:$0xf] }
 0x345   : > { %17429 = vst [vmem:[#allocation15_spill] sm:$0xff] %v16172_v61  ;;  %12023 = vmatmul.mubr.msk.bf16.gmra.mxu1 %vm5967_vm11, %v12223_v39  ;;  %v9180_v17 = vshll.u32 %v8876_v13, 16  ;;  %v9186_v32 = vshll.u32 %v16166_v55, 16  ;;  %v16182_v3 = vpop.f32.mrf.mxu0  ;;  %v9169_v30 = vor.u32 %v9168_v31, %v9164_v43  ;;  %v9190_v0 = vshrl.u32 %v16166_v55, 16  ;;  %17432 = vst [vmem:[#allocation27_spill] sm:$0xff] %v16191_v18 }
 0x346   : > { %v11821_v63 = vpop.f32.mrf.mxu1  ;;  %v9179_v61 = vrot.slane %v9177_v19, 4  ;;  %v9196_v33 = vshll.u32 %v16174_v27, 16  ;;  %12026 = vmatprep.mubr.msk.bf16.mxu1 %vm5967_vm11, %v12224_v10  ;;  %12060 = vmatprep.mubr.msk.bf16.mxu0 %vm5967_vm11, %v11080_v44  ;;  %v9160_v48 = vrot.slane %v9159_v50, 4  ;;  %v16189_v13 = vadd.f32 %v16055_v46, %v6118_v42  ;;  %v16203_v46 = vld [vmem:[#allocation2 + $0xbc] sm:$0x1] }
 0x347   : > { %v9182_v15 = vrot.slane %v9180_v17, 5  ;;  %v9188_v11 = vrot.slane %v9186_v32, 5  ;;  %v9170_v31 = vrot.slane %v9169_v30, 4  ;;  %v9192_v39 = vrot.slane %v9190_v0, 4  ;;  %17435 = vst [vmem:[#allocation25_spill] sm:$0xff] %v16203_v46 }
 0x348   : > { %17431 = vst [vmem:[#allocation22_spill] sm:$0xff] %v16189_v13  ;;  %v6121_v52 = vpop.f32.mrf.mxu1  ;;  %v9198_v5 = vrot.slane %v9196_v33, 5  ;;  %v16194_v19 = vadd.f32 %v16074_v12, %v11821_v63  ;;  %v16196_v27 = vpop.f32.mrf.mxu0  ;;  %v9165_v10 = vsel %vm12354_vm4, %v9160_v48, %v9164_v43  ;;  %v9201_v42 = vshrl.u32 %v8879_v60, 16  ;;  %v8882_v63 = vld [vmem:[#allocation2 + $0xc0] sm:$0xf] }
 0x349   : > { %v9183_v44 = vor.u32 %v9182_v15, %v9179_v61  ;;  %v16201_v50 = vadd.f32 %v16090_v22, %v6121_v52  ;;  %v9175_v0 = vsel %vm12354_vm4, %v9170_v31, %v9174_v26  ;;  %v9193_v32 = vor.u32 %v9192_v39, %v9188_v11  ;;  %v12225_v48 = vld [vmem:[#allocation2 + $0x9c] sm:$0xff]   ;;  %v12226_v15 = vld [vmem:[#allocation2 + $0xa8] sm:$0xff]   ;;  %v16212_v31 = vld [vmem:[#allocation2 + $0xc4] sm:$0xf] }
 0x34a   : > { %17433 = vst [vmem:[#allocation24_spill] sm:$0xff] %v16194_v19  ;;  %v11824_v17 = vpop.f32.mrf.mxu1  ;;  %v9204_v30 = vshll.u32 %v8879_v60, 16  ;;  %v9210_v12 = vshll.u32 %v16191_v18, 16  ;;  %v16208_v33 = vpop.f32.mrf.mxu0  ;;  %v11081_v19 = vcombine.low %v9165_v10, %v9175_v0  ;;  %v9203_v61 = vrot.slane %v9201_v42, 4  ;;  %v16223_v42 = vld [vmem:[#allocation2 + $0xc8] sm:$0x1] }
 0x34b   : > { %17434 = vst [vmem:[#allocation21_spill] sm:$0xff] %v16201_v50  ;;  %v9184_v43 = vrot.slane %v9183_v44, 4  ;;  %v9214_v22 = vshrl.u32 %v16191_v18, 16  ;;  %v9194_v50 = vrot.slane %v9193_v32, 4  ;;  %v9220_v26 = vshll.u32 %v16203_v46, 16 }
 0x34c   : > { %v6134_v52 = vpop.f32.mrf.mxu1  ;;  %v9206_v13 = vrot.slane %v9204_v30, 5  ;;  %v9212_v55 = vrot.slane %v9210_v12, 5  ;;  %v16214_v60 = vpop.f32.mrf.mxu0  ;;  %12061 = vmatmul.mubr.msk.bf16.gmra.mxu0 %vm5967_vm11, %v11081_v19  ;;  %v16220_v44 = vadd.f32 %v16113_v40, %v11824_v17  ;;  %v9225_v0 = vshrl.u32 %v8882_v63, 16 }
 0x34d   : > { %v9189_v39 = vsel %vm12354_vm4, %v9184_v43, %v9188_v11  ;;  %v9216_v10 = vrot.slane %v9214_v22, 4  ;;  %12027 = vmatmul.mubr.msk.bf16.gmra.mxu1 %vm5967_vm11, %v12225_v48  ;;  %v9199_v30 = vsel %vm12354_vm4, %v9194_v50, %v9198_v5  ;;  %v9222_v46 = vrot.slane %v9220_v26, 5 }
 0x34e   : > { %17436 = vst [vmem:[#allocation30_spill] sm:$0xff] %v16220_v44  ;;  %v11825_v32 = vpop.f32.mrf.mxu1  ;;  %v9207_v12 = vor.u32 %v9206_v13, %v9203_v61  ;;  %v9228_v18 = vshll.u32 %v8882_v63, 16  ;;  %12030 = vmatprep.mubr.msk.bf16.mxu1 %vm5967_vm11, %v12226_v15  ;;  %v16228_v19 = vpop.f32.mrf.mxu0  ;;  %v11082_v11 = vcombine.low %v9189_v39, %v9199_v30  ;;  %v9227_v40 = vrot.slane %v9225_v0, 4  ;;  %v9566_v39 = vld [vmem:[#allocation2 + $0x18] sm:$0xe] }
 0x34f   : > { %v9217_v43 = vor.u32 %v9216_v10, %v9212_v55  ;;  %v9234_v17 = vshll.u32 %v16212_v31, 16  ;;  %v9238_v37 = vshrl.u32 %v16212_v31, 16  ;;  %v9244_v62 = vshll.u32 %v16223_v42, 16  ;;  %v8885_v10 = vld [vmem:[#allocation2 + $0xcc] sm:$0xf] }
 0x350   : > { %v6137_v22 = vpop.f32.mrf.mxu1  ;;  %v9208_v48 = vrot.slane %v9207_v12, 4  ;;  %v9230_v44 = vrot.slane %v9228_v18, 5  ;;  %12064 = vmatprep.mubr.msk.bf16.mxu0 %vm5967_vm11, %v11082_v11  ;;  %v16235_v50 = vadd.f32 %v16124_v8, %v6134_v52  ;;  %v16238_v63 = vadd.f32 %v16132_v41, %v11825_v32  ;;  %v12227_v32 = vld [vmem:[#allocation2 + $0xb4] sm:$0xff]   ;;  %v12228_v11 = vld [vmem:[#allocation2 + $0xc0] sm:$0xff]  }
 0x351   : > { %v9218_v13 = vrot.slane %v9217_v43, 4  ;;  %v9236_v5 = vrot.slane %v9234_v17, 5  ;;  %v16240_v61 = vpop.f32.mrf.mxu0  ;;  %v16244_v15 = vadd.f32 %v15821_v16, %v15933_v29  ;;  %v9240_v26 = vrot.slane %v9238_v37, 4 }
 0x352   : > { %v9231_v18 = vor.u32 %v9230_v44, %v9227_v40  ;;  %v9213_v0 = vsel %vm12354_vm4, %v9208_v48, %v9212_v55  ;;  %v16251_v52 = vadd.f32 %v16138_v56, %v6137_v22  ;;  %v9632_v16 = vrot.slane %v15882_v35, 5  ;;  %v16259_v55 = vld [vmem:[#allocation2 + $0xd0] sm:$0xf] }
 0x353   : > { %v9223_v8 = vsel %vm12354_vm4, %v9218_v13, %v9222_v46  ;;  %v11828_v41 = vpop.f32.mrf.mxu1  ;;  %v16253_v30 = vpop.f32.mrf.mxu0  ;;  %v9241_v37 = vor.u32 %v9240_v26, %v9236_v5  ;;  %v9246_v43 = vrot.slane %v9244_v62, 5  ;;  %v11102_v46 = vrot.slane %v9566_v39, 9  ;;  %v16270_v13 = vld [vmem:[#allocation2 + $0xd4] sm:$0x1] }
 0x354   : > { %v11083_v29 = vcombine.low %v9213_v0, %v9223_v8  ;;  %v9232_v44 = vrot.slane %v9231_v18, 4  ;;  %v16257_v12 = vadd.f32 %v16154_v4, %v11828_v41  ;;  %v9634_v40 = vrot.slane %v9632_v16, 4 }
 0x355   : > { %12031 = vmatmul.mubr.msk.bf16.gmra.mxu1 %vm5967_vm11, %v12227_v32  ;;  %v6150_v56 = vpop.f32.mrf.mxu1  ;;  %v9249_v17 = vshrl.u32 %v8885_v10, 16  ;;  %v16262_v22 = vpop.f32.mrf.mxu0  ;;  %v9242_v35 = vrot.slane %v9241_v37, 4  ;;  %v9635_v48 = vrot.slane %v15887_v57, 5  ;;  %v9252_v62 = vshll.u32 %v8885_v10, 16  ;;  %v12229_v37 = vld [vmem:[#allocation2 + $0xcc] sm:$0xff]  }
 0x356   : > { %17437 = vst [vmem:[#allocation32_spill] sm:$0xff] %v16257_v12  ;;  %12065 = vmatmul.mubr.msk.bf16.gmra.mxu0 %vm5967_vm11, %v11083_v29  ;;  %12034 = vmatprep.mubr.msk.bf16.mxu1 %vm5967_vm11, %v12228_v11  ;;  %v16267_v4 = vadd.f32 %v16162_v2, %v6150_v56  ;;  %v9237_v18 = vsel %vm12354_vm4, %v9232_v44, %v9236_v5  ;;  %v9258_v0 = vshll.u32 %v16259_v55, 16  ;;  %v9262_v8 = vshrl.u32 %v16259_v55, 16  ;;  %v9567_v29 = vld [vmem:[#allocation2 + $0x24] sm:$0xe] }
 0x357   : > { %v11829_v26 = vpop.f32.mrf.mxu1  ;;  %v9251_v39 = vrot.slane %v9249_v17, 4  ;;  %v16276_v41 = vpop.f32.mrf.mxu0  ;;  %v9247_v2 = vsel %vm12354_vm4, %v9242_v35, %v9246_v43  ;;  %v9636_v57 = vsel %vm12616_vm7, %v9634_v40, %v9635_v48  ;;  %v9254_v10 = vrot.slane %v9252_v62, 5  ;;  %v9568_v35 = vld [vmem:[#allocation2 + $0x30] sm:$0xe] }
 0x358   : > { %17438 = vst [vmem:[#allocation31_spill] sm:$0xff] %v16267_v4  ;;  %v16281_v32 = vadd.f32 %v16176_v7, %v11829_v26  ;;  %v11084_v5 = vcombine.low %v9237_v18, %v9247_v2  ;;  %v9260_v11 = vrot.slane %v9258_v0, 5  ;;  %v9264_v56 = vrot.slane %v9262_v8, 4 }
 0x359   : > { %v6153_v44 = vpop.f32.mrf.mxu1  ;;  %v9268_v17 = vshll.u32 %v16270_v13, 16  ;;  %v16286_v4 = vpop.f32.mrf.mxu0  ;;  %v9633_v7 = vsel %vm12616_vm7, %v11102_v46, %v9632_v16  ;;  %v9255_v43 = vor.u32 %v9254_v10, %v9251_v39  ;;  %v9639_v40 = vrot.slane %v15914_v9, 5  ;;  %v9569_v46 = vld [vmem:[#allocation2 + $0x3c] sm:$0xe] }
 0x35a   : > { %v16289_v12 = vadd.f32 %v16182_v3, %v6153_v44  ;;  %12068 = vmatprep.mubr.msk.bf16.mxu0 %vm5967_vm11, %v11084_v5  ;;  %v11119_v62 = vcombine.low %v9633_v7, %v9636_v57  ;;  %v9265_v18 = vor.u32 %v9264_v56, %v9260_v11  ;;  %v11103_v0 = vrot.slane %v9567_v29, 9 }
 0x35b   : > { %v11832_v48 = vpop.f32.mrf.mxu1  ;;  %v9270_v26 = vrot.slane %v9268_v17, 5  ;;  %v16295_v8 = vpop.f32.mrf.mxu0  ;;  %v9256_v3 = vrot.slane %v9255_v43, 4  ;;  %v9641_v44 = vrot.slane %v9639_v40, 4  ;;  %v9642_v16 = vrot.slane %v15917_v38, 5 }
 0x35c   : > { %v16298_v2 = vadd.f32 %v16196_v27, %v11832_v48  ;;  %v9266_v39 = vrot.slane %v9265_v18, 4  ;;  %v9640_v57 = vsel %vm12616_vm7, %v11103_v0, %v9639_v40  ;;  %v11104_v10 = vrot.slane %v9568_v35, 9 }
 0x35d   : > { %12035 = vmatmul.mubr.msk.bf16.gmra.mxu1 %vm5967_vm11, %v12229_v37  ;;  %v6166_v9 = vpop.f32.mrf.mxu1  ;;  %v9646_v29 = vrot.slane %v15942_v54, 5  ;;  %v16305_v5 = vpop.f32.mrf.mxu0  ;;  %v9261_v38 = vsel %vm12354_vm4, %v9256_v3, %v9260_v11  ;;  %v9643_v37 = vsel %vm12616_vm7, %v9641_v44, %v9642_v16  ;;  %v9653_v56 = vrot.slane %v15958_v51, 5  ;;  %v9571_v44 = vld [vmem:[#allocation2 + $0x54] sm:$0xe] }
 0x35e   : > { %17439 = vst [vmem:[#allocation35_spill] sm:$0xff] %v16298_v2  ;;  %12074 = vmatprep.mubr.msk.bf16.mxu1 %vm5967_vm11, %v11119_v62  ;;  %v16309_v27 = vadd.f32 %v16208_v33, %v6166_v9  ;;  %v9271_v17 = vsel %vm12354_vm4, %v9266_v39, %v9270_v26  ;;  %v9649_v43 = vrot.slane %v15948_v47, 5  ;;  %v11105_v35 = vrot.slane %v9569_v46, 9  ;;  %v9570_v33 = vld [vmem:[#allocation2 + $0x48] sm:$0xe] }
 0x35f   : > { %v11833_v7 = vpop.f32.mrf.mxu1  ;;  %v9648_v54 = vrot.slane %v9646_v29, 4  ;;  %v16319_v40 = vpop.f32.mrf.mxu0  ;;  %v11085_v48 = vcombine.low %v9261_v38, %v9271_v17  ;;  %v11120_v11 = vcombine.low %v9640_v57, %v9643_v37  ;;  %v9655_v18 = vrot.slane %v9653_v56, 4  ;;  %v9572_v38 = vld [vmem:[#allocation2 + $0x60] sm:$0xe]  ;;  %v17457_v2 = vld [vmem:[#allocation25_spill] sm:$0xff] }
 0x360   : > { %17440 = vst [vmem:[#allocation38_spill] sm:$0xff] %v16309_v27  ;;  %v16322_v62 = vadd.f32 %v16214_v60, %v11833_v7  ;;  %v9647_v51 = vsel %vm12616_vm7, %v11104_v10, %v9646_v29  ;;  %v9656_v47 = vrot.slane %v15970_v49, 5  ;;  %v9660_v3 = vrot.slane %v15974_v28, 5 }
 0x361   : > { %v6169_v0 = vpop.f32.mrf.mxu1  ;;  %v9650_v36 = vsel %vm12616_vm7, %v9648_v54, %v9649_v43  ;;  %v16328_v26 = vpop.f32.mrf.mxu0  ;;  %12069 = vmatmul.mubr.msk.bf16.gmra.mxu0 %vm5967_vm11, %v11085_v48  ;;  %v9654_v46 = vsel %vm12616_vm7, %v11105_v35, %v9653_v56  ;;  %v11106_v9 = vrot.slane %v9570_v33, 9  ;;  %v9663_v28 = vrot.slane %v15989_v20, 5 }
 0x362   : > { %17441 = vst [vmem:[#allocation36_spill] sm:$0xff] %v16322_v62  ;;  %v16334_v60 = vadd.f32 %v16228_v19, %v6169_v0  ;;  %v11121_v16 = vcombine.low %v9647_v51, %v9650_v36  ;;  %v9657_v57 = vsel %vm12616_vm7, %v9655_v18, %v9656_v47  ;;  %v9662_v49 = vrot.slane %v9660_v3, 4 }
 0x363   : > { %v11872_v39 = vpop.f32.mrf.mxu1  ;;  %v16340_v10 = vpop.f32.mrf.mxu0  ;;  %v9667_v29 = vrot.slane %v16007_v45, 5  ;;  %v11122_v37 = vcombine.low %v9654_v46, %v9657_v57  ;;  %v9661_v56 = vsel %vm12616_vm7, %v11106_v9, %v9660_v3  ;;  %v11107_v17 = vrot.slane %v9571_v44, 9 }
 0x364   : > { %17442 = vst [vmem:[#allocation37_spill] sm:$0xff] %v16334_v60  ;;  %v16345_v19 = vadd.f32 %v11872_v39, %v15980_v58  ;;  %v9664_v54 = vsel %vm12616_vm7, %v9662_v49, %v9663_v28  ;;  %v9670_v45 = vrot.slane %v16015_v25, 5  ;;  %v9674_v35 = vrot.slane %v16030_v23, 5  ;;  %v9573_v58 = vld [vmem:[#allocation2 + $0x6c] sm:$0xe] }
 0x365   : > { %12075 = vmatmul.mubr.msk.bf16.vlgmr.msra.gmra.mxu1 %vm5967_vm11, %v11120_v11  ;;  %v6768_v7 = vpop.f32.mrf.mxu1  ;;  %v16352_v43 = vpop.f32.mrf.mxu0  ;;  %v9669_v20 = vrot.slane %v9667_v29, 4  ;;  %v11123_v48 = vcombine.low %v9661_v56, %v9664_v54  ;;  %v16362_v11 = vsel %vm12616_vm7, %v11107_v17, %v9667_v29  ;;  %v11108_v18 = vrot.slane %v9572_v38, 9  ;;  %v9575_v49 = vld [vmem:[#allocation2 + $0x84] sm:$0xe] }
 0x366   : > { %12078 = vmatprep.mubr.msk.bf16.mxu1 %vm5967_vm11, %v11121_v16  ;;  %v16358_v33 = vadd.f32 %v6768_v7, %v16005_v1  ;;  %v9676_v23 = vrot.slane %v9674_v35, 4  ;;  %v9677_v36 = vrot.slane %v16039_v59, 5  ;;  %v9681_v47 = vrot.slane %v16053_v6, 5  ;;  %v9574_v1 = vld [vmem:[#allocation2 + $0x78] sm:$0xe] }
 0x367   : > { %v11873_v0 = vpop.f32.mrf.mxu1  ;;  %v16364_v51 = vpop.f32.mrf.mxu0  ;;  %v16368_v25 = vsel %vm12616_vm7, %v9669_v20, %v9670_v45  ;;  %v16379_v16 = vsel %vm12616_vm7, %v11108_v18, %v9674_v35  ;;  %v11109_v46 = vrot.slane %v9573_v58, 9  ;;  %v9684_v57 = vrot.slane %v16063_v34, 5  ;;  %v9576_v45 = vld [vmem:[#allocation2 + $0x90] sm:$0xe]  ;;  %v17452_v18 = vld [vmem:[#allocation33_spill] sm:$0xff] }
 0x368   : > { %v16373_v3 = vadd.f32 %v11873_v0, %v16013_v14  ;;  %v16385_v59 = vsel %vm12616_vm7, %v9676_v23, %v9677_v36  ;;  %v9683_v6 = vrot.slane %v9681_v47, 4  ;;  %v9688_v14 = vrot.slane %v16072_v21, 5  ;;  %v17444_v35 = vld [vmem:[#allocation26_spill] sm:$0xff] }
 0x369   : > { %v6771_v9 = vpop.f32.mrf.mxu1  ;;  %v16381_v39 = vpop.f32.mrf.mxu0  ;;  %v11125_v29 = vcombine.low %v16379_v16, %v16385_v59  ;;  %v16396_v38 = vsel %vm12616_vm7, %v11109_v46, %v9681_v47  ;;  %v11110_v56 = vrot.slane %v9574_v1, 9  ;;  %v9691_v54 = vrot.slane %v16081_v24, 5  ;;  %v17445_v16 = vld [vmem:[#allocation18_spill] sm:$0xff] }
 0x36a   : > { %v16390_v28 = vadd.f32 %v6771_v9, %v16244_v15  ;;  %v16402_v34 = vsel %vm12616_vm7, %v9683_v6, %v9684_v57  ;;  %v9690_v21 = vrot.slane %v9688_v14, 4  ;;  %v17443_v15 = vld [vmem:[#allocation5_spill] sm:$0xff]  ;;  %v11111_v23 = vrot.slane %v9575_v49, 9  ;;  %v17446_v9 = vld [vmem:[#allocation14_spill] sm:$0xff]  ;;  %v9577_v6 = vld [vmem:[#allocation2 + $0x9c] sm:$0xe] }
 0x36b   : > { %v11876_v17 = vpop.f32.mrf.mxu1  ;;  %v16398_v7 = vpop.f32.mrf.mxu0  ;;  %v9695_v20 = vrot.slane %v17443_v15, 5  ;;  %v16413_v0 = vsel %vm12616_vm7, %v11110_v56, %v9688_v14  ;;  %v9698_v46 = vrot.slane %v17445_v16, 5  ;;  %v9702_v59 = vrot.slane %v17446_v9, 5  ;;  %v17447_v57 = vld [vmem:[#allocation19_spill] sm:$0xff]  ;;  %v17449_v16 = vld [vmem:[#allocation12_spill] sm:$0xff] }
 0x36c   : > { %v16407_v58 = vadd.f32 %v11876_v17, %v17444_v35  ;;  %v16420_v24 = vsel %vm12616_vm7, %v9690_v21, %v9691_v54  ;;  %v11112_v56 = vrot.slane %v9576_v45, 9  ;;  %v17448_v35 = vld [vmem:[#allocation9_spill] sm:$0xff]  ;;  %v17450_v9 = vld [vmem:[#allocation11_spill] sm:$0xff]  ;;  %v11113_v45 = vrot.slane %v9577_v6, 9 }
 0x36d   : > { %12079 = vmatmul.mubr.msk.bf16.gmra.mxu1 %vm5967_vm11, %v11122_v37  ;;  %v6784_v36 = vpop.f32.mrf.mxu1  ;;  %v16416_v47 = vpop.f32.mrf.mxu0  ;;  %v9697_v1 = vrot.slane %v9695_v20, 4  ;;  %v16430_v49 = vsel %vm12616_vm7, %v11111_v23, %v9695_v20  ;;  %v9704_v15 = vrot.slane %v9702_v59, 4 }
 0x36e   : > { %12082 = vmatprep.mubr.msk.bf16.mxu1 %vm5967_vm11, %v11123_v48  ;;  %v6899_v14 = vadd.f32 %v6784_v36, %v17447_v57  ;;  %v9705_v48 = vrot.slane %v17448_v35, 5  ;;  %v9709_v36 = vrot.slane %v17449_v16, 5  ;;  %v17451_v57 = vld [vmem:[#allocation17_spill] sm:$0xff]  ;;  %v17453_v16 = vld [vmem:[#allocation23_spill] sm:$0xff] }
 0x36f   : > { %v11877_v17 = vpop.f32.mrf.mxu1  ;;  %v16432_v21 = vpop.f32.mrf.mxu0  ;;  %v16436_v54 = vsel %vm12616_vm7, %v9697_v1, %v9698_v46  ;;  %v6366_v37 = vadd.f32 %v17451_v57, %v17450_v9  ;;  %v16449_v1 = vsel %vm12616_vm7, %v11112_v56, %v9702_v59  ;;  %v9712_v9 = vrot.slane %v17453_v16, 5  ;;  %v17454_v56 = vld [vmem:[#allocation27_spill] sm:$0xff] }
 0x370   : > { %v6902_v44 = vadd.f32 %v11877_v17, %v17452_v18  ;;  %v16453_v46 = vsel %vm12616_vm7, %v9704_v15, %v9705_v48  ;;  %v9711_v35 = vrot.slane %v9709_v36, 4  ;;  %v9579_v17 = vld [vmem:[#allocation2 + $0xb4] sm:$0xe]  ;;  %v16462_v62 = vsel %vm12616_vm7, %v11113_v45, %v9709_v36  ;;  %v17455_v48 = vld [vmem:[#allocation28_spill] sm:$0xff] }
 0x371   : > { %v6787_v23 = vpop.f32.mrf.mxu1  ;;  %v16445_v60 = vpop.f32.mrf.mxu0  ;;  %v9723_v15 = vrot.slane %v17454_v56, 5  ;;  %v11115_v36 = vrot.slane %v9579_v17, 9 }
 0x372   : > { %v6900_v57 = vadd.f32 %v6787_v23, %v6366_v37  ;;  %v16466_v59 = vsel %vm12616_vm7, %v9711_v35, %v9712_v9  ;;  %v17456_v23 = vcombine.low %v16362_v11, %v16368_v25  ;;  %v9726_v35 = vrot.slane %v17457_v2, 5  ;;  %v17458_v9 = vld [vmem:[#allocation34_spill] sm:$0xff] }
 0x373   : > { %v11880_v6 = vpop.f32.mrf.mxu1  ;;  %v16458_v20 = vpop.f32.mrf.mxu0  ;;  %v9725_v45 = vrot.slane %v9723_v15, 4  ;;  %v16485_v37 = vsel %vm12616_vm7, %v11115_v36, %v9723_v15  ;;  %v17459_v25 = vld [vmem:[#allocation10_spill] sm:$0xff]  ;;  %v16502_v15 = vadd.f32 %v16253_v30, %v16358_v33  ;;  %v16520_v30 = vadd.f32 %v16295_v8, %v6899_v14 }
 0x374   : > { %v6905_v16 = vadd.f32 %v11880_v6, %v17455_v48  ;;  %v17460_v36 = vld [vmem:[#allocation6_spill] sm:$0xff]  ;;  %v16523_v33 = vadd.f32 %v16305_v5, %v6902_v44  ;;  %v17464_v44 = vld [vmem:[#allocation7_spill] sm:$0xff] }
 0x375   : > { %12083 = vmatmul.mubr.msk.bf16.gmra.mxu1 %vm5967_vm11, %v17456_v23  ;;  %v6800_v18 = vpop.f32.mrf.mxu1  ;;  %v16476_v27 = vpop.f32.mrf.mxu0  ;;  %v16489_v11 = vsel %vm12616_vm7, %v9725_v45, %v9726_v35  ;;  %v16507_v45 = vadd.f32 %v16262_v22, %v16373_v3  ;;  %v16511_v35 = vadd.f32 %v16276_v41, %v16390_v28  ;;  %v16527_v3 = vadd.f32 %v16319_v40, %v6900_v57 }
 0x376   : > { %12086 = vmatprep.mubr.msk.bf16.mxu1 %vm5967_vm11, %v11125_v29  ;;  %v6903_v56 = vadd.f32 %v6800_v18, %v17458_v9  ;;  %v11132_v2 = vcombine.low %v16485_v37, %v16489_v11  ;;  %v16496_v29 = vadd.f32 %v16240_v61, %v16345_v19  ;;  %v16517_v19 = vadd.f32 %v16286_v4, %v16407_v58 }
 0x377   : > { %v11881_v6 = vpop.f32.mrf.mxu1  ;;  %v16481_v48 = vpop.f32.mrf.mxu0  ;;  %v16530_v41 = vadd.f32 %v16328_v26, %v6905_v16  ;;  %v17462_v28 = vcombine.low %v16396_v38, %v16402_v34  ;;  %v17463_v26 = vcombine.low %v16413_v0, %v16420_v24  ;;  %v17467_v24 = vld [vmem:[#allocation16_spill] sm:$0xff] }
 0x378   : > { %v6906_v17 = vadd.f32 %v11881_v6, %v17459_v25  ;;  %v17461_v25 = vld [vmem:[#allocation8_spill] sm:$0xff]  ;;  %v16539_v8 = vadd.f32 %v16340_v10, %v6903_v56  ;;  %v17465_v10 = vld [vmem:[#allocation13_spill] sm:$0xff] }
 0x379   : > { %v6803_v18 = vpop.f32.mrf.mxu1  ;;  %v16498_v23 = vpop.f32.mrf.mxu0 }
 0x37a   : > { %v6904_v9 = vadd.f32 %v6803_v18, %v17460_v36  ;;  %v16542_v5 = vadd.f32 %v16352_v43, %v6906_v17  ;;  %v17466_v17 = vld [vmem:[#allocation29_spill] sm:$0xff] }
 0x37b   : > { %v11884_v6 = vpop.f32.mrf.mxu1  ;;  %v16513_v61 = vpop.f32.mrf.mxu0  ;;  %v9716_v0 = vrot.slane %v17466_v17, 5 }
 0x37c   : > { %v6909_v22 = vadd.f32 %v11884_v6, %v17461_v25  ;;  %v16545_v40 = vadd.f32 %v16364_v51, %v6904_v9  ;;  %v17468_v6 = vld [vmem:[#allocation15_spill] sm:$0xff] }
 0x37d   : > { %12087 = vmatmul.mubr.msk.bf16.gmra.mxu1 %vm5967_vm11, %v17462_v28  ;;  %v6816_v4 = vpop.f32.mrf.mxu1  ;;  %v16536_v58 = vpop.f32.mrf.mxu0 }
 0x37e   : > { %12090 = vmatprep.mubr.msk.bf16.mxu1 %vm5967_vm11, %v17463_v26  ;;  %v6907_v38 = vadd.f32 %v6816_v4, %v17464_v44  ;;  %v16553_v34 = vadd.f32 %v16381_v39, %v6909_v22  ;;  %v9718_v4 = vrot.slane %v9716_v0, 4  ;;  %v17471_v44 = vld [vmem:[#allocation22_spill] sm:$0xff] }
 0x37f   : > { %v11885_v14 = vpop.f32.mrf.mxu1  ;;  %v16555_v57 = vpop.f32.mrf.mxu0 }
 0x380   : > { %v6910_v16 = vadd.f32 %v11885_v14, %v17465_v10  ;;  %v16559_v43 = vadd.f32 %v16398_v7, %v6907_v38  ;;  %v17469_v7 = vcombine.low %v16430_v49, %v16436_v54  ;;  %v9578_v14 = vld [vmem:[#allocation2 + $0xa8] sm:$0xe] }
 0x381   : > { %v6819_v51 = vpop.f32.mrf.mxu1  ;;  %v16561_v56 = vpop.f32.mrf.mxu0 }
 0x382   : > { %v6908_v18 = vadd.f32 %v6819_v51, %v17467_v24  ;;  %v16566_v36 = vadd.f32 %v16416_v47, %v6910_v16  ;;  %v17470_v47 = vcombine.low %v16449_v1, %v16453_v46  ;;  %v17472_v16 = vld [vmem:[#allocation20_spill] sm:$0xff]  ;;  %v11114_v1 = vrot.slane %v9578_v14, 9 }
 0x383   : > { %v11888_v39 = vpop.f32.mrf.mxu1  ;;  %v16568_v9 = vpop.f32.mrf.mxu0  ;;  %v9719_v49 = vrot.slane %v17472_v16, 5  ;;  %v17473_v51 = vld [vmem:[#allocation24_spill] sm:$0xff] }
 0x384   : > { %v6913_v25 = vadd.f32 %v11888_v39, %v17468_v6  ;;  %v16572_v22 = vadd.f32 %v16432_v21, %v6908_v18  ;;  %v17474_v6 = vld [vmem:[#allocation21_spill] sm:$0xff] }
 0x385   : > { %12091 = vmatmul.mubr.msk.bf16.gmra.mxu1 %vm5967_vm11, %v17469_v7  ;;  %v6832_v28 = vpop.f32.mrf.mxu1  ;;  %v16578_v26 = vpop.f32.mrf.mxu0  ;;  %v9720_v46 = vsel %vm12616_vm7, %v9718_v4, %v9719_v49  ;;  %v9580_v49 = vld [vmem:[#allocation2 + $0xc0] sm:$0xe] }
 0x386   : > { %12094 = vmatprep.mubr.msk.bf16.mxu1 %vm5967_vm11, %v17470_v47  ;;  %v6911_v38 = vadd.f32 %v6832_v28, %v17471_v44  ;;  %v16586_v21 = vadd.f32 %v16445_v60, %v6913_v25  ;;  %v9730_v60 = vrot.slane %v16212_v31, 5  ;;  %v9717_v47 = vsel %vm12616_vm7, %v11114_v1, %v9716_v0  ;;  %v17475_v44 = vld [vmem:[#allocation30_spill] sm:$0xff] }
 0x387   : > { %v11889_v10 = vpop.f32.mrf.mxu1  ;;  %v16589_v54 = vpop.f32.mrf.mxu0  ;;  %v11131_v14 = vcombine.low %v9717_v47, %v9720_v46  ;;  %v17476_v31 = vcombine.low %v16462_v62, %v16466_v59  ;;  %v9733_v1 = vrot.slane %v16223_v42, 5 }
 0x388   : > { %v6914_v17 = vadd.f32 %v11889_v10, %v17473_v51  ;;  %v16593_v24 = vadd.f32 %v16458_v20, %v6911_v38  ;;  %v9581_v51 = vld [vmem:[#allocation2 + $0xcc] sm:$0xe] }
 0x389   : > { %v6835_v18 = vpop.f32.mrf.mxu1  ;;  %v16597_v39 = vpop.f32.mrf.mxu0 }
 0x38a   : > { %v6912_v25 = vadd.f32 %v6835_v18, %v17474_v6  ;;  %v16602_v7 = vadd.f32 %v16476_v27, %v6914_v17  ;;  %v9732_v27 = vrot.slane %v9730_v60, 4  ;;  %v9737_v17 = vrot.slane %v16259_v55, 5 }
 0x38b   : > { %v11892_v28 = vpop.f32.mrf.mxu1  ;;  %v16606_v20 = vpop.f32.mrf.mxu0  ;;  %v11117_v55 = vrot.slane %v9581_v51, 9 }
 0x38c   : > { %v6917_v38 = vadd.f32 %v11892_v28, %v17475_v44  ;;  %v16610_v4 = vadd.f32 %v16481_v48, %v6912_v25  ;;  %v11116_v25 = vrot.slane %v9580_v49, 9  ;;  %v9739_v47 = vrot.slane %v9737_v17, 4 }
 0x38d   : > { %12095 = vmatmul.mubr.msk.bf16.gmra.mxu1 %vm5967_vm11, %v17476_v31  ;;  %v6848_v10 = vpop.f32.mrf.mxu1  ;;  %v11935_v16 = vpop.f32.mrf.mxu0  ;;  %v9740_v44 = vrot.slane %v16270_v13, 5 }
 0x38e   : > { %12098 = vmatprep.mubr.msk.bf16.mxu1 %vm5967_vm11, %v11131_v14  ;;  %v6915_v0 = vadd.f32 %v6848_v10, %v16235_v50  ;;  %v16620_v18 = vadd.f32 %v16498_v23, %v6917_v38  ;;  %v9734_v50 = vsel %vm12616_vm7, %v9732_v27, %v9733_v1  ;;  %v17477_v14 = vld [vmem:[#allocation32_spill] sm:$0xff] }
 0x38f   : > { %v11893_v48 = vpop.f32.mrf.mxu1  ;;  %v7241_v62 = vpop.f32.mrf.mxu0  ;;  %v9741_v49 = vsel %vm12616_vm7, %v9739_v47, %v9740_v44 }
 0x390   : > { %v6918_v59 = vadd.f32 %v11893_v48, %v16238_v63  ;;  %v16625_v46 = vadd.f32 %v16513_v61, %v6915_v0  ;;  %v9731_v61 = vsel %vm12616_vm7, %v11116_v25, %v9730_v60  ;;  %v9738_v0 = vsel %vm12616_vm7, %v11117_v55, %v9737_v17  ;;  %v17479_v25 = vld [vmem:[#allocation35_spill] sm:$0xff] }
 0x391   : > { %v6851_v6 = vpop.f32.mrf.mxu1  ;;  %v16629_v28 = vpop.f32.mrf.mxu0  ;;  %v11133_v10 = vcombine.low %v9731_v61, %v9734_v50  ;;  %v11134_v1 = vcombine.low %v9738_v0, %v9741_v49 }
 0x392   : > { %v6916_v23 = vadd.f32 %v6851_v6, %v16251_v52  ;;  %v16634_v42 = vadd.f32 %v16536_v58, %v6918_v59  ;;  %v17478_v58 = vld [vmem:[#allocation31_spill] sm:$0xff] }
 0x393   : > { %v16638_v38 = vpop.f32.mrf.mxu0 }
 0x394   : > { %v11896_v63 = vpop.f32.mrf.mxu1  ;;  %v16642_v27 = vadd.f32 %v16555_v57, %v6916_v23  ;;  %v17480_v23 = vld [vmem:[#allocation38_spill] sm:$0xff] }
 0x395   : > { %v6921_v31 = vadd.f32 %v11896_v63, %v17477_v14  ;;  %12099 = vmatmul.mubr.msk.bf16.gmra.mxu1 %vm5967_vm11, %v11132_v2  ;;  %v16648_v13 = vpop.f32.mrf.mxu0  ;;  %v17481_v63 = vld [vmem:[#allocation36_spill] sm:$0xff] }
 0x396   : > { %v6864_v52 = vpop.f32.mrf.mxu1  ;;  %12102 = vmatprep.mubr.msk.bf16.mxu1 %vm5967_vm11, %v11133_v10  ;;  %v17482_v10 = vld [vmem:[#allocation37_spill] sm:$0xff] }
 0x397   : > { %v6919_v60 = vadd.f32 %v6864_v52, %v17478_v58  ;;  %v16657_v57 = vadd.f32 %v16561_v56, %v6921_v31  ;;  %v16659_v37 = vpop.f32.mrf.mxu0 }
 0x398   : > { %v11897_v51 = vpop.f32.mrf.mxu1 }
 0x399   : > { %v6922_v11 = vadd.f32 %v11897_v51, %v16281_v32  ;;  %v16663_v2 = vadd.f32 %v16568_v9, %v6919_v60  ;;  %v16665_v59 = vpop.f32.mrf.mxu0 }
 0x39a   : > { %v6867_v48 = vpop.f32.mrf.mxu1 }
 0x39b   : > { %v6920_v17 = vadd.f32 %v6867_v48, %v16289_v12  ;;  %v16669_v53 = vadd.f32 %v16578_v26, %v6922_v11  ;;  %v16671_v56 = vpop.f32.mrf.mxu0 }
 0x39c   : > { %v11900_v6 = vpop.f32.mrf.mxu1 }
 0x39d   : > { %v6925_v50 = vadd.f32 %v11900_v6, %v17479_v25  ;;  %v16675_v55 = vadd.f32 %v16589_v54, %v6920_v17  ;;  %12103 = vmatmul.mubr.msk.bf16.gmra.mxu1 %vm5967_vm11, %v11134_v1  ;;  %v16678_v9 = vpop.f32.mrf.mxu0 }
 0x39e   : > { %v6880_v32 = vpop.f32.mrf.mxu1 }
 0x39f   : > { %v6923_v47 = vadd.f32 %v6880_v32, %v17480_v23  ;;  %v16682_v12 = vadd.f32 %v16597_v39, %v6925_v50  ;;  %v16684_v44 = vpop.f32.mrf.mxu0 }
 0x3a0   : > { %v11901_v26 = vpop.f32.mrf.mxu1 }
 0x3a1   : > { %v6926_v61 = vadd.f32 %v11901_v26, %v17481_v63  ;;  %v16688_v14 = vadd.f32 %v16606_v20, %v6923_v47  ;;  %v16690_v31 = vpop.f32.mrf.mxu0 }
 0x3a2   : > { %v6883_v54 = vpop.f32.mrf.mxu1 }
 0x3a3   : > { %v6924_v52 = vadd.f32 %v6883_v54, %v17482_v10  ;;  %v16693_v58 = vadd.f32 %v11935_v16, %v6926_v61  ;;  %v16695_v0 = vpop.f32.mrf.mxu0 }
 0x3a4   : > { %v11940_v60 = vpop.f32.mrf.mxu1 }
 0x3a5   : > { %v16698_v39 = vadd.f32 %v11940_v60, %v16496_v29  ;;  %v16700_v49 = vadd.f32 %v7241_v62, %v6924_v52  ;;  %v16702_v11 = vpop.f32.mrf.mxu0 }
 0x3a6   : > { %v7852_v51 = vpop.f32.mrf.mxu1 }
 0x3a7   : > { %v16705_v20 = vadd.f32 %v7852_v51, %v16502_v15  ;;  %v16707_v1 = vpop.f32.mrf.mxu0 }
 0x3a8   : > { %v11941_v48 = vpop.f32.mrf.mxu1 }
 0x3a9   : > { %v16710_v16 = vadd.f32 %v11941_v48, %v16507_v45  ;;  %v16712_v6 = vpop.f32.mrf.mxu0 }
 0x3aa   : > { %v7855_v17 = vpop.f32.mrf.mxu1 }
 0x3ab   : > { %v16715_v29 = vadd.f32 %v7855_v17, %v16511_v35  ;;  %v16717_v25 = vpop.f32.mrf.mxu0 }
 0x3ac   : > { %v11944_v62 = vpop.f32.mrf.mxu1 }
 0x3ad   : > { %v16720_v50 = vadd.f32 %v11944_v62, %v16517_v19  ;;  %v16722_v32 = vpop.f32.mrf.mxu0 }
 0x3ae   : > { %v7868_v15 = vpop.f32.mrf.mxu1  ;;  %17483 = vst [vmem:[#allocation39_spill] sm:$0xff] %v16722_v32 }
 0x3af   : > { %v16725_v23 = vadd.f32 %v7868_v15, %v16520_v30  ;;  %v16727_v47 = vpop.f32.mrf.mxu0 }
 0x3b0   : > { %v11945_v45 = vpop.f32.mrf.mxu1  ;;  %17484 = vst [vmem:[#allocation41_spill] sm:$0xff] %v16727_v47 }
 0x3b1   : > { %v16730_v26 = vadd.f32 %v11945_v45, %v16523_v33  ;;  %v16732_v63 = vpop.f32.mrf.mxu0 }
 0x3b2   : > { %v7871_v35 = vpop.f32.mrf.mxu1  ;;  %17485 = vst [vmem:[#allocation40_spill] sm:$0xff] %v16732_v63 }
 0x3b3   : > { %v16735_v61 = vadd.f32 %v7871_v35, %v16527_v3  ;;  %v16737_v54 = vpop.f32.mrf.mxu0 }
 0x3b4   : > { %v11948_v19 = vpop.f32.mrf.mxu1  ;;  %17486 = vst [vmem:[#allocation42_spill] sm:$0xff] %v16737_v54 }
 0x3b5   : > { %v16740_v10 = vadd.f32 %v11948_v19, %v16530_v41  ;;  %v16742_v52 = vpop.f32.mrf.mxu0 }
 0x3b6   : > { %v7884_v30 = vpop.f32.mrf.mxu1  ;;  %17487 = vst [vmem:[#allocation43_spill] sm:$0xff] %v16742_v52 }
 0x3b7   : > { %v16745_v60 = vadd.f32 %v7884_v30, %v16539_v8  ;;  %v16747_v51 = vpop.f32.mrf.mxu0 }
 0x3b8   : > { %v11949_v33 = vpop.f32.mrf.mxu1  ;;  %17488 = vst [vmem:[#allocation44_spill] sm:$0xff] %v16747_v51 }
 0x3b9   : > { %v16750_v48 = vadd.f32 %v11949_v33, %v16542_v5  ;;  %v16752_v17 = vpop.f32.mrf.mxu0 }
 0x3ba   : > { %v7887_v3 = vpop.f32.mrf.mxu1  ;;  %17489 = vst [vmem:[#allocation45_spill] sm:$0xff] %v16752_v17 }
 0x3bb   : > { %v16755_v62 = vadd.f32 %v7887_v3, %v16545_v40  ;;  %v16757_v15 = vpop.f32.mrf.mxu0 }
 0x3bc   : > { %v11952_v41 = vpop.f32.mrf.mxu1  ;;  %17490 = vst [vmem:[#allocation46_spill] sm:$0xff] %v16757_v15 }
 0x3bd   : > { %v16760_v45 = vadd.f32 %v11952_v41, %v16553_v34  ;;  %v16762_v35 = vpop.f32.mrf.mxu0 }
 0x3be   : > { %v7900_v8 = vpop.f32.mrf.mxu1  ;;  %17491 = vst [vmem:[#allocation47_spill] sm:$0xff] %v16762_v35 }
 0x3bf   : > { %v16765_v19 = vadd.f32 %v7900_v8, %v16559_v43  ;;  %v16770_v33 = vpop.f32.mrf.mxu0 }
 0x3c0   : > { %v11953_v5 = vpop.f32.mrf.mxu1  ;;  %17493 = vst [vmem:[#allocation49_spill] sm:$0xff] %v16770_v33 }
 0x3c1   : > { %v16768_v30 = vadd.f32 %v11953_v5, %v16566_v36  ;;  %v16778_v41 = vpop.f32.mrf.mxu0 }
 0x3c2   : > { %v7903_v40 = vpop.f32.mrf.mxu1  ;;  %17496 = vst [vmem:[#allocation53_spill] sm:$0xff] %v16778_v41 }
 0x3c3   : > { %17492 = vst [vmem:[#allocation48_spill] sm:$0xff] %v16768_v30  ;;  %v16773_v3 = vadd.f32 %v7903_v40, %v16572_v22  ;;  %v16786_v5 = vpop.f32.mrf.mxu0 }
 0x3c4   : > { %v11956_v15 = vpop.f32.mrf.mxu1  ;;  %17499 = vst [vmem:[#allocation56_spill] sm:$0xff] %v16786_v5 }
 0x3c5   : > { %17494 = vst [vmem:[#allocation51_spill] sm:$0xff] %v16773_v3  ;;  %v16776_v34 = vadd.f32 %v11956_v15, %v16586_v21  ;;  %v16794_v15 = vpop.f32.mrf.mxu0 }
 0x3c6   : > { %v7916_v35 = vpop.f32.mrf.mxu1  ;;  %17502 = vst [vmem:[#allocation3_spill] sm:$0xff] %v16794_v15 }
 0x3c7   : > { %17495 = vst [vmem:[#allocation50_spill] sm:$0xff] %v16776_v34  ;;  %v16781_v43 = vadd.f32 %v7916_v35, %v16593_v24 }
 0x3c8   : > { %v11957_v8 = vpop.f32.mrf.mxu1 }
 0x3c9   : > { %17497 = vst [vmem:[#allocation52_spill] sm:$0xff] %v16781_v43  ;;  %v16784_v36 = vadd.f32 %v11957_v8, %v16602_v7  ;;  %v16802_v8 = vpop.f32.mrf.mxu0 }
 0x3ca   : > { %v7919_v33 = vpop.f32.mrf.mxu1  ;;  %17505 = vst [vmem:[#allocation26_spill] sm:$0xff] %v16802_v8 }
 0x3cb   : > { %17498 = vst [vmem:[#allocation54_spill] sm:$0xff] %v16784_v36  ;;  %v16789_v22 = vadd.f32 %v7919_v33, %v16610_v4  ;;  %v16807_v17 = vpop.f32.mrf.mxu0 }
 0x3cc   : > { %v11960_v40 = vpop.f32.mrf.mxu1  ;;  %17507 = vst [vmem:[#allocation14_spill] sm:$0xff] %v16807_v17 }
 0x3cd   : > { %17500 = vst [vmem:[#allocation55_spill] sm:$0xff] %v16789_v22  ;;  %v16792_v21 = vadd.f32 %v11960_v40, %v16620_v18  ;;  %v16815_v15 = vpop.f32.mrf.mxu0 }
 0x3ce   : > { %v7932_v41 = vpop.f32.mrf.mxu1  ;;  %17510 = vst [vmem:[#allocation12_spill] sm:$0xff] %v16815_v15 }
 0x3cf   : > { %17501 = vst [vmem:[#allocation57_spill] sm:$0xff] %v16792_v21  ;;  %v16797_v24 = vadd.f32 %v7932_v41, %v16625_v46 }
 0x3d0   : > { %v11961_v35 = vpop.f32.mrf.mxu1 }
 0x3d1   : > { %17503 = vst [vmem:[#allocation4_spill] sm:$0xff] %v16797_v24  ;;  %v16800_v7 = vadd.f32 %v11961_v35, %v16634_v42 }
 0x3d2   : > { %v7935_v5 = vpop.f32.mrf.mxu1 }
 0x3d3   : > { %17504 = vst [vmem:[#allocation5_spill] sm:$0xff] %v16800_v7  ;;  %v16805_v4 = vadd.f32 %v7935_v5, %v16642_v27  ;;  %v16823_v5 = vpop.f32.mrf.mxu0 }
 0x3d4   : > { %v11964_v33 = vpop.f32.mrf.mxu1  ;;  %17513 = vst [vmem:[#allocation33_spill] sm:$0xff] %v16823_v5 }
 0x3d5   : > { %17506 = vst [vmem:[#allocation18_spill] sm:$0xff] %v16805_v4  ;;  %v16810_v18 = vadd.f32 %v11964_v33, %v16657_v57  ;;  %v16828_v8 = vpop.f32.mrf.mxu0 }
 0x3d6   : > { %v7948_v40 = vpop.f32.mrf.mxu1  ;;  %17515 = vst [vmem:[#allocation27_spill] sm:$0xff] %v16828_v8 }
 0x3d7   : > { %17508 = vst [vmem:[#allocation19_spill] sm:$0xff] %v16810_v18  ;;  %v16813_v46 = vadd.f32 %v7948_v40, %v16663_v2 }
 0x3d8   : > { %v11965_v41 = vpop.f32.mrf.mxu1 }
 0x3d9   : > { %17509 = vst [vmem:[#allocation9_spill] sm:$0xff] %v16813_v46  ;;  %v16818_v42 = vadd.f32 %v11965_v41, %v16669_v53 }
 0x3da   : > { %v7951_v35 = vpop.f32.mrf.mxu1  ;;  %v12042_v15 = vpop.f32.mrf.mxu0 }
 0x3db   : > { %17511 = vst [vmem:[#allocation11_spill] sm:$0xff] %v16818_v42  ;;  %v16821_v27 = vadd.f32 %v7951_v35, %v16675_v55 }
 0x3dd   : > { %17512 = vst [vmem:[#allocation17_spill] sm:$0xff] %v16821_v27  ;;  %v11968_v17 = vpop.f32.mrf.mxu1  ;;  %v9407_v27 = vpop.f32.mrf.mxu0 }
 0x3de   : > { %v16826_v57 = vadd.f32 %v11968_v17, %v16682_v12 }
 0x3df   : > { %v7964_v33 = vpop.f32.mrf.mxu1 }
 0x3e0   : > { %17514 = vst [vmem:[#allocation23_spill] sm:$0xff] %v16826_v57  ;;  %v16831_v2 = vadd.f32 %v7964_v33, %v16688_v14  ;;  %v16839_v57 = vpop.f32.mrf.mxu0 }
 0x3e1   : > { %v11969_v40 = vpop.f32.mrf.mxu1 }
 0x3e2   : > { %17516 = vst [vmem:[#allocation28_spill] sm:$0xff] %v16831_v2  ;;  %v16834_v53 = vadd.f32 %v11969_v40, %v16693_v58  ;;  %v16843_v14 = vpop.f32.mrf.mxu0 }
 0x3e3   : > { %v7967_v41 = vpop.f32.mrf.mxu1 }
 0x3e4   : > { %17517 = vst [vmem:[#allocation25_spill] sm:$0xff] %v16834_v53  ;;  %v16837_v55 = vadd.f32 %v7967_v41, %v16700_v49 }
 0x3e5   : > { %v12008_v35 = vpop.f32.mrf.mxu1 }
 0x3e6   : > { %17518 = vst [vmem:[#allocation34_spill] sm:$0xff] %v16837_v55 }
 0x3e7   : > { %v8681_v5 = vpop.f32.mrf.mxu1  ;;  %v16849_v40 = vpop.f32.mrf.mxu0 }
 0x3e9   : > { %v12009_v12 = vpop.f32.mrf.mxu1  ;;  %v16855_v55 = vpop.f32.mrf.mxu0 }
 0x3eb   : > { %v8684_v17 = vpop.f32.mrf.mxu1  ;;  %v16861_v46 = vpop.f32.mrf.mxu0 }
 0x3ed   : > { %v12012_v8 = vpop.f32.mrf.mxu1  ;;  %v16867_v7 = vpop.f32.mrf.mxu0 }
 0x3ef   : > { %v16841_v42 = vpop.f32.mrf.mxu1 }
 0x3f0   : > { %v16873_v51 = vpop.f32.mrf.mxu0 }
 0x3f1   : > { %v16845_v33 = vpop.f32.mrf.mxu1 }
 0x3f2   : > { %v16879_v36 = vpop.f32.mrf.mxu0 }
 0x3f3   : > { %v16847_v58 = vpop.f32.mrf.mxu1 }
 0x3f4   : > { %v16885_v63 = vpop.f32.mrf.mxu0 }
 0x3f5   : > { %v16851_v49 = vpop.f32.mrf.mxu1 }
 0x3f6   : > { %v16891_v3 = vpop.f32.mrf.mxu0 }
 0x3f7   : > { %v16853_v41 = vpop.f32.mrf.mxu1 }
 0x3f9   : > { %v16857_v53 = vpop.f32.mrf.mxu1 }
 0x3fb   : > { %v16859_v2 = vpop.f32.mrf.mxu1 }
 0x3fd   : > { %v16863_v18 = vpop.f32.mrf.mxu1 }
 0x3ff   : > { %v16865_v4 = vpop.f32.mrf.mxu1 }
 0x401   : > { %v16869_v24 = vpop.f32.mrf.mxu1 }
 0x402   : > { %17519 = vst [vmem:[#allocation10_spill] sm:$0xff] %v16869_v24 }
 0x403   : > { %v16871_v21 = vpop.f32.mrf.mxu1 }
 0x404   : > { %17520 = vst [vmem:[#allocation6_spill] sm:$0xff] %v16871_v21 }
 0x405   : > { %v16875_v22 = vpop.f32.mrf.mxu1 }
 0x406   : > { %17521 = vst [vmem:[#allocation8_spill] sm:$0xff] %v16875_v22  ;;  %v16897_v22 = vpop.f32.mrf.mxu0 }
 0x407   : > { %v16877_v52 = vpop.f32.mrf.mxu1  ;;  %17529 = vst [vmem:[#allocation24_spill] sm:$0xff] %v16897_v22 }
 0x408   : > { %17522 = vst [vmem:[#allocation7_spill] sm:$0xff] %v16877_v52 }
 0x409   : > { %v16881_v54 = vpop.f32.mrf.mxu1 }
 0x40a   : > { %17523 = vst [vmem:[#allocation13_spill] sm:$0xff] %v16881_v54  ;;  %v16903_v54 = vpop.f32.mrf.mxu0 }
 0x40b   : > { %v16883_v43 = vpop.f32.mrf.mxu1  ;;  %17532 = vst [vmem:[#allocation32_spill] sm:$0xff] %v16903_v54 }
 0x40c   : > { %17524 = vst [vmem:[#allocation29_spill] sm:$0xff] %v16883_v43 }
 0x40d   : > { %v16887_v34 = vpop.f32.mrf.mxu1 }
 0x40e   : > { %17525 = vst [vmem:[#allocation16_spill] sm:$0xff] %v16887_v34  ;;  %v16909_v34 = vpop.f32.mrf.mxu0 }
 0x40f   : > { %v16889_v47 = vpop.f32.mrf.mxu1  ;;  %17535 = vst [vmem:[#allocation38_spill] sm:$0xff] %v16909_v34 }
 0x410   : > { %17526 = vst [vmem:[#allocation15_spill] sm:$0xff] %v16889_v47 }
 0x411   : > { %v16893_v21 = vpop.f32.mrf.mxu1 }
 0x412   : > { %17527 = vst [vmem:[#allocation22_spill] sm:$0xff] %v16893_v21  ;;  %v8451_v21 = vadd.f32 %v16629_v28, %v16698_v39  ;;  %v8450_v28 = vadd.f32 %v16659_v37, %v16715_v29  ;;  %v16943_v37 = vld [vmem:[%s17207_s4 + $0x1] ss:$0 sm:$0xff] }
 0x413   : > { %v16895_v24 = vpop.f32.mrf.mxu1 }
 0x414   : > { %17528 = vst [vmem:[#allocation20_spill] sm:$0xff] %v16895_v24  ;;  %v8810_v22 = vadd.f32 %v12008_v35, %v8451_v21 }
 0x415   : > { %v16899_v52 = vpop.f32.mrf.mxu1 }
 0x416   : > { %17530 = vst [vmem:[#allocation21_spill] sm:$0xff] %v16899_v52  ;;  %v8449_v52 = vadd.f32 %v16638_v38, %v16705_v20  ;;  %v9536_v21 = vadd.f32 %v12042_v15, %v8810_v22  ;;  %v8455_v38 = vadd.f32 %v16665_v59, %v16720_v50 }
 0x417   : > { %v16901_v32 = vpop.f32.mrf.mxu1 }
 0x418   : > { %17531 = vst [vmem:[#allocation30_spill] sm:$0xff] %v16901_v32  ;;  %v16919_v32 = vpop.f32.mrf.mxu0  ;;  %v8814_v35 = vadd.f32 %v12012_v8, %v8455_v38  ;;  %v8456_v8 = vadd.f32 %v16678_v9, %v16730_v26 }
 0x419   : > { %v16905_v43 = vpop.f32.mrf.mxu1 }
 0x41a   : > { %17533 = vst [vmem:[#allocation31_spill] sm:$0xff] %v16905_v43  ;;  %v8808_v43 = vadd.f32 %v8681_v5, %v8449_v52  ;;  %v16929_v39 = vpop.f32.mrf.mxu0  ;;  %v16936_v52 = vld [vmem:[%s17207_s4] ss:$0 sm:$0xff] }
 0x41b   : > { %v16907_v30 = vpop.f32.mrf.mxu1 }
 0x41c   : > { %17534 = vst [vmem:[#allocation35_spill] sm:$0xff] %v16907_v30  ;;  %v8452_v30 = vadd.f32 %v16648_v13, %v16710_v16  ;;  %v8809_v13 = vadd.f32 %v8684_v17, %v8450_v28  ;;  %v9534_v5 = vadd.f32 %v9407_v27, %v8808_v43  ;;  %v16945_v59 = vpop.f32.mrf.mxu0  ;;  %v8815_v28 = vadd.f32 %v16845_v33, %v8456_v8 }
 0x41d   : > { %v16911_v47 = vpop.f32.mrf.mxu1 }
 0x41e   : > { %17536 = vst [vmem:[#allocation36_spill] sm:$0xff] %v16911_v47  ;;  %v8811_v47 = vadd.f32 %v12009_v12, %v8452_v30  ;;  %v8453_v30 = vadd.f32 %v16671_v56, %v16725_v23  ;;  %v9535_v17 = vadd.f32 %v16843_v14, %v8809_v13  ;;  %v16965_v26 = vpop.f32.mrf.mxu0 }
 0x41f   : > { %v16915_v24 = vpop.f32.mrf.mxu1 }
 0x420   : > { %v9537_v15 = vadd.f32 %v16839_v57, %v8811_v47  ;;  %v8812_v43 = vadd.f32 %v16841_v42, %v8453_v30  ;;  %v9540_v47 = vadd.f32 %v16849_v40, %v8814_v35 }
 0x421   : > { %v16921_v54 = vpop.f32.mrf.mxu1 }
 0x423   : > { %v16925_v34 = vpop.f32.mrf.mxu1 }
 0x425   : > { %v12076_v20 = vpop.f32.mrf.mxu1 }
 0x426   : > { %v10006_v16 = vadd.f32 %v12076_v20, %v9536_v21  ;;  %v8454_v21 = vadd.f32 %v16684_v44, %v16735_v61  ;;  %v8459_v61 = vadd.f32 %v16690_v31, %v16740_v10  ;;  %v9538_v20 = vadd.f32 %v16855_v55, %v8812_v43  ;;  %v16981_v10 = vpop.f32.mrf.mxu0 }
 0x427   : > { %v9877_v29 = vpop.f32.mrf.mxu1  ;;  %v9541_v31 = vadd.f32 %v16861_v46, %v8815_v28 }
 0x428   : > { %v10043_v50 = vmul.f32 %v16936_v52, %v10006_v16  ;;  %v10004_v22 = vadd.f32 %v9877_v29, %v9534_v5  ;;  %v8813_v44 = vadd.f32 %v16847_v58, %v8454_v21  ;;  %v8818_v35 = vadd.f32 %v16851_v49, %v8459_v61 }
 0x429   : > { %v12077_v56 = vpop.f32.mrf.mxu1  ;;  %v8457_v58 = vadd.f32 %v16695_v0, %v16745_v60  ;;  %v8460_v49 = vadd.f32 %v16702_v11, %v16750_v48  ;;  %v16999_v48 = vpop.f32.mrf.mxu0 }
 0x42a   : > { %v10080_v23 = vadd.f32 %v16943_v37, %v10043_v50  ;;  %v10041_v27 = vmul.f32 %v16936_v52, %v10004_v22  ;;  %v10007_v12 = vadd.f32 %v12077_v56, %v9537_v15  ;;  %v9539_v60 = vadd.f32 %v16867_v7, %v8813_v44 }
 0x42b   : > { %v9880_v9 = vpop.f32.mrf.mxu1  ;;  %v8816_v15 = vadd.f32 %v16853_v41, %v8457_v58  ;;  %v8458_v41 = vadd.f32 %v16707_v1, %v16755_v62  ;;  %v9544_v11 = vadd.f32 %v16873_v51, %v8818_v35  ;;  %v17539_v35 = vld [vmem:[#allocation10_spill] sm:$0xff] }
 0x42c   : > { %v10112_v42 = vmax.f32 %v10080_v23, 0.0  ;;  %v10078_v57 = vadd.f32 %v16943_v37, %v10041_v27  ;;  %v10044_v14 = vmul.f32 %v16936_v52, %v10007_v12  ;;  %v10005_v33 = vadd.f32 %v9880_v9, %v9535_v17 }
 0x42d   : > { %v12080_v38 = vpop.f32.mrf.mxu1  ;;  %v8819_v23 = vadd.f32 %v16857_v53, %v8460_v49  ;;  %v8817_v21 = vadd.f32 %v16859_v2, %v8458_v41  ;;  %v8463_v53 = vadd.f32 %v16712_v6, %v16760_v45  ;;  %v9542_v62 = vadd.f32 %v16879_v36, %v8816_v15  ;;  %v17017_v45 = vpop.f32.mrf.mxu0  ;;  %v17546_v41 = vld [vmem:[#allocation32_spill] sm:$0xff] }
 0x42e   : > { %10144 = vst.msk [vmem:[%s16962_s7 + $0x10] sm:$0xff] %vm5967_vm11, %v10112_v42  ;;  %v10110_v40 = vmax.f32 %v10078_v57, 0.0  ;;  %v10081_v13 = vadd.f32 %v16943_v37, %v10044_v14  ;;  %v10042_v16 = vmul.f32 %v16936_v52, %v10005_v33  ;;  %v10010_v5 = vadd.f32 %v12080_v38, %v9540_v47 }
 0x42f   : > { %v9893_v30 = vpop.f32.mrf.mxu1  ;;  %v8822_v57 = vadd.f32 %v16863_v18, %v8463_v53  ;;  %v8461_v2 = vadd.f32 %v16717_v25, %v16765_v19  ;;  %v9545_v6 = vadd.f32 %v16885_v63, %v8819_v23  ;;  %v17537_v18 = vld [vmem:[#allocation48_spill] sm:$0xff]  ;;  %v9543_v19 = vadd.f32 %v16891_v3, %v8817_v21 }
 0x430   : > { %10142 = vst.msk [vmem:[%s16962_s7] sm:$0xff] %vm5967_vm11, %v10110_v40  ;;  %v10113_v55 = vmax.f32 %v10081_v13, 0.0  ;;  %v10079_v29 = vadd.f32 %v16943_v37, %v10042_v16  ;;  %v10047_v50 = vmul.f32 %v16936_v52, %v10010_v5  ;;  %v10008_v22 = vadd.f32 %v9893_v30, %v9538_v20  ;;  %v17538_v20 = vld [vmem:[#allocation39_spill] sm:$0xff]  ;;  %v17548_v53 = vld [vmem:[#allocation52_spill] sm:$0xff] }
 0x431   : > { %v12081_v0 = vpop.f32.mrf.mxu1  ;;  %v8820_v38 = vadd.f32 %v16865_v4, %v8461_v2  ;;  %v8464_v40 = vadd.f32 %v17538_v20, %v17537_v18  ;;  %v17540_v30 = vld [vmem:[#allocation51_spill] sm:$0xff] }
 0x432   : > { %10145 = vst.msk [vmem:[%s16962_s7 + $0x18] sm:$0xff] %vm5967_vm11, %v10113_v55  ;;  %v10111_v46 = vmax.f32 %v10079_v29, 0.0  ;;  %v10084_v43 = vadd.f32 %v16943_v37, %v10047_v50  ;;  %v10045_v8 = vmul.f32 %v16936_v52, %v10008_v22  ;;  %v10011_v56 = vadd.f32 %v12081_v0, %v9541_v31  ;;  %v17541_v31 = vld [vmem:[#allocation41_spill] sm:$0xff]  ;;  %v17542_v29 = vld [vmem:[#allocation24_spill] sm:$0xff]  ;;  %v17035_v22 = vpop.f32.mrf.mxu0 }
 0x433   : > { %v9896_v27 = vpop.f32.mrf.mxu1  ;;  %v8823_v58 = vadd.f32 %v17539_v35, %v8464_v40  ;;  %v8462_v4 = vadd.f32 %v17541_v31, %v17540_v30  ;;  %v9548_v50 = vadd.f32 %v17542_v29, %v8822_v57  ;;  %v17556_v35 = vld [vmem:[#allocation44_spill] sm:$0xff] }
 0x434   : > { %10143 = vst.msk [vmem:[%s16962_s7 + $0x8] sm:$0xff] %vm5967_vm11, %v10111_v46  ;;  %v10116_v7 = vmax.f32 %v10084_v43, 0.0  ;;  %v10082_v12 = vadd.f32 %v16943_v37, %v10045_v8  ;;  %v10048_v17 = vmul.f32 %v16936_v52, %v10011_v56  ;;  %v10009_v28 = vadd.f32 %v9896_v27, %v9539_v60  ;;  %v17543_v60 = vld [vmem:[#allocation6_spill] sm:$0xff]  ;;  %v17545_v8 = vld [vmem:[#allocation40_spill] sm:$0xff] }
 0x435   : > { %v12084_v1 = vpop.f32.mrf.mxu1  ;;  %v8821_v46 = vadd.f32 %v17543_v60, %v8462_v4  ;;  %v17544_v43 = vld [vmem:[#allocation50_spill] sm:$0xff]  ;;  %v9546_v27 = vadd.f32 %v17546_v41, %v8820_v38  ;;  %v17560_v41 = vld [vmem:[#allocation16_spill] sm:$0xff] }
 0x436   : > { %10148 = vst.msk [vmem:[%s16962_s7 + $0x30] sm:$0xff] %vm5967_vm11, %v10116_v7  ;;  %v10114_v51 = vmax.f32 %v10082_v12, 0.0  ;;  %v10085_v9 = vadd.f32 %v16943_v37, %v10048_v17  ;;  %v10046_v47 = vmul.f32 %v16936_v52, %v10009_v28  ;;  %v10014_v42 = vadd.f32 %v12084_v1, %v9544_v11  ;;  %v17547_v28 = vld [vmem:[#allocation8_spill] sm:$0xff]  ;;  %v17549_v1 = vld [vmem:[#allocation42_spill] sm:$0xff] }
 0x437   : > { %v9909_v14 = vpop.f32.mrf.mxu1  ;;  %v8467_v56 = vadd.f32 %v17545_v8, %v17544_v43  ;;  %v9547_v20 = vadd.f32 %v16919_v32, %v8821_v46 }
 0x438   : > { %10146 = vst.msk [vmem:[%s16962_s7 + $0x20] sm:$0xff] %vm5967_vm11, %v10114_v51  ;;  %v10117_v36 = vmax.f32 %v10085_v9, 0.0  ;;  %v10083_v33 = vadd.f32 %v16943_v37, %v10046_v47  ;;  %v10051_v44 = vmul.f32 %v16936_v52, %v10014_v42  ;;  %v10012_v61 = vadd.f32 %v9909_v14, %v9542_v62  ;;  %v17550_v9 = vld [vmem:[#allocation38_spill] sm:$0xff]  ;;  %v17053_v42 = vpop.f32.mrf.mxu0 }
 0x439   : > { %v12085_v25 = vpop.f32.mrf.mxu1  ;;  %v8826_v21 = vadd.f32 %v17547_v28, %v8467_v56  ;;  %v8465_v62 = vadd.f32 %v17549_v1, %v17548_v53  ;;  %v9549_v47 = vadd.f32 %v17550_v9, %v8823_v58 }
 0x43a   : > { %10149 = vst.msk [vmem:[%s16962_s7 + $0x38] sm:$0xff] %vm5967_vm11, %v10117_v36  ;;  %v10115_v63 = vmax.f32 %v10083_v33, 0.0  ;;  %v10088_v13 = vadd.f32 %v16943_v37, %v10051_v44  ;;  %v10049_v16 = vmul.f32 %v16936_v52, %v10012_v61  ;;  %v10015_v5 = vadd.f32 %v12085_v25, %v9545_v6  ;;  %v17551_v36 = vld [vmem:[#allocation7_spill] sm:$0xff]  ;;  %v17552_v44 = vld [vmem:[#allocation54_spill] sm:$0xff]  ;;  %v17071_v4 = vpop.f32.mrf.mxu0 }
 0x43b   : > { %v9912_v55 = vpop.f32.mrf.mxu1  ;;  %v8824_v33 = vadd.f32 %v17551_v36, %v8465_v62  ;;  %v17553_v61 = vld [vmem:[#allocation43_spill] sm:$0xff]  ;;  %v9552_v31 = vadd.f32 %v16929_v39, %v8826_v21 }
 0x43c   : > { %10147 = vst.msk [vmem:[%s16962_s7 + $0x28] sm:$0xff] %vm5967_vm11, %v10115_v63  ;;  %v10120_v3 = vmax.f32 %v10088_v13, 0.0  ;;  %v10086_v15 = vadd.f32 %v16943_v37, %v10049_v16  ;;  %v10052_v49 = vmul.f32 %v16936_v52, %v10015_v5  ;;  %v10013_v0 = vadd.f32 %v9912_v55, %v9543_v19  ;;  %v17554_v13 = vld [vmem:[#allocation13_spill] sm:$0xff]  ;;  %v17555_v5 = vld [vmem:[#allocation55_spill] sm:$0xff]  ;;  %v17089_v21 = vpop.f32.mrf.mxu0 }
 0x43d   : > { %v12088_v23 = vpop.f32.mrf.mxu1  ;;  %v8468_v38 = vadd.f32 %v17553_v61, %v17552_v44  ;;  %v8466_v58 = vadd.f32 %v17556_v35, %v17555_v5  ;;  %v9550_v43 = vadd.f32 %v16945_v59, %v8824_v33  ;;  %v17566_v61 = vld [vmem:[#allocation22_spill] sm:$0xff]  ;;  %v17569_v35 = vld [vmem:[#allocation20_spill] sm:$0xff] }
 0x43e   : > { %10152 = vst.msk [vmem:[%s16962_s7 + $0x50] sm:$0xff] %vm5967_vm11, %v10120_v3  ;;  %v10118_v11 = vmax.f32 %v10086_v15, 0.0  ;;  %v10089_v7 = vadd.f32 %v16943_v37, %v10052_v49  ;;  %v10050_v12 = vmul.f32 %v16936_v52, %v10013_v0  ;;  %v10018_v17 = vadd.f32 %v12088_v23, %v9548_v50  ;;  %v17557_v3 = vld [vmem:[#allocation29_spill] sm:$0xff] }
 0x43f   : > { %v9925_v51 = vpop.f32.mrf.mxu1  ;;  %v8827_v16 = vadd.f32 %v17554_v13, %v8468_v38  ;;  %v8825_v15 = vadd.f32 %v17557_v3, %v8466_v58  ;;  %v17558_v49 = vld [vmem:[#allocation57_spill] sm:$0xff] }
 0x440   : > { %10150 = vst.msk [vmem:[%s16962_s7 + $0x40] sm:$0xff] %vm5967_vm11, %v10118_v11  ;;  %v10121_v57 = vmax.f32 %v10089_v7, 0.0  ;;  %v10087_v2 = vadd.f32 %v16943_v37, %v10050_v12  ;;  %v10055_v14 = vmul.f32 %v16936_v52, %v10018_v17  ;;  %v10016_v6 = vadd.f32 %v9925_v51, %v9546_v27  ;;  %v17559_v0 = vld [vmem:[#allocation45_spill] sm:$0xff]  ;;  %v17561_v11 = vld [vmem:[#allocation4_spill] sm:$0xff]  ;;  %v17562_v7 = vld [vmem:[#allocation46_spill] sm:$0xff] }
 0x441   : > { %v12089_v18 = vpop.f32.mrf.mxu1  ;;  %v8471_v60 = vadd.f32 %v17559_v0, %v17558_v49  ;;  %v8469_v12 = vadd.f32 %v17562_v7, %v17561_v11  ;;  %v9553_v28 = vadd.f32 %v16965_v26, %v8827_v16  ;;  %v17563_v51 = vld [vmem:[#allocation15_spill] sm:$0xff]  ;;  %v17572_v49 = vld [vmem:[#allocation21_spill] sm:$0xff]  ;;  %v17575_v11 = vld [vmem:[#allocation30_spill] sm:$0xff] }
 0x442   : > { %10153 = vst.msk [vmem:[%s16962_s7 + $0x58] sm:$0xff] %vm5967_vm11, %v10121_v57  ;;  %v10119_v40 = vmax.f32 %v10087_v2, 0.0  ;;  %v10092_v25 = vadd.f32 %v16943_v37, %v10055_v14  ;;  %v10053_v19 = vmul.f32 %v16936_v52, %v10016_v6  ;;  %v10019_v63 = vadd.f32 %v12089_v18, %v9549_v47  ;;  %v17564_v47 = vld [vmem:[#allocation5_spill] sm:$0xff]  ;;  %v17565_v57 = vld [vmem:[#allocation47_spill] sm:$0xff]  ;;  %v17567_v18 = vld [vmem:[#allocation18_spill] sm:$0xff] }
 0x443   : > { %v9928_v30 = vpop.f32.mrf.mxu1  ;;  %v8830_v27 = vadd.f32 %v17560_v41, %v8471_v60  ;;  %v8828_v9 = vadd.f32 %v17563_v51, %v8469_v12  ;;  %v8472_v2 = vadd.f32 %v17565_v57, %v17564_v47  ;;  %v9551_v6 = vadd.f32 %v16981_v10, %v8825_v15  ;;  %v17573_v60 = vld [vmem:[#allocation9_spill] sm:$0xff]  ;;  %v17576_v12 = vld [vmem:[#allocation11_spill] sm:$0xff] }
 0x444   : > { %10151 = vst.msk [vmem:[%s16962_s7 + $0x48] sm:$0xff] %vm5967_vm11, %v10119_v40  ;;  %v10124_v32 = vmax.f32 %v10092_v25, 0.0  ;;  %v10090_v55 = vadd.f32 %v16943_v37, %v10053_v19  ;;  %v10056_v29 = vmul.f32 %v16936_v52, %v10019_v63  ;;  %v10017_v50 = vadd.f32 %v9928_v30, %v9547_v20  ;;  %v17568_v20 = vld [vmem:[#allocation49_spill] sm:$0xff]  ;;  %v12067_v63 = vpop.f32.mrf.mxu0  ;;  %v17570_v30 = vld [vmem:[#allocation19_spill] sm:$0xff] }
 0x445   : > { %v12092_v46 = vpop.f32.mrf.mxu1  ;;  %v8831_v38 = vadd.f32 %v17566_v61, %v8472_v2  ;;  %v8470_v40 = vadd.f32 %v17568_v20, %v17567_v18  ;;  %v9556_v19 = vadd.f32 %v16999_v48, %v8830_v27  ;;  %v17578_v47 = vld [vmem:[#allocation31_spill] sm:$0xff]  ;;  %v17579_v2 = vld [vmem:[#allocation17_spill] sm:$0xff] }
 0x446   : > { %10156 = vst.msk [vmem:[%s16962_s7 + $0x70] sm:$0xff] %vm5967_vm11, %v10124_v32  ;;  %v10122_v39 = vmax.f32 %v10090_v55, 0.0  ;;  %v10093_v8 = vadd.f32 %v16943_v37, %v10056_v29  ;;  %v10054_v56 = vmul.f32 %v16936_v52, %v10017_v50  ;;  %v10022_v23 = vadd.f32 %v12092_v46, %v9552_v31  ;;  %v17571_v31 = vld [vmem:[#allocation53_spill] sm:$0xff]  ;;  %v17574_v46 = vld [vmem:[#allocation56_spill] sm:$0xff]  ;;  %v17582_v20 = vld [vmem:[#allocation23_spill] sm:$0xff] }
 0x447   : > { %v9941_v17 = vpop.f32.mrf.mxu1  ;;  %v8829_v58 = vadd.f32 %v17569_v35, %v8470_v40  ;;  %v8475_v32 = vadd.f32 %v17571_v31, %v17570_v30  ;;  %v9554_v29 = vadd.f32 %v17017_v45, %v8828_v9  ;;  %v17583_v40 = vld [vmem:[#allocation14_spill] sm:$0xff]  ;;  %v17585_v31 = vld [vmem:[#allocation28_spill] sm:$0xff] }
 0x448   : > { %10154 = vst.msk [vmem:[%s16962_s7 + $0x60] sm:$0xff] %vm5967_vm11, %v10122_v39  ;;  %v10125_v59 = vmax.f32 %v10093_v8, 0.0  ;;  %v10091_v53 = vadd.f32 %v16943_v37, %v10054_v56  ;;  %v10059_v1 = vmul.f32 %v16936_v52, %v10022_v23  ;;  %v10020_v62 = vadd.f32 %v9941_v17, %v9550_v43  ;;  %v9506_v56 = vpop.f32.mrf.mxu0  ;;  %v17577_v17 = vld [vmem:[#allocation3_spill] sm:$0xff] }
 0x449   : > { %v12093_v14 = vpop.f32.mrf.mxu1  ;;  %v8834_v0 = vadd.f32 %v17572_v49, %v8475_v32  ;;  %v8473_v43 = vadd.f32 %v17574_v46, %v17573_v60  ;;  %v9557_v8 = vadd.f32 %v17035_v22, %v8831_v38  ;;  %v17581_v38 = vld [vmem:[#allocation35_spill] sm:$0xff]  ;;  %v17586_v32 = vld [vmem:[#allocation12_spill] sm:$0xff]  ;;  %v17588_v60 = vld [vmem:[#allocation33_spill] sm:$0xff] }
 0x44a   : > { %10157 = vst.msk [vmem:[%s16962_s7 + $0x78] sm:$0xff] %vm5967_vm11, %v10125_v59  ;;  %v10123_v26 = vmax.f32 %v10091_v53, 0.0  ;;  %v10096_v36 = vadd.f32 %v16943_v37, %v10059_v1  ;;  %v10057_v33 = vmul.f32 %v16936_v52, %v10020_v62  ;;  %v10023_v44 = vadd.f32 %v12093_v14, %v9553_v28  ;;  %v12070_v1 = vpop.f32.mrf.mxu0  ;;  %v17580_v14 = vld [vmem:[#allocation26_spill] sm:$0xff] }
 0x44b   : > { %v9944_v25 = vpop.f32.mrf.mxu1  ;;  %v8832_v7 = vadd.f32 %v17575_v11, %v8473_v43  ;;  %v8476_v28 = vadd.f32 %v17577_v17, %v17576_v12  ;;  %v9555_v53 = vadd.f32 %v17053_v42, %v8829_v58  ;;  %v17584_v58 = vld [vmem:[#allocation36_spill] sm:$0xff] }
 0x44c   : > { %10155 = vst.msk [vmem:[%s16962_s7 + $0x68] sm:$0xff] %vm5967_vm11, %v10123_v26  ;;  %v10128_v10 = vmax.f32 %v10096_v36, 0.0  ;;  %v10094_v13 = vadd.f32 %v16943_v37, %v10057_v33  ;;  %v10060_v16 = vmul.f32 %v16936_v52, %v10023_v44  ;;  %v10021_v5 = vadd.f32 %v9944_v25, %v9551_v6 }
 0x44d   : > { %v12096_v55 = vpop.f32.mrf.mxu1  ;;  %v8835_v57 = vadd.f32 %v17578_v47, %v8476_v28  ;;  %v8474_v6 = vadd.f32 %v17580_v14, %v17579_v2  ;;  %v9560_v36 = vadd.f32 %v17071_v4, %v8834_v0  ;;  %v8479_v25 = vadd.f32 %v17583_v40, %v17582_v20  ;;  %v17587_v0 = vld [vmem:[#allocation25_spill] sm:$0xff] }
 0x44e   : > { %10160 = vst.msk [vmem:[%s16962_s7 + $0x90] sm:$0xff] %vm5967_vm11, %v10128_v10  ;;  %v10126_v48 = vmax.f32 %v10094_v13, 0.0  ;;  %v10097_v50 = vadd.f32 %v16943_v37, %v10060_v16  ;;  %v10058_v3 = vmul.f32 %v16936_v52, %v10021_v5  ;;  %v10026_v15 = vadd.f32 %v12096_v55, %v9556_v19  ;;  %v9519_v13 = vpop.f32.mrf.mxu0 }
 0x44f   : > { %v9957_v39 = vpop.f32.mrf.mxu1  ;;  %v8833_v18 = vadd.f32 %v17581_v38, %v8474_v6  ;;  %v9558_v10 = vadd.f32 %v17089_v21, %v8832_v7  ;;  %v8838_v30 = vadd.f32 %v17584_v58, %v8479_v25  ;;  %v8477_v55 = vadd.f32 %v17586_v32, %v17585_v31  ;;  %v17589_v7 = vld [vmem:[#allocation34_spill] sm:$0xff] }
 0x450   : > { %10158 = vst.msk [vmem:[%s16962_s7 + $0x80] sm:$0xff] %vm5967_vm11, %v10126_v48  ;;  %v10129_v45 = vmax.f32 %v10097_v50, 0.0  ;;  %v10095_v23 = vadd.f32 %v16943_v37, %v10058_v3  ;;  %v10063_v41 = vmul.f32 %v16936_v52, %v10026_v15  ;;  %v10024_v27 = vadd.f32 %v9957_v39, %v9554_v29 }
 0x451   : > { %v12097_v59 = vpop.f32.mrf.mxu1  ;;  %v9561_v48 = vadd.f32 %v12067_v63, %v8835_v57  ;;  %v8836_v49 = vadd.f32 %v16915_v24, %v8477_v55  ;;  %v8480_v46 = vadd.f32 %v17588_v60, %v17587_v0  ;;  %v9559_v39 = vadd.f32 %v9506_v56, %v8833_v18  ;;  %v17590_v24 = vld [vmem:[#allocation27_spill] sm:$0xff] }
 0x452   : > { %10161 = vst.msk [vmem:[%s16962_s7 + $0x98] sm:$0xff] %vm5967_vm11, %v10129_v45  ;;  %v10127_v22 = vmax.f32 %v10095_v23, 0.0  ;;  %v10100_v62 = vadd.f32 %v16943_v37, %v10063_v41  ;;  %v10061_v51 = vmul.f32 %v16936_v52, %v10024_v27  ;;  %v10027_v9 = vadd.f32 %v12097_v59, %v9557_v8  ;;  %v12071_v8 = vpop.f32.mrf.mxu0 }
 0x453   : > { %v9960_v26 = vpop.f32.mrf.mxu1  ;;  %v9564_v27 = vadd.f32 %v12070_v1, %v8838_v30  ;;  %v8839_v11 = vadd.f32 %v16921_v54, %v8480_v46  ;;  %v8478_v12 = vadd.f32 %v17590_v24, %v17589_v7 }
 0x454   : > { %10159 = vst.msk [vmem:[%s16962_s7 + $0x88] sm:$0xff] %vm5967_vm11, %v10127_v22  ;;  %v10132_v42 = vmax.f32 %v10100_v62, 0.0  ;;  %v10098_v33 = vadd.f32 %v16943_v37, %v10061_v51  ;;  %v10064_v44 = vmul.f32 %v16936_v52, %v10027_v9  ;;  %v10025_v61 = vadd.f32 %v9960_v26, %v9555_v53  ;;  %v9522_v1 = vpop.f32.mrf.mxu0 }
 0x455   : > { %v12100_v19 = vpop.f32.mrf.mxu1  ;;  %v9562_v22 = vadd.f32 %v9519_v13, %v8836_v49  ;;  %v8837_v62 = vadd.f32 %v16925_v34, %v8478_v12  ;;  %v9565_v2 = vadd.f32 %v12071_v8, %v8839_v11 }
 0x456   : > { %10164 = vst.msk [vmem:[%s16962_s7 + $0xb0] sm:$0xff] %vm5967_vm11, %v10132_v42  ;;  %v10130_v4 = vmax.f32 %v10098_v33, 0.0  ;;  %v10101_v16 = vadd.f32 %v16943_v37, %v10064_v44  ;;  %v10062_v5 = vmul.f32 %v16936_v52, %v10025_v61  ;;  %v10030_v35 = vadd.f32 %v12100_v19, %v9560_v36 }
 0x457   : > { %v9973_v29 = vpop.f32.mrf.mxu1  ;;  %v9563_v42 = vadd.f32 %v9522_v1, %v8837_v62 }
 0x458   : > { %10162 = vst.msk [vmem:[%s16962_s7 + $0xa0] sm:$0xff] %vm5967_vm11, %v10130_v4  ;;  %v10133_v21 = vmax.f32 %v10101_v16, 0.0  ;;  %v10099_v50 = vadd.f32 %v16943_v37, %v10062_v5  ;;  %v10067_v3 = vmul.f32 %v16936_v52, %v10030_v35  ;;  %v10028_v15 = vadd.f32 %v9973_v29, %v9558_v10 }
 0x459   : > { %v12101_v43 = vpop.f32.mrf.mxu1 }
 0x45a   : > { %10165 = vst.msk [vmem:[%s16962_s7 + $0xb8] sm:$0xff] %vm5967_vm11, %v10133_v21  ;;  %v10131_v63 = vmax.f32 %v10099_v50, 0.0  ;;  %v10104_v45 = vadd.f32 %v16943_v37, %v10067_v3  ;;  %v10065_v23 = vmul.f32 %v16936_v52, %v10028_v15  ;;  %v10031_v41 = vadd.f32 %v12101_v43, %v9561_v48 }
 0x45b   : > { %v9976_v17 = vpop.f32.mrf.mxu1 }
 0x45c   : > { %10163 = vst.msk [vmem:[%s16962_s7 + $0xa8] sm:$0xff] %vm5967_vm11, %v10131_v63  ;;  %v10136_v56 = vmax.f32 %v10104_v45, 0.0  ;;  %v10102_v28 = vadd.f32 %v16943_v37, %v10065_v23  ;;  %v10068_v59 = vmul.f32 %v16936_v52, %v10031_v41  ;;  %v10029_v53 = vadd.f32 %v9976_v17, %v9559_v39 }
 0x45d   : > { %v12104_v51 = vpop.f32.mrf.mxu1 }
 0x45e   : > { %10168 = vst.msk [vmem:[%s16962_s7 + $0xd0] sm:$0xff] %vm5967_vm11, %v10136_v56  ;;  %v10134_v54 = vmax.f32 %v10102_v28, 0.0  ;;  %v10105_v9 = vadd.f32 %v16943_v37, %v10068_v59  ;;  %v10066_v47 = vmul.f32 %v16936_v52, %v10029_v53  ;;  %v10034_v57 = vadd.f32 %v12104_v51, %v9564_v27 }
 0x45f   : > { %v9989_v14 = vpop.f32.mrf.mxu1 }
 0x460   : > { %10166 = vst.msk [vmem:[%s16962_s7 + $0xc0] sm:$0xff] %vm5967_vm11, %v10134_v54  ;;  %v10137_v6 = vmax.f32 %v10105_v9, 0.0  ;;  %v10103_v26 = vadd.f32 %v16943_v37, %v10066_v47  ;;  %v10071_v34 = vmul.f32 %v16936_v52, %v10034_v57  ;;  %v10032_v36 = vadd.f32 %v9989_v14, %v9562_v22 }
 0x461   : > { %v12105_v33 = vpop.f32.mrf.mxu1 }
 0x462   : > { %10169 = vst.msk [vmem:[%s16962_s7 + $0xd8] sm:$0xff] %vm5967_vm11, %v10137_v6  ;;  %v10135_v44 = vmax.f32 %v10103_v26, 0.0  ;;  %v10108_v61 = vadd.f32 %v16943_v37, %v10071_v34  ;;  %v10069_v38 = vmul.f32 %v16936_v52, %v10032_v36  ;;  %v10035_v18 = vadd.f32 %v12105_v33, %v9565_v2 }
 0x463   : > { %v9992_v20 = vpop.f32.mrf.mxu1 }
 0x464   : > { %10167 = vst.msk [vmem:[%s16962_s7 + $0xc8] sm:$0xff] %vm5967_vm11, %v10135_v44  ;;  %v10140_v40 = vmax.f32 %v10108_v61, 0.0  ;;  %v10106_v25 = vadd.f32 %v16943_v37, %v10069_v38  ;;  %v10072_v19 = vmul.f32 %v16936_v52, %v10035_v18  ;;  %v10033_v10 = vadd.f32 %v9992_v20, %v9563_v42 }
 0x466   : > { %10172 = vst.msk [vmem:[%s16962_s7 + $0xf0] sm:$0xff] %vm5967_vm11, %v10140_v40  ;;  %v10138_v13 = vmax.f32 %v10106_v25, 0.0  ;;  %v10109_v4 = vadd.f32 %v16943_v37, %v10072_v19  ;;  %v10070_v16 = vmul.f32 %v16936_v52, %v10033_v10 }
 0x468   : > { %10170 = vst.msk [vmem:[%s16962_s7 + $0xe0] sm:$0xff] %vm5967_vm11, %v10138_v13  ;;  %v10141_v5 = vmax.f32 %v10109_v4, 0.0  ;;  %v10107_v35 = vadd.f32 %v16943_v37, %v10070_v16 }
 0x46a   : > { %10173 = vst.msk [vmem:[%s16962_s7 + $0xf8] sm:$0xff] %vm5967_vm11, %v10141_v5  ;;  %v10139_v58 = vmax.f32 %v10107_v35, 0.0 }
 0x46c   : > { %10171 = vst.msk [vmem:[%s16962_s7 + $0xe8] sm:$0xff] %vm5967_vm11, %v10139_v58 }
 0x46d PF: > { %s15_s18 = sadd.s32 1, %s12248_s18  }
 0x46e   : > { %p12_p4 = scmp.ge.s32.totalorder %s15_s18, 4  }
 0x470   :  { %14 = sbr.rel (!%p12_p4) target bundleno = 1 (0x1), region = 90 }

</bundles_post_ra>
